<compile_context>
chip_gen: v5e
topology: v5e:2x2
jax: 0.10.0
libtpu: 0.0.40
codegen_flags: <defaults>
</compile_context>

<pallas_src>
import functools

import jax
import jax.numpy as jnp
from jax import lax
from jax.experimental import pallas as pl
from jax.experimental.pallas import tpu as pltpu

_BN_EPS = 1e-5
_LANE = 128


# -----------------------------------------------------------------------------
# Small helpers
# -----------------------------------------------------------------------------
def _round_up(n, m):
    return -(-n // m) * m


def _vmem_limit():
    """Generation-aware VMEM budget: ~3/4 of physical capacity
    (v7x 64 MiB -> ~48 MiB, v5e/v6e 128 MiB -> 96 MiB)."""
    try:
        cap = int(pltpu.get_tpu_info().vmem_capacity_bytes)
    except Exception:                      # conservative fallback
        cap = 64 * 1024 * 1024
    return max(32 * 1024 * 1024, min((cap * 3) // 4, 96 * 1024 * 1024))


def _pick_row_tile(r, k, n, vmem_limit):
    """Row tile for a (r, k) x (k, n) pass: as close to 2048 rows as the VMEM
    budget allows, near-equal tiles, minimal padding.  Returns (tile, padded_r)."""
    budget = max(vmem_limit // 3, 4 * 1024 * 1024)
    cap = 2048
    # rough per-row bytes: bf16 in (x2 buffers) + bf16 out (x2) + f32 acc.
    while cap > 128 and cap * (4 * k + 8 * n) > budget:
        cap //= 2
    tiles = pl.cdiv(r, cap)
    tm = _round_up(pl.cdiv(r, tiles), 8)
    return tm, tiles * tm


# -----------------------------------------------------------------------------
# Pallas kernels
# -----------------------------------------------------------------------------
def _mm_fused_kernel(*refs, fuse_bn, mask_rows, total_rows):
    """One row tile of y = f(a) @ w where f = relu(a*scale + shift) when the
    producer's BatchNorm is fused onto the input (fuse_bn), else identity.
    Emits per-tile partial sum / sum-of-squares of y for the consumer's BN
    (reduced in XLA -> no cross-tile serialization, 'parallel' grid axis)."""
    if fuse_bn:
        a_ref, w_ref, sc_ref, sh_ref, y_ref, sum_ref, sq_ref = refs
    else:
        a_ref, w_ref, y_ref, sum_ref, sq_ref = refs

    a = a_ref[...]
    if fuse_bn:
        a = jnp.maximum(a.astype(jnp.float32) * sc_ref[...] + sh_ref[...], 0.0)
    if mask_rows:
        tm = a_ref.shape[0]
        row = pl.program_id(0) * tm + lax.broadcasted_iota(jnp.int32, a.shape, 0)
        a = jnp.where(row < total_rows, a, 0)

    acc = jnp.dot(a.astype(jnp.bfloat16), w_ref[...],
                  preferred_element_type=jnp.float32)
    y_ref[...] = acc.astype(y_ref.dtype)

    n = acc.shape[1]
    s = jnp.sum(acc, axis=0, keepdims=True)
    q = jnp.sum(acc * acc, axis=0, keepdims=True)
    sum_ref[...] = jnp.broadcast_to(s.reshape(1, 1, n), (1, 8, n))
    sq_ref[...] = jnp.broadcast_to(q.reshape(1, 1, n), (1, 8, n))


def _conv_fused_kernel(x_ref, sc_ref, sh_ref, w_ref, y_ref, sum_ref, sq_ref,
                       pad_scr, slab_scr, *, kh, kw):
    """kh x kw stride-1 conv of one image with the producer's BatchNorm + ReLU
    fused on the input.  The pad=1 halo is built in a VMEM scratch (never in
    HBM).  The kw taps of each row are folded into K (one K = kw*kin matmul
    per dy -> deeper MXU fill, fewer f32 accumulator passes).  Also emits
    per-image partial BN statistics of the raw conv output."""
    kin = x_ref.shape[-1]
    _, ho, wo, pout = y_ref.shape

    # BN(prev) + ReLU applied in-register; bf16 operand for the MXU.
    xin = x_ref[0].astype(jnp.float32)
    xn = jnp.maximum(xin * sc_ref[...] + sh_ref[...], 0.0).astype(jnp.bfloat16)

    # Halo in VMEM: zero the padded scratch, then store the interior.
    # (Re-done every step so it stays correct under megacore grid sharding.)
    pad_scr[...] = jnp.zeros(pad_scr.shape, pad_scr.dtype)
    pad_scr[1:1 + ho, 1:1 + wo, :] = xn

    acc = jnp.zeros((ho * wo, pout), jnp.float32)
    for dy in range(kh):
        for dx in range(kw):
            slab_scr[:, :, dx * kin:(dx + 1) * kin] = \
                pad_scr[dy:dy + ho, dx:dx + wo, :]
        a = slab_scr[...].reshape(ho * wo, kw * kin)
        acc = acc + jnp.dot(a, w_ref[dy], preferred_element_type=jnp.float32)

    y_ref[...] = acc.reshape(1, ho, wo, pout).astype(y_ref.dtype)
    s = jnp.sum(acc, axis=0, keepdims=True)
    q = jnp.sum(acc * acc, axis=0, keepdims=True)
    sum_ref[...] = jnp.broadcast_to(s.reshape(1, 1, pout), (1, 8, pout))
    sq_ref[...] = jnp.broadcast_to(q.reshape(1, 1, pout), (1, 8, pout))


def _bn_add_relu_kernel(y_ref, s_ref, t_ref, r_ref, rs_ref, rt_ref, o_ref):
    v = y_ref[...].astype(jnp.float32) * s_ref[...] + t_ref[...]
    res = r_ref[...].astype(jnp.float32) * rs_ref[...] + rt_ref[...]
    o_ref[...] = jnp.maximum(v + res, 0.0).astype(o_ref.dtype)


# -----------------------------------------------------------------------------
# pallas_call wrappers
# -----------------------------------------------------------------------------
def matmul_fused(a, w, in_scale=None, in_shift=None, *, vmem_limit):
    """y = relu(a*in_scale+in_shift) @ w (or a @ w), plus reduced BN stats."""
    r, k = a.shape
    n = w.shape[1]
    tm, rp = _pick_row_tile(r, k, n, vmem_limit)
    mask = rp != r
    if mask:
        a = jnp.pad(a, ((0, rp - r), (0, 0)))
    fuse = in_scale is not None
    num = rp // tm

    in_specs = [pl.BlockSpec((tm, k), lambda i: (i, 0)),
                pl.BlockSpec((k, n), lambda i: (0, 0))]        # resident weights
    args = [a, w]
    if fuse:
        in_specs += [pl.BlockSpec((1, k), lambda i: (0, 0)),
                     pl.BlockSpec((1, k), lambda i: (0, 0))]
        args += [in_scale, in_shift]

    y, s, q = pl.pallas_call(
        functools.partial(_mm_fused_kernel, fuse_bn=fuse, mask_rows=mask,
                          total_rows=r),
        grid=(num,),
        in_specs=in_specs,
        out_specs=(pl.BlockSpec((tm, n), lambda i: (i, 0)),
                   pl.BlockSpec((1, 8, n), lambda i: (i, 0, 0)),
                   pl.BlockSpec((1, 8, n), lambda i: (i, 0, 0))),
        out_shape=(jax.ShapeDtypeStruct((rp, n), jnp.bfloat16),
                   jax.ShapeDtypeStruct((num, 8, n), jnp.float32),
                   jax.ShapeDtypeStruct((num, 8, n), jnp.float32)),
        compiler_params=pltpu.CompilerParams(
            dimension_semantics=("parallel",),      # per-tile partial stats
            vmem_limit_bytes=vmem_limit),
    )(*args)
    colsum = jnp.sum(s[:, 0, :], axis=0, keepdims=True)
    colsq = jnp.sum(q[:, 0, :], axis=0, keepdims=True)
    return (y[:r] if mask else y), colsum, colsq


def conv_fused(x_img, in_scale, in_shift, w, *, kh, kw, vmem_limit):
    """x_img: (B, H, W, Kin) bf16; w: (kh, kw*Kin, Pout) bf16 (dx folded in K)."""
    b, ho, wo, kin = x_img.shape
    pout = w.shape[-1]
    assert w.shape == (kh, kw * kin, pout), w.shape
    y, s, q = pl.pallas_call(
        functools.partial(_conv_fused_kernel, kh=kh, kw=kw),
        grid=(b,),
        in_specs=[pl.BlockSpec((1, ho, wo, kin), lambda i: (i, 0, 0, 0)),
                  pl.BlockSpec((1, kin), lambda i: (0, 0)),
                  pl.BlockSpec((1, kin), lambda i: (0, 0)),
                  pl.BlockSpec((kh, kw * kin, pout), lambda i: (0, 0, 0))],
        out_specs=(pl.BlockSpec((1, ho, wo, pout), lambda i: (i, 0, 0, 0)),
                   pl.BlockSpec((1, 8, pout), lambda i: (i, 0, 0)),
                   pl.BlockSpec((1, 8, pout), lambda i: (i, 0, 0))),
        out_shape=(jax.ShapeDtypeStruct((b, ho, wo, pout), jnp.bfloat16),
                   jax.ShapeDtypeStruct((b, 8, pout), jnp.float32),
                   jax.ShapeDtypeStruct((b, 8, pout), jnp.float32)),
        scratch_shapes=[
            pltpu.VMEM((ho + kh - 1, wo + kw - 1, kin), jnp.bfloat16),  # halo
            pltpu.VMEM((ho, wo, kw * kin), jnp.bfloat16)],              # K-slab
        compiler_params=pltpu.CompilerParams(
            dimension_semantics=("parallel",),
            vmem_limit_bytes=vmem_limit),
    )(x_img, in_scale, in_shift, w)
    colsum = jnp.sum(s[:, 0, :], axis=0, keepdims=True)
    colsq = jnp.sum(q[:, 0, :], axis=0, keepdims=True)
    return y, colsum, colsq


def bn_add_relu(y, scale, shift, res, rscale, rshift, *, vmem_limit):
    """out = relu(y*scale + shift + res*rscale + rshift), row-tiled, bf16 out."""
    r, n = y.shape
    tm, rp = _pick_row_tile(r, n, n, vmem_limit)
    if rp != r:
        y = jnp.pad(y, ((0, rp - r), (0, 0)))
        res = jnp.pad(res, ((0, rp - r), (0, 0)))
    out = pl.pallas_call(
        _bn_add_relu_kernel,
        grid=(rp // tm,),
        in_specs=[pl.BlockSpec((tm, n), lambda i: (i, 0)),
                  pl.BlockSpec((1, n), lambda i: (0, 0)),
                  pl.BlockSpec((1, n), lambda i: (0, 0)),
                  pl.BlockSpec((tm, n), lambda i: (i, 0)),
                  pl.BlockSpec((1, n), lambda i: (0, 0)),
                  pl.BlockSpec((1, n), lambda i: (0, 0))],
        out_specs=pl.BlockSpec((tm, n), lambda i: (i, 0)),
        out_shape=jax.ShapeDtypeStruct((rp, n), jnp.bfloat16),
        compiler_params=pltpu.CompilerParams(
            dimension_semantics=("parallel",),
            vmem_limit_bytes=vmem_limit),
    )(y, scale, shift, res, rscale, rshift)
    return out[:r] if rp != r else out


def _bn_scale_shift(colsum, colsumsq, n_rows, gamma, beta):
    """Fold batch statistics into a per-channel scale/shift pair (tiny XLA op)."""
    mean = colsum / n_rows
    var = jnp.maximum(colsumsq / n_rows - mean * mean, 0.0)
    scale = gamma * lax.rsqrt(var + _BN_EPS)
    return scale, beta - mean * scale


# -----------------------------------------------------------------------------
# Parameter init (torch layout) + one-time preprocessing (hoisted out of fwd)
# -----------------------------------------------------------------------------
def init_bottleneck_params(key, in_planes, planes, stride):
    expansion = 4
    ks = jax.random.split(key, 12)

    def conv_w(k, cout, cin, kh, kw):
        fan_in = cin * kh * kw
        return jax.random.normal(k, (cout, cin, kh, kw), jnp.float32) / jnp.sqrt(fan_in)

    def bn(kg, kb, c):
        g = 1.0 + 0.1 * jax.random.normal(kg, (c,), jnp.float32)
        b = 0.1 * jax.random.normal(kb, (c,), jnp.float32)
        return g, b

    params = {
        "w1": conv_w(ks[0], planes, in_planes, 1, 1),              # conv1: 1x1
        "w2": conv_w(ks[1], planes, planes, 3, 3),                 # conv2: 3x3
        "w3": conv_w(ks[2], expansion * planes, planes, 1, 1),     # conv3: 1x1
    }
    params["g1"], params["b1"] = bn(ks[3], ks[4], planes)
    params["g2"], params["b2"] = bn(ks[5], ks[6], planes)
    params["g3"], params["b3"] = bn(ks[7], ks[8], expansion * planes)
    if stride != 1 or in_planes != expansion * planes:
        params["ws"] = conv_w(ks[9], expansion * planes, in_planes, 1, 1)
        params["gs"], params["bs"] = bn(ks[10], ks[11], expansion * planes)
    return params


def prepare_params(params, stride=1):
    """One-time: transpose to (K, N), zero-pad channels to multiples of 128,
    cast weights to bf16, reshape BN params to (1, N) f32.  conv2 weights are
    laid out tap-row-major with the dx taps folded into K; for stride=2 they
    are rewritten as the equivalent 2x2 conv over a 2x2 space-to-depth stack."""
    planes, in_planes = params["w1"].shape[:2]
    out_planes = params["w3"].shape[0]
    cp, pp, ep = (_round_up(in_planes, _LANE), _round_up(planes, _LANE),
                  _round_up(out_planes, _LANE))

    def pad_to(a, n, axis):
        pad = [(0, 0)] * a.ndim
        pad[axis] = (0, n - a.shape[axis])
        return jnp.pad(a, pad)

    def conv1x1(w, kin, kout):            # torch (Cout, Cin, 1, 1) -> (kin, kout)
        wt = jnp.transpose(w[:, :, 0, 0])
        return pad_to(pad_to(wt, kin, 0), kout, 1).astype(jnp.bfloat16)

    def bnvec(g, b, n):
        return (pad_to(g.reshape(1, -1), n, 1).astype(jnp.float32),
                pad_to(b.reshape(1, -1), n, 1).astype(jnp.float32))

    prep = {"w1": conv1x1(params["w1"], cp, pp),
            "w3": conv1x1(params["w3"], pp, ep)}

    wt = jnp.transpose(params["w2"], (2, 3, 1, 0))      # (3, 3, Cin, Cout)
    wt = pad_to(pad_to(wt, pp, 2), pp, 3)               # (3, 3, pp, pp) f32
    if stride == 1:
        prep["w2"] = wt.reshape(3, 3 * pp, pp).astype(jnp.bfloat16)
    else:
        # 3x3 / stride-2 == 2x2 / stride-1 over the 2x2 space-to-depth stack.
        # phase map: original tap index d -> (block tap, phase within block)
        phase = {0: (0, 1), 1: (1, 0), 2: (1, 1)}
        w4 = jnp.zeros((2, 2, 4, pp, pp), jnp.float32)
        for dy in range(3):
            da, p = phase[dy]
            for dx in range(3):
                db, q = phase[dx]
                w4 = w4.at[da, db, 2 * p + q].set(wt[dy, dx])
        prep["w2"] = w4.reshape(2, 2 * 4 * pp, pp).astype(jnp.bfloat16)

    prep["g1"], prep["b1"] = bnvec(params["g1"], params["b1"], pp)
    prep["g2"], prep["b2"] = bnvec(params["g2"], params["b2"], pp)
    prep["g3"], prep["b3"] = bnvec(params["g3"], params["b3"], ep)
    if "ws" in params:
        prep["ws"] = conv1x1(params["ws"], cp, ep)
        prep["gs"], prep["bs"] = bnvec(params["gs"], params["bs"], ep)
    return prep


# -----------------------------------------------------------------------------
# Bottleneck forward (Pallas) + pure-JAX reference
# -----------------------------------------------------------------------------
def bottleneck_forward(x_nchw, prep, *, cout, stride=1):
    vmem_limit = _vmem_limit()

    # bf16 BEFORE the layout transpose (halves transpose bandwidth).  In a
    # real network activations would stay NHWC across blocks.
    xh = jnp.transpose(x_nchw.astype(jnp.bfloat16), (0, 2, 3, 1))  # NCHW -> NHWC
    b, h, w, cin = xh.shape
    cp, pp = prep["w1"].shape
    ep = prep["w3"].shape[1]
    if cp != cin:
        xh = jnp.pad(xh, ((0, 0), (0, 0), (0, 0), (0, cp - cin)))
    rows = b * h * w
    xr = xh.reshape(rows, cp)

    # conv1 (1x1): raw y1 (bf16) + bn1 batch statistics (per-tile partials).
    y1, s1, q1 = matmul_fused(xr, prep["w1"], vmem_limit=vmem_limit)
    sc1, sh1 = _bn_scale_shift(s1, q1, rows, prep["g1"], prep["b1"])

    # conv2 (3x3, pad 1, stride): bn1 + relu fused on the input inside the
    # kernel; halo built in VMEM (no padded activation in HBM, no im2col).
    ho = (h - 1) // stride + 1
    wo = (w - 1) // stride + 1
    rows2 = b * ho * wo
    if stride == 1:
        x2 = y1.reshape(b, h, w, pp)
        sc_in, sh_in = sc1, sh1
        kh = kw = 3
    else:
        assert stride == 2 and h % 2 == 0 and w % 2 == 0, (
            "stride-2 path assumes even spatial dims")
        # 2x2 space-to-depth phase stack (single cheap XLA reshape/transpose).
        x2 = (y1.reshape(b, ho, 2, wo, 2, pp)
                .transpose(0, 1, 3, 2, 4, 5)
                .reshape(b, ho, wo, 4 * pp))
        sc_in, sh_in = jnp.tile(sc1, (1, 4)), jnp.tile(sh1, (1, 4))
        kh = kw = 2
    y2, s2, q2 = conv_fused(x2, sc_in, sh_in, prep["w2"], kh=kh, kw=kw,
                            vmem_limit=vmem_limit)
    sc2, sh2 = _bn_scale_shift(s2, q2, rows2, prep["g2"], prep["b2"])

    # conv3 (1x1): bn2 + relu fused on the input.
    y3, s3, q3 = matmul_fused(y2.reshape(rows2, pp), prep["w3"],
                              in_scale=sc2, in_shift=sh2, vmem_limit=vmem_limit)
    sc3, sh3 = _bn_scale_shift(s3, q3, rows2, prep["g3"], prep["b3"])

    # shortcut (raw matmul only; its BN is folded into the final fused kernel).
    if "ws" in prep:
        xs = xh if stride == 1 else xh[:, ::stride, ::stride, :]
        ysc, ss, qs = matmul_fused(xs.reshape(rows2, cp), prep["ws"],
                                   vmem_limit=vmem_limit)
        rsc, rsh = _bn_scale_shift(ss, qs, rows2, prep["gs"], prep["bs"])
        res = ysc
    else:
        res = xr                             # identity shortcut (cp == ep here)
        rsc = jnp.ones((1, ep), jnp.float32)
        rsh = jnp.zeros((1, ep), jnp.float32)

    # bn3 + shortcut-bn + add + relu, fused, bf16 output.
    out = bn_add_relu(y3, sc3, sh3, res, rsc, rsh, vmem_limit=vmem_limit)
    out = out.reshape(b, ho, wo, ep)[..., :cout]
    return jnp.transpose(out, (0, 3, 1, 2)).astype(jnp.float32)   # NHWC -> NCHW


def bottleneck_reference(x_nchw, params, stride=1):
    """Pure-JAX f32 reference (lax.conv + batch-stat BN) used for sanity check."""
    x = jnp.transpose(x_nchw, (0, 2, 3, 1)).astype(jnp.float32)

    def conv(h, w, s, pad):
        return lax.conv_general_dilated(
            h, w, window_strides=(s, s), padding=[(pad, pad)] * 2,
            dimension_numbers=("NHWC", "OIHW", "NHWC"))

    def bn(h, g, b):
        mean = jnp.mean(h, axis=(0, 1, 2), keepdims=True)
        var = jnp.mean(jnp.square(h - mean), axis=(0, 1, 2), keepdims=True)
        return (h - mean) / jnp.sqrt(var + _BN_EPS) * g + b

    h = jax.nn.relu(bn(conv(x, params["w1"], 1, 0), params["g1"], params["b1"]))
    h = jax.nn.relu(bn(conv(h, params["w2"], stride, 1), params["g2"], params["b2"]))
    h = bn(conv(h, params["w3"], 1, 0), params["g3"], params["b3"])
    if "ws" in params:
        sc = bn(conv(x, params["ws"], stride, 0), params["gs"], params["bs"])
    else:
        sc = x
    out = jax.nn.relu(h + sc)
    return jnp.transpose(out, (0, 3, 1, 2))


if __name__ == "__main__":
    key = jax.random.PRNGKey(0)

    def run_case(case_key, B, in_planes, planes, H, W, stride):
        kx, kp = jax.random.split(case_key)
        x = jax.random.normal(kx, (B, in_planes, H, W), jnp.float32)  # NCHW
        params = init_bottleneck_params(kp, in_planes, planes, stride)
        prep = prepare_params(params, stride=stride)                  # hoisted prep
        fwd = jax.jit(bottleneck_forward, static_argnames=("cout", "stride"))
        out = jax.block_until_ready(fwd(x, prep, cout=4 * planes, stride=stride))
        ref = jax.block_until_ready(bottleneck_reference(x, params, stride=stride))
        ho = (H - 1) // stride + 1
        wo = (W - 1) // stride + 1
        assert out.shape == (B, 4 * planes, ho, wo), out.shape
        max_err = float(jnp.max(jnp.abs(out - ref)))
        # bf16 matmul operands / bf16 final store (f32 accumulation) vs f32 ref.
        assert jnp.allclose(out, ref, atol=5e-2, rtol=5e-2), \
            f"stride={stride}: max abs err = {max_err}"

    k1, k2 = jax.random.split(key)
    run_case(k1, B=2, in_planes=4, planes=4, H=16, W=16, stride=1)   # plain block
    run_case(k2, B=2, in_planes=8, planes=4, H=16, W=16, stride=2)   # downsample block

    print("KERNEL_OK")
</pallas_src>

<mosaic_0001>
module attributes {stable_mosaic.version = 11 : i64} {
  func.func @_mm_fused_kernel(%arg0: i32, %arg1: memref<512x128xbf16, #tpu.memory_space<vmem>>, %arg2: memref<128x128xbf16, #tpu.memory_space<vmem>>, %arg3: memref<512x128xbf16, #tpu.memory_space<vmem>>, %arg4: memref<1x8x128xf32, #tpu.memory_space<vmem>>, %arg5: memref<1x8x128xf32, #tpu.memory_space<vmem>>) attributes {dimension_semantics = [#tpu.dimension_semantics<parallel>], iteration_bounds = array<i64: 1>, scalar_prefetch = 0 : i64, scratch_operands = 0 : i64, tpu.core_type = #tpu.core_type<tc>, window_params = [{transform_indices = @transform_0, window_bounds = array<i64: 512, 128>}, {pipeline_mode = #tpu.pipeline_mode<synchronous>, transform_indices = @transform_1, window_bounds = array<i64: 128, 128>}, {transform_indices = @transform_2, window_bounds = array<i64: 512, 128>}, {transform_indices = @transform_3, window_bounds = array<i64: 1, 8, 128>}, {transform_indices = @transform_4, window_bounds = array<i64: 1, 8, 128>}]} {
    %c0 = arith.constant 0 : index
    %c0_0 = arith.constant 0 : index
    %0 = vector.load %arg1[%c0, %c0_0] : memref<512x128xbf16, #tpu.memory_space<vmem>>, vector<512x128xbf16>
    %c0_1 = arith.constant 0 : index
    %c0_2 = arith.constant 0 : index
    %1 = vector.load %arg2[%c0_1, %c0_2] : memref<128x128xbf16, #tpu.memory_space<vmem>>, vector<128x128xbf16>
    %cst = arith.constant dense<0.000000e+00> : vector<512x128xf32>
    %2 = tpu.matmul %0, %1, %cst {dimension_numbers = #tpu.dot_dimension_numbers<[1], [0], [0], [1], [0, 0, 1, 1], [], []>} : vector<512x128xbf16>, vector<128x128xbf16>, vector<512x128xf32> -> vector<512x128xf32>
    %3 = arith.truncf %2 : vector<512x128xf32> to vector<512x128xbf16>
    %c0_3 = arith.constant 0 : index
    %c0_4 = arith.constant 0 : index
    %4 = vector.load %arg3[%c0_3, %c0_4] : memref<512x128xbf16, #tpu.memory_space<vmem>>, vector<512x128xbf16>
    tpu.vector_store %arg3[%c0_3, %c0_4], %3 {strides = array<i32>} : memref<512x128xbf16, #tpu.memory_space<vmem>>, vector<512x128xbf16>,
    %cst_5 = arith.constant dense<0.000000e+00> : vector<128xf32>
    %5 = vector.multi_reduction <add>, %2, %cst_5 [0] : vector<512x128xf32> to vector<128xf32>
    %6 = vector.shape_cast %5 : vector<128xf32> to vector<1x128xf32>
    %7 = arith.mulf %2, %2 : vector<512x128xf32>
    %cst_6 = arith.constant dense<0.000000e+00> : vector<128xf32>
    %8 = vector.multi_reduction <add>, %7, %cst_6 [0] : vector<512x128xf32> to vector<128xf32>
    %9 = vector.shape_cast %8 : vector<128xf32> to vector<1x128xf32>
    %10 = vector.shape_cast %6 : vector<1x128xf32> to vector<1x1x128xf32>
    %11 = vector.shape_cast %10 : vector<1x1x128xf32> to vector<1x1x128xf32>
    %12 = vector.broadcast %11 : vector<1x1x128xf32> to vector<1x8x128xf32>
    %c0_7 = arith.constant 0 : index
    %c0_8 = arith.constant 0 : index
    %c0_9 = arith.constant 0 : index
    %13 = vector.load %arg4[%c0_7, %c0_8, %c0_9] : memref<1x8x128xf32, #tpu.memory_space<vmem>>, vector<1x8x128xf32>
    tpu.vector_store %arg4[%c0_7, %c0_8, %c0_9], %12 {strides = array<i32>} : memref<1x8x128xf32, #tpu.memory_space<vmem>>, vector<1x8x128xf32>,
    %14 = vector.shape_cast %9 : vector<1x128xf32> to vector<1x1x128xf32>
    %15 = vector.shape_cast %14 : vector<1x1x128xf32> to vector<1x1x128xf32>
    %16 = vector.broadcast %15 : vector<1x1x128xf32> to vector<1x8x128xf32>
    %c0_10 = arith.constant 0 : index
    %c0_11 = arith.constant 0 : index
    %c0_12 = arith.constant 0 : index
    %17 = vector.load %arg5[%c0_10, %c0_11, %c0_12] : memref<1x8x128xf32, #tpu.memory_space<vmem>>, vector<1x8x128xf32>
    tpu.vector_store %arg5[%c0_10, %c0_11, %c0_12], %16 {strides = array<i32>} : memref<1x8x128xf32, #tpu.memory_space<vmem>>, vector<1x8x128xf32>,
    return
  }
  func.func @transform_0(%arg0: i32) -> (i32, i32) {
    %c0_i32 = arith.constant 0 : i32
    %c0_i32_0 = arith.constant 0 : i32
    return %arg0, %c0_i32 : i32, i32
  }
  func.func @transform_1(%arg0: i32) -> (i32, i32) {
    %c0_i32 = arith.constant 0 : i32
    %c0_i32_0 = arith.constant 0 : i32
    %c0_i32_1 = arith.constant 0 : i32
    return %c0_i32, %c0_i32_0 : i32, i32
  }
  func.func @transform_2(%arg0: i32) -> (i32, i32) {
    %c0_i32 = arith.constant 0 : i32
    %c0_i32_0 = arith.constant 0 : i32
    return %arg0, %c0_i32 : i32, i32
  }
  func.func @transform_3(%arg0: i32) -> (i32, i32, i32) {
    %c0_i32 = arith.constant 0 : i32
    %c0_i32_0 = arith.constant 0 : i32
    %c0_i32_1 = arith.constant 0 : i32
    return %arg0, %c0_i32, %c0_i32_0 : i32, i32, i32
  }
  func.func @transform_4(%arg0: i32) -> (i32, i32, i32) {
    %c0_i32 = arith.constant 0 : i32
    %c0_i32_0 = arith.constant 0 : i32
    %c0_i32_1 = arith.constant 0 : i32
    return %arg0, %c0_i32, %c0_i32_0 : i32, i32, i32
  }
}

module attributes {stable_mosaic.version = 11 : i64} {
  func.func @_conv_fused_kernel(%arg0: i32, %arg1: memref<1x16x16x128xbf16, #tpu.memory_space<vmem>>, %arg2: memref<1x128xf32, #tpu.memory_space<vmem>>, %arg3: memref<1x128xf32, #tpu.memory_space<vmem>>, %arg4: memref<3x384x128xbf16, #tpu.memory_space<vmem>>, %arg5: memref<1x16x16x128xbf16, #tpu.memory_space<vmem>>, %arg6: memref<1x8x128xf32, #tpu.memory_space<vmem>>, %arg7: memref<1x8x128xf32, #tpu.memory_space<vmem>>, %arg8: memref<18x18x128xbf16, #tpu.memory_space<vmem>>, %arg9: memref<16x16x384xbf16, #tpu.memory_space<vmem>>) attributes {dimension_semantics = [#tpu.dimension_semantics<parallel>], iteration_bounds = array<i64: 2>, scalar_prefetch = 0 : i64, scratch_operands = 2 : i64, tpu.core_type = #tpu.core_type<tc>, window_params = [{transform_indices = @transform_0, window_bounds = array<i64: 1, 16, 16, 128>}, {pipeline_mode = #tpu.pipeline_mode<synchronous>, transform_indices = @transform_1, window_bounds = array<i64: 1, 128>}, {pipeline_mode = #tpu.pipeline_mode<synchronous>, transform_indices = @transform_2, window_bounds = array<i64: 1, 128>}, {pipeline_mode = #tpu.pipeline_mode<synchronous>, transform_indices = @transform_3, window_bounds = array<i64: 3, 384, 128>}, {transform_indices = @transform_4, window_bounds = array<i64: 1, 16, 16, 128>}, {transform_indices = @transform_5, window_bounds = array<i64: 1, 8, 128>}, {transform_indices = @transform_6, window_bounds = array<i64: 1, 8, 128>}]} {
    %c0 = arith.constant 0 : index
    %c0_0 = arith.constant 0 : index
    %c0_1 = arith.constant 0 : index
    %c0_2 = arith.constant 0 : index
    %0 = vector.load %arg1[%c0, %c0_0, %c0_1, %c0_2] : memref<1x16x16x128xbf16, #tpu.memory_space<vmem>>, vector<1x16x16x128xbf16>
    %1 = vector.shape_cast %0 : vector<1x16x16x128xbf16> to vector<16x16x128xbf16>
    %2 = arith.extf %1 : vector<16x16x128xbf16> to vector<16x16x128xf32>
    %c0_3 = arith.constant 0 : index
    %c0_4 = arith.constant 0 : index
    %3 = vector.load %arg2[%c0_3, %c0_4] : memref<1x128xf32, #tpu.memory_space<vmem>>, vector<1x128xf32>
    %4 = vector.shape_cast %3 : vector<1x128xf32> to vector<1x1x128xf32>
    %5 = vector.broadcast %4 : vector<1x1x128xf32> to vector<16x16x128xf32>
    %6 = arith.mulf %2, %5 : vector<16x16x128xf32>
    %c0_5 = arith.constant 0 : index
    %c0_6 = arith.constant 0 : index
    %7 = vector.load %arg3[%c0_5, %c0_6] : memref<1x128xf32, #tpu.memory_space<vmem>>, vector<1x128xf32>
    %8 = vector.shape_cast %7 : vector<1x128xf32> to vector<1x1x128xf32>
    %9 = vector.broadcast %8 : vector<1x1x128xf32> to vector<16x16x128xf32>
    %10 = arith.addf %6, %9 : vector<16x16x128xf32>
    %cst = arith.constant 0.000000e+00 : f32
    %11 = vector.broadcast %cst : f32 to vector<16x16x128xf32>
    %12 = arith.maximumf %10, %11 : vector<16x16x128xf32>
    %13 = arith.truncf %12 : vector<16x16x128xf32> to vector<16x16x128xbf16>
    %cst_7 = arith.constant 0.000000e+00 : bf16
    %14 = vector.broadcast %cst_7 : bf16 to vector<18x18x128xbf16>
    %c0_8 = arith.constant 0 : index
    %c0_9 = arith.constant 0 : index
    %c0_10 = arith.constant 0 : index
    %15 = vector.load %arg8[%c0_8, %c0_9, %c0_10] : memref<18x18x128xbf16, #tpu.memory_space<vmem>>, vector<18x18x128xbf16>
    tpu.vector_store %arg8[%c0_8, %c0_9, %c0_10], %14 {strides = array<i32>} : memref<18x18x128xbf16, #tpu.memory_space<vmem>>, vector<18x18x128xbf16>,
    %c1 = arith.constant 1 : index
    %c1_11 = arith.constant 1 : index
    %c0_12 = arith.constant 0 : index
    %16 = vector.load %arg8[%c1, %c1_11, %c0_12] : memref<18x18x128xbf16, #tpu.memory_space<vmem>>, vector<16x16x128xbf16>
    tpu.vector_store %arg8[%c1, %c1_11, %c0_12], %13 {strides = array<i32>} : memref<18x18x128xbf16, #tpu.memory_space<vmem>>, vector<16x16x128xbf16>,
    %cst_13 = arith.constant 0.000000e+00 : f32
    %17 = vector.broadcast %cst_13 : f32 to vector<256x128xf32>
    %c0_14 = arith.constant 0 : index
    %c0_15 = arith.constant 0 : index
    %c0_16 = arith.constant 0 : index
    %18 = vector.load %arg8[%c0_14, %c0_15, %c0_16] : memref<18x18x128xbf16, #tpu.memory_space<vmem>>, vector<16x16x128xbf16>
    %c0_17 = arith.constant 0 : index
    %c0_18 = arith.constant 0 : index
    %c0_19 = arith.constant 0 : index
    %19 = vector.load %arg9[%c0_17, %c0_18, %c0_19] : memref<16x16x384xbf16, #tpu.memory_space<vmem>>, vector<16x16x128xbf16>
    tpu.vector_store %arg9[%c0_17, %c0_18, %c0_19], %18 {strides = array<i32>} : memref<16x16x384xbf16, #tpu.memory_space<vmem>>, vector<16x16x128xbf16>,
    %c0_20 = arith.constant 0 : index
    %c1_21 = arith.constant 1 : index
    %c0_22 = arith.constant 0 : index
    %20 = vector.load %arg8[%c0_20, %c1_21, %c0_22] : memref<18x18x128xbf16, #tpu.memory_space<vmem>>, vector<16x16x128xbf16>
    %c0_23 = arith.constant 0 : index
    %c0_24 = arith.constant 0 : index
    %c128 = arith.constant 128 : index
    %21 = vector.load %arg9[%c0_23, %c0_24, %c128] : memref<16x16x384xbf16, #tpu.memory_space<vmem>>, vector<16x16x128xbf16>
    tpu.vector_store %arg9[%c0_23, %c0_24, %c128], %20 {strides = array<i32>} : memref<16x16x384xbf16, #tpu.memory_space<vmem>>, vector<16x16x128xbf16>,
    %c0_25 = arith.constant 0 : index
    %c2 = arith.constant 2 : index
    %c0_26 = arith.constant 0 : index
    %22 = vector.load %arg8[%c0_25, %c2, %c0_26] : memref<18x18x128xbf16, #tpu.memory_space<vmem>>, vector<16x16x128xbf16>
    %c0_27 = arith.constant 0 : index
    %c0_28 = arith.constant 0 : index
    %c256 = arith.constant 256 : index
    %23 = vector.load %arg9[%c0_27, %c0_28, %c256] : memref<16x16x384xbf16, #tpu.memory_space<vmem>>, vector<16x16x128xbf16>
    tpu.vector_store %arg9[%c0_27, %c0_28, %c256], %22 {strides = array<i32>} : memref<16x16x384xbf16, #tpu.memory_space<vmem>>, vector<16x16x128xbf16>,
    %c0_29 = arith.constant 0 : index
    %c0_30 = arith.constant 0 : index
    %c0_31 = arith.constant 0 : index
    %24 = vector.load %arg9[%c0_29, %c0_30, %c0_31] : memref<16x16x384xbf16, #tpu.memory_space<vmem>>, vector<16x16x384xbf16>
    %25 = vector.shape_cast %24 : vector<16x16x384xbf16> to vector<256x384xbf16>
    %c0_32 = arith.constant 0 : index
    %c0_33 = arith.constant 0 : index
    %c0_34 = arith.constant 0 : index
    %26 = vector.load %arg4[%c0_32, %c0_33, %c0_34] : memref<3x384x128xbf16, #tpu.memory_space<vmem>>, vector<1x384x128xbf16>
    %27 = vector.shape_cast %26 : vector<1x384x128xbf16> to vector<384x128xbf16>
    %cst_35 = arith.constant dense<0.000000e+00> : vector<256x128xf32>
    %28 = tpu.matmul %25, %27, %cst_35 {dimension_numbers = #tpu.dot_dimension_numbers<[1], [0], [0], [1], [0, 0, 1, 1], [], []>} : vector<256x384xbf16>, vector<384x128xbf16>, vector<256x128xf32> -> vector<256x128xf32>
    %29 = arith.addf %17, %28 : vector<256x128xf32>
    %c1_36 = arith.constant 1 : index
    %c0_37 = arith.constant 0 : index
    %c0_38 = arith.constant 0 : index
    %30 = vector.load %arg8[%c1_36, %c0_37, %c0_38] : memref<18x18x128xbf16, #tpu.memory_space<vmem>>, vector<16x16x128xbf16>
    %c0_39 = arith.constant 0 : index
    %c0_40 = arith.constant 0 : index
    %c0_41 = arith.constant 0 : index
    %31 = vector.load %arg9[%c0_39, %c0_40, %c0_41] : memref<16x16x384xbf16, #tpu.memory_space<vmem>>, vector<16x16x128xbf16>
    tpu.vector_store %arg9[%c0_39, %c0_40, %c0_41], %30 {strides = array<i32>} : memref<16x16x384xbf16, #tpu.memory_space<vmem>>, vector<16x16x128xbf16>,
    %c1_42 = arith.constant 1 : index
    %c1_43 = arith.constant 1 : index
    %c0_44 = arith.constant 0 : index
    %32 = vector.load %arg8[%c1_42, %c1_43, %c0_44] : memref<18x18x128xbf16, #tpu.memory_space<vmem>>, vector<16x16x128xbf16>
    %c0_45 = arith.constant 0 : index
    %c0_46 = arith.constant 0 : index
    %c128_47 = arith.constant 128 : index
    %33 = vector.load %arg9[%c0_45, %c0_46, %c128_47] : memref<16x16x384xbf16, #tpu.memory_space<vmem>>, vector<16x16x128xbf16>
    tpu.vector_store %arg9[%c0_45, %c0_46, %c128_47], %32 {strides = array<i32>} : memref<16x16x384xbf16, #tpu.memory_space<vmem>>, vector<16x16x128xbf16>,
    %c1_48 = arith.constant 1 : index
    %c2_49 = arith.constant 2 : index
    %c0_50 = arith.constant 0 : index
    %34 = vector.load %arg8[%c1_48, %c2_49, %c0_50] : memref<18x18x128xbf16, #tpu.memory_space<vmem>>, vector<16x16x128xbf16>
    %c0_51 = arith.constant 0 : index
    %c0_52 = arith.constant 0 : index
    %c256_53 = arith.constant 256 : index
    %35 = vector.load %arg9[%c0_51, %c0_52, %c256_53] : memref<16x16x384xbf16, #tpu.memory_space<vmem>>, vector<16x16x128xbf16>
    tpu.vector_store %arg9[%c0_51, %c0_52, %c256_53], %34 {strides = array<i32>} : memref<16x16x384xbf16, #tpu.memory_space<vmem>>, vector<16x16x128xbf16>,
    %c0_54 = arith.constant 0 : index
    %c0_55 = arith.constant 0 : index
    %c0_56 = arith.constant 0 : index
    %36 = vector.load %arg9[%c0_54, %c0_55, %c0_56] : memref<16x16x384xbf16, #tpu.memory_space<vmem>>, vector<16x16x384xbf16>
    %37 = vector.shape_cast %36 : vector<16x16x384xbf16> to vector<256x384xbf16>
    %c1_57 = arith.constant 1 : index
    %c0_58 = arith.constant 0 : index
    %c0_59 = arith.constant 0 : index
    %38 = vector.load %arg4[%c1_57, %c0_58, %c0_59] : memref<3x384x128xbf16, #tpu.memory_space<vmem>>, vector<1x384x128xbf16>
    %39 = vector.shape_cast %38 : vector<1x384x128xbf16> to vector<384x128xbf16>
    %cst_60 = arith.constant dense<0.000000e+00> : vector<256x128xf32>
    %40 = tpu.matmul %37, %39, %cst_60 {dimension_numbers = #tpu.dot_dimension_numbers<[1], [0], [0], [1], [0, 0, 1, 1], [], []>} : vector<256x384xbf16>, vector<384x128xbf16>, vector<256x128xf32> -> vector<256x128xf32>
    %41 = arith.addf %29, %40 : vector<256x128xf32>
    %c2_61 = arith.constant 2 : index
    %c0_62 = arith.constant 0 : index
    %c0_63 = arith.constant 0 : index
    %42 = vector.load %arg8[%c2_61, %c0_62, %c0_63] : memref<18x18x128xbf16, #tpu.memory_space<vmem>>, vector<16x16x128xbf16>
    %c0_64 = arith.constant 0 : index
    %c0_65 = arith.constant 0 : index
    %c0_66 = arith.constant 0 : index
    %43 = vector.load %arg9[%c0_64, %c0_65, %c0_66] : memref<16x16x384xbf16, #tpu.memory_space<vmem>>, vector<16x16x128xbf16>
    tpu.vector_store %arg9[%c0_64, %c0_65, %c0_66], %42 {strides = array<i32>} : memref<16x16x384xbf16, #tpu.memory_space<vmem>>, vector<16x16x128xbf16>,
    %c2_67 = arith.constant 2 : index
    %c1_68 = arith.constant 1 : index
    %c0_69 = arith.constant 0 : index
    %44 = vector.load %arg8[%c2_67, %c1_68, %c0_69] : memref<18x18x128xbf16, #tpu.memory_space<vmem>>, vector<16x16x128xbf16>
    %c0_70 = arith.constant 0 : index
    %c0_71 = arith.constant 0 : index
    %c128_72 = arith.constant 128 : index
    %45 = vector.load %arg9[%c0_70, %c0_71, %c128_72] : memref<16x16x384xbf16, #tpu.memory_space<vmem>>, vector<16x16x128xbf16>
    tpu.vector_store %arg9[%c0_70, %c0_71, %c128_72], %44 {strides = array<i32>} : memref<16x16x384xbf16, #tpu.memory_space<vmem>>, vector<16x16x128xbf16>,
    %c2_73 = arith.constant 2 : index
    %c2_74 = arith.constant 2 : index
    %c0_75 = arith.constant 0 : index
    %46 = vector.load %arg8[%c2_73, %c2_74, %c0_75] : memref<18x18x128xbf16, #tpu.memory_space<vmem>>, vector<16x16x128xbf16>
    %c0_76 = arith.constant 0 : index
    %c0_77 = arith.constant 0 : index
    %c256_78 = arith.constant 256 : index
    %47 = vector.load %arg9[%c0_76, %c0_77, %c256_78] : memref<16x16x384xbf16, #tpu.memory_space<vmem>>, vector<16x16x128xbf16>
    tpu.vector_store %arg9[%c0_76, %c0_77, %c256_78], %46 {strides = array<i32>} : memref<16x16x384xbf16, #tpu.memory_space<vmem>>, vector<16x16x128xbf16>,
    %c0_79 = arith.constant 0 : index
    %c0_80 = arith.constant 0 : index
    %c0_81 = arith.constant 0 : index
    %48 = vector.load %arg9[%c0_79, %c0_80, %c0_81] : memref<16x16x384xbf16, #tpu.memory_space<vmem>>, vector<16x16x384xbf16>
    %49 = vector.shape_cast %48 : vector<16x16x384xbf16> to vector<256x384xbf16>
    %c2_82 = arith.constant 2 : index
    %c0_83 = arith.constant 0 : index
    %c0_84 = arith.constant 0 : index
    %50 = vector.load %arg4[%c2_82, %c0_83, %c0_84] : memref<3x384x128xbf16, #tpu.memory_space<vmem>>, vector<1x384x128xbf16>
    %51 = vector.shape_cast %50 : vector<1x384x128xbf16> to vector<384x128xbf16>
    %cst_85 = arith.constant dense<0.000000e+00> : vector<256x128xf32>
    %52 = tpu.matmul %49, %51, %cst_85 {dimension_numbers = #tpu.dot_dimension_numbers<[1], [0], [0], [1], [0, 0, 1, 1], [], []>} : vector<256x384xbf16>, vector<384x128xbf16>, vector<256x128xf32> -> vector<256x128xf32>
    %53 = arith.addf %41, %52 : vector<256x128xf32>
    %54 = vector.shape_cast %53 : vector<256x128xf32> to vector<1x16x16x128xf32>
    %55 = arith.truncf %54 : vector<1x16x16x128xf32> to vector<1x16x16x128xbf16>
    %c0_86 = arith.constant 0 : index
    %c0_87 = arith.constant 0 : index
    %c0_88 = arith.constant 0 : index
    %c0_89 = arith.constant 0 : index
    %56 = vector.load %arg5[%c0_86, %c0_87, %c0_88, %c0_89] : memref<1x16x16x128xbf16, #tpu.memory_space<vmem>>, vector<1x16x16x128xbf16>
    tpu.vector_store %arg5[%c0_86, %c0_87, %c0_88, %c0_89], %55 {strides = array<i32>} : memref<1x16x16x128xbf16, #tpu.memory_space<vmem>>, vector<1x16x16x128xbf16>,
    %cst_90 = arith.constant dense<0.000000e+00> : vector<128xf32>
    %57 = vector.multi_reduction <add>, %53, %cst_90 [0] : vector<256x128xf32> to vector<128xf32>
    %58 = vector.shape_cast %57 : vector<128xf32> to vector<1x128xf32>
    %59 = arith.mulf %53, %53 : vector<256x128xf32>
    %cst_91 = arith.constant dense<0.000000e+00> : vector<128xf32>
    %60 = vector.multi_reduction <add>, %59, %cst_91 [0] : vector<256x128xf32> to vector<128xf32>
    %61 = vector.shape_cast %60 : vector<128xf32> to vector<1x128xf32>
    %62 = vector.shape_cast %58 : vector<1x128xf32> to vector<1x1x128xf32>
    %63 = vector.shape_cast %62 : vector<1x1x128xf32> to vector<1x1x128xf32>
    %64 = vector.broadcast %63 : vector<1x1x128xf32> to vector<1x8x128xf32>
    %c0_92 = arith.constant 0 : index
    %c0_93 = arith.constant 0 : index
    %c0_94 = arith.constant 0 : index
    %65 = vector.load %arg6[%c0_92, %c0_93, %c0_94] : memref<1x8x128xf32, #tpu.memory_space<vmem>>, vector<1x8x128xf32>
    tpu.vector_store %arg6[%c0_92, %c0_93, %c0_94], %64 {strides = array<i32>} : memref<1x8x128xf32, #tpu.memory_space<vmem>>, vector<1x8x128xf32>,
    %66 = vector.shape_cast %61 : vector<1x128xf32> to vector<1x1x128xf32>
    %67 = vector.shape_cast %66 : vector<1x1x128xf32> to vector<1x1x128xf32>
    %68 = vector.broadcast %67 : vector<1x1x128xf32> to vector<1x8x128xf32>
    %c0_95 = arith.constant 0 : index
    %c0_96 = arith.constant 0 : index
    %c0_97 = arith.constant 0 : index
    %69 = vector.load %arg7[%c0_95, %c0_96, %c0_97] : memref<1x8x128xf32, #tpu.memory_space<vmem>>, vector<1x8x128xf32>
    tpu.vector_store %arg7[%c0_95, %c0_96, %c0_97], %68 {strides = array<i32>} : memref<1x8x128xf32, #tpu.memory_space<vmem>>, vector<1x8x128xf32>,
    return
  }
  func.func @transform_0(%arg0: i32) -> (i32, i32, i32, i32) {
    %c0_i32 = arith.constant 0 : i32
    %c0_i32_0 = arith.constant 0 : i32
    %c0_i32_1 = arith.constant 0 : i32
    %c0_i32_2 = arith.constant 0 : i32
    return %arg0, %c0_i32, %c0_i32_0, %c0_i32_1 : i32, i32, i32, i32
  }
  func.func @transform_1(%arg0: i32) -> (i32, i32) {
    %c0_i32 = arith.constant 0 : i32
    %c0_i32_0 = arith.constant 0 : i32
    %c0_i32_1 = arith.constant 0 : i32
    return %c0_i32, %c0_i32_0 : i32, i32
  }
  func.func @transform_2(%arg0: i32) -> (i32, i32) {
    %c0_i32 = arith.constant 0 : i32
    %c0_i32_0 = arith.constant 0 : i32
    %c0_i32_1 = arith.constant 0 : i32
    return %c0_i32, %c0_i32_0 : i32, i32
  }
  func.func @transform_3(%arg0: i32) -> (i32, i32, i32) {
    %c0_i32 = arith.constant 0 : i32
    %c0_i32_0 = arith.constant 0 : i32
    %c0_i32_1 = arith.constant 0 : i32
    %c0_i32_2 = arith.constant 0 : i32
    return %c0_i32, %c0_i32_0, %c0_i32_1 : i32, i32, i32
  }
  func.func @transform_4(%arg0: i32) -> (i32, i32, i32, i32) {
    %c0_i32 = arith.constant 0 : i32
    %c0_i32_0 = arith.constant 0 : i32
    %c0_i32_1 = arith.constant 0 : i32
    %c0_i32_2 = arith.constant 0 : i32
    return %arg0, %c0_i32, %c0_i32_0, %c0_i32_1 : i32, i32, i32, i32
  }
  func.func @transform_5(%arg0: i32) -> (i32, i32, i32) {
    %c0_i32 = arith.constant 0 : i32
    %c0_i32_0 = arith.constant 0 : i32
    %c0_i32_1 = arith.constant 0 : i32
    return %arg0, %c0_i32, %c0_i32_0 : i32, i32, i32
  }
  func.func @transform_6(%arg0: i32) -> (i32, i32, i32) {
    %c0_i32 = arith.constant 0 : i32
    %c0_i32_0 = arith.constant 0 : i32
    %c0_i32_1 = arith.constant 0 : i32
    return %arg0, %c0_i32, %c0_i32_0 : i32, i32, i32
  }
}

module attributes {stable_mosaic.version = 11 : i64} {
  func.func @_mm_fused_kernel(%arg0: i32, %arg1: memref<512x128xbf16, #tpu.memory_space<vmem>>, %arg2: memref<128x128xbf16, #tpu.memory_space<vmem>>, %arg3: memref<1x128xf32, #tpu.memory_space<vmem>>, %arg4: memref<1x128xf32, #tpu.memory_space<vmem>>, %arg5: memref<512x128xbf16, #tpu.memory_space<vmem>>, %arg6: memref<1x8x128xf32, #tpu.memory_space<vmem>>, %arg7: memref<1x8x128xf32, #tpu.memory_space<vmem>>) attributes {dimension_semantics = [#tpu.dimension_semantics<parallel>], iteration_bounds = array<i64: 1>, scalar_prefetch = 0 : i64, scratch_operands = 0 : i64, tpu.core_type = #tpu.core_type<tc>, window_params = [{transform_indices = @transform_0, window_bounds = array<i64: 512, 128>}, {pipeline_mode = #tpu.pipeline_mode<synchronous>, transform_indices = @transform_1, window_bounds = array<i64: 128, 128>}, {pipeline_mode = #tpu.pipeline_mode<synchronous>, transform_indices = @transform_2, window_bounds = array<i64: 1, 128>}, {pipeline_mode = #tpu.pipeline_mode<synchronous>, transform_indices = @transform_3, window_bounds = array<i64: 1, 128>}, {transform_indices = @transform_4, window_bounds = array<i64: 512, 128>}, {transform_indices = @transform_5, window_bounds = array<i64: 1, 8, 128>}, {transform_indices = @transform_6, window_bounds = array<i64: 1, 8, 128>}]} {
    %c0 = arith.constant 0 : index
    %c0_0 = arith.constant 0 : index
    %0 = vector.load %arg1[%c0, %c0_0] : memref<512x128xbf16, #tpu.memory_space<vmem>>, vector<512x128xbf16>
    %1 = arith.extf %0 : vector<512x128xbf16> to vector<512x128xf32>
    %c0_1 = arith.constant 0 : index
    %c0_2 = arith.constant 0 : index
    %2 = vector.load %arg3[%c0_1, %c0_2] : memref<1x128xf32, #tpu.memory_space<vmem>>, vector<1x128xf32>
    %3 = vector.broadcast %2 : vector<1x128xf32> to vector<512x128xf32>
    %4 = arith.mulf %1, %3 : vector<512x128xf32>
    %c0_3 = arith.constant 0 : index
    %c0_4 = arith.constant 0 : index
    %5 = vector.load %arg4[%c0_3, %c0_4] : memref<1x128xf32, #tpu.memory_space<vmem>>, vector<1x128xf32>
    %6 = vector.broadcast %5 : vector<1x128xf32> to vector<512x128xf32>
    %7 = arith.addf %4, %6 : vector<512x128xf32>
    %cst = arith.constant 0.000000e+00 : f32
    %8 = vector.broadcast %cst : f32 to vector<512x128xf32>
    %9 = arith.maximumf %7, %8 : vector<512x128xf32>
    %10 = arith.truncf %9 : vector<512x128xf32> to vector<512x128xbf16>
    %c0_5 = arith.constant 0 : index
    %c0_6 = arith.constant 0 : index
    %11 = vector.load %arg2[%c0_5, %c0_6] : memref<128x128xbf16, #tpu.memory_space<vmem>>, vector<128x128xbf16>
    %cst_7 = arith.constant dense<0.000000e+00> : vector<512x128xf32>
    %12 = tpu.matmul %10, %11, %cst_7 {dimension_numbers = #tpu.dot_dimension_numbers<[1], [0], [0], [1], [0, 0, 1, 1], [], []>} : vector<512x128xbf16>, vector<128x128xbf16>, vector<512x128xf32> -> vector<512x128xf32>
    %13 = arith.truncf %12 : vector<512x128xf32> to vector<512x128xbf16>
    %c0_8 = arith.constant 0 : index
    %c0_9 = arith.constant 0 : index
    %14 = vector.load %arg5[%c0_8, %c0_9] : memref<512x128xbf16, #tpu.memory_space<vmem>>, vector<512x128xbf16>
    tpu.vector_store %arg5[%c0_8, %c0_9], %13 {strides = array<i32>} : memref<512x128xbf16, #tpu.memory_space<vmem>>, vector<512x128xbf16>,
    %cst_10 = arith.constant dense<0.000000e+00> : vector<128xf32>
    %15 = vector.multi_reduction <add>, %12, %cst_10 [0] : vector<512x128xf32> to vector<128xf32>
    %16 = vector.shape_cast %15 : vector<128xf32> to vector<1x128xf32>
    %17 = arith.mulf %12, %12 : vector<512x128xf32>
    %cst_11 = arith.constant dense<0.000000e+00> : vector<128xf32>
    %18 = vector.multi_reduction <add>, %17, %cst_11 [0] : vector<512x128xf32> to vector<128xf32>
    %19 = vector.shape_cast %18 : vector<128xf32> to vector<1x128xf32>
    %20 = vector.shape_cast %16 : vector<1x128xf32> to vector<1x1x128xf32>
    %21 = vector.shape_cast %20 : vector<1x1x128xf32> to vector<1x1x128xf32>
    %22 = vector.broadcast %21 : vector<1x1x128xf32> to vector<1x8x128xf32>
    %c0_12 = arith.constant 0 : index
    %c0_13 = arith.constant 0 : index
    %c0_14 = arith.constant 0 : index
    %23 = vector.load %arg6[%c0_12, %c0_13, %c0_14] : memref<1x8x128xf32, #tpu.memory_space<vmem>>, vector<1x8x128xf32>
    tpu.vector_store %arg6[%c0_12, %c0_13, %c0_14], %22 {strides = array<i32>} : memref<1x8x128xf32, #tpu.memory_space<vmem>>, vector<1x8x128xf32>,
    %24 = vector.shape_cast %19 : vector<1x128xf32> to vector<1x1x128xf32>
    %25 = vector.shape_cast %24 : vector<1x1x128xf32> to vector<1x1x128xf32>
    %26 = vector.broadcast %25 : vector<1x1x128xf32> to vector<1x8x128xf32>
    %c0_15 = arith.constant 0 : index
    %c0_16 = arith.constant 0 : index
    %c0_17 = arith.constant 0 : index
    %27 = vector.load %arg7[%c0_15, %c0_16, %c0_17] : memref<1x8x128xf32, #tpu.memory_space<vmem>>, vector<1x8x128xf32>
    tpu.vector_store %arg7[%c0_15, %c0_16, %c0_17], %26 {strides = array<i32>} : memref<1x8x128xf32, #tpu.memory_space<vmem>>, vector<1x8x128xf32>,
    return
  }
  func.func @transform_0(%arg0: i32) -> (i32, i32) {
    %c0_i32 = arith.constant 0 : i32
    %c0_i32_0 = arith.constant 0 : i32
    return %arg0, %c0_i32 : i32, i32
  }
  func.func @transform_1(%arg0: i32) -> (i32, i32) {
    %c0_i32 = arith.constant 0 : i32
    %c0_i32_0 = arith.constant 0 : i32
    %c0_i32_1 = arith.constant 0 : i32
    return %c0_i32, %c0_i32_0 : i32, i32
  }
  func.func @transform_2(%arg0: i32) -> (i32, i32) {
    %c0_i32 = arith.constant 0 : i32
    %c0_i32_0 = arith.constant 0 : i32
    %c0_i32_1 = arith.constant 0 : i32
    return %c0_i32, %c0_i32_0 : i32, i32
  }
  func.func @transform_3(%arg0: i32) -> (i32, i32) {
    %c0_i32 = arith.constant 0 : i32
    %c0_i32_0 = arith.constant 0 : i32
    %c0_i32_1 = arith.constant 0 : i32
    return %c0_i32, %c0_i32_0 : i32, i32
  }
  func.func @transform_4(%arg0: i32) -> (i32, i32) {
    %c0_i32 = arith.constant 0 : i32
    %c0_i32_0 = arith.constant 0 : i32
    return %arg0, %c0_i32 : i32, i32
  }
  func.func @transform_5(%arg0: i32) -> (i32, i32, i32) {
    %c0_i32 = arith.constant 0 : i32
    %c0_i32_0 = arith.constant 0 : i32
    %c0_i32_1 = arith.constant 0 : i32
    return %arg0, %c0_i32, %c0_i32_0 : i32, i32, i32
  }
  func.func @transform_6(%arg0: i32) -> (i32, i32, i32) {
    %c0_i32 = arith.constant 0 : i32
    %c0_i32_0 = arith.constant 0 : i32
    %c0_i32_1 = arith.constant 0 : i32
    return %arg0, %c0_i32, %c0_i32_0 : i32, i32, i32
  }
}

module attributes {stable_mosaic.version = 11 : i64} {
  func.func @_bn_add_relu_kernel(%arg0: i32, %arg1: memref<512x128xbf16, #tpu.memory_space<vmem>>, %arg2: memref<1x128xf32, #tpu.memory_space<vmem>>, %arg3: memref<1x128xf32, #tpu.memory_space<vmem>>, %arg4: memref<512x128xbf16, #tpu.memory_space<vmem>>, %arg5: memref<1x128xf32, #tpu.memory_space<vmem>>, %arg6: memref<1x128xf32, #tpu.memory_space<vmem>>, %arg7: memref<512x128xbf16, #tpu.memory_space<vmem>>) attributes {dimension_semantics = [#tpu.dimension_semantics<parallel>], iteration_bounds = array<i64: 1>, scalar_prefetch = 0 : i64, scratch_operands = 0 : i64, tpu.core_type = #tpu.core_type<tc>, window_params = [{transform_indices = @transform_0, window_bounds = array<i64: 512, 128>}, {pipeline_mode = #tpu.pipeline_mode<synchronous>, transform_indices = @transform_1, window_bounds = array<i64: 1, 128>}, {pipeline_mode = #tpu.pipeline_mode<synchronous>, transform_indices = @transform_2, window_bounds = array<i64: 1, 128>}, {transform_indices = @transform_3, window_bounds = array<i64: 512, 128>}, {pipeline_mode = #tpu.pipeline_mode<synchronous>, transform_indices = @transform_4, window_bounds = array<i64: 1, 128>}, {pipeline_mode = #tpu.pipeline_mode<synchronous>, transform_indices = @transform_5, window_bounds = array<i64: 1, 128>}, {transform_indices = @transform_6, window_bounds = array<i64: 512, 128>}]} {
    %c0 = arith.constant 0 : index
    %c0_0 = arith.constant 0 : index
    %0 = vector.load %arg1[%c0, %c0_0] : memref<512x128xbf16, #tpu.memory_space<vmem>>, vector<512x128xbf16>
    %1 = arith.extf %0 : vector<512x128xbf16> to vector<512x128xf32>
    %c0_1 = arith.constant 0 : index
    %c0_2 = arith.constant 0 : index
    %2 = vector.load %arg2[%c0_1, %c0_2] : memref<1x128xf32, #tpu.memory_space<vmem>>, vector<1x128xf32>
    %3 = vector.broadcast %2 : vector<1x128xf32> to vector<512x128xf32>
    %4 = arith.mulf %1, %3 : vector<512x128xf32>
    %c0_3 = arith.constant 0 : index
    %c0_4 = arith.constant 0 : index
    %5 = vector.load %arg3[%c0_3, %c0_4] : memref<1x128xf32, #tpu.memory_space<vmem>>, vector<1x128xf32>
    %6 = vector.broadcast %5 : vector<1x128xf32> to vector<512x128xf32>
    %7 = arith.addf %4, %6 : vector<512x128xf32>
    %c0_5 = arith.constant 0 : index
    %c0_6 = arith.constant 0 : index
    %8 = vector.load %arg4[%c0_5, %c0_6] : memref<512x128xbf16, #tpu.memory_space<vmem>>, vector<512x128xbf16>
    %9 = arith.extf %8 : vector<512x128xbf16> to vector<512x128xf32>
    %c0_7 = arith.constant 0 : index
    %c0_8 = arith.constant 0 : index
    %10 = vector.load %arg5[%c0_7, %c0_8] : memref<1x128xf32, #tpu.memory_space<vmem>>, vector<1x128xf32>
    %11 = vector.broadcast %10 : vector<1x128xf32> to vector<512x128xf32>
    %12 = arith.mulf %9, %11 : vector<512x128xf32>
    %c0_9 = arith.constant 0 : index
    %c0_10 = arith.constant 0 : index
    %13 = vector.load %arg6[%c0_9, %c0_10] : memref<1x128xf32, #tpu.memory_space<vmem>>, vector<1x128xf32>
    %14 = vector.broadcast %13 : vector<1x128xf32> to vector<512x128xf32>
    %15 = arith.addf %12, %14 : vector<512x128xf32>
    %16 = arith.addf %7, %15 : vector<512x128xf32>
    %cst = arith.constant 0.000000e+00 : f32
    %17 = vector.broadcast %cst : f32 to vector<512x128xf32>
    %18 = arith.maximumf %16, %17 : vector<512x128xf32>
    %19 = arith.truncf %18 : vector<512x128xf32> to vector<512x128xbf16>
    %c0_11 = arith.constant 0 : index
    %c0_12 = arith.constant 0 : index
    %20 = vector.load %arg7[%c0_11, %c0_12] : memref<512x128xbf16, #tpu.memory_space<vmem>>, vector<512x128xbf16>
    tpu.vector_store %arg7[%c0_11, %c0_12], %19 {strides = array<i32>} : memref<512x128xbf16, #tpu.memory_space<vmem>>, vector<512x128xbf16>,
    return
  }
  func.func @transform_0(%arg0: i32) -> (i32, i32) {
    %c0_i32 = arith.constant 0 : i32
    %c0_i32_0 = arith.constant 0 : i32
    return %arg0, %c0_i32 : i32, i32
  }
  func.func @transform_1(%arg0: i32) -> (i32, i32) {
    %c0_i32 = arith.constant 0 : i32
    %c0_i32_0 = arith.constant 0 : i32
    %c0_i32_1 = arith.constant 0 : i32
    return %c0_i32, %c0_i32_0 : i32, i32
  }
  func.func @transform_2(%arg0: i32) -> (i32, i32) {
    %c0_i32 = arith.constant 0 : i32
    %c0_i32_0 = arith.constant 0 : i32
    %c0_i32_1 = arith.constant 0 : i32
    return %c0_i32, %c0_i32_0 : i32, i32
  }
  func.func @transform_3(%arg0: i32) -> (i32, i32) {
    %c0_i32 = arith.constant 0 : i32
    %c0_i32_0 = arith.constant 0 : i32
    return %arg0, %c0_i32 : i32, i32
  }
  func.func @transform_4(%arg0: i32) -> (i32, i32) {
    %c0_i32 = arith.constant 0 : i32
    %c0_i32_0 = arith.constant 0 : i32
    %c0_i32_1 = arith.constant 0 : i32
    return %c0_i32, %c0_i32_0 : i32, i32
  }
  func.func @transform_5(%arg0: i32) -> (i32, i32) {
    %c0_i32 = arith.constant 0 : i32
    %c0_i32_0 = arith.constant 0 : i32
    %c0_i32_1 = arith.constant 0 : i32
    return %c0_i32, %c0_i32_0 : i32, i32
  }
  func.func @transform_6(%arg0: i32) -> (i32, i32) {
    %c0_i32 = arith.constant 0 : i32
    %c0_i32_0 = arith.constant 0 : i32
    return %arg0, %c0_i32 : i32, i32
  }
}

</mosaic_0001>

<bundles_post_ra>
// kernel: bottleneck_forward.7
= control target key start
LH: loop header
LB: loop body
LE: loop exit
PB: predicated region body
PF: predicated region fallthrough
CT: control target
= control target key end

     0   :  { %s2056_s1 = inlined_call_operand.vmem [shape: bf16[128,128], index: 1, kind: input, shape index: {}]   ;;  %s2057_s2 = inlined_call_operand.vmem [shape: f32[1,128], index: 2, kind: input, shape index: {}]   ;;  %s2058_s3 = inlined_call_operand.vmem [shape: f32[1,128], index: 3, kind: input, shape index: {}]   ;;  %s2059_s0 = inlined_call_operand.vmem [shape: bf16[512,128], index: 0, kind: input, shape index: {}]   ;;  %s2060_s4 = inlined_call_operand.vmem [shape: bf16[512,128], index: 4, kind: output, shape index: {0}]   ;;  %s2061_s5 = inlined_call_operand.vmem [shape: f32[1,8,128], index: 5, kind: output, shape index: {1}]   ;;  %s2062_s6 = inlined_call_operand.vmem [shape: f32[1,8,128], index: 6, kind: output, shape index: {2}]  }
   0x1   :  { %v996_v0 = vld [vmem:[%s2056_s1 + $0x38] sm:$0xff]  ;;  %v995_v1 = vld [vmem:[%s2056_s1 + $0x30] sm:$0xff]  ;;  %v994_v2 = vld [vmem:[%s2056_s1 + $0x28] sm:$0xff] }
   0x2   :  { %444 = vmatpush.bf16.msra.mxu0 %v996_v0  ;;  %1347 = vmatpush.bf16.msra.mxu1 %v996_v0  ;;  %v993_v3 = vld [vmem:[%s2056_s1 + $0x20] sm:$0xff]  ;;  %v992_v8 = vld [vmem:[%s2056_s1 + $0x18] sm:$0xff]  ;;  %v991_v17 = vld [vmem:[%s2056_s1 + $0x10] sm:$0xff] }
   0x3   :  { %1348 = vmatpush.bf16.msra.mxu2 %v996_v0  ;;  %1349 = vmatpush.bf16.msra.mxu3 %v996_v0  ;;  %v998_v4 = vld [vmem:[%s2059_s0] sm:$0xff]   ;;  %v990_v22 = vld [vmem:[%s2056_s1 + $0x8] sm:$0xff]  ;;  %v1286_v47 = vld [vmem:[%s2059_s0 + $0x10] sm:$0xff]  }
   0x4   :  { %v999_v5 = vunpack.c.l.bf16 %v998_v4  ;;  %v1000_v6 = vunpack.c.h.bf16 %v998_v4  ;;  %v1426_v7 = vld [vmem:[%s2057_s2] ss:$0 sm:$0xff]  ;;  %v1285_v25 = vld [vmem:[%s2059_s0 + $0x8] sm:$0xff]   ;;  %v1007_v54 = vunpack.c.l.bf16 %v1286_v47  ;;  %v1008_v55 = vunpack.c.h.bf16 %v1286_v47  ;;  %v1294_v60 = vld [vmem:[%s2059_s0 + $0x50] sm:$0xff]  }
   0x5   :  { %v1292_v9 = vld [vmem:[%s2059_s0 + $0x40] sm:$0xff]   ;;  %v1003_v29 = vunpack.c.l.bf16 %v1285_v25  ;;  %v1004_v30 = vunpack.c.h.bf16 %v1285_v25  ;;  %v1293_v33 = vld [vmem:[%s2059_s0 + $0x48] sm:$0xff]   ;;  %v1039_v63 = vunpack.c.l.bf16 %v1294_v60  ;;  %v1040_v0 = vunpack.c.h.bf16 %v1294_v60 }
   0x6   :  { %445 = vmatpush.bf16.msra.mxu0 %v995_v1  ;;  %1350 = vmatpush.bf16.msra.mxu1 %v995_v1  ;;  %v1031_v10 = vunpack.c.l.bf16 %v1292_v9  ;;  %v1032_v11 = vunpack.c.h.bf16 %v1292_v9  ;;  %v152_v12 = vmul.f32 %v1426_v7, %v999_v5  ;;  %v153_v13 = vmul.f32 %v1426_v7, %v1000_v6  ;;  %v1439_v14 = vld [vmem:[%s2058_s3] ss:$0 sm:$0xff] }
   0x7   :  { %1351 = vmatpush.bf16.msra.mxu2 %v995_v1  ;;  %1352 = vmatpush.bf16.msra.mxu3 %v995_v1  ;;  %v989_v28 = vld [vmem:[%s2056_s1] sm:$0xff]  ;;  %v1035_v34 = vunpack.c.l.bf16 %v1293_v33  ;;  %v1036_v35 = vunpack.c.h.bf16 %v1293_v33  ;;  %v154_v36 = vmul.f32 %v1426_v7, %v1003_v29  ;;  %v155_v37 = vmul.f32 %v1426_v7, %v1004_v30 }
   0x8   :  { %v168_v15 = vmul.f32 %v1426_v7, %v1031_v10  ;;  %v169_v16 = vmul.f32 %v1426_v7, %v1032_v11  ;;  %v220_v18 = vadd.f32 %v1439_v14, %v152_v12  ;;  %v221_v19 = vadd.f32 %v1439_v14, %v153_v13  ;;  %v1300_v46 = vld [vmem:[%s2059_s0 + $0x80] sm:$0xff]   ;;  %v1301_v13 = vld [vmem:[%s2059_s0 + $0x88] sm:$0xff]  }
   0x9   :  { %v170_v38 = vmul.f32 %v1426_v7, %v1035_v34  ;;  %v171_v39 = vmul.f32 %v1426_v7, %v1036_v35  ;;  %v222_v40 = vadd.f32 %v1439_v14, %v154_v36  ;;  %v223_v41 = vadd.f32 %v1439_v14, %v155_v37  ;;  %v1308_v47 = vld [vmem:[%s2059_s0 + $0xc0] sm:$0xff]  }
   0xa   :  { %446 = vmatpush.bf16.msra.mxu0 %v994_v2  ;;  %1353 = vmatpush.bf16.msra.mxu1 %v994_v2  ;;  %v236_v20 = vadd.f32 %v1439_v14, %v168_v15  ;;  %v237_v21 = vadd.f32 %v1439_v14, %v169_v16  ;;  %v284_v23 = vmax.f32 %v220_v18, 0.0  ;;  %v285_v24 = vmax.f32 %v221_v19, 0.0  ;;  %v1287_v15 = vld [vmem:[%s2059_s0 + $0x18] sm:$0xff]  }
   0xb   :  { %1354 = vmatpush.bf16.msra.mxu2 %v994_v2  ;;  %1355 = vmatpush.bf16.msra.mxu3 %v994_v2  ;;  %v238_v42 = vadd.f32 %v1439_v14, %v170_v38  ;;  %v239_v43 = vadd.f32 %v1439_v14, %v171_v39  ;;  %v286_v44 = vmax.f32 %v222_v40, 0.0  ;;  %v287_v45 = vmax.f32 %v223_v41, 0.0 }
   0xc   :  { %v300_v26 = vmax.f32 %v236_v20, 0.0  ;;  %v301_v27 = vmax.f32 %v237_v21, 0.0  ;;  %v348_v31 = vpack.c.bf16 %v285_v24, %v284_v23  ;;  %v1063_v50 = vunpack.c.l.bf16 %v1300_v46 }
   0xd   :  { %v302_v48 = vmax.f32 %v238_v42, 0.0  ;;  %v303_v49 = vmax.f32 %v239_v43, 0.0  ;;  %v1064_v51 = vunpack.c.h.bf16 %v1300_v46  ;;  %v349_v56 = vpack.c.bf16 %v287_v45, %v286_v44  ;;  %v1302_v46 = vld [vmem:[%s2059_s0 + $0x90] sm:$0xff]  }
   0xe   :  { %447 = vmatpush.bf16.msra.mxu0 %v993_v3  ;;  %1356 = vmatpush.bf16.msra.mxu1 %v993_v3  ;;  %v356_v32 = vpack.c.bf16 %v301_v27, %v300_v26  ;;  %v184_v52 = vmul.f32 %v1426_v7, %v1063_v50  ;;  %v156_v1 = vmul.f32 %v1426_v7, %v1007_v54  ;;  %v1067_v18 = vunpack.c.l.bf16 %v1301_v13 }
   0xf   :  { %1357 = vmatpush.bf16.msra.mxu2 %v993_v3  ;;  %1358 = vmatpush.bf16.msra.mxu3 %v993_v3  ;;  %v185_v53 = vmul.f32 %v1426_v7, %v1064_v51  ;;  %v357_v57 = vpack.c.bf16 %v303_v49, %v302_v48  ;;  %v157_v2 = vmul.f32 %v1426_v7, %v1008_v55  ;;  %v1068_v19 = vunpack.c.h.bf16 %v1301_v13  ;;  %v1288_v48 = vld [vmem:[%s2059_s0 + $0x20] sm:$0xff]  }
  0x10   :  { %v252_v58 = vadd.f32 %v1439_v14, %v184_v52  ;;  %v172_v4 = vmul.f32 %v1426_v7, %v1039_v63  ;;  %v173_v5 = vmul.f32 %v1426_v7, %v1040_v0  ;;  %v224_v6 = vadd.f32 %v1439_v14, %v156_v1  ;;  %v1296_v1 = vld [vmem:[%s2059_s0 + $0x60] sm:$0xff]  }
  0x11   :  { %v253_v59 = vadd.f32 %v1439_v14, %v185_v53  ;;  %v186_v20 = vmul.f32 %v1426_v7, %v1067_v18  ;;  %v187_v21 = vmul.f32 %v1426_v7, %v1068_v19  ;;  %v1012_v23 = vunpack.c.h.bf16 %v1287_v15 }
  0x12   :  { %448 = vmatpush.bf16.msra.mxu0 %v992_v8  ;;  %1359 = vmatpush.bf16.msra.mxu1 %v992_v8  ;;  %v316_v61 = vmax.f32 %v252_v58, 0.0  ;;  %v240_v9 = vadd.f32 %v1439_v14, %v172_v4  ;;  %v241_v10 = vadd.f32 %v1439_v14, %v173_v5  ;;  %v288_v11 = vmax.f32 %v224_v6, 0.0 }
  0x13   :  { %1360 = vmatpush.bf16.msra.mxu2 %v992_v8  ;;  %1361 = vmatpush.bf16.msra.mxu3 %v992_v8  ;;  %v317_v62 = vmax.f32 %v253_v59, 0.0  ;;  %v225_v8 = vadd.f32 %v1439_v14, %v157_v2  ;;  %v254_v26 = vadd.f32 %v1439_v14, %v186_v20  ;;  %v255_v27 = vadd.f32 %v1439_v14, %v187_v21 }
  0x14   :  { %v304_v16 = vmax.f32 %v240_v9, 0.0  ;;  %v159_v34 = vmul.f32 %v1426_v7, %v1012_v23  ;;  %v1071_v49 = vunpack.c.l.bf16 %v1302_v46  ;;  %v1072_v50 = vunpack.c.h.bf16 %v1302_v46 }
  0x15   :  { %v364_v3 = vpack.c.bf16 %v317_v62, %v316_v61  ;;  %v289_v12 = vmax.f32 %v225_v8, 0.0  ;;  %v318_v29 = vmax.f32 %v254_v26, 0.0  ;;  %v319_v30 = vmax.f32 %v255_v27, 0.0  ;;  %v1289_v26 = vld [vmem:[%s2059_s0 + $0x28] sm:$0xff]  }
  0x16   :  { %449 = vmatpush.bf16.msra.mxu0 %v991_v17  ;;  %1362 = vmatpush.bf16.msra.mxu1 %v991_v17  ;;  %v227_v39 = vadd.f32 %v1439_v14, %v159_v34  ;;  %v1095_v51 = vunpack.c.l.bf16 %v1308_v47  ;;  %v1096_v52 = vunpack.c.h.bf16 %v1308_v47  ;;  %v188_v53 = vmul.f32 %v1426_v7, %v1071_v49 }
  0x17   :  { %1363 = vmatpush.bf16.msra.mxu2 %v991_v17  ;;  %1364 = vmatpush.bf16.msra.mxu3 %v991_v17  ;;  %v305_v17 = vmax.f32 %v241_v10, 0.0  ;;  %v350_v24 = vpack.c.bf16 %v289_v12, %v288_v11  ;;  %v365_v35 = vpack.c.bf16 %v319_v30, %v318_v29  ;;  %v189_v54 = vmul.f32 %v1426_v7, %v1072_v50 }
  0x18   :  { %v291_v43 = vmax.f32 %v227_v39, 0.0  ;;  %v200_v55 = vmul.f32 %v1426_v7, %v1095_v51  ;;  %v1015_v58 = vunpack.c.l.bf16 %v1288_v48  ;;  %v1016_v59 = vunpack.c.h.bf16 %v1288_v48 }
  0x19   :  { %v358_v25 = vpack.c.bf16 %v305_v17, %v304_v16  ;;  %v256_v61 = vadd.f32 %v1439_v14, %v188_v53  ;;  %v257_v62 = vadd.f32 %v1439_v14, %v189_v54  ;;  %v1047_v9 = vunpack.c.l.bf16 %v1296_v1 }
  0x1a   :  { %450 = vmatpush.bf16.msra.mxu0 %v990_v22  ;;  %1365 = vmatpush.bf16.msra.mxu1 %v990_v22  ;;  %v268_v63 = vadd.f32 %v1439_v14, %v200_v55  ;;  %v160_v6 = vmul.f32 %v1426_v7, %v1015_v58  ;;  %v161_v8 = vmul.f32 %v1426_v7, %v1016_v59  ;;  %v1048_v10 = vunpack.c.h.bf16 %v1296_v1  ;;  %v1310_v1 = vld [vmem:[%s2059_s0 + $0xd0] sm:$0xff]  }
  0x1b   :  { %1366 = vmatpush.bf16.msra.mxu2 %v990_v22  ;;  %1367 = vmatpush.bf16.msra.mxu3 %v990_v22  ;;  %v1011_v22 = vunpack.c.l.bf16 %v1287_v15  ;;  %v320_v2 = vmax.f32 %v256_v61, 0.0  ;;  %v176_v13 = vmul.f32 %v1426_v7, %v1047_v9 }
  0x1c   :  { %v332_v4 = vmax.f32 %v268_v63, 0.0  ;;  %v177_v15 = vmul.f32 %v1426_v7, %v1048_v10  ;;  %v228_v16 = vadd.f32 %v1439_v14, %v160_v6  ;;  %v229_v17 = vadd.f32 %v1439_v14, %v161_v8 }
  0x1d   :  { %v158_v33 = vmul.f32 %v1426_v7, %v1011_v22  ;;  %v244_v18 = vadd.f32 %v1439_v14, %v176_v13  ;;  %v1104_v6 = vunpack.c.h.bf16 %v1310_v1 }
  0x1e   :  { %451 = vmatpush.bf16.msra.mxu0 %v989_v28  ;;  %1368 = vmatpush.bf16.msra.mxu1 %v989_v28  ;;  %v245_v19 = vadd.f32 %v1439_v14, %v177_v15  ;;  %v292_v20 = vmax.f32 %v228_v16, 0.0  ;;  %v293_v21 = vmax.f32 %v229_v17, 0.0 }
  0x1f   :  { %1369 = vmatpush.bf16.msra.mxu2 %v989_v28  ;;  %1370 = vmatpush.bf16.msra.mxu3 %v989_v28  ;;  %v1295_v28 = vld [vmem:[%s2059_s0 + $0x58] sm:$0xff]   ;;  %v226_v38 = vadd.f32 %v1439_v14, %v158_v33  ;;  %v308_v22 = vmax.f32 %v244_v18, 0.0 }
  0x20   :  { %v309_v23 = vmax.f32 %v245_v19, 0.0 }
  0x21   :  { %452 = vmatmul.bf16.vlgmr.msra.gmra.mxu0 %v348_v31  ;;  %492 = vmatmul.bf16.vlgmr.msra.gmra.mxu1 %v356_v32  ;;  %v1043_v31 = vunpack.c.l.bf16 %v1295_v28  ;;  %v1044_v32 = vunpack.c.h.bf16 %v1295_v28  ;;  %v290_v42 = vmax.f32 %v226_v38, 0.0 }
  0x22   :  { %532 = vmatmul.bf16.vlgmr.msra.gmra.mxu2 %v364_v3  ;;  %v321_v3 = vmax.f32 %v257_v62, 0.0  ;;  %v360_v38 = vpack.c.bf16 %v309_v23, %v308_v22 }
  0x23   :  { %v174_v36 = vmul.f32 %v1426_v7, %v1043_v31  ;;  %v175_v37 = vmul.f32 %v1426_v7, %v1044_v32 }
  0x24   :  { %v366_v11 = vpack.c.bf16 %v321_v3, %v320_v2  ;;  %v1290_v2 = vld [vmem:[%s2059_s0 + $0x30] sm:$0xff]  }
  0x25   :  { %v242_v40 = vadd.f32 %v1439_v14, %v174_v36  ;;  %v243_v41 = vadd.f32 %v1439_v14, %v175_v37  ;;  %v1019_v36 = vunpack.c.l.bf16 %v1289_v26  ;;  %v1020_v37 = vunpack.c.h.bf16 %v1289_v26 }
  0x26   :  { %v1023_v13 = vunpack.c.l.bf16 %v1290_v2  ;;  %v1024_v15 = vunpack.c.h.bf16 %v1290_v2 }
  0x27   :  { %v306_v44 = vmax.f32 %v242_v40, 0.0  ;;  %v307_v45 = vmax.f32 %v243_v41, 0.0  ;;  %v162_v48 = vmul.f32 %v1426_v7, %v1019_v36  ;;  %v163_v49 = vmul.f32 %v1426_v7, %v1020_v37 }
  0x28   :  { %v164_v26 = vmul.f32 %v1426_v7, %v1023_v13 }
  0x29   :  { %v359_v60 = vpack.c.bf16 %v307_v45, %v306_v44 }
  0x31   :  { %457 = vmatmul.bf16.gmra.mxu0 %v349_v56  ;;  %497 = vmatmul.bf16.gmra.mxu1 %v357_v57  ;;  %v201_v56 = vmul.f32 %v1426_v7, %v1096_v52  ;;  %v351_v57 = vpack.c.bf16 %v291_v43, %v290_v42  ;;  %v1297_v43 = vld [vmem:[%s2059_s0 + $0x68] sm:$0xff]  }
  0x32   :  { %537 = vmatmul.bf16.gmra.mxu2 %v365_v35  ;;  %v352_v35 = vpack.c.bf16 %v293_v21, %v292_v20  ;;  %v1051_v50 = vunpack.c.l.bf16 %v1297_v43  ;;  %v1052_v51 = vunpack.c.h.bf16 %v1297_v43  ;;  %v1298_v21 = vld [vmem:[%s2059_s0 + $0x70] sm:$0xff]   ;;  %v1311_v43 = vld [vmem:[%s2059_s0 + $0xd8] sm:$0xff]  }
  0x33   :  { %v269_v0 = vadd.f32 %v1439_v14, %v201_v56  ;;  %v230_v56 = vadd.f32 %v1439_v14, %v162_v48  ;;  %v1108_v48 = vunpack.c.h.bf16 %v1311_v43 }
  0x34   :  { %v178_v54 = vmul.f32 %v1426_v7, %v1051_v50  ;;  %v179_v55 = vmul.f32 %v1426_v7, %v1052_v51 }
  0x35   :  { %v333_v5 = vmax.f32 %v269_v0, 0.0  ;;  %v1304_v0 = vld [vmem:[%s2059_s0 + $0xa0] sm:$0xff]  }
  0x36   :  { %v246_v58 = vadd.f32 %v1439_v14, %v178_v54  ;;  %v247_v59 = vadd.f32 %v1439_v14, %v179_v55  ;;  %v1079_v3 = vunpack.c.l.bf16 %v1304_v0 }
  0x37   :  { %v372_v12 = vpack.c.bf16 %v333_v5, %v332_v4  ;;  %v1080_v4 = vunpack.c.h.bf16 %v1304_v0  ;;  %v1103_v5 = vunpack.c.l.bf16 %v1310_v1 }
  0x38   :  { %v310_v62 = vmax.f32 %v246_v58, 0.0  ;;  %v311_v63 = vmax.f32 %v247_v59, 0.0  ;;  %v192_v8 = vmul.f32 %v1426_v7, %v1079_v3 }
  0x39   :  { %572 = vmatmul.bf16.vlgmr.msra.gmra.mxu3 %v372_v12  ;;  %v193_v9 = vmul.f32 %v1426_v7, %v1080_v4  ;;  %v204_v10 = vmul.f32 %v1426_v7, %v1103_v5 }
  0x3a   :  { %v361_v16 = vpack.c.bf16 %v311_v63, %v310_v62  ;;  %v260_v17 = vadd.f32 %v1439_v14, %v192_v8 }
  0x3b   :  { %v261_v18 = vadd.f32 %v1439_v14, %v193_v9  ;;  %v272_v19 = vadd.f32 %v1439_v14, %v204_v10 }
  0x3c   :  { %v324_v22 = vmax.f32 %v260_v17, 0.0 }
  0x3d   :  { %v325_v23 = vmax.f32 %v261_v18, 0.0 }
  0x41   :  { %462 = vmatmul.bf16.gmra.mxu0 %v350_v24  ;;  %502 = vmatmul.bf16.gmra.mxu1 %v358_v25  ;;  %v1303_v24 = vld [vmem:[%s2059_s0 + $0x98] sm:$0xff]   ;;  %v1309_v25 = vld [vmem:[%s2059_s0 + $0xc8] sm:$0xff]  }
  0x42   :  { %542 = vmatmul.bf16.gmra.mxu2 %v366_v11  ;;  %v1075_v27 = vunpack.c.l.bf16 %v1303_v24  ;;  %v1076_v28 = vunpack.c.h.bf16 %v1303_v24  ;;  %v1099_v29 = vunpack.c.l.bf16 %v1309_v25  ;;  %v1100_v30 = vunpack.c.h.bf16 %v1309_v25 }
  0x43   :  { %v205_v11 = vmul.f32 %v1426_v7, %v1104_v6  ;;  %v336_v24 = vmax.f32 %v272_v19, 0.0 }
  0x44   :  { %v190_v31 = vmul.f32 %v1426_v7, %v1075_v27  ;;  %v191_v32 = vmul.f32 %v1426_v7, %v1076_v28  ;;  %v202_v33 = vmul.f32 %v1426_v7, %v1099_v29  ;;  %v203_v34 = vmul.f32 %v1426_v7, %v1100_v30 }
  0x45   :  { %v273_v20 = vadd.f32 %v1439_v14, %v205_v11  ;;  %v165_v27 = vmul.f32 %v1426_v7, %v1024_v15  ;;  %v1055_v28 = vunpack.c.l.bf16 %v1298_v21  ;;  %v1056_v29 = vunpack.c.h.bf16 %v1298_v21  ;;  %v1312_v21 = vld [vmem:[%s2059_s0 + $0xe0] sm:$0xff]  }
  0x46   :  { %v258_v39 = vadd.f32 %v1439_v14, %v190_v31  ;;  %v259_v40 = vadd.f32 %v1439_v14, %v191_v32  ;;  %v270_v41 = vadd.f32 %v1439_v14, %v202_v33  ;;  %v271_v42 = vadd.f32 %v1439_v14, %v203_v34 }
  0x47   :  { %v337_v25 = vmax.f32 %v273_v20, 0.0  ;;  %v368_v30 = vpack.c.bf16 %v325_v23, %v324_v22  ;;  %v180_v32 = vmul.f32 %v1426_v7, %v1055_v28  ;;  %v181_v33 = vmul.f32 %v1426_v7, %v1056_v29  ;;  %v1306_v20 = vld [vmem:[%s2059_s0 + $0xb0] sm:$0xff]  }
  0x48   :  { %v322_v44 = vmax.f32 %v258_v39, 0.0  ;;  %v323_v45 = vmax.f32 %v259_v40, 0.0  ;;  %v334_v46 = vmax.f32 %v270_v41, 0.0  ;;  %v335_v47 = vmax.f32 %v271_v42, 0.0  ;;  %v1305_v42 = vld [vmem:[%s2059_s0 + $0xa8] sm:$0xff]  }
  0x49   :  { %v374_v31 = vpack.c.bf16 %v337_v25, %v336_v24  ;;  %v232_v34 = vadd.f32 %v1439_v14, %v164_v26  ;;  %v248_v36 = vadd.f32 %v1439_v14, %v180_v32  ;;  %v249_v37 = vadd.f32 %v1439_v14, %v181_v33 }
  0x4a   :  { %v367_v52 = vpack.c.bf16 %v323_v45, %v322_v44  ;;  %v373_v53 = vpack.c.bf16 %v335_v47, %v334_v46  ;;  %v1291_v44 = vld [vmem:[%s2059_s0 + $0x38] sm:$0xff]   ;;  %v1083_v45 = vunpack.c.l.bf16 %v1305_v42  ;;  %v1084_v46 = vunpack.c.h.bf16 %v1305_v42 }
  0x4b   :  { %v312_v40 = vmax.f32 %v248_v36, 0.0  ;;  %v313_v41 = vmax.f32 %v249_v37, 0.0  ;;  %v1107_v47 = vunpack.c.l.bf16 %v1311_v43  ;;  %v1027_v54 = vunpack.c.l.bf16 %v1291_v44  ;;  %v1307_v42 = vld [vmem:[%s2059_s0 + $0xb8] sm:$0xff]   ;;  %v1313_v43 = vld [vmem:[%s2059_s0 + $0xe8] sm:$0xff]  }
  0x4c   :  { %577 = vmatmul.bf16.gmra.mxu3 %v373_v53  ;;  %v195_v50 = vmul.f32 %v1426_v7, %v1084_v46  ;;  %v1028_v55 = vunpack.c.h.bf16 %v1291_v44  ;;  %v1087_v22 = vunpack.c.l.bf16 %v1306_v20  ;;  %v1088_v23 = vunpack.c.h.bf16 %v1306_v20 }
  0x4d   :  { %v206_v51 = vmul.f32 %v1426_v7, %v1107_v47  ;;  %v166_v2 = vmul.f32 %v1426_v7, %v1027_v54  ;;  %v1111_v24 = vunpack.c.l.bf16 %v1312_v21  ;;  %v1112_v25 = vunpack.c.h.bf16 %v1312_v21 }
  0x4e   :  { %v263_v58 = vadd.f32 %v1439_v14, %v195_v50  ;;  %v167_v3 = vmul.f32 %v1426_v7, %v1028_v55  ;;  %v196_v26 = vmul.f32 %v1426_v7, %v1087_v22  ;;  %v1091_v44 = vunpack.c.l.bf16 %v1307_v42 }
  0x4f   :  { %v274_v59 = vadd.f32 %v1439_v14, %v206_v51  ;;  %v234_v11 = vadd.f32 %v1439_v14, %v166_v2  ;;  %v208_v28 = vmul.f32 %v1426_v7, %v1111_v24  ;;  %v209_v29 = vmul.f32 %v1426_v7, %v1112_v25 }
  0x50   :  { %v327_v63 = vmax.f32 %v263_v58, 0.0  ;;  %v264_v32 = vadd.f32 %v1439_v14, %v196_v26  ;;  %v1115_v46 = vunpack.c.l.bf16 %v1313_v43  ;;  %v1116_v47 = vunpack.c.h.bf16 %v1313_v43 }
  0x51   :  { %467 = vmatmul.bf16.gmra.mxu0 %v351_v57  ;;  %507 = vmatmul.bf16.gmra.mxu1 %v359_v60  ;;  %v231_v57 = vadd.f32 %v1439_v14, %v163_v49  ;;  %v294_v60 = vmax.f32 %v230_v56, 0.0  ;;  %v194_v49 = vmul.f32 %v1426_v7, %v1083_v45  ;;  %v362_v56 = vpack.c.bf16 %v313_v41, %v312_v40 }
  0x52   :  { %547 = vmatmul.bf16.gmra.mxu2 %v367_v52  ;;  %v207_v52 = vmul.f32 %v1426_v7, %v1108_v48  ;;  %v338_v0 = vmax.f32 %v274_v59, 0.0  ;;  %v328_v36 = vmax.f32 %v264_v32, 0.0  ;;  %v1092_v45 = vunpack.c.h.bf16 %v1307_v42  ;;  %v1315_v32 = vld [vmem:[%s2059_s0 + $0xf8] sm:$0xff]  }
  0x53   :  { %v295_v61 = vmax.f32 %v231_v57, 0.0  ;;  %v262_v57 = vadd.f32 %v1439_v14, %v194_v49  ;;  %v198_v48 = vmul.f32 %v1426_v7, %v1091_v44  ;;  %v210_v50 = vmul.f32 %v1426_v7, %v1115_v46 }
  0x54   :  { %v199_v49 = vmul.f32 %v1426_v7, %v1092_v45  ;;  %v211_v51 = vmul.f32 %v1426_v7, %v1116_v47 }
  0x55   :  { %v353_v12 = vpack.c.bf16 %v295_v61, %v294_v60  ;;  %v275_v60 = vadd.f32 %v1439_v14, %v207_v52  ;;  %v1299_v61 = vld [vmem:[%s2059_s0 + $0x78] sm:$0xff]   ;;  %v326_v62 = vmax.f32 %v262_v57, 0.0  ;;  %v266_v52 = vadd.f32 %v1439_v14, %v198_v48 }
  0x56   :  { %v1059_v4 = vunpack.c.l.bf16 %v1299_v61  ;;  %v1060_v5 = vunpack.c.h.bf16 %v1299_v61  ;;  %v278_v54 = vadd.f32 %v1439_v14, %v210_v50  ;;  %v279_v55 = vadd.f32 %v1439_v14, %v211_v51 }
  0x57   :  { %v339_v1 = vmax.f32 %v275_v60, 0.0  ;;  %v369_v6 = vpack.c.bf16 %v327_v63, %v326_v62  ;;  %v330_v58 = vmax.f32 %v266_v52, 0.0 }
  0x58   :  { %v182_v9 = vmul.f32 %v1426_v7, %v1059_v4  ;;  %v183_v10 = vmul.f32 %v1426_v7, %v1060_v5  ;;  %v342_v60 = vmax.f32 %v278_v54, 0.0  ;;  %v343_v61 = vmax.f32 %v279_v55, 0.0 }
  0x59   :  { %v375_v8 = vpack.c.bf16 %v339_v1, %v338_v0 }
  0x5a   :  { %v250_v13 = vadd.f32 %v1439_v14, %v182_v9  ;;  %v251_v15 = vadd.f32 %v1439_v14, %v183_v10  ;;  %v377_v63 = vpack.c.bf16 %v343_v61, %v342_v60 }
  0x5c   :  { %582 = vmatmul.bf16.gmra.mxu3 %v374_v31  ;;  %v314_v18 = vmax.f32 %v250_v13, 0.0  ;;  %v315_v19 = vmax.f32 %v251_v15, 0.0 }
  0x5e   :  { %v363_v31 = vpack.c.bf16 %v315_v19, %v314_v18 }
  0x61   :  { %472 = vmatmul.bf16.gmra.mxu0 %v352_v35  ;;  %512 = vmatmul.bf16.gmra.mxu1 %v360_v38  ;;  %v233_v35 = vadd.f32 %v1439_v14, %v165_v27  ;;  %v296_v38 = vmax.f32 %v232_v34, 0.0  ;;  %v197_v27 = vmul.f32 %v1426_v7, %v1088_v23  ;;  %v276_v34 = vadd.f32 %v1439_v14, %v208_v28 }
  0x62   :  { %552 = vmatmul.bf16.gmra.mxu2 %v368_v30 }
  0x63   :  { %v297_v39 = vmax.f32 %v233_v35, 0.0  ;;  %v265_v33 = vadd.f32 %v1439_v14, %v197_v27  ;;  %v277_v35 = vadd.f32 %v1439_v14, %v209_v29 }
  0x65   :  { %v354_v53 = vpack.c.bf16 %v297_v39, %v296_v38  ;;  %v329_v37 = vmax.f32 %v265_v33, 0.0  ;;  %v340_v38 = vmax.f32 %v276_v34, 0.0  ;;  %v341_v39 = vmax.f32 %v277_v35, 0.0 }
  0x66   :  { %v1123_v34 = vunpack.c.l.bf16 %v1315_v32  ;;  %v1124_v35 = vunpack.c.h.bf16 %v1315_v32 }
  0x67   :  { %v370_v40 = vpack.c.bf16 %v329_v37, %v328_v36  ;;  %v376_v41 = vpack.c.bf16 %v341_v39, %v340_v38 }
  0x68   :  { %v214_v36 = vmul.f32 %v1426_v7, %v1123_v34  ;;  %v215_v37 = vmul.f32 %v1426_v7, %v1124_v35 }
  0x6a   :  { %v282_v38 = vadd.f32 %v1439_v14, %v214_v36  ;;  %v283_v39 = vadd.f32 %v1439_v14, %v215_v37 }
  0x6c   :  { %587 = vmatmul.bf16.gmra.mxu3 %v375_v8  ;;  %v1314_v8 = vld [vmem:[%s2059_s0 + $0xf0] sm:$0xff]   ;;  %v346_v45 = vmax.f32 %v282_v38, 0.0  ;;  %v347_v47 = vmax.f32 %v283_v39, 0.0 }
  0x6d   :  { %v1119_v10 = vunpack.c.l.bf16 %v1314_v8 }
  0x71   :  { %477 = vmatmul.bf16.gmra.mxu0 %v353_v12  ;;  %517 = vmatmul.bf16.gmra.mxu1 %v361_v16  ;;  %v235_v12 = vadd.f32 %v1439_v14, %v167_v3  ;;  %v298_v16 = vmax.f32 %v234_v11, 0.0  ;;  %v1120_v11 = vunpack.c.h.bf16 %v1314_v8 }
  0x72   :  { %557 = vmatmul.bf16.gmra.mxu2 %v369_v6 }
  0x73   :  { %v299_v17 = vmax.f32 %v235_v12, 0.0  ;;  %v212_v12 = vmul.f32 %v1426_v7, %v1119_v10  ;;  %v213_v13 = vmul.f32 %v1426_v7, %v1120_v11  ;;  %v379_v7 = vpack.c.bf16 %v347_v47, %v346_v45 }
  0x75   :  { %v355_v30 = vpack.c.bf16 %v299_v17, %v298_v16  ;;  %v280_v15 = vadd.f32 %v1439_v14, %v212_v12  ;;  %v281_v16 = vadd.f32 %v1439_v14, %v213_v13 }
  0x77   :  { %v344_v21 = vmax.f32 %v280_v15, 0.0  ;;  %v345_v22 = vmax.f32 %v281_v16, 0.0 }
  0x79   :  { %v378_v24 = vpack.c.bf16 %v345_v22, %v344_v21 }
  0x7c   :  { %592 = vmatmul.bf16.gmra.mxu3 %v376_v41 }
  0x81   :  { %482 = vmatmul.bf16.gmra.mxu0 %v354_v53  ;;  %522 = vmatmul.bf16.gmra.mxu1 %v362_v56  ;;  %v267_v53 = vadd.f32 %v1439_v14, %v199_v49 }
  0x82   :  { %562 = vmatmul.bf16.gmra.mxu2 %v370_v40 }
  0x83   :  { %v331_v59 = vmax.f32 %v267_v53, 0.0 }
  0x85   :  { %v371_v62 = vpack.c.bf16 %v331_v59, %v330_v58 }
  0x8c   :  { %597 = vmatmul.bf16.gmra.mxu3 %v377_v63 }
  0x91   :  { %487 = vmatmul.bf16.gmra.mxu0 %v355_v30  ;;  %527 = vmatmul.bf16.gmra.mxu1 %v363_v31 }
  0x92   :  { %567 = vmatmul.bf16.gmra.mxu2 %v371_v62 }
  0x9c   :  { %602 = vmatmul.bf16.gmra.mxu3 %v378_v24 }
  0x9e   :  { %v453_v56 = vpop.f32.mrf.mxu0  ;;  %v1652_v57 = vpop.f32.mrf.mxu1 }
  0x9f   :  { %v810_v0 = vmul.f32 %v453_v56, %v453_v56 }
  0xa5   :  { %v1677_v31 = vpop.f32.mrf.mxu2 }
  0xa6   :  { %v455_v1 = vpop.f32.mrf.mxu0  ;;  %v1654_v2 = vpop.f32.mrf.mxu1 }
  0xa7   :  { %v1128_v3 = vpack.c.bf16 %v455_v1, %v453_v56  ;;  %v741_v4 = vadd.f32 %v455_v1, %v453_v56  ;;  %v811_v5 = vmul.f32 %v455_v1, %v455_v1  ;;  %v1168_v6 = vpack.c.bf16 %v1654_v2, %v1652_v57 }
  0xa9   :  { %1129 = vst [vmem:[%s2060_s4] sm:$0xff] %v1128_v3   ;;  %v874_v9 = vadd.f32 %v811_v5, %v810_v0 }
  0xaa   :  { %1323 = vst [vmem:[%s2060_s4 + $0x40] sm:$0xff] %v1168_v6  }
  0xac   :  { %607 = vmatmul.bf16.gmra.mxu3 %v379_v7 }
  0xad   :  { %v1696_v44 = vpop.f32.mrf.mxu2 }
  0xae   :  { %v458_v17 = vpop.f32.mrf.mxu0  ;;  %v1671_v18 = vpop.f32.mrf.mxu1  ;;  %v1208_v46 = vpack.c.bf16 %v1696_v44, %v1677_v31 }
  0xaf   :  { %v742_v19 = vadd.f32 %v741_v4, %v458_v17  ;;  %v812_v20 = vmul.f32 %v458_v17, %v458_v17 }
  0xb0   :  { %1331 = vst [vmem:[%s2060_s4 + $0x80] sm:$0xff] %v1208_v46  }
  0xb1   :  { %v875_v23 = vadd.f32 %v874_v9, %v812_v20 }
  0xb5   :  { %v1709_v52 = vpop.f32.mrf.mxu2 }
  0xb6   :  { %v460_v25 = vpop.f32.mrf.mxu0  ;;  %v1673_v26 = vpop.f32.mrf.mxu1 }
  0xb7   :  { %v1133_v27 = vpack.c.bf16 %v460_v25, %v458_v17  ;;  %v743_v28 = vadd.f32 %v742_v19, %v460_v25  ;;  %v813_v29 = vmul.f32 %v460_v25, %v460_v25  ;;  %v1173_v30 = vpack.c.bf16 %v1673_v26, %v1671_v18 }
  0xb9   :  { %1316 = vst [vmem:[%s2060_s4 + $0x8] sm:$0xff] %v1133_v27   ;;  %v876_v33 = vadd.f32 %v875_v23, %v813_v29 }
  0xba   :  { %1324 = vst [vmem:[%s2060_s4 + $0x48] sm:$0xff] %v1173_v30  }
  0xbc   :  { %v1732_v63 = vpop.f32.mrf.mxu3 }
  0xbd   :  { %v1719_v55 = vpop.f32.mrf.mxu2 }
  0xbe   :  { %v463_v40 = vpop.f32.mrf.mxu0  ;;  %v1692_v41 = vpop.f32.mrf.mxu1  ;;  %v1213_v56 = vpack.c.bf16 %v1719_v55, %v1709_v52 }
  0xbf   :  { %v1694_v42 = vadd.f32 %v743_v28, %v463_v40  ;;  %v814_v43 = vmul.f32 %v463_v40, %v463_v40 }
  0xc0   :  { %1332 = vst [vmem:[%s2060_s4 + $0x88] sm:$0xff] %v1213_v56  }
  0xc1   :  { %v1700_v48 = vadd.f32 %v876_v33, %v814_v43 }
  0xc4   :  { %v1744_v4 = vpop.f32.mrf.mxu3 }
  0xc5   :  { %v1730_v62 = vpop.f32.mrf.mxu2  ;;  %v1248_v6 = vpack.c.bf16 %v1744_v4, %v1732_v63 }
  0xc6   :  { %v465_v14 = vpop.f32.mrf.mxu0  ;;  %v1705_v49 = vpop.f32.mrf.mxu1 }
  0xc7   :  { %v1138_v50 = vpack.c.bf16 %v465_v14, %v463_v40  ;;  %v1178_v51 = vpack.c.bf16 %v1705_v49, %v1692_v41  ;;  %1339 = vst [vmem:[%s2060_s4 + $0xc0] sm:$0xff] %v1248_v6   ;;  %v815_v34 = vmul.f32 %v465_v14, %v465_v14  ;;  %v745_v38 = vadd.f32 %v1694_v42, %v465_v14 }
  0xc9   :  { %1317 = vst [vmem:[%s2060_s4 + $0x10] sm:$0xff] %v1138_v50   ;;  %v878_v39 = vadd.f32 %v1700_v48, %v815_v34 }
  0xca   :  { %1325 = vst [vmem:[%s2060_s4 + $0x50] sm:$0xff] %v1178_v51  }
  0xcd   :  { %v1742_v3 = vpop.f32.mrf.mxu2 }
  0xce   :  { %v468_v53 = vpop.f32.mrf.mxu0  ;;  %v1717_v54 = vpop.f32.mrf.mxu1  ;;  %v1218_v5 = vpack.c.bf16 %v1742_v3, %v1730_v62 }
  0xcf   :  { %v1762_v13 = vpop.f32.mrf.mxu3  ;;  %v816_v37 = vmul.f32 %v468_v53, %v468_v53  ;;  %v746_v43 = vadd.f32 %v745_v38, %v468_v53 }
  0xd0   :  { %1333 = vst [vmem:[%s2060_s4 + $0x90] sm:$0xff] %v1218_v5  }
  0xd1   :  { %v879_v45 = vadd.f32 %v878_v39, %v816_v37 }
  0xd5   :  { %v1760_v12 = vpop.f32.mrf.mxu2 }
  0xd6   :  { %v470_v58 = vpop.f32.mrf.mxu0  ;;  %v1726_v59 = vpop.f32.mrf.mxu1 }
  0xd7   :  { %v1143_v60 = vpack.c.bf16 %v470_v58, %v468_v53  ;;  %v1183_v61 = vpack.c.bf16 %v1726_v59, %v1717_v54  ;;  %v1774_v19 = vpop.f32.mrf.mxu3  ;;  %v817_v40 = vmul.f32 %v470_v58, %v470_v58  ;;  %v747_v50 = vadd.f32 %v746_v43, %v470_v58 }
  0xd8   :  { %v1253_v21 = vpack.c.bf16 %v1774_v19, %v1762_v13 }
  0xd9   :  { %1318 = vst [vmem:[%s2060_s4 + $0x18] sm:$0xff] %v1143_v60   ;;  %v880_v14 = vadd.f32 %v879_v45, %v817_v40 }
  0xda   :  { %1326 = vst [vmem:[%s2060_s4 + $0x58] sm:$0xff] %v1183_v61  }
  0xdb   :  { %1340 = vst [vmem:[%s2060_s4 + $0xc8] sm:$0xff] %v1253_v21  }
  0xdd   :  { %v1772_v17 = vpop.f32.mrf.mxu2 }
  0xde   :  { %v473_v0 = vpop.f32.mrf.mxu0  ;;  %v1740_v1 = vpop.f32.mrf.mxu1  ;;  %v1223_v20 = vpack.c.bf16 %v1772_v17, %v1760_v12 }
  0xdf   :  { %v1792_v28 = vpop.f32.mrf.mxu3  ;;  %v818_v46 = vmul.f32 %v473_v0, %v473_v0  ;;  %v748_v5 = vadd.f32 %v747_v50, %v473_v0 }
  0xe0   :  { %1334 = vst [vmem:[%s2060_s4 + $0x98] sm:$0xff] %v1223_v20  }
  0xe1   :  { %v881_v48 = vadd.f32 %v880_v14, %v818_v46 }
  0xe5   :  { %v1790_v27 = vpop.f32.mrf.mxu2 }
  0xe6   :  { %v475_v8 = vpop.f32.mrf.mxu0  ;;  %v1756_v9 = vpop.f32.mrf.mxu1 }
  0xe7   :  { %v1148_v10 = vpack.c.bf16 %v475_v8, %v473_v0  ;;  %v1188_v11 = vpack.c.bf16 %v1756_v9, %v1740_v1  ;;  %v1804_v33 = vpop.f32.mrf.mxu3  ;;  %v819_v61 = vmul.f32 %v475_v8, %v475_v8  ;;  %v749_v58 = vadd.f32 %v748_v5, %v475_v8 }
  0xe8   :  { %v1258_v36 = vpack.c.bf16 %v1804_v33, %v1792_v28 }
  0xe9   :  { %1319 = vst [vmem:[%s2060_s4 + $0x20] sm:$0xff] %v1148_v10   ;;  %v882_v6 = vadd.f32 %v881_v48, %v819_v61 }
  0xea   :  { %1327 = vst [vmem:[%s2060_s4 + $0x60] sm:$0xff] %v1188_v11  }
  0xeb   :  { %1341 = vst [vmem:[%s2060_s4 + $0xd0] sm:$0xff] %v1258_v36  }
  0xed   :  { %v1802_v32 = vpop.f32.mrf.mxu2 }
  0xee   :  { %v478_v15 = vpop.f32.mrf.mxu0  ;;  %v1770_v16 = vpop.f32.mrf.mxu1  ;;  %v1228_v35 = vpack.c.bf16 %v1802_v32, %v1790_v27 }
  0xef   :  { %v1824_v42 = vpop.f32.mrf.mxu3  ;;  %v820_v53 = vmul.f32 %v478_v15, %v478_v15  ;;  %v750_v11 = vadd.f32 %v749_v58, %v478_v15 }
  0xf0   :  { %1335 = vst [vmem:[%s2060_s4 + $0xa0] sm:$0xff] %v1228_v35  }
  0xf1   :  { %v883_v20 = vadd.f32 %v882_v6, %v820_v53  ;;  %v827_v6 = vmul.f32 %v1654_v2, %v1654_v2 }
  0xf5   :  { %v1822_v60 = vpop.f32.mrf.mxu2 }
  0xf6   :  { %v480_v22 = vpop.f32.mrf.mxu0  ;;  %v1786_v23 = vpop.f32.mrf.mxu1 }
  0xf7   :  { %v1153_v24 = vpack.c.bf16 %v480_v22, %v478_v15  ;;  %v1193_v25 = vpack.c.bf16 %v1786_v23, %v1770_v16  ;;  %v821_v10 = vmul.f32 %v480_v22, %v480_v22  ;;  %v751_v0 = vadd.f32 %v750_v11, %v480_v22  ;;  %v1836_v35 = vpop.f32.mrf.mxu3 }
  0xf8   :  { %v1263_v8 = vpack.c.bf16 %v1836_v35, %v1824_v42 }
  0xf9   :  { %1320 = vst [vmem:[%s2060_s4 + $0x28] sm:$0xff] %v1153_v24   ;;  %v884_v36 = vadd.f32 %v883_v20, %v821_v10  ;;  %v828_v20 = vmul.f32 %v1671_v18, %v1671_v18 }
  0xfa   :  { %1328 = vst [vmem:[%s2060_s4 + $0x68] sm:$0xff] %v1193_v25  }
  0xfb   :  { %1342 = vst [vmem:[%s2060_s4 + $0xd8] sm:$0xff] %v1263_v8  }
  0xfd   :  { %v1834_v34 = vpop.f32.mrf.mxu2 }
  0xfe   :  { %v483_v29 = vpop.f32.mrf.mxu0  ;;  %v1800_v30 = vpop.f32.mrf.mxu1  ;;  %v1233_v38 = vpack.c.bf16 %v1834_v34, %v1822_v60 }
  0xff   :  { %v822_v21 = vmul.f32 %v483_v29, %v483_v29  ;;  %v752_v39 = vadd.f32 %v751_v0, %v483_v29  ;;  %v1854_v48 = vpop.f32.mrf.mxu3 }
 0x100   :  { %1336 = vst [vmem:[%s2060_s4 + $0xa8] sm:$0xff] %v1233_v38  }
 0x101   :  { %v885_v15 = vadd.f32 %v884_v36, %v822_v21 }
 0x105   :  { %v1852_v5 = vpop.f32.mrf.mxu2 }
 0x106   :  { %v485_v47 = vpop.f32.mrf.mxu0  ;;  %v1818_v7 = vpop.f32.mrf.mxu1 }
 0x107   :  { %v1158_v51 = vpack.c.bf16 %v485_v47, %v483_v29  ;;  %v1198_v56 = vpack.c.bf16 %v1818_v7, %v1800_v30  ;;  %v823_v37 = vmul.f32 %v485_v47, %v485_v47  ;;  %v753_v22 = vadd.f32 %v752_v39, %v485_v47  ;;  %v1876_v38 = vpop.f32.mrf.mxu3 }
 0x108   :  { %v826_v47 = vmul.f32 %v1652_v57, %v1652_v57  ;;  %v1268_v8 = vpack.c.bf16 %v1876_v38, %v1854_v48 }
 0x109   :  { %1321 = vst [vmem:[%s2060_s4 + $0x30] sm:$0xff] %v1158_v51   ;;  %v886_v43 = vadd.f32 %v885_v15, %v823_v37 }
 0x10a   :  { %1329 = vst [vmem:[%s2060_s4 + $0x70] sm:$0xff] %v1198_v56  }
 0x10b   :  { %1343 = vst [vmem:[%s2060_s4 + $0xe0] sm:$0xff] %v1268_v8   ;;  %v839_v8 = vmul.f32 %v1818_v7, %v1818_v7 }
 0x10d   :  { %v1874_v37 = vpop.f32.mrf.mxu2 }
 0x10e   :  { %v488_v24 = vpop.f32.mrf.mxu0  ;;  %v1832_v25 = vpop.f32.mrf.mxu1 }
 0x10f   :  { %v824_v40 = vmul.f32 %v488_v24, %v488_v24  ;;  %v754_v45 = vadd.f32 %v753_v22, %v488_v24 }
 0x111   :  { %v887_v46 = vadd.f32 %v886_v43, %v824_v40  ;;  %v832_v43 = vmul.f32 %v1717_v54, %v1717_v54 }
 0x116   :  { %v490_v50 = vpop.f32.mrf.mxu0  ;;  %v1848_v51 = vpop.f32.mrf.mxu1 }
 0x117   :  { %v1163_v56 = vpack.c.bf16 %v490_v50, %v488_v24  ;;  %v755_v14 = vadd.f32 %v754_v45, %v490_v50  ;;  %v825_v29 = vmul.f32 %v490_v50, %v490_v50  ;;  %v1203_v61 = vpack.c.bf16 %v1848_v51, %v1832_v25 }
 0x119   :  { %1322 = vst [vmem:[%s2060_s4 + $0x38] sm:$0xff] %v1163_v56   ;;  %v756_v53 = vadd.f32 %v755_v14, %v1652_v57  ;;  %v888_v58 = vadd.f32 %v887_v46, %v825_v29  ;;  %v829_v57 = vmul.f32 %v1673_v26, %v1673_v26  ;;  %v833_v46 = vmul.f32 %v1726_v59, %v1726_v59  ;;  %v1900_v14 = vpop.f32.mrf.mxu2 }
 0x11a   :  { %1330 = vst [vmem:[%s2060_s4 + $0x78] sm:$0xff] %v1203_v61   ;;  %v834_v29 = vmul.f32 %v1740_v1, %v1740_v1 }
 0x11b   :  { %v757_v10 = vadd.f32 %v756_v53, %v1654_v2  ;;  %v889_v11 = vadd.f32 %v888_v58, %v826_v47  ;;  %v1238_v2 = vpack.c.bf16 %v1874_v37, %v1852_v5  ;;  %v835_v53 = vmul.f32 %v1756_v9, %v1756_v9 }
 0x11d   :  { %v758_v21 = vadd.f32 %v757_v10, %v1671_v18  ;;  %v890_v24 = vadd.f32 %v889_v11, %v827_v6  ;;  %v830_v18 = vmul.f32 %v1692_v41, %v1692_v41  ;;  %1337 = vst [vmem:[%s2060_s4 + $0xb0] sm:$0xff] %v1238_v2   ;;  %v837_v11 = vmul.f32 %v1786_v23, %v1786_v23 }
 0x11f   :  { %v759_v0 = vadd.f32 %v758_v21, %v1673_v26  ;;  %v891_v36 = vadd.f32 %v890_v24, %v828_v20  ;;  %v831_v26 = vmul.f32 %v1705_v49, %v1705_v49 }
 0x121   :  { %v760_v39 = vadd.f32 %v759_v0, %v1692_v41  ;;  %v892_v15 = vadd.f32 %v891_v36, %v829_v57 }
 0x123   :  { %v761_v40 = vadd.f32 %v760_v39, %v1705_v49  ;;  %v893_v22 = vadd.f32 %v892_v15, %v830_v18  ;;  %v1902_v49 = vpop.f32.mrf.mxu3 }
 0x125   :  { %v894_v45 = vadd.f32 %v893_v22, %v831_v26  ;;  %v762_v41 = vadd.f32 %v761_v40, %v1717_v54  ;;  %v841_v40 = vmul.f32 %v1848_v51, %v1848_v51 }
 0x127   :  { %v763_v50 = vadd.f32 %v762_v41, %v1726_v59  ;;  %v895_v56 = vadd.f32 %v894_v45, %v832_v43  ;;  %v836_v59 = vmul.f32 %v1770_v16, %v1770_v16  ;;  %v843_v41 = vmul.f32 %v1696_v44, %v1696_v44 }
 0x129   :  { %v764_v61 = vadd.f32 %v763_v50, %v1740_v1  ;;  %v896_v47 = vadd.f32 %v895_v56, %v833_v46  ;;  %v1916_v1 = vpop.f32.mrf.mxu2  ;;  %v844_v50 = vmul.f32 %v1709_v52, %v1709_v52 }
 0x12b   :  { %v765_v54 = vadd.f32 %v764_v61, %v1756_v9  ;;  %v897_v58 = vadd.f32 %v896_v47, %v834_v29  ;;  %v1918_v24 = vpop.f32.mrf.mxu3  ;;  %v1243_v9 = vpack.c.bf16 %v1916_v1, %v1900_v14  ;;  %v845_v29 = vmul.f32 %v1719_v55, %v1719_v55 }
 0x12c   :  { %v1273_v57 = vpack.c.bf16 %v1918_v24, %v1902_v49 }
 0x12d   :  { %v766_v6 = vadd.f32 %v765_v54, %v1770_v16  ;;  %v898_v10 = vadd.f32 %v897_v58, %v835_v53  ;;  %v838_v16 = vmul.f32 %v1800_v30, %v1800_v30  ;;  %1338 = vst [vmem:[%s2060_s4 + $0xb8] sm:$0xff] %v1243_v9  }
 0x12e   :  { %1344 = vst [vmem:[%s2060_s4 + $0xe8] sm:$0xff] %v1273_v57   ;;  %v850_v57 = vmul.f32 %v1790_v27, %v1790_v27 }
 0x12f   :  { %v767_v20 = vadd.f32 %v766_v6, %v1786_v23  ;;  %v899_v21 = vadd.f32 %v898_v10, %v836_v59  ;;  %v848_v6 = vmul.f32 %v1760_v12, %v1760_v12 }
 0x131   :  { %v768_v0 = vadd.f32 %v767_v20, %v1800_v30  ;;  %v900_v36 = vadd.f32 %v899_v21, %v837_v11  ;;  %v840_v30 = vmul.f32 %v1832_v25, %v1832_v25 }
 0x133   :  { %v901_v23 = vadd.f32 %v900_v36, %v838_v16  ;;  %v769_v2 = vadd.f32 %v768_v0, %v1818_v7  ;;  %v1942_v22 = vpop.f32.mrf.mxu3  ;;  %v842_v7 = vmul.f32 %v1677_v31, %v1677_v31  ;;  %v851_v16 = vmul.f32 %v1802_v32, %v1802_v32 }
 0x135   :  { %v902_v18 = vadd.f32 %v901_v23, %v839_v8  ;;  %v770_v39 = vadd.f32 %v769_v2, %v1832_v25  ;;  %v852_v23 = vmul.f32 %v1822_v60, %v1822_v60 }
 0x137   :  { %v903_v15 = vadd.f32 %v902_v18, %v840_v30  ;;  %v771_v26 = vadd.f32 %v770_v39, %v1848_v51  ;;  %v853_v18 = vmul.f32 %v1834_v34, %v1834_v34 }
 0x139   :  { %v772_v43 = vadd.f32 %v771_v26, %v1677_v31  ;;  %v904_v45 = vadd.f32 %v903_v15, %v841_v40 }
 0x13b   :  { %v773_v46 = vadd.f32 %v772_v43, %v1696_v44  ;;  %v905_v25 = vadd.f32 %v904_v45, %v842_v7  ;;  %v1956_v31 = vpop.f32.mrf.mxu3  ;;  %v846_v44 = vmul.f32 %v1730_v62, %v1730_v62  ;;  %v856_v45 = vmul.f32 %v1900_v14, %v1900_v14 }
 0x13c   :  { %v1278_v53 = vpack.c.bf16 %v1956_v31, %v1942_v22 }
 0x13d   :  { %v774_v56 = vadd.f32 %v773_v46, %v1709_v52  ;;  %v906_v51 = vadd.f32 %v905_v25, %v843_v41  ;;  %v847_v52 = vmul.f32 %v1742_v3, %v1742_v3  ;;  %v858_v25 = vmul.f32 %v1732_v63, %v1732_v63 }
 0x13e   :  { %1345 = vst [vmem:[%s2060_s4 + $0xf0] sm:$0xff] %v1278_v53  }
 0x13f   :  { %v775_v61 = vadd.f32 %v774_v56, %v1719_v55  ;;  %v907_v47 = vadd.f32 %v906_v51, %v844_v50 }
 0x141   :  { %v776_v54 = vadd.f32 %v775_v61, %v1730_v62  ;;  %v908_v58 = vadd.f32 %v907_v47, %v845_v29  ;;  %v849_v62 = vmul.f32 %v1772_v17, %v1772_v17 }
 0x143   :  { %v777_v55 = vadd.f32 %v776_v54, %v1742_v3  ;;  %v909_v59 = vadd.f32 %v908_v58, %v846_v44  ;;  %v1975_v9 = vpop.f32.mrf.mxu3 }
 0x145   :  { %v910_v10 = vadd.f32 %v909_v59, %v847_v52  ;;  %v778_v11 = vadd.f32 %v777_v55, %v1760_v12 }
 0x147   :  { %v779_v20 = vadd.f32 %v778_v11, %v1772_v17  ;;  %v911_v21 = vadd.f32 %v910_v10, %v848_v6 }
 0x149   :  { %v780_v3 = vadd.f32 %v779_v20, %v1790_v27  ;;  %v912_v0 = vadd.f32 %v911_v21, %v849_v62 }
 0x14b   :  { %v781_v36 = vadd.f32 %v780_v3, %v1802_v32  ;;  %v913_v12 = vadd.f32 %v912_v0, %v850_v57  ;;  %v610_v27 = vpop.f32.mrf.mxu3  ;;  %v854_v32 = vmul.f32 %v1852_v5, %v1852_v5 }
 0x14c   :  { %v1283_v30 = vpack.c.bf16 %v610_v27, %v1975_v9 }
 0x14d   :  { %v782_v17 = vadd.f32 %v781_v36, %v1822_v60  ;;  %v914_v2 = vadd.f32 %v913_v12, %v851_v16  ;;  %v869_v16 = vmul.f32 %v1918_v24, %v1918_v24 }
 0x14e   :  { %1346 = vst [vmem:[%s2060_s4 + $0xf8] sm:$0xff] %v1283_v30   ;;  %v873_v30 = vmul.f32 %v610_v27, %v610_v27 }
 0x14f   :  { %v783_v8 = vadd.f32 %v782_v17, %v1834_v34  ;;  %v915_v39 = vadd.f32 %v914_v2, %v852_v23  ;;  %v855_v34 = vmul.f32 %v1874_v37, %v1874_v37  ;;  %v870_v23 = vmul.f32 %v1942_v22, %v1942_v22 }
 0x150   :  { %v871_v2 = vmul.f32 %v1956_v31, %v1956_v31 }
 0x151   :  { %v916_v15 = vadd.f32 %v915_v39, %v853_v18  ;;  %v784_v26 = vadd.f32 %v783_v8, %v1852_v5  ;;  %v857_v5 = vmul.f32 %v1916_v1, %v1916_v1  ;;  %v872_v18 = vmul.f32 %v1975_v9, %v1975_v9 }
 0x153   :  { %v917_v60 = vadd.f32 %v916_v15, %v854_v32  ;;  %v785_v40 = vadd.f32 %v784_v26, %v1874_v37  ;;  %v859_v37 = vmul.f32 %v1744_v4, %v1744_v4 }
 0x155   :  { %v918_v7 = vadd.f32 %v917_v60, %v855_v34  ;;  %v786_v43 = vadd.f32 %v785_v40, %v1900_v14  ;;  %v860_v14 = vmul.f32 %v1762_v13, %v1762_v13 }
 0x157   :  { %v919_v41 = vadd.f32 %v918_v7, %v856_v45  ;;  %v787_v46 = vadd.f32 %v786_v43, %v1916_v1  ;;  %v861_v1 = vmul.f32 %v1774_v19, %v1774_v19 }
 0x159   :  { %v788_v50 = vadd.f32 %v787_v46, %v1732_v63  ;;  %v920_v56 = vadd.f32 %v919_v41, %v857_v5  ;;  %v862_v63 = vmul.f32 %v1792_v28, %v1792_v28 }
 0x15b   :  { %v789_v51 = vadd.f32 %v788_v50, %v1744_v4  ;;  %v921_v29 = vadd.f32 %v920_v56, %v858_v25  ;;  %v863_v4 = vmul.f32 %v1804_v33, %v1804_v33 }
 0x15d   :  { %v790_v61 = vadd.f32 %v789_v51, %v1762_v13  ;;  %v922_v47 = vadd.f32 %v921_v29, %v859_v37  ;;  %v864_v13 = vmul.f32 %v1824_v42, %v1824_v42 }
 0x15f   :  { %v791_v53 = vadd.f32 %v790_v61, %v1774_v19  ;;  %v923_v44 = vadd.f32 %v922_v47, %v860_v14  ;;  %v865_v19 = vmul.f32 %v1836_v35, %v1836_v35 }
 0x161   :  { %v792_v54 = vadd.f32 %v791_v53, %v1792_v28  ;;  %v924_v58 = vadd.f32 %v923_v44, %v861_v1  ;;  %v866_v28 = vmul.f32 %v1854_v48, %v1854_v48 }
 0x163   :  { %v793_v52 = vadd.f32 %v792_v54, %v1804_v33  ;;  %v925_v55 = vadd.f32 %v924_v58, %v862_v63  ;;  %v867_v33 = vmul.f32 %v1876_v38, %v1876_v38 }
 0x165   :  { %v926_v59 = vadd.f32 %v925_v55, %v863_v4  ;;  %v794_v6 = vadd.f32 %v793_v52, %v1824_v42  ;;  %v868_v42 = vmul.f32 %v1902_v49, %v1902_v49 }
 0x167   :  { %v795_v10 = vadd.f32 %v794_v6, %v1836_v35  ;;  %v927_v11 = vadd.f32 %v926_v59, %v864_v13 }
 0x169   :  { %v796_v62 = vadd.f32 %v795_v10, %v1854_v48  ;;  %v928_v20 = vadd.f32 %v927_v11, %v865_v19 }
 0x16b   :  { %v797_v21 = vadd.f32 %v796_v62, %v1876_v38  ;;  %v929_v57 = vadd.f32 %v928_v20, %v866_v28 }
 0x16d   :  { %v798_v3 = vadd.f32 %v797_v21, %v1902_v49  ;;  %v930_v0 = vadd.f32 %v929_v57, %v867_v33 }
 0x16f   :  { %v799_v35 = vadd.f32 %v798_v3, %v1918_v24  ;;  %v931_v36 = vadd.f32 %v930_v0, %v868_v42 }
 0x171   :  { %v932_v48 = vadd.f32 %v931_v36, %v869_v16  ;;  %v800_v12 = vadd.f32 %v799_v35, %v1942_v22 }
 0x173   :  { %v933_v38 = vadd.f32 %v932_v48, %v870_v23  ;;  %v801_v17 = vadd.f32 %v800_v12, %v1956_v31 }
 0x175   :  { %v934_v49 = vadd.f32 %v933_v38, %v871_v2  ;;  %v802_v8 = vadd.f32 %v801_v17, %v1975_v9 }
 0x177   :  { %v935_v24 = vadd.f32 %v934_v49, %v872_v18  ;;  %v803_v39 = vadd.f32 %v802_v8, %v610_v27 }
 0x179   :  { %v804_v15 = vrot.slane %v803_v39, 4  ;;  %v936_v26 = vadd.f32 %v935_v24, %v873_v30 }
 0x17b   :  { %v805_v32 = vadd.f32 %v804_v15, %v803_v39  ;;  %v937_v60 = vrot.slane %v936_v26, 4 }
 0x17d   :  { %v806_v22 = vrot.slane %v805_v32, 2  ;;  %v938_v40 = vadd.f32 %v937_v60, %v936_v26 }
 0x17f   :  { %v807_v34 = vadd.f32 %v806_v22, %v805_v32  ;;  %v939_v7 = vrot.slane %v938_v40, 2 }
 0x181   :  { %v808_v43 = vrot.slane %v807_v34, 1  ;;  %v940_v45 = vadd.f32 %v939_v7, %v938_v40 }
 0x183   :  { %v809_v31 = vadd.f32 %v808_v43, %v807_v34  ;;  %v941_v41 = vrot.slane %v940_v45, 1 }
 0x185   :  { %v942_v46 = vadd.f32 %v941_v41, %v940_v45  ;;  %943 = vst [vmem:[%s2061_s5] sm:$0xff] %v809_v31 }
 0x187   :  { %944 = vst [vmem:[%s2062_s6] sm:$0xff] %v942_v46 }

// kernel: bottleneck_forward.5
= control target key start
LH: loop header
LB: loop body
LE: loop exit
PB: predicated region body
PF: predicated region fallthrough
CT: control target
= control target key end

     0   :  { %s1797_s1 = inlined_call_operand.vmem [shape: bf16[128,128], index: 1, kind: input, shape index: {}]   ;;  %s1798_s0 = inlined_call_operand.vmem [shape: bf16[512,128], index: 0, kind: input, shape index: {}]   ;;  %s1799_s2 = inlined_call_operand.vmem [shape: bf16[512,128], index: 2, kind: output, shape index: {0}]   ;;  %s1800_s3 = inlined_call_operand.vmem [shape: f32[1,8,128], index: 3, kind: output, shape index: {1}]   ;;  %s1801_s4 = inlined_call_operand.vmem [shape: f32[1,8,128], index: 4, kind: output, shape index: {2}]  }
   0x1   :  { %v1046_v0 = vld [vmem:[%s1797_s1 + $0x38] sm:$0xff]  ;;  %v1045_v1 = vld [vmem:[%s1797_s1 + $0x30] sm:$0xff]  ;;  %v1044_v2 = vld [vmem:[%s1797_s1 + $0x28] sm:$0xff] }
   0x2   :  { %334 = vmatpush.bf16.msra.mxu0 %v1046_v0  ;;  %1238 = vmatpush.bf16.msra.mxu1 %v1046_v0  ;;  %v1043_v3 = vld [vmem:[%s1797_s1 + $0x20] sm:$0xff]  ;;  %v1042_v4 = vld [vmem:[%s1797_s1 + $0x18] sm:$0xff]  ;;  %v1041_v5 = vld [vmem:[%s1797_s1 + $0x10] sm:$0xff] }
   0x3   :  { %1239 = vmatpush.bf16.msra.mxu2 %v1046_v0  ;;  %1240 = vmatpush.bf16.msra.mxu3 %v1046_v0  ;;  %v1040_v6 = vld [vmem:[%s1797_s1 + $0x8] sm:$0xff]  ;;  %v1039_v7 = vld [vmem:[%s1797_s1] sm:$0xff]  ;;  %v1009_v13 = vld [vmem:[%s1798_s0 + $0x10] sm:$0xff] }
   0x4   :  { %v1007_v8 = vld [vmem:[%s1798_s0] sm:$0xff]  ;;  %v1008_v10 = vld [vmem:[%s1798_s0 + $0x8] sm:$0xff]  ;;  %v1017_v14 = vld [vmem:[%s1798_s0 + $0x50] sm:$0xff] }
   0x5   :  { %v1015_v9 = vld [vmem:[%s1798_s0 + $0x40] sm:$0xff]  ;;  %v1016_v11 = vld [vmem:[%s1798_s0 + $0x48] sm:$0xff]  ;;  %v1010_v16 = vld [vmem:[%s1798_s0 + $0x18] sm:$0xff] }
   0x6   :  { %335 = vmatpush.bf16.msra.mxu0 %v1045_v1  ;;  %1241 = vmatpush.bf16.msra.mxu1 %v1045_v1  ;;  %v1023_v12 = vld [vmem:[%s1798_s0 + $0x80] sm:$0xff]  ;;  %v1024_v15 = vld [vmem:[%s1798_s0 + $0x88] sm:$0xff]  ;;  %v1018_v17 = vld [vmem:[%s1798_s0 + $0x58] sm:$0xff] }
   0x7   :  { %1242 = vmatpush.bf16.msra.mxu2 %v1045_v1  ;;  %1243 = vmatpush.bf16.msra.mxu3 %v1045_v1  ;;  %v1025_v18 = vld [vmem:[%s1798_s0 + $0x90] sm:$0xff]  ;;  %v1031_v19 = vld [vmem:[%s1798_s0 + $0xc0] sm:$0xff]  ;;  %v1026_v22 = vld [vmem:[%s1798_s0 + $0x98] sm:$0xff] }
   0x8   :  { %v1011_v20 = vld [vmem:[%s1798_s0 + $0x20] sm:$0xff]  ;;  %v1032_v23 = vld [vmem:[%s1798_s0 + $0xc8] sm:$0xff]  ;;  %v1033_v27 = vld [vmem:[%s1798_s0 + $0xd0] sm:$0xff] }
   0x9   :  { %v1019_v21 = vld [vmem:[%s1798_s0 + $0x60] sm:$0xff]  ;;  %v1012_v24 = vld [vmem:[%s1798_s0 + $0x28] sm:$0xff]  ;;  %v1013_v28 = vld [vmem:[%s1798_s0 + $0x30] sm:$0xff] }
   0xa   :  { %336 = vmatpush.bf16.msra.mxu0 %v1044_v2  ;;  %1244 = vmatpush.bf16.msra.mxu1 %v1044_v2  ;;  %v1020_v25 = vld [vmem:[%s1798_s0 + $0x68] sm:$0xff]  ;;  %v1027_v26 = vld [vmem:[%s1798_s0 + $0xa0] sm:$0xff]  ;;  %v1021_v29 = vld [vmem:[%s1798_s0 + $0x70] sm:$0xff] }
   0xb   :  { %1245 = vmatpush.bf16.msra.mxu2 %v1044_v2  ;;  %1246 = vmatpush.bf16.msra.mxu3 %v1044_v2  ;;  %v1028_v30 = vld [vmem:[%s1798_s0 + $0xa8] sm:$0xff]  ;;  %v1034_v31 = vld [vmem:[%s1798_s0 + $0xd8] sm:$0xff]  ;;  %v1029_v34 = vld [vmem:[%s1798_s0 + $0xb0] sm:$0xff] }
   0xc   :  { %v1014_v32 = vld [vmem:[%s1798_s0 + $0x38] sm:$0xff]  ;;  %v1035_v35 = vld [vmem:[%s1798_s0 + $0xe0] sm:$0xff]  ;;  %v1036_v39 = vld [vmem:[%s1798_s0 + $0xe8] sm:$0xff] }
   0xd   :  { %v1022_v33 = vld [vmem:[%s1798_s0 + $0x78] sm:$0xff]  ;;  %v1037_v53 = vld [vmem:[%s1798_s0 + $0xf0] sm:$0xff] }
   0xe   :  { %337 = vmatpush.bf16.msra.mxu0 %v1043_v3  ;;  %1247 = vmatpush.bf16.msra.mxu1 %v1043_v3  ;;  %v1030_v38 = vld [vmem:[%s1798_s0 + $0xb8] sm:$0xff] }
   0xf   :  { %1248 = vmatpush.bf16.msra.mxu2 %v1043_v3  ;;  %1249 = vmatpush.bf16.msra.mxu3 %v1043_v3 }
  0x12   :  { %338 = vmatpush.bf16.msra.mxu0 %v1042_v4  ;;  %1250 = vmatpush.bf16.msra.mxu1 %v1042_v4 }
  0x13   :  { %1251 = vmatpush.bf16.msra.mxu2 %v1042_v4  ;;  %1252 = vmatpush.bf16.msra.mxu3 %v1042_v4 }
  0x16   :  { %339 = vmatpush.bf16.msra.mxu0 %v1041_v5  ;;  %1253 = vmatpush.bf16.msra.mxu1 %v1041_v5 }
  0x17   :  { %1254 = vmatpush.bf16.msra.mxu2 %v1041_v5  ;;  %1255 = vmatpush.bf16.msra.mxu3 %v1041_v5  ;;  %v1038_v5 = vld [vmem:[%s1798_s0 + $0xf8] sm:$0xff] }
  0x1a   :  { %340 = vmatpush.bf16.msra.mxu0 %v1040_v6  ;;  %1256 = vmatpush.bf16.msra.mxu1 %v1040_v6 }
  0x1b   :  { %1257 = vmatpush.bf16.msra.mxu2 %v1040_v6  ;;  %1258 = vmatpush.bf16.msra.mxu3 %v1040_v6 }
  0x1e   :  { %341 = vmatpush.bf16.msra.mxu0 %v1039_v7  ;;  %1259 = vmatpush.bf16.msra.mxu1 %v1039_v7 }
  0x1f   :  { %1260 = vmatpush.bf16.msra.mxu2 %v1039_v7  ;;  %1261 = vmatpush.bf16.msra.mxu3 %v1039_v7 }
  0x21   :  { %342 = vmatmul.bf16.vlgmr.msra.gmra.mxu0 %v1007_v8  ;;  %382 = vmatmul.bf16.vlgmr.msra.gmra.mxu1 %v1015_v9 }
  0x22   :  { %422 = vmatmul.bf16.vlgmr.msra.gmra.mxu2 %v1023_v12  ;;  %462 = vmatmul.bf16.vlgmr.msra.gmra.mxu3 %v1031_v19 }
  0x31   :  { %347 = vmatmul.bf16.gmra.mxu0 %v1008_v10  ;;  %387 = vmatmul.bf16.gmra.mxu1 %v1016_v11 }
  0x32   :  { %427 = vmatmul.bf16.gmra.mxu2 %v1024_v15  ;;  %467 = vmatmul.bf16.gmra.mxu3 %v1032_v23 }
  0x41   :  { %352 = vmatmul.bf16.gmra.mxu0 %v1009_v13  ;;  %392 = vmatmul.bf16.gmra.mxu1 %v1017_v14 }
  0x42   :  { %432 = vmatmul.bf16.gmra.mxu2 %v1025_v18  ;;  %472 = vmatmul.bf16.gmra.mxu3 %v1033_v27 }
  0x51   :  { %357 = vmatmul.bf16.gmra.mxu0 %v1010_v16  ;;  %397 = vmatmul.bf16.gmra.mxu1 %v1018_v17 }
  0x52   :  { %437 = vmatmul.bf16.gmra.mxu2 %v1026_v22  ;;  %477 = vmatmul.bf16.gmra.mxu3 %v1034_v31 }
  0x61   :  { %362 = vmatmul.bf16.gmra.mxu0 %v1011_v20  ;;  %402 = vmatmul.bf16.gmra.mxu1 %v1019_v21 }
  0x62   :  { %442 = vmatmul.bf16.gmra.mxu2 %v1027_v26  ;;  %482 = vmatmul.bf16.gmra.mxu3 %v1035_v35 }
  0x71   :  { %367 = vmatmul.bf16.gmra.mxu0 %v1012_v24  ;;  %407 = vmatmul.bf16.gmra.mxu1 %v1020_v25 }
  0x72   :  { %447 = vmatmul.bf16.gmra.mxu2 %v1028_v30  ;;  %487 = vmatmul.bf16.gmra.mxu3 %v1036_v39 }
  0x81   :  { %372 = vmatmul.bf16.gmra.mxu0 %v1013_v28  ;;  %412 = vmatmul.bf16.gmra.mxu1 %v1021_v29 }
  0x82   :  { %452 = vmatmul.bf16.gmra.mxu2 %v1029_v34  ;;  %492 = vmatmul.bf16.gmra.mxu3 %v1037_v53 }
  0x91   :  { %377 = vmatmul.bf16.gmra.mxu0 %v1014_v32  ;;  %417 = vmatmul.bf16.gmra.mxu1 %v1022_v33 }
  0x92   :  { %457 = vmatmul.bf16.gmra.mxu2 %v1030_v38  ;;  %497 = vmatmul.bf16.gmra.mxu3 %v1038_v5 }
  0x9e   :  { %v343_v36 = vpop.f32.mrf.mxu0  ;;  %v1395_v37 = vpop.f32.mrf.mxu1 }
  0x9f   :  { %v700_v40 = vmul.f32 %v343_v36, %v343_v36 }
  0xa5   :  { %v1422_v60 = vpop.f32.mrf.mxu2  ;;  %v1473_v20 = vpop.f32.mrf.mxu3 }
  0xa6   :  { %v345_v41 = vpop.f32.mrf.mxu0  ;;  %v1403_v42 = vpop.f32.mrf.mxu1 }
  0xa7   :  { %v1050_v43 = vpack.c.bf16 %v345_v41, %v343_v36  ;;  %v631_v44 = vadd.f32 %v345_v41, %v343_v36  ;;  %v701_v45 = vmul.f32 %v345_v41, %v345_v41  ;;  %v1090_v46 = vpack.c.bf16 %v1403_v42, %v1395_v37 }
  0xa9   :  { %1051 = vst [vmem:[%s1799_s2] sm:$0xff] %v1050_v43   ;;  %v764_v47 = vadd.f32 %v701_v45, %v700_v40 }
  0xaa   :  { %1214 = vst [vmem:[%s1799_s2 + $0x40] sm:$0xff] %v1090_v46  }
  0xad   :  { %v1434_v2 = vpop.f32.mrf.mxu2  ;;  %v1485_v24 = vpop.f32.mrf.mxu3 }
  0xae   :  { %v348_v48 = vpop.f32.mrf.mxu0  ;;  %v1413_v49 = vpop.f32.mrf.mxu1  ;;  %v1130_v3 = vpack.c.bf16 %v1434_v2, %v1422_v60  ;;  %v1170_v26 = vpack.c.bf16 %v1485_v24, %v1473_v20 }
  0xaf   :  { %v632_v50 = vadd.f32 %v631_v44, %v348_v48  ;;  %v702_v51 = vmul.f32 %v348_v48, %v348_v48 }
  0xb0   :  { %1222 = vst [vmem:[%s1799_s2 + $0x80] sm:$0xff] %v1130_v3  }
  0xb1   :  { %v765_v52 = vadd.f32 %v764_v47, %v702_v51  ;;  %1230 = vst [vmem:[%s1799_s2 + $0xc0] sm:$0xff] %v1170_v26  }
  0xb5   :  { %v1450_v10 = vpop.f32.mrf.mxu2  ;;  %v1503_v32 = vpop.f32.mrf.mxu3 }
  0xb6   :  { %v350_v54 = vpop.f32.mrf.mxu0  ;;  %v1418_v55 = vpop.f32.mrf.mxu1 }
  0xb7   :  { %v1055_v56 = vpack.c.bf16 %v350_v54, %v348_v48  ;;  %v633_v57 = vadd.f32 %v632_v50, %v350_v54  ;;  %v703_v58 = vmul.f32 %v350_v54, %v350_v54  ;;  %v1095_v59 = vpack.c.bf16 %v1418_v55, %v1413_v49 }
  0xb9   :  { %1207 = vst [vmem:[%s1799_s2 + $0x8] sm:$0xff] %v1055_v56   ;;  %v766_v61 = vadd.f32 %v765_v52, %v703_v58 }
  0xba   :  { %1215 = vst [vmem:[%s1799_s2 + $0x48] sm:$0xff] %v1095_v59  }
  0xbd   :  { %v1460_v13 = vpop.f32.mrf.mxu2  ;;  %v1515_v36 = vpop.f32.mrf.mxu3 }
  0xbe   :  { %v353_v62 = vpop.f32.mrf.mxu0  ;;  %v1430_v63 = vpop.f32.mrf.mxu1  ;;  %v1135_v14 = vpack.c.bf16 %v1460_v13, %v1450_v10  ;;  %v1175_v39 = vpack.c.bf16 %v1515_v36, %v1503_v32 }
  0xbf   :  { %v1432_v0 = vadd.f32 %v633_v57, %v353_v62  ;;  %v704_v1 = vmul.f32 %v353_v62, %v353_v62 }
  0xc0   :  { %1223 = vst [vmem:[%s1799_s2 + $0x88] sm:$0xff] %v1135_v14  }
  0xc1   :  { %v1438_v4 = vadd.f32 %v766_v61, %v704_v1  ;;  %1231 = vst [vmem:[%s1799_s2 + $0xc8] sm:$0xff] %v1175_v39  }
  0xc5   :  { %v1471_v19 = vpop.f32.mrf.mxu2  ;;  %v1533_v46 = vpop.f32.mrf.mxu3 }
  0xc6   :  { %v355_v6 = vpop.f32.mrf.mxu0  ;;  %v1446_v7 = vpop.f32.mrf.mxu1 }
  0xc7   :  { %v1060_v8 = vpack.c.bf16 %v355_v6, %v353_v62  ;;  %v1100_v9 = vpack.c.bf16 %v1446_v7, %v1430_v63  ;;  %v705_v52 = vmul.f32 %v355_v6, %v355_v6  ;;  %v635_v57 = vadd.f32 %v1432_v0, %v355_v6 }
  0xc9   :  { %1208 = vst [vmem:[%s1799_s2 + $0x10] sm:$0xff] %v1060_v8   ;;  %v768_v58 = vadd.f32 %v1438_v4, %v705_v52 }
  0xca   :  { %1216 = vst [vmem:[%s1799_s2 + $0x50] sm:$0xff] %v1100_v9  }
  0xcd   :  { %v1483_v23 = vpop.f32.mrf.mxu2  ;;  %v1545_v51 = vpop.f32.mrf.mxu3 }
  0xce   :  { %v358_v11 = vpop.f32.mrf.mxu0  ;;  %v1458_v12 = vpop.f32.mrf.mxu1  ;;  %v1140_v25 = vpack.c.bf16 %v1483_v23, %v1471_v19  ;;  %v1180_v54 = vpack.c.bf16 %v1545_v51, %v1533_v46 }
  0xcf   :  { %v706_v56 = vmul.f32 %v358_v11, %v358_v11  ;;  %v636_v61 = vadd.f32 %v635_v57, %v358_v11 }
  0xd0   :  { %1224 = vst [vmem:[%s1799_s2 + $0x90] sm:$0xff] %v1140_v25  }
  0xd1   :  { %1232 = vst [vmem:[%s1799_s2 + $0xd0] sm:$0xff] %v1180_v54   ;;  %v769_v62 = vadd.f32 %v768_v58, %v706_v56 }
  0xd5   :  { %v1501_v31 = vpop.f32.mrf.mxu2  ;;  %v1565_v0 = vpop.f32.mrf.mxu3 }
  0xd6   :  { %v360_v15 = vpop.f32.mrf.mxu0  ;;  %v1467_v16 = vpop.f32.mrf.mxu1 }
  0xd7   :  { %v1065_v17 = vpack.c.bf16 %v360_v15, %v358_v11  ;;  %v1105_v18 = vpack.c.bf16 %v1467_v16, %v1458_v12  ;;  %v707_v59 = vmul.f32 %v360_v15, %v360_v15  ;;  %v637_v8 = vadd.f32 %v636_v61, %v360_v15 }
  0xd9   :  { %1209 = vst [vmem:[%s1799_s2 + $0x18] sm:$0xff] %v1065_v17   ;;  %v770_v6 = vadd.f32 %v769_v62, %v707_v59 }
  0xda   :  { %1217 = vst [vmem:[%s1799_s2 + $0x58] sm:$0xff] %v1105_v18  }
  0xdd   :  { %v1513_v35 = vpop.f32.mrf.mxu2 }
  0xde   :  { %v363_v21 = vpop.f32.mrf.mxu0  ;;  %v1481_v22 = vpop.f32.mrf.mxu1  ;;  %v1145_v38 = vpack.c.bf16 %v1513_v35, %v1501_v31 }
  0xdf   :  { %v708_v1 = vmul.f32 %v363_v21, %v363_v21  ;;  %v638_v25 = vadd.f32 %v637_v8, %v363_v21 }
  0xe0   :  { %1225 = vst [vmem:[%s1799_s2 + $0x98] sm:$0xff] %v1145_v38  }
  0xe1   :  { %v771_v4 = vadd.f32 %v770_v6, %v708_v1 }
  0xe5   :  { %v1531_v45 = vpop.f32.mrf.mxu2 }
  0xe6   :  { %v365_v27 = vpop.f32.mrf.mxu0  ;;  %v1497_v28 = vpop.f32.mrf.mxu1 }
  0xe7   :  { %v1070_v29 = vpack.c.bf16 %v365_v27, %v363_v21  ;;  %v1110_v30 = vpack.c.bf16 %v1497_v28, %v1481_v22  ;;  %v709_v18 = vmul.f32 %v365_v27, %v365_v27  ;;  %v639_v15 = vadd.f32 %v638_v25, %v365_v27 }
  0xe9   :  { %1210 = vst [vmem:[%s1799_s2 + $0x20] sm:$0xff] %v1070_v29   ;;  %v772_v26 = vadd.f32 %v771_v4, %v709_v18 }
  0xea   :  { %1218 = vst [vmem:[%s1799_s2 + $0x60] sm:$0xff] %v1110_v30  }
  0xed   :  { %v1543_v50 = vpop.f32.mrf.mxu2 }
  0xee   :  { %v368_v33 = vpop.f32.mrf.mxu0  ;;  %v1511_v34 = vpop.f32.mrf.mxu1  ;;  %v1150_v53 = vpack.c.bf16 %v1543_v50, %v1531_v45 }
  0xef   :  { %v710_v11 = vmul.f32 %v368_v33, %v368_v33  ;;  %v640_v30 = vadd.f32 %v639_v15, %v368_v33 }
  0xf0   :  { %1226 = vst [vmem:[%s1799_s2 + $0xa0] sm:$0xff] %v1150_v53   ;;  %v1577_v53 = vpop.f32.mrf.mxu3 }
  0xf1   :  { %v773_v38 = vadd.f32 %v772_v26, %v710_v11  ;;  %v1185_v27 = vpack.c.bf16 %v1577_v53, %v1565_v0  ;;  %v717_v26 = vmul.f32 %v1403_v42, %v1403_v42 }
  0xf3   :  { %1233 = vst [vmem:[%s1799_s2 + $0xd8] sm:$0xff] %v1185_v27  }
  0xf5   :  { %v1563_v17 = vpop.f32.mrf.mxu2 }
  0xf6   :  { %v370_v40 = vpop.f32.mrf.mxu0  ;;  %v1527_v41 = vpop.f32.mrf.mxu1 }
  0xf7   :  { %v1075_v43 = vpack.c.bf16 %v370_v40, %v368_v33  ;;  %v1115_v44 = vpack.c.bf16 %v1527_v41, %v1511_v34  ;;  %v711_v29 = vmul.f32 %v370_v40, %v370_v40  ;;  %v641_v21 = vadd.f32 %v640_v30, %v370_v40 }
  0xf8   :  { %v1595_v4 = vpop.f32.mrf.mxu3 }
  0xf9   :  { %1211 = vst [vmem:[%s1799_s2 + $0x28] sm:$0xff] %v1075_v43   ;;  %v774_v54 = vadd.f32 %v773_v38, %v711_v29  ;;  %v718_v38 = vmul.f32 %v1413_v49, %v1413_v49 }
  0xfa   :  { %1219 = vst [vmem:[%s1799_s2 + $0x68] sm:$0xff] %v1115_v44  }
  0xfd   :  { %v1575_v52 = vpop.f32.mrf.mxu2 }
  0xfe   :  { %v373_v47 = vpop.f32.mrf.mxu0  ;;  %v1541_v48 = vpop.f32.mrf.mxu1  ;;  %v1155_v57 = vpack.c.bf16 %v1575_v52, %v1563_v17 }
  0xff   :  { %v712_v39 = vmul.f32 %v373_v47, %v373_v47  ;;  %v642_v58 = vadd.f32 %v641_v21, %v373_v47 }
 0x100   :  { %1227 = vst [vmem:[%s1799_s2 + $0xa8] sm:$0xff] %v1155_v57   ;;  %v1617_v57 = vpop.f32.mrf.mxu3 }
 0x101   :  { %v775_v33 = vadd.f32 %v774_v54, %v712_v39  ;;  %v1190_v27 = vpack.c.bf16 %v1617_v57, %v1595_v4 }
 0x103   :  { %1234 = vst [vmem:[%s1799_s2 + $0xe0] sm:$0xff] %v1190_v27  }
 0x105   :  { %v1593_v25 = vpop.f32.mrf.mxu2 }
 0x106   :  { %v375_v3 = vpop.f32.mrf.mxu0  ;;  %v1559_v5 = vpop.f32.mrf.mxu1 }
 0x107   :  { %v1080_v9 = vpack.c.bf16 %v375_v3, %v373_v47  ;;  %v1120_v14 = vpack.c.bf16 %v1559_v5, %v1541_v48  ;;  %v713_v56 = vmul.f32 %v375_v3, %v375_v3  ;;  %v643_v40 = vadd.f32 %v642_v58, %v375_v3 }
 0x108   :  { %v716_v3 = vmul.f32 %v1395_v37, %v1395_v37  ;;  %v729_v27 = vmul.f32 %v1559_v5, %v1559_v5 }
 0x109   :  { %1212 = vst [vmem:[%s1799_s2 + $0x30] sm:$0xff] %v1080_v9   ;;  %v776_v61 = vadd.f32 %v775_v33, %v713_v56 }
 0x10a   :  { %1220 = vst [vmem:[%s1799_s2 + $0x70] sm:$0xff] %v1120_v14  }
 0x10d   :  { %v1615_v56 = vpop.f32.mrf.mxu2 }
 0x10e   :  { %v378_v43 = vpop.f32.mrf.mxu0  ;;  %v1573_v44 = vpop.f32.mrf.mxu1 }
 0x10f   :  { %v714_v59 = vmul.f32 %v378_v43, %v378_v43  ;;  %v644_v62 = vadd.f32 %v643_v40, %v378_v43 }
 0x111   :  { %v777_v1 = vadd.f32 %v776_v61, %v714_v59  ;;  %v722_v61 = vmul.f32 %v1458_v12, %v1458_v12 }
 0x116   :  { %v380_v8 = vpop.f32.mrf.mxu0  ;;  %v1589_v9 = vpop.f32.mrf.mxu1 }
 0x117   :  { %v1085_v14 = vpack.c.bf16 %v380_v8, %v378_v43  ;;  %v645_v6 = vadd.f32 %v644_v62, %v380_v8  ;;  %v715_v47 = vmul.f32 %v380_v8, %v380_v8  ;;  %v1125_v18 = vpack.c.bf16 %v1589_v9, %v1573_v44 }
 0x119   :  { %1213 = vst [vmem:[%s1799_s2 + $0x38] sm:$0xff] %v1085_v14   ;;  %v646_v11 = vadd.f32 %v645_v6, %v1395_v37  ;;  %v778_v15 = vadd.f32 %v777_v1, %v715_v47  ;;  %v719_v37 = vmul.f32 %v1418_v55, %v1418_v55  ;;  %v723_v1 = vmul.f32 %v1467_v16, %v1467_v16  ;;  %v1641_v6 = vpop.f32.mrf.mxu2 }
 0x11a   :  { %1221 = vst [vmem:[%s1799_s2 + $0x78] sm:$0xff] %v1125_v18   ;;  %v724_v47 = vmul.f32 %v1481_v22, %v1481_v22 }
 0x11b   :  { %v647_v29 = vadd.f32 %v646_v11, %v1403_v42  ;;  %v779_v30 = vadd.f32 %v778_v15, %v716_v3  ;;  %v1160_v42 = vpack.c.bf16 %v1615_v56, %v1593_v25  ;;  %v725_v11 = vmul.f32 %v1497_v28, %v1497_v28 }
 0x11d   :  { %v648_v39 = vadd.f32 %v647_v29, %v1413_v49  ;;  %v780_v43 = vadd.f32 %v779_v30, %v717_v26  ;;  %v720_v49 = vmul.f32 %v1430_v63, %v1430_v63  ;;  %1228 = vst [vmem:[%s1799_s2 + $0xb0] sm:$0xff] %v1160_v42   ;;  %v727_v30 = vmul.f32 %v1527_v41, %v1527_v41 }
 0x11f   :  { %v649_v21 = vadd.f32 %v648_v39, %v1418_v55  ;;  %v781_v54 = vadd.f32 %v780_v43, %v718_v38  ;;  %v721_v55 = vmul.f32 %v1446_v7, %v1446_v7 }
 0x121   :  { %v650_v58 = vadd.f32 %v649_v21, %v1430_v63  ;;  %v782_v33 = vadd.f32 %v781_v54, %v719_v37 }
 0x123   :  { %v651_v59 = vadd.f32 %v650_v58, %v1446_v7  ;;  %v783_v40 = vadd.f32 %v782_v33, %v720_v49  ;;  %v1643_v7 = vpop.f32.mrf.mxu3 }
 0x125   :  { %v784_v62 = vadd.f32 %v783_v40, %v721_v55  ;;  %v652_v63 = vadd.f32 %v651_v59, %v1458_v12  ;;  %v731_v59 = vmul.f32 %v1589_v9, %v1589_v9 }
 0x127   :  { %v653_v8 = vadd.f32 %v652_v63, %v1467_v16  ;;  %v785_v14 = vadd.f32 %v784_v62, %v722_v61  ;;  %v726_v16 = vmul.f32 %v1511_v34, %v1511_v34  ;;  %v733_v63 = vmul.f32 %v1434_v2, %v1434_v2 }
 0x129   :  { %v654_v18 = vadd.f32 %v653_v8, %v1481_v22  ;;  %v786_v3 = vadd.f32 %v785_v14, %v723_v1  ;;  %v1657_v22 = vpop.f32.mrf.mxu2  ;;  %v734_v8 = vmul.f32 %v1450_v10, %v1450_v10 }
 0x12b   :  { %v655_v12 = vadd.f32 %v654_v18, %v1497_v28  ;;  %v787_v15 = vadd.f32 %v786_v3, %v724_v47  ;;  %v1659_v43 = vpop.f32.mrf.mxu3  ;;  %v1165_v28 = vpack.c.bf16 %v1657_v22, %v1641_v6  ;;  %v735_v47 = vmul.f32 %v1460_v13, %v1460_v13 }
 0x12c   :  { %v1195_v37 = vpack.c.bf16 %v1659_v43, %v1643_v7 }
 0x12d   :  { %v656_v26 = vadd.f32 %v655_v12, %v1511_v34  ;;  %v788_v29 = vadd.f32 %v787_v15, %v725_v11  ;;  %v728_v34 = vmul.f32 %v1541_v48, %v1541_v48  ;;  %1229 = vst [vmem:[%s1799_s2 + $0xb8] sm:$0xff] %v1165_v28  }
 0x12e   :  { %1235 = vst [vmem:[%s1799_s2 + $0xe8] sm:$0xff] %v1195_v37   ;;  %v740_v37 = vmul.f32 %v1531_v45, %v1531_v45 }
 0x12f   :  { %v657_v38 = vadd.f32 %v656_v26, %v1527_v41  ;;  %v789_v39 = vadd.f32 %v788_v29, %v726_v16  ;;  %v738_v26 = vmul.f32 %v1501_v31, %v1501_v31 }
 0x131   :  { %v658_v21 = vadd.f32 %v657_v38, %v1541_v48  ;;  %v790_v54 = vadd.f32 %v789_v39, %v727_v30  ;;  %v730_v48 = vmul.f32 %v1573_v44, %v1573_v44 }
 0x133   :  { %v791_v41 = vadd.f32 %v790_v54, %v728_v34  ;;  %v659_v42 = vadd.f32 %v658_v21, %v1559_v5  ;;  %v1683_v40 = vpop.f32.mrf.mxu3  ;;  %v732_v5 = vmul.f32 %v1422_v60, %v1422_v60  ;;  %v741_v34 = vmul.f32 %v1543_v50, %v1543_v50 }
 0x135   :  { %v792_v49 = vadd.f32 %v791_v41, %v729_v27  ;;  %v660_v58 = vadd.f32 %v659_v42, %v1573_v44  ;;  %v742_v41 = vmul.f32 %v1563_v17, %v1563_v17 }
 0x137   :  { %v793_v33 = vadd.f32 %v792_v49, %v730_v48  ;;  %v661_v55 = vadd.f32 %v660_v58, %v1589_v9  ;;  %v743_v49 = vmul.f32 %v1575_v52, %v1575_v52 }
 0x139   :  { %v662_v61 = vadd.f32 %v661_v55, %v1422_v60  ;;  %v794_v62 = vadd.f32 %v793_v33, %v731_v59 }
 0x13b   :  { %v663_v1 = vadd.f32 %v662_v61, %v1434_v2  ;;  %v795_v44 = vadd.f32 %v794_v62, %v732_v5  ;;  %v1697_v60 = vpop.f32.mrf.mxu3  ;;  %v736_v2 = vmul.f32 %v1471_v19, %v1471_v19  ;;  %v746_v62 = vmul.f32 %v1641_v6, %v1641_v6 }
 0x13c   :  { %v1200_v11 = vpack.c.bf16 %v1697_v60, %v1683_v40 }
 0x13d   :  { %v664_v14 = vadd.f32 %v663_v1, %v1450_v10  ;;  %v796_v9 = vadd.f32 %v795_v44, %v733_v63  ;;  %v737_v10 = vmul.f32 %v1483_v23, %v1483_v23  ;;  %v748_v44 = vmul.f32 %v1473_v20, %v1473_v20 }
 0x13e   :  { %1236 = vst [vmem:[%s1799_s2 + $0xf0] sm:$0xff] %v1200_v11  }
 0x13f   :  { %v665_v18 = vadd.f32 %v664_v14, %v1460_v13  ;;  %v797_v3 = vadd.f32 %v796_v9, %v734_v8 }
 0x141   :  { %v666_v12 = vadd.f32 %v665_v18, %v1471_v19  ;;  %v798_v15 = vadd.f32 %v797_v3, %v735_v47  ;;  %v739_v19 = vmul.f32 %v1513_v35, %v1513_v35 }
 0x143   :  { %v667_v13 = vadd.f32 %v666_v12, %v1483_v23  ;;  %v799_v16 = vadd.f32 %v798_v15, %v736_v2  ;;  %v1716_v28 = vpop.f32.mrf.mxu3 }
 0x145   :  { %v800_v29 = vadd.f32 %v799_v16, %v737_v10  ;;  %v668_v30 = vadd.f32 %v667_v13, %v1501_v31 }
 0x147   :  { %v669_v38 = vadd.f32 %v668_v30, %v1513_v35  ;;  %v801_v39 = vadd.f32 %v800_v29, %v738_v26 }
 0x149   :  { %v670_v23 = vadd.f32 %v669_v38, %v1531_v45  ;;  %v802_v21 = vadd.f32 %v801_v39, %v739_v19 }
 0x14b   :  { %v671_v54 = vadd.f32 %v670_v23, %v1543_v50  ;;  %v803_v31 = vadd.f32 %v802_v21, %v740_v37  ;;  %v500_v45 = vpop.f32.mrf.mxu3  ;;  %v744_v50 = vmul.f32 %v1593_v25, %v1593_v25 }
 0x14c   :  { %v1205_v48 = vpack.c.bf16 %v500_v45, %v1716_v28 }
 0x14d   :  { %v672_v35 = vadd.f32 %v671_v54, %v1563_v17  ;;  %v804_v42 = vadd.f32 %v803_v31, %v741_v34  ;;  %v759_v34 = vmul.f32 %v1659_v43, %v1659_v43 }
 0x14e   :  { %1237 = vst [vmem:[%s1799_s2 + $0xf8] sm:$0xff] %v1205_v48   ;;  %v763_v48 = vmul.f32 %v500_v45, %v500_v45 }
 0x14f   :  { %v673_v27 = vadd.f32 %v672_v35, %v1575_v52  ;;  %v805_v58 = vadd.f32 %v804_v42, %v742_v41  ;;  %v745_v52 = vmul.f32 %v1615_v56, %v1615_v56  ;;  %v760_v41 = vmul.f32 %v1683_v40, %v1683_v40 }
 0x150   :  { %v761_v42 = vmul.f32 %v1697_v60, %v1697_v60 }
 0x151   :  { %v806_v33 = vadd.f32 %v805_v58, %v743_v49  ;;  %v674_v55 = vadd.f32 %v673_v27, %v1593_v25  ;;  %v747_v25 = vmul.f32 %v1657_v22, %v1657_v22  ;;  %v762_v49 = vmul.f32 %v1716_v28, %v1716_v28 }
 0x153   :  { %v807_v17 = vadd.f32 %v806_v33, %v744_v50  ;;  %v675_v59 = vadd.f32 %v674_v55, %v1615_v56  ;;  %v749_v56 = vmul.f32 %v1485_v24, %v1485_v24 }
 0x155   :  { %v808_v5 = vadd.f32 %v807_v17, %v745_v52  ;;  %v676_v61 = vadd.f32 %v675_v59, %v1641_v6  ;;  %v750_v6 = vmul.f32 %v1503_v32, %v1503_v32 }
 0x157   :  { %v809_v63 = vadd.f32 %v808_v5, %v746_v62  ;;  %v677_v1 = vadd.f32 %v676_v61, %v1657_v22  ;;  %v751_v22 = vmul.f32 %v1515_v36, %v1515_v36 }
 0x159   :  { %v678_v8 = vadd.f32 %v677_v1, %v1473_v20  ;;  %v810_v14 = vadd.f32 %v809_v63, %v747_v25  ;;  %v752_v20 = vmul.f32 %v1533_v46, %v1533_v46 }
 0x15b   :  { %v679_v9 = vadd.f32 %v678_v8, %v1485_v24  ;;  %v811_v47 = vadd.f32 %v810_v14, %v748_v44  ;;  %v753_v24 = vmul.f32 %v1545_v51, %v1545_v51 }
 0x15d   :  { %v680_v18 = vadd.f32 %v679_v9, %v1503_v32  ;;  %v812_v3 = vadd.f32 %v811_v47, %v749_v56  ;;  %v754_v32 = vmul.f32 %v1565_v0, %v1565_v0 }
 0x15f   :  { %v681_v11 = vadd.f32 %v680_v18, %v1515_v36  ;;  %v813_v2 = vadd.f32 %v812_v3, %v750_v6  ;;  %v755_v36 = vmul.f32 %v1577_v53, %v1577_v53 }
 0x161   :  { %v682_v12 = vadd.f32 %v681_v11, %v1533_v46  ;;  %v814_v15 = vadd.f32 %v813_v2, %v751_v22  ;;  %v756_v46 = vmul.f32 %v1595_v4, %v1595_v4 }
 0x163   :  { %v683_v10 = vadd.f32 %v682_v12, %v1545_v51  ;;  %v815_v13 = vadd.f32 %v814_v15, %v752_v20  ;;  %v757_v51 = vmul.f32 %v1617_v57, %v1617_v57 }
 0x165   :  { %v816_v16 = vadd.f32 %v815_v13, %v753_v24  ;;  %v684_v26 = vadd.f32 %v683_v10, %v1565_v0  ;;  %v758_v0 = vmul.f32 %v1643_v7, %v1643_v7 }
 0x167   :  { %v685_v29 = vadd.f32 %v684_v26, %v1577_v53  ;;  %v817_v30 = vadd.f32 %v816_v16, %v754_v32 }
 0x169   :  { %v686_v19 = vadd.f32 %v685_v29, %v1595_v4  ;;  %v818_v38 = vadd.f32 %v817_v30, %v755_v36 }
 0x16b   :  { %v687_v39 = vadd.f32 %v686_v19, %v1617_v57  ;;  %v819_v37 = vadd.f32 %v818_v38, %v756_v46 }
 0x16d   :  { %v688_v23 = vadd.f32 %v687_v39, %v1643_v7  ;;  %v820_v21 = vadd.f32 %v819_v37, %v757_v51 }
 0x16f   :  { %v689_v53 = vadd.f32 %v688_v23, %v1659_v43  ;;  %v821_v54 = vadd.f32 %v820_v21, %v758_v0 }
 0x171   :  { %v822_v4 = vadd.f32 %v821_v54, %v759_v34  ;;  %v690_v31 = vadd.f32 %v689_v53, %v1683_v40 }
 0x173   :  { %v823_v57 = vadd.f32 %v822_v4, %v760_v41  ;;  %v691_v35 = vadd.f32 %v690_v31, %v1697_v60 }
 0x175   :  { %v824_v7 = vadd.f32 %v823_v57, %v761_v42  ;;  %v692_v27 = vadd.f32 %v691_v35, %v1716_v28 }
 0x177   :  { %v825_v43 = vadd.f32 %v824_v7, %v762_v49  ;;  %v693_v58 = vadd.f32 %v692_v27, %v500_v45 }
 0x179   :  { %v694_v33 = vrot.slane %v693_v58, 4  ;;  %v826_v55 = vadd.f32 %v825_v43, %v763_v48 }
 0x17b   :  { %v695_v50 = vadd.f32 %v694_v33, %v693_v58  ;;  %v827_v17 = vrot.slane %v826_v55, 4 }
 0x17d   :  { %v696_v40 = vrot.slane %v695_v50, 2  ;;  %v828_v59 = vadd.f32 %v827_v17, %v826_v55 }
 0x17f   :  { %v697_v52 = vadd.f32 %v696_v40, %v695_v50  ;;  %v829_v5 = vrot.slane %v828_v59, 2 }
 0x181   :  { %v698_v61 = vrot.slane %v697_v52, 1  ;;  %v830_v62 = vadd.f32 %v829_v5, %v828_v59 }
 0x183   :  { %v699_v60 = vadd.f32 %v698_v61, %v697_v52  ;;  %v831_v63 = vrot.slane %v830_v62, 1 }
 0x185   :  { %v832_v1 = vadd.f32 %v831_v63, %v830_v62  ;;  %833 = vst [vmem:[%s1800_s3] sm:$0xff] %v699_v60 }
 0x187   :  { %834 = vst [vmem:[%s1801_s4] sm:$0xff] %v832_v1 }

// kernel: bottleneck_forward.9
= control target key start
LH: loop header
LB: loop body
LE: loop exit
PB: predicated region body
PF: predicated region fallthrough
CT: control target
= control target key end

     0   :  { %s1947_s0 = inlined_call_operand.vmem [shape: bf16[512,128], index: 0, kind: input, shape index: {}]   ;;  %s1948_s1 = inlined_call_operand.vmem [shape: f32[1,128], index: 1, kind: input, shape index: {}]   ;;  %s1949_s2 = inlined_call_operand.vmem [shape: f32[1,128], index: 2, kind: input, shape index: {}]   ;;  %s1950_s3 = inlined_call_operand.vmem [shape: bf16[512,128], index: 3, kind: input, shape index: {}]   ;;  %s1951_s4 = inlined_call_operand.vmem [shape: f32[1,128], index: 4, kind: input, shape index: {}]   ;;  %s1952_s5 = inlined_call_operand.vmem [shape: f32[1,128], index: 5, kind: input, shape index: {}]   ;;  %s1953_s6 = inlined_call_operand.vmem [shape: bf16[512,128], index: 6, kind: output, shape index: {}]  }
   0x1   :  { %v812_v0 = vld [vmem:[%s1947_s0] sm:$0xff]   ;;  %v1227_v12 = vld [vmem:[%s1947_s0 + $0x8] sm:$0xff]   ;;  %v1228_v18 = vld [vmem:[%s1947_s0 + $0x10] sm:$0xff]  }
   0x2   :  { %v1369_v1 = vld [vmem:[%s1948_s1] ss:$0 sm:$0xff]  ;;  %v813_v2 = vunpack.c.l.bf16 %v812_v0  ;;  %v814_v3 = vunpack.c.h.bf16 %v812_v0  ;;  %v1258_v13 = vld [vmem:[%s1950_s3 + $0x8] sm:$0xff]   ;;  %v817_v16 = vunpack.c.l.bf16 %v1227_v12  ;;  %v818_v17 = vunpack.c.h.bf16 %v1227_v12  ;;  %v1259_v31 = vld [vmem:[%s1950_s3 + $0x10] sm:$0xff]  }
   0x3   :  { %v1374_v4 = vld [vmem:[%s1949_s2] ss:$0 sm:$0xff]  ;;  %v945_v21 = vunpack.c.l.bf16 %v1258_v13  ;;  %v946_v22 = vunpack.c.h.bf16 %v1258_v13  ;;  %v821_v29 = vunpack.c.l.bf16 %v1228_v18  ;;  %v822_v30 = vunpack.c.h.bf16 %v1228_v18  ;;  %v1229_v40 = vld [vmem:[%s1947_s0 + $0x18] sm:$0xff]  }
   0x4   :  { %v940_v5 = vld [vmem:[%s1950_s3] sm:$0xff]   ;;  %v155_v9 = vmul.f32 %v1369_v1, %v813_v2  ;;  %v156_v10 = vmul.f32 %v1369_v1, %v814_v3  ;;  %v157_v25 = vmul.f32 %v1369_v1, %v817_v16  ;;  %v158_v26 = vmul.f32 %v1369_v1, %v818_v17  ;;  %v1260_v45 = vld [vmem:[%s1950_s3 + $0x18] sm:$0xff]   ;;  %v1231_v16 = vld [vmem:[%s1947_s0 + $0x28] sm:$0xff]  }
   0x5   :  { %v941_v6 = vunpack.c.l.bf16 %v940_v5  ;;  %v942_v7 = vunpack.c.h.bf16 %v940_v5  ;;  %v1382_v8 = vld [vmem:[%s1951_s4] ss:$0 sm:$0xff]  ;;  %v159_v38 = vmul.f32 %v1369_v1, %v821_v29  ;;  %v160_v39 = vmul.f32 %v1369_v1, %v822_v30  ;;  %v1232_v30 = vld [vmem:[%s1947_s0 + $0x30] sm:$0xff]  }
   0x6   :  { %v1389_v11 = vld [vmem:[%s1952_s5] ss:$0 sm:$0xff]  ;;  %v223_v19 = vadd.f32 %v1374_v4, %v155_v9  ;;  %v224_v20 = vadd.f32 %v1374_v4, %v156_v10  ;;  %v421_v27 = vmul.f32 %v1382_v8, %v945_v21  ;;  %v422_v28 = vmul.f32 %v1382_v8, %v946_v22 }
   0x7   :  { %v419_v14 = vmul.f32 %v1382_v8, %v941_v6  ;;  %v420_v15 = vmul.f32 %v1382_v8, %v942_v7  ;;  %v225_v34 = vadd.f32 %v1374_v4, %v157_v25  ;;  %v226_v35 = vadd.f32 %v1374_v4, %v158_v26  ;;  %v1230_v54 = vld [vmem:[%s1947_s0 + $0x20] sm:$0xff]   ;;  %v1262_v25 = vld [vmem:[%s1950_s3 + $0x28] sm:$0xff]  }
   0x8   :  { %v489_v36 = vadd.f32 %v1389_v11, %v421_v27  ;;  %v490_v37 = vadd.f32 %v1389_v11, %v422_v28  ;;  %v949_v43 = vunpack.c.l.bf16 %v1259_v31  ;;  %v950_v44 = vunpack.c.h.bf16 %v1259_v31  ;;  %v1261_v5 = vld [vmem:[%s1950_s3 + $0x20] sm:$0xff]  }
   0x9   :  { %v487_v23 = vadd.f32 %v1389_v11, %v419_v14  ;;  %v488_v24 = vadd.f32 %v1389_v11, %v420_v15  ;;  %v227_v48 = vadd.f32 %v1374_v4, %v159_v38  ;;  %v228_v49 = vadd.f32 %v1374_v4, %v160_v39 }
   0xa   :  { %v553_v46 = vadd.f32 %v489_v36, %v225_v34  ;;  %v554_v47 = vadd.f32 %v490_v37, %v226_v35  ;;  %v423_v51 = vmul.f32 %v1382_v8, %v949_v43  ;;  %v424_v52 = vmul.f32 %v1382_v8, %v950_v44  ;;  %v1263_v43 = vld [vmem:[%s1950_s3 + $0x30] sm:$0xff]  }
   0xb   :  { %v551_v32 = vadd.f32 %v487_v23, %v223_v19  ;;  %v552_v33 = vadd.f32 %v488_v24, %v224_v20  ;;  %v825_v53 = vunpack.c.l.bf16 %v1229_v40  ;;  %v826_v57 = vunpack.c.h.bf16 %v1229_v40 }
   0xc   :  { %v617_v55 = vmax.f32 %v553_v46, 0.0  ;;  %v618_v56 = vmax.f32 %v554_v47, 0.0  ;;  %v953_v58 = vunpack.c.l.bf16 %v1260_v45  ;;  %v491_v59 = vadd.f32 %v1389_v11, %v423_v51 }
   0xd   :  { %v615_v41 = vmax.f32 %v551_v32, 0.0  ;;  %v616_v42 = vmax.f32 %v552_v33, 0.0  ;;  %v492_v60 = vadd.f32 %v1389_v11, %v424_v52  ;;  %v161_v61 = vmul.f32 %v1369_v1, %v825_v53  ;;  %v1233_v52 = vld [vmem:[%s1947_s0 + $0x38] sm:$0xff]  }
   0xe   :  { %v954_v62 = vunpack.c.h.bf16 %v1260_v45  ;;  %v1075_v63 = vpack.c.bf16 %v618_v56, %v617_v55  ;;  %v162_v0 = vmul.f32 %v1369_v1, %v826_v57  ;;  %v425_v2 = vmul.f32 %v1382_v8, %v953_v58 }
   0xf   :  { %v1070_v50 = vpack.c.bf16 %v616_v42, %v615_v41  ;;  %v829_v3 = vunpack.c.l.bf16 %v1230_v54  ;;  %v555_v6 = vadd.f32 %v491_v59, %v227_v48  ;;  %v556_v7 = vadd.f32 %v492_v60, %v228_v49 }
  0x10   :  { %v229_v9 = vadd.f32 %v1374_v4, %v161_v61  ;;  %v426_v10 = vmul.f32 %v1382_v8, %v954_v62  ;;  %1289 = vst [vmem:[%s1953_s6 + $0x8] sm:$0xff] %v1075_v63   ;;  %v230_v12 = vadd.f32 %v1374_v4, %v162_v0  ;;  %v493_v13 = vadd.f32 %v1389_v11, %v425_v2  ;;  %v1264_v2 = vld [vmem:[%s1950_s3 + $0x38] sm:$0xff]  }
  0x11   :  { %1071 = vst [vmem:[%s1953_s6] sm:$0xff] %v1070_v50   ;;  %v830_v14 = vunpack.c.h.bf16 %v1230_v54  ;;  %v163_v15 = vmul.f32 %v1369_v1, %v829_v3  ;;  %v619_v17 = vmax.f32 %v555_v6, 0.0  ;;  %v620_v18 = vmax.f32 %v556_v7, 0.0 }
  0x12   :  { %v494_v19 = vadd.f32 %v1389_v11, %v426_v10  ;;  %v957_v20 = vunpack.c.l.bf16 %v1261_v5  ;;  %v557_v21 = vadd.f32 %v493_v13, %v229_v9  ;;  %v958_v24 = vunpack.c.h.bf16 %v1261_v5  ;;  %v1234_v9 = vld [vmem:[%s1947_s0 + $0x40] sm:$0xff]  }
  0x13   :  { %v164_v22 = vmul.f32 %v1369_v1, %v830_v14  ;;  %v231_v23 = vadd.f32 %v1374_v4, %v163_v15  ;;  %v1080_v26 = vpack.c.bf16 %v620_v18, %v619_v17  ;;  %v833_v29 = vunpack.c.l.bf16 %v1231_v16 }
  0x14   :  { %v558_v27 = vadd.f32 %v494_v19, %v230_v12  ;;  %v427_v28 = vmul.f32 %v1382_v8, %v957_v20  ;;  %v621_v31 = vmax.f32 %v557_v21, 0.0  ;;  %v428_v33 = vmul.f32 %v1382_v8, %v958_v24 }
  0x15   :  { %v232_v32 = vadd.f32 %v1374_v4, %v164_v22  ;;  %v834_v34 = vunpack.c.h.bf16 %v1231_v16  ;;  %1290 = vst [vmem:[%s1953_s6 + $0x10] sm:$0xff] %v1080_v26   ;;  %v165_v37 = vmul.f32 %v1369_v1, %v833_v29  ;;  %v961_v38 = vunpack.c.l.bf16 %v1262_v25 }
  0x16   :  { %v622_v35 = vmax.f32 %v558_v27, 0.0  ;;  %v495_v36 = vadd.f32 %v1389_v11, %v427_v28  ;;  %v496_v39 = vadd.f32 %v1389_v11, %v428_v33  ;;  %v962_v41 = vunpack.c.h.bf16 %v1262_v25  ;;  %v1235_v28 = vld [vmem:[%s1947_s0 + $0x48] sm:$0xff]  }
  0x17   :  { %v166_v40 = vmul.f32 %v1369_v1, %v834_v34  ;;  %v837_v42 = vunpack.c.l.bf16 %v1232_v30  ;;  %v233_v46 = vadd.f32 %v1374_v4, %v165_v37  ;;  %v429_v47 = vmul.f32 %v1382_v8, %v961_v38 }
  0x18   :  { %v1085_v44 = vpack.c.bf16 %v622_v35, %v621_v31  ;;  %v559_v45 = vadd.f32 %v495_v36, %v231_v23  ;;  %v560_v48 = vadd.f32 %v496_v39, %v232_v32  ;;  %v430_v50 = vmul.f32 %v1382_v8, %v962_v41  ;;  %v1265_v23 = vld [vmem:[%s1950_s3 + $0x40] sm:$0xff]   ;;  %v1266_v41 = vld [vmem:[%s1950_s3 + $0x48] sm:$0xff]  }
  0x19   :  { %v234_v49 = vadd.f32 %v1374_v4, %v166_v40  ;;  %v838_v51 = vunpack.c.h.bf16 %v1232_v30  ;;  %v497_v54 = vadd.f32 %v1389_v11, %v429_v47  ;;  %v167_v55 = vmul.f32 %v1369_v1, %v837_v42 }
  0x1a   :  { %1291 = vst [vmem:[%s1953_s6 + $0x18] sm:$0xff] %v1085_v44   ;;  %v623_v53 = vmax.f32 %v559_v45, 0.0  ;;  %v965_v56 = vunpack.c.l.bf16 %v1263_v43  ;;  %v624_v57 = vmax.f32 %v560_v48, 0.0  ;;  %v498_v58 = vadd.f32 %v1389_v11, %v430_v50  ;;  %v1236_v50 = vld [vmem:[%s1947_s0 + $0x50] sm:$0xff]  }
  0x1b   :  { %v168_v59 = vmul.f32 %v1369_v1, %v838_v51  ;;  %v966_v60 = vunpack.c.h.bf16 %v1263_v43  ;;  %v561_v61 = vadd.f32 %v497_v54, %v233_v46  ;;  %v235_v62 = vadd.f32 %v1374_v4, %v167_v55 }
  0x1c   :  { %v431_v63 = vmul.f32 %v1382_v8, %v965_v56  ;;  %v841_v0 = vunpack.c.l.bf16 %v1233_v52  ;;  %v1090_v3 = vpack.c.bf16 %v624_v57, %v623_v53  ;;  %v562_v5 = vadd.f32 %v498_v58, %v234_v49 }
  0x1d   :  { %v236_v6 = vadd.f32 %v1374_v4, %v168_v59  ;;  %v432_v7 = vmul.f32 %v1382_v8, %v966_v60  ;;  %v625_v10 = vmax.f32 %v561_v61, 0.0  ;;  %v842_v13 = vunpack.c.h.bf16 %v1233_v52  ;;  %v1267_v59 = vld [vmem:[%s1950_s3 + $0x50] sm:$0xff]  }
  0x1e   :  { %v499_v12 = vadd.f32 %v1389_v11, %v431_v63  ;;  %v169_v14 = vmul.f32 %v1369_v1, %v841_v0  ;;  %1292 = vst [vmem:[%s1953_s6 + $0x20] sm:$0xff] %v1090_v3   ;;  %v626_v15 = vmax.f32 %v562_v5, 0.0  ;;  %v969_v17 = vunpack.c.l.bf16 %v1264_v2 }
  0x1f   :  { %v500_v16 = vadd.f32 %v1389_v11, %v432_v7  ;;  %v970_v18 = vunpack.c.h.bf16 %v1264_v2  ;;  %v170_v20 = vmul.f32 %v1369_v1, %v842_v13  ;;  %v845_v22 = vunpack.c.l.bf16 %v1234_v9 }
  0x20   :  { %v563_v19 = vadd.f32 %v499_v12, %v235_v62  ;;  %v237_v21 = vadd.f32 %v1374_v4, %v169_v14  ;;  %v1095_v24 = vpack.c.bf16 %v626_v15, %v625_v10  ;;  %v433_v26 = vmul.f32 %v1382_v8, %v969_v17 }
  0x21   :  { %v564_v25 = vadd.f32 %v500_v16, %v236_v6  ;;  %v434_v27 = vmul.f32 %v1382_v8, %v970_v18  ;;  %v238_v30 = vadd.f32 %v1374_v4, %v170_v20  ;;  %v846_v31 = vunpack.c.h.bf16 %v1234_v9  ;;  %v1237_v6 = vld [vmem:[%s1947_s0 + $0x58] sm:$0xff]  }
  0x22   :  { %v627_v29 = vmax.f32 %v563_v19, 0.0  ;;  %v171_v32 = vmul.f32 %v1369_v1, %v845_v22  ;;  %1293 = vst [vmem:[%s1953_s6 + $0x28] sm:$0xff] %v1095_v24   ;;  %v501_v34 = vadd.f32 %v1389_v11, %v433_v26  ;;  %v973_v36 = vunpack.c.l.bf16 %v1265_v23  ;;  %v1238_v26 = vld [vmem:[%s1947_s0 + $0x60] sm:$0xff]  }
  0x23   :  { %v628_v33 = vmax.f32 %v564_v25, 0.0  ;;  %v502_v35 = vadd.f32 %v1389_v11, %v434_v27  ;;  %v172_v37 = vmul.f32 %v1369_v1, %v846_v31  ;;  %v974_v39 = vunpack.c.h.bf16 %v1265_v23 }
  0x24   :  { %v239_v38 = vadd.f32 %v1374_v4, %v171_v32  ;;  %v849_v40 = vunpack.c.l.bf16 %v1235_v28  ;;  %v565_v43 = vadd.f32 %v501_v34, %v237_v21  ;;  %v435_v45 = vmul.f32 %v1382_v8, %v973_v36  ;;  %v1268_v21 = vld [vmem:[%s1950_s3 + $0x58] sm:$0xff]  }
  0x25   :  { %v1100_v42 = vpack.c.bf16 %v628_v33, %v627_v29  ;;  %v566_v44 = vadd.f32 %v502_v35, %v238_v30  ;;  %v240_v46 = vadd.f32 %v1374_v4, %v172_v37  ;;  %v436_v47 = vmul.f32 %v1382_v8, %v974_v39  ;;  %v1269_v39 = vld [vmem:[%s1950_s3 + $0x60] sm:$0xff]  }
  0x26   :  { %v850_v48 = vunpack.c.h.bf16 %v1235_v28  ;;  %v173_v49 = vmul.f32 %v1369_v1, %v849_v40  ;;  %v629_v51 = vmax.f32 %v565_v43, 0.0  ;;  %v503_v53 = vadd.f32 %v1389_v11, %v435_v45 }
  0x27   :  { %1294 = vst [vmem:[%s1953_s6 + $0x30] sm:$0xff] %v1100_v42   ;;  %v630_v52 = vmax.f32 %v566_v44, 0.0  ;;  %v977_v54 = vunpack.c.l.bf16 %v1266_v41  ;;  %v504_v55 = vadd.f32 %v1389_v11, %v436_v47  ;;  %v978_v58 = vunpack.c.h.bf16 %v1266_v41  ;;  %v1239_v44 = vld [vmem:[%s1947_s0 + $0x68] sm:$0xff]  }
  0x28   :  { %v174_v56 = vmul.f32 %v1369_v1, %v850_v48  ;;  %v241_v57 = vadd.f32 %v1374_v4, %v173_v49  ;;  %v567_v61 = vadd.f32 %v503_v53, %v239_v38  ;;  %v853_v63 = vunpack.c.l.bf16 %v1236_v50 }
  0x29   :  { %v1105_v60 = vpack.c.bf16 %v630_v52, %v629_v51  ;;  %v437_v62 = vmul.f32 %v1382_v8, %v977_v54  ;;  %v568_v0 = vadd.f32 %v504_v55, %v240_v46  ;;  %v438_v3 = vmul.f32 %v1382_v8, %v978_v58 }
  0x2a   :  { %v242_v2 = vadd.f32 %v1374_v4, %v174_v56  ;;  %v854_v5 = vunpack.c.h.bf16 %v1236_v50  ;;  %v631_v7 = vmax.f32 %v567_v61, 0.0  ;;  %v175_v10 = vmul.f32 %v1369_v1, %v853_v63 }
  0x2b   :  { %1295 = vst [vmem:[%s1953_s6 + $0x38] sm:$0xff] %v1105_v60   ;;  %v505_v9 = vadd.f32 %v1389_v11, %v437_v62  ;;  %v981_v12 = vunpack.c.l.bf16 %v1267_v59  ;;  %v632_v13 = vmax.f32 %v568_v0, 0.0  ;;  %v506_v14 = vadd.f32 %v1389_v11, %v438_v3  ;;  %v1240_v3 = vld [vmem:[%s1947_s0 + $0x70] sm:$0xff]  }
  0x2c   :  { %v176_v15 = vmul.f32 %v1369_v1, %v854_v5  ;;  %v982_v16 = vunpack.c.h.bf16 %v1267_v59  ;;  %v243_v18 = vadd.f32 %v1374_v4, %v175_v10  ;;  %v857_v20 = vunpack.c.l.bf16 %v1237_v6 }
  0x2d   :  { %v569_v17 = vadd.f32 %v505_v9, %v241_v57  ;;  %v439_v19 = vmul.f32 %v1382_v8, %v981_v12  ;;  %v1110_v22 = vpack.c.bf16 %v632_v13, %v631_v7  ;;  %v570_v23 = vadd.f32 %v506_v14, %v242_v2  ;;  %v1270_v57 = vld [vmem:[%s1950_s3 + $0x68] sm:$0xff]  }
  0x2e   :  { %v244_v24 = vadd.f32 %v1374_v4, %v176_v15  ;;  %v440_v25 = vmul.f32 %v1382_v8, %v982_v16  ;;  %v858_v29 = vunpack.c.h.bf16 %v1237_v6  ;;  %v177_v30 = vmul.f32 %v1369_v1, %v857_v20  ;;  %v1271_v15 = vld [vmem:[%s1950_s3 + $0x70] sm:$0xff]  }
  0x2f   :  { %v633_v27 = vmax.f32 %v569_v17, 0.0  ;;  %v507_v28 = vadd.f32 %v1389_v11, %v439_v19  ;;  %1296 = vst [vmem:[%s1953_s6 + $0x40] sm:$0xff] %v1110_v22   ;;  %v634_v31 = vmax.f32 %v570_v23, 0.0  ;;  %v985_v33 = vunpack.c.l.bf16 %v1268_v21 }
  0x30   :  { %v508_v32 = vadd.f32 %v1389_v11, %v440_v25  ;;  %v986_v34 = vunpack.c.h.bf16 %v1268_v21  ;;  %v178_v36 = vmul.f32 %v1369_v1, %v858_v29  ;;  %v245_v37 = vadd.f32 %v1374_v4, %v177_v30 }
  0x31   :  { %v571_v35 = vadd.f32 %v507_v28, %v243_v18  ;;  %v861_v38 = vunpack.c.l.bf16 %v1238_v26  ;;  %v1115_v40 = vpack.c.bf16 %v634_v31, %v633_v27  ;;  %v441_v42 = vmul.f32 %v1382_v8, %v985_v33 }
  0x32   :  { %v572_v41 = vadd.f32 %v508_v32, %v244_v24  ;;  %v442_v43 = vmul.f32 %v1382_v8, %v986_v34  ;;  %v246_v46 = vadd.f32 %v1374_v4, %v178_v36  ;;  %v862_v47 = vunpack.c.h.bf16 %v1238_v26  ;;  %v1241_v24 = vld [vmem:[%s1947_s0 + $0x78] sm:$0xff]  }
  0x33   :  { %v635_v45 = vmax.f32 %v571_v35, 0.0  ;;  %v179_v48 = vmul.f32 %v1369_v1, %v861_v38  ;;  %1297 = vst [vmem:[%s1953_s6 + $0x48] sm:$0xff] %v1115_v40   ;;  %v509_v50 = vadd.f32 %v1389_v11, %v441_v42  ;;  %v989_v52 = vunpack.c.l.bf16 %v1269_v39  ;;  %v1242_v42 = vld [vmem:[%s1947_s0 + $0x80] sm:$0xff]  }
  0x34   :  { %v636_v49 = vmax.f32 %v572_v41, 0.0  ;;  %v510_v51 = vadd.f32 %v1389_v11, %v442_v43  ;;  %v180_v53 = vmul.f32 %v1369_v1, %v862_v47  ;;  %v990_v55 = vunpack.c.h.bf16 %v1269_v39 }
  0x35   :  { %v247_v54 = vadd.f32 %v1374_v4, %v179_v48  ;;  %v865_v56 = vunpack.c.l.bf16 %v1239_v44  ;;  %v573_v59 = vadd.f32 %v509_v50, %v245_v37  ;;  %v443_v61 = vmul.f32 %v1382_v8, %v989_v52  ;;  %v1272_v37 = vld [vmem:[%s1950_s3 + $0x78] sm:$0xff]  }
  0x36   :  { %v1120_v58 = vpack.c.bf16 %v636_v49, %v635_v45  ;;  %v574_v60 = vadd.f32 %v510_v51, %v246_v46  ;;  %v248_v62 = vadd.f32 %v1374_v4, %v180_v53  ;;  %v444_v63 = vmul.f32 %v1382_v8, %v990_v55  ;;  %v1273_v55 = vld [vmem:[%s1950_s3 + $0x80] sm:$0xff]  }
  0x37   :  { %v866_v0 = vunpack.c.h.bf16 %v1239_v44  ;;  %v181_v2 = vmul.f32 %v1369_v1, %v865_v56  ;;  %v637_v5 = vmax.f32 %v573_v59, 0.0  ;;  %v511_v7 = vadd.f32 %v1389_v11, %v443_v61 }
  0x38   :  { %1298 = vst [vmem:[%s1953_s6 + $0x50] sm:$0xff] %v1120_v58   ;;  %v638_v6 = vmax.f32 %v574_v60, 0.0  ;;  %v993_v9 = vunpack.c.l.bf16 %v1270_v57  ;;  %v512_v10 = vadd.f32 %v1389_v11, %v444_v63  ;;  %v994_v14 = vunpack.c.h.bf16 %v1270_v57  ;;  %v1243_v60 = vld [vmem:[%s1947_s0 + $0x88] sm:$0xff]  }
  0x39   :  { %v182_v12 = vmul.f32 %v1369_v1, %v866_v0  ;;  %v249_v13 = vadd.f32 %v1374_v4, %v181_v2  ;;  %v575_v17 = vadd.f32 %v511_v7, %v247_v54  ;;  %v869_v19 = vunpack.c.l.bf16 %v1240_v3 }
  0x3a   :  { %v1125_v16 = vpack.c.bf16 %v638_v6, %v637_v5  ;;  %v445_v18 = vmul.f32 %v1382_v8, %v993_v9  ;;  %v576_v20 = vadd.f32 %v512_v10, %v248_v62  ;;  %v446_v22 = vmul.f32 %v1382_v8, %v994_v14 }
  0x3b   :  { %v250_v21 = vadd.f32 %v1374_v4, %v182_v12  ;;  %v870_v23 = vunpack.c.h.bf16 %v1240_v3  ;;  %v639_v25 = vmax.f32 %v575_v17, 0.0  ;;  %v183_v27 = vmul.f32 %v1369_v1, %v869_v19 }
  0x3c   :  { %1299 = vst [vmem:[%s1953_s6 + $0x58] sm:$0xff] %v1125_v16   ;;  %v513_v26 = vadd.f32 %v1389_v11, %v445_v18  ;;  %v997_v28 = vunpack.c.l.bf16 %v1271_v15  ;;  %v640_v29 = vmax.f32 %v576_v20, 0.0  ;;  %v514_v30 = vadd.f32 %v1389_v11, %v446_v22  ;;  %v1244_v22 = vld [vmem:[%s1947_s0 + $0x90] sm:$0xff]  }
  0x3d   :  { %v184_v31 = vmul.f32 %v1369_v1, %v870_v23  ;;  %v998_v32 = vunpack.c.h.bf16 %v1271_v15  ;;  %v251_v34 = vadd.f32 %v1374_v4, %v183_v27  ;;  %v873_v36 = vunpack.c.l.bf16 %v1241_v24 }
  0x3e   :  { %v577_v33 = vadd.f32 %v513_v26, %v249_v13  ;;  %v447_v35 = vmul.f32 %v1382_v8, %v997_v28  ;;  %v1130_v38 = vpack.c.bf16 %v640_v29, %v639_v25  ;;  %v578_v39 = vadd.f32 %v514_v30, %v250_v21  ;;  %v1274_v13 = vld [vmem:[%s1950_s3 + $0x88] sm:$0xff]  }
  0x3f   :  { %v252_v40 = vadd.f32 %v1374_v4, %v184_v31  ;;  %v448_v41 = vmul.f32 %v1382_v8, %v998_v32  ;;  %v874_v45 = vunpack.c.h.bf16 %v1241_v24  ;;  %v185_v46 = vmul.f32 %v1369_v1, %v873_v36  ;;  %v1275_v31 = vld [vmem:[%s1950_s3 + $0x90] sm:$0xff]  }
  0x40   :  { %v641_v43 = vmax.f32 %v577_v33, 0.0  ;;  %v515_v44 = vadd.f32 %v1389_v11, %v447_v35  ;;  %1300 = vst [vmem:[%s1953_s6 + $0x60] sm:$0xff] %v1130_v38   ;;  %v642_v47 = vmax.f32 %v578_v39, 0.0  ;;  %v1001_v49 = vunpack.c.l.bf16 %v1272_v37 }
  0x41   :  { %v516_v48 = vadd.f32 %v1389_v11, %v448_v41  ;;  %v1002_v50 = vunpack.c.h.bf16 %v1272_v37  ;;  %v186_v52 = vmul.f32 %v1369_v1, %v874_v45  ;;  %v253_v53 = vadd.f32 %v1374_v4, %v185_v46 }
  0x42   :  { %v579_v51 = vadd.f32 %v515_v44, %v251_v34  ;;  %v877_v54 = vunpack.c.l.bf16 %v1242_v42  ;;  %v1135_v56 = vpack.c.bf16 %v642_v47, %v641_v43  ;;  %v449_v58 = vmul.f32 %v1382_v8, %v1001_v49 }
  0x43   :  { %v580_v57 = vadd.f32 %v516_v48, %v252_v40  ;;  %v450_v59 = vmul.f32 %v1382_v8, %v1002_v50  ;;  %v254_v62 = vadd.f32 %v1374_v4, %v186_v52  ;;  %v878_v63 = vunpack.c.h.bf16 %v1242_v42  ;;  %v1245_v40 = vld [vmem:[%s1947_s0 + $0x98] sm:$0xff]  }
  0x44   :  { %v643_v61 = vmax.f32 %v579_v51, 0.0  ;;  %v187_v0 = vmul.f32 %v1369_v1, %v877_v54  ;;  %1301 = vst [vmem:[%s1953_s6 + $0x68] sm:$0xff] %v1135_v56   ;;  %v517_v3 = vadd.f32 %v1389_v11, %v449_v58  ;;  %v1005_v6 = vunpack.c.l.bf16 %v1273_v55  ;;  %v1246_v58 = vld [vmem:[%s1947_s0 + $0xa0] sm:$0xff]  }
  0x45   :  { %v644_v2 = vmax.f32 %v580_v57, 0.0  ;;  %v518_v5 = vadd.f32 %v1389_v11, %v450_v59  ;;  %v188_v7 = vmul.f32 %v1369_v1, %v878_v63  ;;  %v1006_v10 = vunpack.c.h.bf16 %v1273_v55 }
  0x46   :  { %v255_v9 = vadd.f32 %v1374_v4, %v187_v0  ;;  %v881_v12 = vunpack.c.l.bf16 %v1243_v60  ;;  %v581_v15 = vadd.f32 %v517_v3, %v253_v53  ;;  %v451_v17 = vmul.f32 %v1382_v8, %v1005_v6  ;;  %v1276_v53 = vld [vmem:[%s1950_s3 + $0x98] sm:$0xff]  }
  0x47   :  { %v1140_v14 = vpack.c.bf16 %v644_v2, %v643_v61  ;;  %v582_v16 = vadd.f32 %v518_v5, %v254_v62  ;;  %v256_v18 = vadd.f32 %v1374_v4, %v188_v7  ;;  %v452_v19 = vmul.f32 %v1382_v8, %v1006_v10  ;;  %v1277_v10 = vld [vmem:[%s1950_s3 + $0xa0] sm:$0xff]  }
  0x48   :  { %v882_v20 = vunpack.c.h.bf16 %v1243_v60  ;;  %v189_v21 = vmul.f32 %v1369_v1, %v881_v12  ;;  %v645_v23 = vmax.f32 %v581_v15, 0.0  ;;  %v519_v25 = vadd.f32 %v1389_v11, %v451_v17 }
  0x49   :  { %1302 = vst [vmem:[%s1953_s6 + $0x70] sm:$0xff] %v1140_v14   ;;  %v646_v24 = vmax.f32 %v582_v16, 0.0  ;;  %v1009_v26 = vunpack.c.l.bf16 %v1274_v13  ;;  %v520_v27 = vadd.f32 %v1389_v11, %v452_v19  ;;  %v1010_v30 = vunpack.c.h.bf16 %v1274_v13  ;;  %v1247_v16 = vld [vmem:[%s1947_s0 + $0xa8] sm:$0xff]  }
  0x4a   :  { %v190_v28 = vmul.f32 %v1369_v1, %v882_v20  ;;  %v257_v29 = vadd.f32 %v1374_v4, %v189_v21  ;;  %v583_v33 = vadd.f32 %v519_v25, %v255_v9  ;;  %v885_v35 = vunpack.c.l.bf16 %v1244_v22 }
  0x4b   :  { %v1145_v32 = vpack.c.bf16 %v646_v24, %v645_v23  ;;  %v453_v34 = vmul.f32 %v1382_v8, %v1009_v26  ;;  %v584_v36 = vadd.f32 %v520_v27, %v256_v18  ;;  %v454_v38 = vmul.f32 %v1382_v8, %v1010_v30 }
  0x4c   :  { %v258_v37 = vadd.f32 %v1374_v4, %v190_v28  ;;  %v886_v39 = vunpack.c.h.bf16 %v1244_v22  ;;  %v647_v41 = vmax.f32 %v583_v33, 0.0  ;;  %v191_v43 = vmul.f32 %v1369_v1, %v885_v35 }
  0x4d   :  { %1303 = vst [vmem:[%s1953_s6 + $0x78] sm:$0xff] %v1145_v32   ;;  %v521_v42 = vadd.f32 %v1389_v11, %v453_v34  ;;  %v1013_v44 = vunpack.c.l.bf16 %v1275_v31  ;;  %v648_v45 = vmax.f32 %v584_v36, 0.0  ;;  %v522_v46 = vadd.f32 %v1389_v11, %v454_v38  ;;  %v1248_v38 = vld [vmem:[%s1947_s0 + $0xb0] sm:$0xff]  }
  0x4e   :  { %v192_v47 = vmul.f32 %v1369_v1, %v886_v39  ;;  %v1014_v48 = vunpack.c.h.bf16 %v1275_v31  ;;  %v259_v50 = vadd.f32 %v1374_v4, %v191_v43  ;;  %v889_v52 = vunpack.c.l.bf16 %v1245_v40 }
  0x4f   :  { %v585_v49 = vadd.f32 %v521_v42, %v257_v29  ;;  %v455_v51 = vmul.f32 %v1382_v8, %v1013_v44  ;;  %v1150_v54 = vpack.c.bf16 %v648_v45, %v647_v41  ;;  %v586_v55 = vadd.f32 %v522_v46, %v258_v37  ;;  %v1278_v29 = vld [vmem:[%s1950_s3 + $0xa8] sm:$0xff]  }
  0x50   :  { %v260_v56 = vadd.f32 %v1374_v4, %v192_v47  ;;  %v456_v57 = vmul.f32 %v1382_v8, %v1014_v48  ;;  %v890_v61 = vunpack.c.h.bf16 %v1245_v40  ;;  %v193_v62 = vmul.f32 %v1369_v1, %v889_v52  ;;  %v1279_v47 = vld [vmem:[%s1950_s3 + $0xb0] sm:$0xff]  }
  0x51   :  { %v649_v59 = vmax.f32 %v585_v49, 0.0  ;;  %v523_v60 = vadd.f32 %v1389_v11, %v455_v51  ;;  %1304 = vst [vmem:[%s1953_s6 + $0x80] sm:$0xff] %v1150_v54   ;;  %v650_v63 = vmax.f32 %v586_v55, 0.0  ;;  %v1017_v2 = vunpack.c.l.bf16 %v1276_v53 }
  0x52   :  { %v524_v0 = vadd.f32 %v1389_v11, %v456_v57  ;;  %v1018_v3 = vunpack.c.h.bf16 %v1276_v53  ;;  %v194_v6 = vmul.f32 %v1369_v1, %v890_v61  ;;  %v261_v7 = vadd.f32 %v1374_v4, %v193_v62 }
  0x53   :  { %v587_v5 = vadd.f32 %v523_v60, %v259_v50  ;;  %v893_v9 = vunpack.c.l.bf16 %v1246_v58  ;;  %v1155_v12 = vpack.c.bf16 %v650_v63, %v649_v59  ;;  %v457_v14 = vmul.f32 %v1382_v8, %v1017_v2 }
  0x54   :  { %v588_v13 = vadd.f32 %v524_v0, %v260_v56  ;;  %v458_v15 = vmul.f32 %v1382_v8, %v1018_v3  ;;  %v262_v18 = vadd.f32 %v1374_v4, %v194_v6  ;;  %v894_v19 = vunpack.c.h.bf16 %v1246_v58  ;;  %v1249_v56 = vld [vmem:[%s1947_s0 + $0xb8] sm:$0xff]  }
  0x55   :  { %v651_v17 = vmax.f32 %v587_v5, 0.0  ;;  %v195_v20 = vmul.f32 %v1369_v1, %v893_v9  ;;  %1305 = vst [vmem:[%s1953_s6 + $0x88] sm:$0xff] %v1155_v12   ;;  %v525_v22 = vadd.f32 %v1389_v11, %v457_v14  ;;  %v1021_v24 = vunpack.c.l.bf16 %v1277_v10  ;;  %v1250_v14 = vld [vmem:[%s1947_s0 + $0xc0] sm:$0xff]  }
  0x56   :  { %v652_v21 = vmax.f32 %v588_v13, 0.0  ;;  %v526_v23 = vadd.f32 %v1389_v11, %v458_v15  ;;  %v196_v25 = vmul.f32 %v1369_v1, %v894_v19  ;;  %v1022_v27 = vunpack.c.h.bf16 %v1277_v10 }
  0x57   :  { %v263_v26 = vadd.f32 %v1374_v4, %v195_v20  ;;  %v897_v28 = vunpack.c.l.bf16 %v1247_v16  ;;  %v589_v31 = vadd.f32 %v525_v22, %v261_v7  ;;  %v459_v33 = vmul.f32 %v1382_v8, %v1021_v24  ;;  %v1280_v7 = vld [vmem:[%s1950_s3 + $0xb8] sm:$0xff]  }
  0x58   :  { %v1160_v30 = vpack.c.bf16 %v652_v21, %v651_v17  ;;  %v590_v32 = vadd.f32 %v526_v23, %v262_v18  ;;  %v264_v34 = vadd.f32 %v1374_v4, %v196_v25  ;;  %v460_v35 = vmul.f32 %v1382_v8, %v1022_v27  ;;  %v1281_v27 = vld [vmem:[%s1950_s3 + $0xc0] sm:$0xff]  }
  0x59   :  { %v898_v36 = vunpack.c.h.bf16 %v1247_v16  ;;  %v197_v37 = vmul.f32 %v1369_v1, %v897_v28  ;;  %v653_v39 = vmax.f32 %v589_v31, 0.0  ;;  %v527_v41 = vadd.f32 %v1389_v11, %v459_v33 }
  0x5a   :  { %1306 = vst [vmem:[%s1953_s6 + $0x90] sm:$0xff] %v1160_v30   ;;  %v654_v40 = vmax.f32 %v590_v32, 0.0  ;;  %v1025_v42 = vunpack.c.l.bf16 %v1278_v29  ;;  %v528_v43 = vadd.f32 %v1389_v11, %v460_v35  ;;  %v1026_v46 = vunpack.c.h.bf16 %v1278_v29  ;;  %v1251_v32 = vld [vmem:[%s1947_s0 + $0xc8] sm:$0xff]  }
  0x5b   :  { %v198_v44 = vmul.f32 %v1369_v1, %v898_v36  ;;  %v265_v45 = vadd.f32 %v1374_v4, %v197_v37  ;;  %v591_v49 = vadd.f32 %v527_v41, %v263_v26  ;;  %v901_v51 = vunpack.c.l.bf16 %v1248_v38 }
  0x5c   :  { %v1165_v48 = vpack.c.bf16 %v654_v40, %v653_v39  ;;  %v461_v50 = vmul.f32 %v1382_v8, %v1025_v42  ;;  %v592_v52 = vadd.f32 %v528_v43, %v264_v34  ;;  %v462_v54 = vmul.f32 %v1382_v8, %v1026_v46 }
  0x5d   :  { %v266_v53 = vadd.f32 %v1374_v4, %v198_v44  ;;  %v902_v55 = vunpack.c.h.bf16 %v1248_v38  ;;  %v655_v57 = vmax.f32 %v591_v49, 0.0  ;;  %v199_v59 = vmul.f32 %v1369_v1, %v901_v51 }
  0x5e   :  { %1307 = vst [vmem:[%s1953_s6 + $0x98] sm:$0xff] %v1165_v48   ;;  %v529_v58 = vadd.f32 %v1389_v11, %v461_v50  ;;  %v1029_v60 = vunpack.c.l.bf16 %v1279_v47  ;;  %v656_v61 = vmax.f32 %v592_v52, 0.0  ;;  %v530_v62 = vadd.f32 %v1389_v11, %v462_v54  ;;  %v1252_v54 = vld [vmem:[%s1947_s0 + $0xd0] sm:$0xff]  }
  0x5f   :  { %v200_v63 = vmul.f32 %v1369_v1, %v902_v55  ;;  %v1030_v0 = vunpack.c.h.bf16 %v1279_v47  ;;  %v267_v3 = vadd.f32 %v1374_v4, %v199_v59  ;;  %v905_v6 = vunpack.c.l.bf16 %v1249_v56 }
  0x60   :  { %v593_v2 = vadd.f32 %v529_v58, %v265_v45  ;;  %v463_v5 = vmul.f32 %v1382_v8, %v1029_v60  ;;  %v1170_v9 = vpack.c.bf16 %v656_v61, %v655_v57  ;;  %v594_v10 = vadd.f32 %v530_v62, %v266_v53  ;;  %v1282_v45 = vld [vmem:[%s1950_s3 + $0xc8] sm:$0xff]  }
  0x61   :  { %v268_v12 = vadd.f32 %v1374_v4, %v200_v63  ;;  %v464_v13 = vmul.f32 %v1382_v8, %v1030_v0  ;;  %v906_v17 = vunpack.c.h.bf16 %v1249_v56  ;;  %v201_v18 = vmul.f32 %v1369_v1, %v905_v6  ;;  %v1283_v63 = vld [vmem:[%s1950_s3 + $0xd0] sm:$0xff]  }
  0x62   :  { %v657_v15 = vmax.f32 %v593_v2, 0.0  ;;  %v531_v16 = vadd.f32 %v1389_v11, %v463_v5  ;;  %1308 = vst [vmem:[%s1953_s6 + $0xa0] sm:$0xff] %v1170_v9   ;;  %v658_v19 = vmax.f32 %v594_v10, 0.0  ;;  %v1033_v21 = vunpack.c.l.bf16 %v1280_v7 }
  0x63   :  { %v532_v20 = vadd.f32 %v1389_v11, %v464_v13  ;;  %v1034_v22 = vunpack.c.h.bf16 %v1280_v7  ;;  %v202_v24 = vmul.f32 %v1369_v1, %v906_v17  ;;  %v269_v25 = vadd.f32 %v1374_v4, %v201_v18 }
  0x64   :  { %v595_v23 = vadd.f32 %v531_v16, %v267_v3  ;;  %v909_v26 = vunpack.c.l.bf16 %v1250_v14  ;;  %v1175_v28 = vpack.c.bf16 %v658_v19, %v657_v15  ;;  %v465_v30 = vmul.f32 %v1382_v8, %v1033_v21  ;;  %v1836_v16 = vld [vmem:[%s1952_s5] ss:$0 sm:$0xff] }
  0x65   :  { %v596_v29 = vadd.f32 %v532_v20, %v268_v12  ;;  %v466_v31 = vmul.f32 %v1382_v8, %v1034_v22  ;;  %v270_v34 = vadd.f32 %v1374_v4, %v202_v24  ;;  %v910_v35 = vunpack.c.h.bf16 %v1250_v14  ;;  %v1830_v14 = vld [vmem:[%s1948_s1] ss:$0 sm:$0xff] }
  0x66   :  { %v659_v33 = vmax.f32 %v595_v23, 0.0  ;;  %v203_v36 = vmul.f32 %v1369_v1, %v909_v26  ;;  %1309 = vst [vmem:[%s1953_s6 + $0xa8] sm:$0xff] %v1175_v28   ;;  %v533_v38 = vadd.f32 %v1389_v11, %v465_v30  ;;  %v1037_v40 = vunpack.c.l.bf16 %v1281_v27  ;;  %v1843_v20 = vld [vmem:[%s1949_s2] ss:$0 sm:$0xff] }
  0x67   :  { %v660_v37 = vmax.f32 %v596_v29, 0.0  ;;  %v534_v39 = vadd.f32 %v1389_v11, %v466_v31  ;;  %v204_v41 = vmul.f32 %v1369_v1, %v910_v35  ;;  %v1038_v43 = vunpack.c.h.bf16 %v1281_v27  ;;  %v1849_v22 = vld [vmem:[%s1951_s4] ss:$0 sm:$0xff] }
  0x68   :  { %v271_v42 = vadd.f32 %v1374_v4, %v203_v36  ;;  %v913_v44 = vunpack.c.l.bf16 %v1251_v32  ;;  %v597_v47 = vadd.f32 %v533_v38, %v269_v25  ;;  %v467_v49 = vmul.f32 %v1382_v8, %v1037_v40  ;;  %v1284_v25 = vld [vmem:[%s1950_s3 + $0xd8] sm:$0xff]   ;;  %v1254_v30 = vld [vmem:[%s1947_s0 + $0xe0] sm:$0xff]  }
  0x69   :  { %v1180_v46 = vpack.c.bf16 %v660_v37, %v659_v33  ;;  %v598_v48 = vadd.f32 %v534_v39, %v270_v34  ;;  %v272_v50 = vadd.f32 %v1374_v4, %v204_v41  ;;  %v468_v51 = vmul.f32 %v1382_v8, %v1038_v43  ;;  %v1285_v43 = vld [vmem:[%s1950_s3 + $0xe0] sm:$0xff]  }
  0x6a   :  { %v914_v52 = vunpack.c.h.bf16 %v1251_v32  ;;  %v205_v53 = vmul.f32 %v1369_v1, %v913_v44  ;;  %v661_v55 = vmax.f32 %v597_v47, 0.0  ;;  %v535_v57 = vadd.f32 %v1389_v11, %v467_v49 }
  0x6b   :  { %1310 = vst [vmem:[%s1953_s6 + $0xb0] sm:$0xff] %v1180_v46   ;;  %v662_v56 = vmax.f32 %v598_v48, 0.0  ;;  %v1041_v58 = vunpack.c.l.bf16 %v1282_v45  ;;  %v536_v59 = vadd.f32 %v1389_v11, %v468_v51  ;;  %v1042_v62 = vunpack.c.h.bf16 %v1282_v45  ;;  %v1255_v48 = vld [vmem:[%s1947_s0 + $0xe8] sm:$0xff]  }
  0x6c   :  { %v206_v60 = vmul.f32 %v1369_v1, %v914_v52  ;;  %v273_v61 = vadd.f32 %v1374_v4, %v205_v53  ;;  %v599_v2 = vadd.f32 %v535_v57, %v271_v42  ;;  %v917_v5 = vunpack.c.l.bf16 %v1252_v54  ;;  %v1253_v1 = vld [vmem:[%s1947_s0 + $0xd8] sm:$0xff]  }
  0x6d   :  { %v1185_v0 = vpack.c.bf16 %v662_v56, %v661_v55  ;;  %v469_v3 = vmul.f32 %v1382_v8, %v1041_v58  ;;  %v600_v6 = vadd.f32 %v536_v59, %v272_v50  ;;  %v470_v9 = vmul.f32 %v1382_v8, %v1042_v62 }
  0x6e   :  { %v274_v7 = vadd.f32 %v1374_v4, %v206_v60  ;;  %v918_v10 = vunpack.c.h.bf16 %v1252_v54  ;;  %v663_v12 = vmax.f32 %v599_v2, 0.0  ;;  %v207_v4 = vmul.f32 %v1830_v14, %v917_v5 }
  0x6f   :  { %1311 = vst [vmem:[%s1953_s6 + $0xb8] sm:$0xff] %v1185_v0   ;;  %v537_v13 = vadd.f32 %v1389_v11, %v469_v3  ;;  %v1045_v8 = vunpack.c.l.bf16 %v1283_v63  ;;  %v664_v15 = vmax.f32 %v600_v6, 0.0  ;;  %v538_v17 = vadd.f32 %v1836_v16, %v470_v9  ;;  %v1256_v9 = vld [vmem:[%s1947_s0 + $0xf0] sm:$0xff]  }
  0x70   :  { %v208_v18 = vmul.f32 %v1830_v14, %v918_v10  ;;  %v1046_v19 = vunpack.c.h.bf16 %v1283_v63  ;;  %v275_v21 = vadd.f32 %v1843_v20, %v207_v4  ;;  %v921_v24 = vunpack.c.l.bf16 %v1253_v1 }
  0x71   :  { %v601_v11 = vadd.f32 %v537_v13, %v273_v61  ;;  %v471_v23 = vmul.f32 %v1849_v22, %v1045_v8  ;;  %v1190_v26 = vpack.c.bf16 %v664_v15, %v663_v12  ;;  %v602_v27 = vadd.f32 %v538_v17, %v274_v7  ;;  %v1286_v61 = vld [vmem:[%s1950_s3 + $0xe8] sm:$0xff]  }
  0x72   :  { %v276_v28 = vadd.f32 %v1843_v20, %v208_v18  ;;  %v472_v29 = vmul.f32 %v1849_v22, %v1046_v19  ;;  %v922_v33 = vunpack.c.h.bf16 %v1253_v1  ;;  %v209_v34 = vmul.f32 %v1830_v14, %v921_v24  ;;  %v1287_v18 = vld [vmem:[%s1950_s3 + $0xf0] sm:$0xff]  }
  0x73   :  { %v665_v31 = vmax.f32 %v601_v11, 0.0  ;;  %v539_v32 = vadd.f32 %v1836_v16, %v471_v23  ;;  %1312 = vst [vmem:[%s1953_s6 + $0xc0] sm:$0xff] %v1190_v26   ;;  %v666_v35 = vmax.f32 %v602_v27, 0.0  ;;  %v1049_v37 = vunpack.c.l.bf16 %v1284_v25 }
  0x74   :  { %v540_v36 = vadd.f32 %v1836_v16, %v472_v29  ;;  %v1050_v38 = vunpack.c.h.bf16 %v1284_v25  ;;  %v210_v40 = vmul.f32 %v1830_v14, %v922_v33  ;;  %v277_v41 = vadd.f32 %v1843_v20, %v209_v34 }
  0x75   :  { %v603_v39 = vadd.f32 %v539_v32, %v275_v21  ;;  %v925_v42 = vunpack.c.l.bf16 %v1254_v30  ;;  %v1195_v44 = vpack.c.bf16 %v666_v35, %v665_v31  ;;  %v473_v46 = vmul.f32 %v1849_v22, %v1049_v37 }
  0x76   :  { %v604_v45 = vadd.f32 %v540_v36, %v276_v28  ;;  %v474_v47 = vmul.f32 %v1849_v22, %v1050_v38  ;;  %v278_v50 = vadd.f32 %v1843_v20, %v210_v40  ;;  %v926_v51 = vunpack.c.h.bf16 %v1254_v30  ;;  %v1257_v28 = vld [vmem:[%s1947_s0 + $0xf8] sm:$0xff]  }
  0x77   :  { %v667_v49 = vmax.f32 %v603_v39, 0.0  ;;  %v211_v52 = vmul.f32 %v1830_v14, %v925_v42  ;;  %1313 = vst [vmem:[%s1953_s6 + $0xc8] sm:$0xff] %v1195_v44   ;;  %v541_v54 = vadd.f32 %v1836_v16, %v473_v46  ;;  %v1053_v56 = vunpack.c.l.bf16 %v1285_v43 }
  0x78   :  { %v668_v53 = vmax.f32 %v604_v45, 0.0  ;;  %v542_v55 = vadd.f32 %v1836_v16, %v474_v47  ;;  %v212_v57 = vmul.f32 %v1830_v14, %v926_v51  ;;  %v1054_v59 = vunpack.c.h.bf16 %v1285_v43 }
  0x79   :  { %v279_v58 = vadd.f32 %v1843_v20, %v211_v52  ;;  %v929_v60 = vunpack.c.l.bf16 %v1255_v48  ;;  %v605_v63 = vadd.f32 %v541_v54, %v277_v41  ;;  %v475_v2 = vmul.f32 %v1849_v22, %v1053_v56  ;;  %v1288_v41 = vld [vmem:[%s1950_s3 + $0xf8] sm:$0xff]  }
  0x7a   :  { %v1200_v62 = vpack.c.bf16 %v668_v53, %v667_v49  ;;  %v606_v0 = vadd.f32 %v542_v55, %v278_v50  ;;  %v280_v3 = vadd.f32 %v1843_v20, %v212_v57  ;;  %v476_v5 = vmul.f32 %v1849_v22, %v1054_v59 }
  0x7b   :  { %v930_v6 = vunpack.c.h.bf16 %v1255_v48  ;;  %v213_v7 = vmul.f32 %v1830_v14, %v929_v60  ;;  %v669_v10 = vmax.f32 %v605_v63, 0.0  ;;  %v543_v12 = vadd.f32 %v1836_v16, %v475_v2 }
  0x7c   :  { %1314 = vst [vmem:[%s1953_s6 + $0xd0] sm:$0xff] %v1200_v62   ;;  %v670_v1 = vmax.f32 %v606_v0, 0.0  ;;  %v1057_v13 = vunpack.c.l.bf16 %v1286_v61  ;;  %v544_v4 = vadd.f32 %v1836_v16, %v476_v5  ;;  %v1058_v17 = vunpack.c.h.bf16 %v1286_v61 }
  0x7d   :  { %v214_v8 = vmul.f32 %v1830_v14, %v930_v6  ;;  %v281_v15 = vadd.f32 %v1843_v20, %v213_v7  ;;  %v607_v11 = vadd.f32 %v543_v12, %v279_v58  ;;  %v933_v23 = vunpack.c.l.bf16 %v1256_v9 }
  0x7e   :  { %v1205_v19 = vpack.c.bf16 %v670_v1, %v669_v10  ;;  %v477_v21 = vmul.f32 %v1849_v22, %v1057_v13  ;;  %v608_v24 = vadd.f32 %v544_v4, %v280_v3  ;;  %v478_v26 = vmul.f32 %v1849_v22, %v1058_v17 }
  0x7f   :  { %v282_v25 = vadd.f32 %v1843_v20, %v214_v8  ;;  %v934_v27 = vunpack.c.h.bf16 %v1256_v9  ;;  %v671_v29 = vmax.f32 %v607_v11, 0.0  ;;  %v215_v31 = vmul.f32 %v1830_v14, %v933_v23 }
  0x80   :  { %1315 = vst [vmem:[%s1953_s6 + $0xd8] sm:$0xff] %v1205_v19   ;;  %v545_v30 = vadd.f32 %v1836_v16, %v477_v21  ;;  %v1061_v32 = vunpack.c.l.bf16 %v1287_v18  ;;  %v672_v33 = vmax.f32 %v608_v24, 0.0  ;;  %v546_v34 = vadd.f32 %v1836_v16, %v478_v26 }
  0x81   :  { %v216_v35 = vmul.f32 %v1830_v14, %v934_v27  ;;  %v1062_v36 = vunpack.c.h.bf16 %v1287_v18  ;;  %v283_v38 = vadd.f32 %v1843_v20, %v215_v31  ;;  %v937_v40 = vunpack.c.l.bf16 %v1257_v28 }
  0x82   :  { %v609_v37 = vadd.f32 %v545_v30, %v281_v15  ;;  %v479_v39 = vmul.f32 %v1849_v22, %v1061_v32  ;;  %v1210_v42 = vpack.c.bf16 %v672_v33, %v671_v29  ;;  %v610_v43 = vadd.f32 %v546_v34, %v282_v25 }
  0x83   :  { %v284_v44 = vadd.f32 %v1843_v20, %v216_v35  ;;  %v480_v45 = vmul.f32 %v1849_v22, %v1062_v36  ;;  %v938_v48 = vunpack.c.h.bf16 %v1257_v28  ;;  %v217_v49 = vmul.f32 %v1830_v14, %v937_v40 }
  0x84   :  { %v673_v46 = vmax.f32 %v609_v37, 0.0  ;;  %v547_v47 = vadd.f32 %v1836_v16, %v479_v39  ;;  %1316 = vst [vmem:[%s1953_s6 + $0xe0] sm:$0xff] %v1210_v42   ;;  %v674_v50 = vmax.f32 %v610_v43, 0.0  ;;  %v1065_v52 = vunpack.c.l.bf16 %v1288_v41 }
  0x85   :  { %v548_v51 = vadd.f32 %v1836_v16, %v480_v45  ;;  %v1066_v53 = vunpack.c.h.bf16 %v1288_v41  ;;  %v218_v55 = vmul.f32 %v1830_v14, %v938_v48  ;;  %v285_v56 = vadd.f32 %v1843_v20, %v217_v49 }
  0x86   :  { %v611_v54 = vadd.f32 %v547_v47, %v283_v38  ;;  %v1215_v57 = vpack.c.bf16 %v674_v50, %v673_v46  ;;  %v481_v59 = vmul.f32 %v1849_v22, %v1065_v52 }
  0x87   :  { %v612_v58 = vadd.f32 %v548_v51, %v284_v44  ;;  %v482_v60 = vmul.f32 %v1849_v22, %v1066_v53  ;;  %v286_v62 = vadd.f32 %v1843_v20, %v218_v55 }
  0x88   :  { %v675_v61 = vmax.f32 %v611_v54, 0.0  ;;  %1317 = vst [vmem:[%s1953_s6 + $0xe8] sm:$0xff] %v1215_v57   ;;  %v549_v0 = vadd.f32 %v1836_v16, %v481_v59 }
  0x89   :  { %v676_v63 = vmax.f32 %v612_v58, 0.0  ;;  %v550_v14 = vadd.f32 %v1836_v16, %v482_v60 }
  0x8a   :  { %v613_v3 = vadd.f32 %v549_v0, %v285_v56 }
  0x8b   :  { %v1220_v2 = vpack.c.bf16 %v676_v63, %v675_v61  ;;  %v614_v5 = vadd.f32 %v550_v14, %v286_v62 }
  0x8c   :  { %v677_v22 = vmax.f32 %v613_v3, 0.0 }
  0x8d   :  { %1318 = vst [vmem:[%s1953_s6 + $0xf0] sm:$0xff] %v1220_v2   ;;  %v678_v6 = vmax.f32 %v614_v5, 0.0 }
  0x8f   :  { %v1225_v7 = vpack.c.bf16 %v678_v6, %v677_v22 }
  0x91   :  { %1319 = vst [vmem:[%s1953_s6 + $0xf8] sm:$0xff] %v1225_v7  }

// kernel: bottleneck_forward.6
= control target key start
LH: loop header
LB: loop body
LE: loop exit
PB: predicated region body
PF: predicated region fallthrough
CT: control target
= control target key end

     0   :  { %s7626_s21 = smov 0   ;;  %s9426_s0 = inlined_call_operand.vmem [shape: bf16[2,16,16,128], index: 0, kind: input, shape index: {}]   ;;  %s9427_s1 = inlined_call_operand.vmem [shape: f32[1,128], index: 1, kind: input, shape index: {}]   ;;  %s9428_s2 = inlined_call_operand.vmem [shape: f32[1,128], index: 2, kind: input, shape index: {}]   ;;  %s9429_s3 = inlined_call_operand.vmem [shape: bf16[3,384,128], index: 3, kind: input, shape index: {}]   ;;  %s9430_s4 = inlined_call_operand.vmem [shape: bf16[2,16,16,128], index: 4, kind: output, shape index: {0}]   ;;  %s9431_s5 = inlined_call_operand.vmem [shape: f32[2,8,128], index: 5, kind: output, shape index: {1}]   ;;  %s9432_s6 = inlined_call_operand.vmem [shape: f32[2,8,128], index: 6, kind: output, shape index: {2}]  }
   0x1 LB: > { %s6132_s22 = sadd.s32 4294967295, %s7588_s21   ;;  %p6136_p0 = scmp.ge.s32.totalorder %s7588_s21, 1  ;;  %s7588_s21 = sphi %s7626_s21, %s17_s21  }
   0x2   : > { %p217_p1 = scmp.lt.s32.totalorder %s7588_s21, 3 }
   0x4   : > { %p218_p2 = pnand %p6136_p0, %p217_p1 }
   0x6   : > { %221 = sbr.rel (%p218_p2) target bundleno = 1005 (0x3ed), region = 36 }
   0xb   : > { %v7282_v0 = vld [vmem:[%s9429_s3 + $0xf8] sm:$0xff]  ;;  %p255_p3 = scmp.lt.s32.totalorder %s6132_s22, 1  ;;  %v7590_v1 = vmov 0   ;;  %v7281_v2 = vld [vmem:[%s9429_s3 + $0xf0] sm:$0xff]  ;;  %v7280_v3 = vld [vmem:[%s9429_s3 + $0xe8] sm:$0xff]  ;;  %vm852_vm0 = vcmask 1043456  }
   0xc   : > { %474 = vst [vmem:[#allocation2] sm:$0xf] %v7590_v1  ;;  %3264 = vmatpush.bf16.msra.mxu0 %v7282_v0  ;;  %7545 = vmatpush.bf16.msra.mxu1 %v7282_v0  ;;  %v7662_v10 = vld [vmem:[%s9427_s1] ss:$0 sm:$0xff]  ;;  %v7278_v27 = vld [vmem:[%s9429_s3 + $0xd8] sm:$0xff]  ;;  %v7277_v32 = vld [vmem:[%s9429_s3 + $0xd0] sm:$0xff] }
   0xd   : > { %s9629_s22 = smov (!%p255_p3, %s6132_s22), 1  ;;  %7546 = vmatpush.bf16.msra.mxu2 %v7282_v0  ;;  %7547 = vmatpush.bf16.msra.mxu3 %v7282_v0  ;;  %475 = vst [vmem:[#allocation2 + $0x4] sm:$0xf] %v7590_v1  ;;  %v7673_v16 = vld [vmem:[%s9428_s2] ss:$0 sm:$0xff]  ;;  %v7276_v58 = vld [vmem:[%s9429_s3 + $0xc8] sm:$0xff] }
   0xe   : > { %s7153_s27 = sshll.u32 %s9629_s22, 7  ;;  %477 = vst [vmem:[#allocation2 + $0xc] sm:$0xf] %v7590_v1  ;;  %v7279_v17 = vld [vmem:[%s9429_s3 + $0xe0] sm:$0xff]  ;;  %vm528_vm1 = vsmask.f32 256 }
   0xf   : > { %s7650_s30 = scalar_lea.vmem %s9426_s0, %s7153_s27  ;;  %478 = vst [vmem:[#allocation2 + $0x10] sm:$0xf] %v7590_v1  ;;  %vm529_vm2 = vsmask.f32 4368  ;;  %vm853_vm3 = vsmask.f32 7938  ;;  %s9260_s11 = scalar_lea.vmem %s9430_s4, %s7153_s27 }
  0x10   : > { %3265 = vmatpush.bf16.msra.mxu0 %v7281_v2  ;;  %7548 = vmatpush.bf16.msra.mxu1 %v7281_v2  ;;  %v7372_v4 = vld [vmem:[%s7650_s30] sm:$0xff]   ;;  %v7515_v5 = vld [vmem:[%s7650_s30 + $0x8] sm:$0xff]   ;;  %480 = vst [vmem:[#allocation2 + $0x18] sm:$0xf] %v7590_v1  ;;  %v7517_v26 = vld [vmem:[%s7650_s30 + $0x18] sm:$0xff]   ;;  %vm859_vm6 = vcmask 1040384  }
  0x11   : > { %7549 = vmatpush.bf16.msra.mxu2 %v7281_v2  ;;  %7550 = vmatpush.bf16.msra.mxu3 %v7281_v2  ;;  %v7373_v6 = vunpack.c.l.bf16 %v7372_v4  ;;  %v7374_v7 = vunpack.c.h.bf16 %v7372_v4  ;;  %v7377_v8 = vunpack.c.l.bf16 %v7515_v5  ;;  %v7378_v9 = vunpack.c.h.bf16 %v7515_v5  ;;  %481 = vst [vmem:[#allocation2 + $0x1c] sm:$0xf] %v7590_v1  ;;  %v7518_v36 = vld [vmem:[%s7650_s30 + $0x20] sm:$0xff]   ;;  %vm7707_vm4 = vmor %vm528_vm1, %vm529_vm2  ;;  %v7205_v62 = vld [vmem:[%s9429_s3 + $0x10] sm:$0xff]  ;;  %s6141_s27 = sshll.u32 %s9629_s22, 3 }
  0x12   : > { %476 = vst [vmem:[#allocation2 + $0x8] sm:$0x1] %v7590_v1  ;;  %v7385_v34 = vunpack.c.l.bf16 %v7517_v26  ;;  %v7386_v35 = vunpack.c.h.bf16 %v7517_v26  ;;  %v7389_v50 = vunpack.c.l.bf16 %v7518_v36  ;;  %vm7720_vm5 = vmand %vm852_vm0, %vm853_vm3  ;;  %v7390_v4 = vunpack.c.h.bf16 %v7518_v36  ;;  %s268_s14 = scalar_lea.vmem %s9431_s5, %s6141_s27  ;;  %s272_s17 = scalar_lea.vmem %s9432_s6, %s6141_s27 }
  0x13   : > { %v969_v11 = vld [vmem:[#allocation2] sm:$0xf]  ;;  %v342_v12 = vmul.f32 %v7662_v10, %v7373_v6  ;;  %v343_v13 = vmul.f32 %v7662_v10, %v7374_v7  ;;  %v344_v14 = vmul.f32 %v7662_v10, %v7377_v8  ;;  %v345_v15 = vmul.f32 %v7662_v10, %v7378_v9  ;;  %479 = vst [vmem:[#allocation2 + $0x14] sm:$0x1] %v7590_v1  ;;  %vm8189_vm7 = vmand %vm859_vm6, %vm528_vm1 }
  0x14   : > { %1001 = vst [vmem:[#allocation3] sm:$0xf] %v969_v11  ;;  %3266 = vmatpush.bf16.msra.mxu0 %v7280_v3  ;;  %7551 = vmatpush.bf16.msra.mxu1 %v7280_v3  ;;  %v970_v21 = vld [vmem:[#allocation2 + $0x4] sm:$0xf]  ;;  %v348_v51 = vmul.f32 %v7662_v10, %v7385_v34  ;;  %v349_v57 = vmul.f32 %v7662_v10, %v7386_v35  ;;  %vm1081_vm8 = vsmask.f32 3328 }
  0x15   : > { %7552 = vmatpush.bf16.msra.mxu2 %v7280_v3  ;;  %7553 = vmatpush.bf16.msra.mxu3 %v7280_v3  ;;  %v378_v18 = vadd.f32 %v7673_v16, %v342_v12  ;;  %v379_v19 = vadd.f32 %v7673_v16, %v343_v13  ;;  %v380_v20 = vadd.f32 %v7673_v16, %v344_v14  ;;  %v855_v49 = vld [vmem:[#allocation2 + $0xc] sm:$0xf]  ;;  %v7275_v7 = vld [vmem:[%s9429_s3 + $0xc0] sm:$0xff]  ;;  %v7521_v12 = vld [vmem:[%s7650_s30 + $0x38] sm:$0xff]   ;;  %vm1082_vm9 = vsmask.f32 7440 }
  0x16   : > { %v381_v22 = vadd.f32 %v7673_v16, %v345_v15  ;;  %1002 = vst [vmem:[#allocation3 + $0xc] sm:$0xf] %v970_v21  ;;  %v350_v5 = vmul.f32 %v7662_v10, %v7389_v50  ;;  %v384_v6 = vadd.f32 %v7673_v16, %v348_v51  ;;  %v385_v8 = vadd.f32 %v7673_v16, %v349_v57  ;;  %v7519_v21 = vld [vmem:[%s7650_s30 + $0x28] sm:$0xff]   ;;  %vm8206_vm12 = vmor %vm1081_vm8, %vm1082_vm9 }
  0x17   : > { %v410_v23 = vmax.f32 %v378_v18, 0.0  ;;  %v411_v24 = vmax.f32 %v379_v19, 0.0  ;;  %v412_v25 = vmax.f32 %v380_v20, 0.0  ;;  %482 = vst [vmem:[#allocation2 + $0x20] sm:$0x1] %v7590_v1  ;;  %v351_v9 = vmul.f32 %v7662_v10, %v7390_v4 }
  0x18   : > { %3267 = vmatpush.bf16.msra.mxu0 %v7279_v17  ;;  %7554 = vmatpush.bf16.msra.mxu1 %v7279_v17  ;;  %v413_v28 = vmax.f32 %v381_v22, 0.0  ;;  %483 = vst [vmem:[#allocation2 + $0x24] sm:$0xf] %v7590_v1  ;;  %v864_v56 = vld [vmem:[#allocation2 + $0x18] sm:$0xf]  ;;  %v386_v11 = vadd.f32 %v7673_v16, %v350_v5  ;;  %v416_v14 = vmax.f32 %v384_v6, 0.0  ;;  %v7401_v19 = vunpack.c.l.bf16 %v7521_v12 }
  0x19   : > { %7555 = vmatpush.bf16.msra.mxu2 %v7279_v17  ;;  %7556 = vmatpush.bf16.msra.mxu3 %v7279_v17  ;;  %v442_v29 = vpack.c.bf16 %v410_v23, %v410_v23  ;;  %v443_v30 = vpack.c.bf16 %v411_v24, %v411_v24  ;;  %v444_v31 = vpack.c.bf16 %v412_v25, %v412_v25  ;;  %v417_v17 = vmax.f32 %v385_v8, 0.0 }
  0x1a   : > { %484 = vst [vmem:[#allocation2 + $0x28] sm:$0xf] %v7590_v1  ;;  %v445_v33 = vpack.c.bf16 %v413_v28, %v413_v28  ;;  %v387_v22 = vadd.f32 %v7673_v16, %v351_v9  ;;  %v418_v23 = vmax.f32 %v386_v11, 0.0  ;;  %v448_v24 = vpack.c.bf16 %v416_v14, %v416_v14  ;;  %v7525_v11 = vld [vmem:[%s7650_s30 + $0x58] sm:$0xff]  }
  0x1b   : > { %485 = vst [vmem:[#allocation2 + $0x2c] sm:$0x1] %v7590_v1  ;;  %v532_v37 = vshrl.u32 %v442_v29, 16  ;;  %v535_v38 = vshll.u32 %v442_v29, 16  ;;  %v540_v39 = vshrl.u32 %v443_v30, 16  ;;  %v543_v40 = vshll.u32 %v443_v30, 16 }
  0x1c   : > { %486 = vst [vmem:[#allocation2 + $0x30] sm:$0xf] %v7590_v1  ;;  %3268 = vmatpush.bf16.msra.mxu0 %v7278_v27  ;;  %7557 = vmatpush.bf16.msra.mxu1 %v7278_v27  ;;  %v549_v41 = vshrl.u32 %v444_v31, 16  ;;  %v552_v42 = vshll.u32 %v444_v31, 16  ;;  %v557_v43 = vshrl.u32 %v445_v33, 16  ;;  %v560_v44 = vshll.u32 %v445_v33, 16 }
  0x1d   : > { %487 = vst [vmem:[#allocation2 + $0x34] sm:$0xf] %v7590_v1  ;;  %7558 = vmatpush.bf16.msra.mxu2 %v7278_v27  ;;  %7559 = vmatpush.bf16.msra.mxu3 %v7278_v27  ;;  %v534_v45 = vrot.slane %v532_v37, 7  ;;  %v7698_v46 = vrot.slane %v540_v39, 7  ;;  %v7744_v13 = vld [vmem:[#allocation3] sm:$0xf]  ;;  %v7393_v25 = vunpack.c.l.bf16 %v7519_v21  ;;  %v449_v26 = vpack.c.bf16 %v417_v17, %v417_v17 }
  0x1e   : > { %488 = vst [vmem:[#allocation2 + $0x38] sm:$0x1] %v7590_v1  ;;  %v551_v47 = vrot.slane %v549_v41, 7  ;;  %v7701_v48 = vrot.slane %v557_v43, 7  ;;  %v7747_v15 = vld [vmem:[#allocation3 + $0x8] sm:$0xf0]  ;;  %v356_v27 = vmul.f32 %v7662_v10, %v7401_v19  ;;  %v450_v29 = vpack.c.bf16 %v418_v23, %v418_v23 }
  0x1f   : > { %489 = vst [vmem:[#allocation2 + $0x3c] sm:$0xf] %v7590_v1  ;;  %v537_v53 = vor.u32 %v535_v38, %v534_v45  ;;  %v538_v54 = vrot.slane %v534_v45, 4  ;;  %v545_v55 = vor.u32 %v543_v40, %v7698_v46  ;;  %v419_v28 = vmax.f32 %v387_v22, 0.0  ;;  %v7522_v30 = vld [vmem:[%s7650_s30 + $0x40] sm:$0xff]  }
  0x20   : > { %490 = vst [vmem:[#allocation2 + $0x40] sm:$0xf] %v7590_v1  ;;  %3269 = vmatpush.bf16.msra.mxu0 %v7277_v32  ;;  %7560 = vmatpush.bf16.msra.mxu1 %v7277_v32  ;;  %v554_v59 = vor.u32 %v552_v42, %v551_v47  ;;  %v555_v60 = vrot.slane %v551_v47, 4  ;;  %v562_v61 = vor.u32 %v560_v44, %v7701_v48  ;;  %v583_v33 = vshrl.u32 %v448_v24, 16  ;;  %v7526_v22 = vld [vmem:[%s7650_s30 + $0x60] sm:$0xff]  }
  0x21   : > { %491 = vst [vmem:[#allocation2 + $0x44] sm:$0x1] %v7590_v1  ;;  %7561 = vmatpush.bf16.msra.mxu2 %v7277_v32  ;;  %7562 = vmatpush.bf16.msra.mxu3 %v7277_v32  ;;  %v546_v63 = vsel %vm7707_vm4, %v538_v54, %v545_v55  ;;  %v856_v0 = vsel %vm7720_vm5, %v537_v53, %v855_v49  ;;  %v7394_v32 = vunpack.c.h.bf16 %v7519_v21  ;;  %v7402_v34 = vunpack.c.h.bf16 %v7521_v12 }
  0x22   : > { %492 = vst [vmem:[#allocation2 + $0x48] sm:$0xf] %v7590_v1  ;;  %v563_v2 = vsel %vm7707_vm4, %v555_v60, %v562_v61  ;;  %v865_v3 = vsel %vm7720_vm5, %v554_v59, %v864_v56  ;;  %v352_v36 = vmul.f32 %v7662_v10, %v7393_v25  ;;  %v591_v37 = vshrl.u32 %v449_v26, 16  ;;  %v7523_v56 = vld [vmem:[%s7650_s30 + $0x48] sm:$0xff]  }
  0x23   : > { %857 = vst [vmem:[#allocation2 + $0xc] sm:$0xf] %v856_v0  ;;  %v7405_v39 = vunpack.c.l.bf16 %v7522_v30  ;;  %v392_v40 = vadd.f32 %v7673_v16, %v356_v27  ;;  %v7763_v42 = vpack.c.bf16 %v419_v28, %v419_v28  ;;  %v586_v43 = vshll.u32 %v448_v24, 16  ;;  %v7782_v4 = vld [vmem:[#allocation2 + $0x30] sm:$0xf] }
  0x24   : > { %858 = vst [vmem:[#allocation2 + $0x10] sm:$0xf] %v546_v63  ;;  %3270 = vmatpush.bf16.msra.mxu0 %v7276_v58  ;;  %7563 = vmatpush.bf16.msra.mxu1 %v7276_v58  ;;  %v600_v44 = vshrl.u32 %v450_v29, 16  ;;  %v353_v47 = vmul.f32 %v7662_v10, %v7394_v32  ;;  %v585_v49 = vrot.slane %v583_v33, 7  ;;  %v357_v50 = vmul.f32 %v7662_v10, %v7402_v34 }
  0x25   : > { %866 = vst [vmem:[#allocation2 + $0x18] sm:$0xf] %v865_v3  ;;  %7564 = vmatpush.bf16.msra.mxu2 %v7276_v58  ;;  %7565 = vmatpush.bf16.msra.mxu3 %v7276_v58  ;;  %v388_v51 = vadd.f32 %v7673_v16, %v352_v36  ;;  %v7769_v53 = vrot.slane %v591_v37, 7  ;;  %v594_v54 = vshll.u32 %v449_v26, 16  ;;  %v7406_v55 = vunpack.c.h.bf16 %v7522_v30  ;;  %v7527_v36 = vld [vmem:[%s7650_s30 + $0x68] sm:$0xff]  }
  0x26   : > { %867 = vst [vmem:[#allocation2 + $0x1c] sm:$0xf] %v563_v2  ;;  %v603_v57 = vshll.u32 %v450_v29, 16  ;;  %v358_v58 = vmul.f32 %v7662_v10, %v7405_v39  ;;  %v424_v59 = vmax.f32 %v392_v40, 0.0  ;;  %v7775_v60 = vrot.slane %v600_v44, 7 }
  0x27   : > { %493 = vst [vmem:[#allocation2 + $0x4c] sm:$0xf] %v7590_v1  ;;  %v608_v61 = vshrl.u32 %v7763_v42, 16  ;;  %v7409_v63 = vunpack.c.l.bf16 %v7523_v56  ;;  %v7410_v0 = vunpack.c.h.bf16 %v7523_v56  ;;  %v389_v2 = vadd.f32 %v7673_v16, %v353_v47  ;;  %v7806_v25 = vld [vmem:[#allocation2 + $0x3c] sm:$0xf] }
  0x28   : > { %494 = vst [vmem:[#allocation2 + $0x50] sm:$0x1] %v7590_v1  ;;  %3271 = vmatpush.bf16.msra.mxu0 %v7275_v7  ;;  %7566 = vmatpush.bf16.msra.mxu1 %v7275_v7  ;;  %v7780_v3 = vor.u32 %v586_v43, %v585_v49  ;;  %v393_v5 = vadd.f32 %v7673_v16, %v357_v50  ;;  %v420_v6 = vmax.f32 %v388_v51, 0.0  ;;  %v611_v12 = vshll.u32 %v7763_v42, 16 }
  0x29   : > { %495 = vst [vmem:[#allocation2 + $0x54] sm:$0xf] %v7590_v1  ;;  %7567 = vmatpush.bf16.msra.mxu2 %v7275_v7  ;;  %7568 = vmatpush.bf16.msra.mxu3 %v7275_v7  ;;  %v589_v7 = vrot.slane %v585_v49, 4  ;;  %v596_v8 = vor.u32 %v594_v54, %v7769_v53  ;;  %v359_v9 = vmul.f32 %v7662_v10, %v7406_v55  ;;  %v7796_v19 = vrot.slane %v608_v61, 7 }
  0x2a   : > { %v1919_v18 = vld [vmem:[#allocation2 + $0xc] sm:$0xf]  ;;  %496 = vst [vmem:[#allocation2 + $0x58] sm:$0xf] %v7590_v1  ;;  %v394_v14 = vadd.f32 %v7673_v16, %v358_v58  ;;  %v456_v17 = vpack.c.bf16 %v424_v59, %v424_v59  ;;  %v361_v21 = vmul.f32 %v7662_v10, %v7410_v0  ;;  %v421_v23 = vmax.f32 %v389_v2, 0.0 }
  0x2b   : > { %v1920_v20 = vld [vmem:[#allocation2 + $0x10] sm:$0xf]  ;;  %1951 = vst [vmem:[#allocation3] sm:$0xf] %v1919_v18  ;;  %v7794_v18 = vor.u32 %v603_v57, %v7775_v60  ;;  %v879_v24 = vsel %vm7720_vm5, %v7780_v3, %v7782_v4  ;;  %v425_v26 = vmax.f32 %v393_v5, 0.0  ;;  %v7417_v27 = vunpack.c.l.bf16 %v7525_v11 }
  0x2c   : > { %1952 = vst [vmem:[#allocation3 + $0xc] sm:$0xf] %v1920_v20  ;;  %v4199_v31 = vld [vmem:[#allocation2 + $0x18] sm:$0xf]  ;;  %v360_v20 = vmul.f32 %v7662_v10, %v7409_v63  ;;  %v452_v28 = vpack.c.bf16 %v420_v6, %v420_v6  ;;  %v7811_v29 = vsel %vm7707_vm4, %v589_v7, %v596_v8  ;;  %v395_v30 = vadd.f32 %v7673_v16, %v359_v9 }
  0x2d   : > { %497 = vst [vmem:[#allocation2 + $0x5c] sm:$0x1] %v7590_v1  ;;  %v4200_v35 = vld [vmem:[#allocation2 + $0x1c] sm:$0xf]  ;;  %v606_v32 = vrot.slane %v7775_v60, 4  ;;  %v426_v33 = vmax.f32 %v394_v14, 0.0  ;;  %v613_v37 = vor.u32 %v611_v12, %v7796_v19  ;;  %v397_v40 = vadd.f32 %v7673_v16, %v361_v21 }
  0x2e   : > { %498 = vst [vmem:[#allocation2 + $0x60] sm:$0xf] %v7590_v1  ;;  %v651_v34 = vshrl.u32 %v456_v17, 16  ;;  %v396_v39 = vadd.f32 %v7673_v16, %v360_v20  ;;  %v7828_v42 = vpack.c.bf16 %v425_v26, %v425_v26  ;;  %v7422_v43 = vunpack.c.h.bf16 %v7526_v22 }
  0x2f   : > { %499 = vst [vmem:[#allocation2 + $0x64] sm:$0xf] %v7590_v1  ;;  %v364_v44 = vmul.f32 %v7662_v10, %v7417_v27  ;;  %v427_v47 = vmax.f32 %v395_v30, 0.0  ;;  %v7425_v49 = vunpack.c.l.bf16 %v7527_v36  ;;  %v7834_v51 = vpack.c.bf16 %v426_v33, %v426_v33 }
  0x30   : > { %500 = vst [vmem:[#allocation2 + $0x68] sm:$0x1] %v7590_v1  ;;  %v7836_v54 = vrot.slane %v651_v34, 7  ;;  %v654_v55 = vshll.u32 %v456_v17, 16  ;;  %v7842_v57 = vsel %vm7707_vm4, %v606_v32, %v613_v37  ;;  %v428_v58 = vmax.f32 %v396_v39, 0.0 }
  0x31   : > { %501 = vst [vmem:[#allocation2 + $0x6c] sm:$0xf] %v7590_v1  ;;  %v429_v59 = vmax.f32 %v397_v40, 0.0  ;;  %v7426_v60 = vunpack.c.h.bf16 %v7527_v36  ;;  %v659_v63 = vshrl.u32 %v7828_v42, 16  ;;  %v367_v0 = vmul.f32 %v7662_v10, %v7422_v43 }
  0x32   : > { %v6225_v38 = vld [vmem:[#allocation3] sm:$0xf]  ;;  %502 = vst [vmem:[#allocation2 + $0x70] sm:$0xf] %v7590_v1  ;;  %v400_v2 = vadd.f32 %v7673_v16, %v364_v44  ;;  %v620_v6 = vshll.u32 %v452_v28, 16  ;;  %v368_v7 = vmul.f32 %v7662_v10, %v7425_v49  ;;  %v7853_v9 = vpack.c.bf16 %v427_v47, %v427_v47 }
  0x33   : > { %v7228_v41 = vld [vmem:[#allocation3 + $0x8] sm:$0xf0]  ;;  %4231 = vst [vmem:[#allocation3] sm:$0xf] %v4199_v31  ;;  %v7418_v31 = vunpack.c.h.bf16 %v7525_v11  ;;  %v7856_v11 = vor.u32 %v654_v55, %v7836_v54  ;;  %v668_v12 = vshrl.u32 %v7834_v51, 16  ;;  %v7861_v17 = vpack.c.bf16 %v428_v58, %v428_v58 }
  0x34   : > { %v6226_v45 = vor.u32 %v7228_v41, %v6225_v38  ;;  %4232 = vst [vmem:[#allocation3 + $0xc] sm:$0xf] %v4200_v35  ;;  %v7421_v35 = vunpack.c.l.bf16 %v7526_v22  ;;  %v886_v38 = vsel %vm7720_vm5, %v7794_v18, %v7806_v25  ;;  %v7826_v41 = vpack.c.bf16 %v421_v23, %v421_v23 }
  0x35   : > { %503 = vst [vmem:[#allocation2 + $0x74] sm:$0x1] %v7590_v1  ;;  %v365_v50 = vmul.f32 %v7662_v10, %v7418_v31  ;;  %v7863_v20 = vpack.c.bf16 %v429_v59, %v429_v59  ;;  %v662_v21 = vshll.u32 %v7828_v42, 16  ;;  %v369_v22 = vmul.f32 %v7662_v10, %v7426_v60  ;;  %v892_v31 = vld [vmem:[#allocation2 + $0x48] sm:$0xf] }
  0x36   : > { %3272 = vmatmul.bf16.vlgmr.msra.gmra.mxu0 %v6226_v45  ;;  %504 = vst [vmem:[#allocation2 + $0x78] sm:$0xf] %v7590_v1  ;;  %v617_v45 = vshrl.u32 %v452_v28, 16  ;;  %v366_v56 = vmul.f32 %v7662_v10, %v7421_v35  ;;  %v625_v61 = vshrl.u32 %v7826_v41, 16  ;;  %v628_v26 = vshll.u32 %v7826_v41, 16 }
  0x37   : > { %505 = vst [vmem:[#allocation2 + $0x7c] sm:$0xf] %v7590_v1  ;;  %v401_v8 = vadd.f32 %v7673_v16, %v365_v50  ;;  %v403_v27 = vadd.f32 %v7673_v16, %v367_v0  ;;  %v432_v28 = vmax.f32 %v400_v2, 0.0  ;;  %v7873_v32 = vrot.slane %v659_v63, 7 }
  0x38   : > { %506 = vst [vmem:[#allocation2 + $0x80] sm:$0x1] %v7590_v1  ;;  %v619_v5 = vrot.slane %v617_v45, 7  ;;  %v402_v14 = vadd.f32 %v7673_v16, %v366_v56  ;;  %v7868_v23 = vrot.slane %v625_v61, 7  ;;  %v404_v33 = vadd.f32 %v7673_v16, %v368_v7 }
  0x39   : > { %507 = vst [vmem:[#allocation2 + $0x84] sm:$0xf] %v7590_v1  ;;  %v433_v34 = vmax.f32 %v401_v8, 0.0  ;;  %v657_v35 = vrot.slane %v7836_v54, 4  ;;  %v7878_v36 = vrot.slane %v668_v12, 7  ;;  %v676_v37 = vshrl.u32 %v7853_v9, 16 }
  0x3a   : > { %508 = vst [vmem:[#allocation2 + $0x88] sm:$0xf] %v7590_v1  ;;  %v622_v30 = vor.u32 %v620_v6, %v619_v5  ;;  %v434_v39 = vmax.f32 %v402_v14, 0.0  ;;  %v671_v40 = vshll.u32 %v7834_v51, 16  ;;  %v685_v41 = vshrl.u32 %v7861_v17, 16 }
  0x3b   : > { %509 = vst [vmem:[#allocation2 + $0x8c] sm:$0x1] %v7590_v1  ;;  %v693_v42 = vshrl.u32 %v7863_v20, 16  ;;  %v405_v43 = vadd.f32 %v7673_v16, %v369_v22  ;;  %v623_v44 = vrot.slane %v619_v5, 4  ;;  %v630_v45 = vor.u32 %v628_v26, %v7868_v23  ;;  %v906_v54 = vld [vmem:[#allocation2 + $0x60] sm:$0xf] }
  0x3c   : > { %510 = vst [vmem:[#allocation2 + $0x90] sm:$0xf] %v7590_v1  ;;  %v435_v47 = vmax.f32 %v403_v27, 0.0  ;;  %v7888_v49 = vpack.c.bf16 %v432_v28, %v432_v28  ;;  %v893_v50 = vsel %vm7720_vm5, %v622_v30, %v892_v31  ;;  %v664_v51 = vor.u32 %v662_v21, %v7873_v32  ;;  %v913_v8 = vld [vmem:[#allocation2 + $0x6c] sm:$0xf] }
  0x3d   : > { %511 = vst [vmem:[#allocation2 + $0x94] sm:$0xf] %v7590_v1  ;;  %v436_v55 = vmax.f32 %v404_v33, 0.0  ;;  %v465_v56 = vpack.c.bf16 %v433_v34, %v433_v34  ;;  %v7899_v58 = vrot.slane %v676_v37, 7  ;;  %v679_v59 = vshll.u32 %v7853_v9, 16 }
  0x3e   : > { %512 = vst [vmem:[#allocation2 + $0x98] sm:$0x1] %v7590_v1  ;;  %v7903_v60 = vpack.c.bf16 %v434_v39, %v434_v39  ;;  %v687_v61 = vrot.slane %v685_v41, 7  ;;  %v7906_v63 = vrot.slane %v693_v42, 7  ;;  %v696_v0 = vshll.u32 %v7863_v20, 16 }
  0x3f   : > { %513 = vst [vmem:[#allocation2 + $0x9c] sm:$0xf] %v7590_v1  ;;  %v437_v2 = vmax.f32 %v405_v43, 0.0  ;;  %v631_v3 = vsel %vm7707_vm4, %v623_v44, %v630_v45  ;;  %v7916_v4 = vpack.c.bf16 %v435_v47, %v435_v47  ;;  %v907_v5 = vsel %vm7720_vm5, %v7856_v11, %v906_v54  ;;  %v920_v11 = vld [vmem:[#allocation2 + $0x78] sm:$0xf]  ;;  %v7516_v54 = vld [vmem:[%s7650_s30 + $0x10] sm:$0xff]  }
  0x40   : > { %514 = vst [vmem:[#allocation2 + $0xa0] sm:$0xf] %v7590_v1  ;;  %v7924_v6 = vpack.c.bf16 %v436_v55, %v436_v55  ;;  %v727_v7 = vshrl.u32 %v465_v56, 16  ;;  %v665_v18 = vsel %vm7707_vm4, %v657_v35, %v664_v51  ;;  %v674_v25 = vrot.slane %v7878_v36, 4  ;;  %v7520_v55 = vld [vmem:[%s7650_s30 + $0x30] sm:$0xff]  }
  0x41   : > { %515 = vst [vmem:[#allocation2 + $0xa4] sm:$0x1] %v7590_v1  ;;  %v691_v12 = vrot.slane %v687_v61, 4  ;;  %v698_v14 = vor.u32 %v696_v0, %v7906_v63  ;;  %v722_v21 = vshll.u32 %v7888_v49, 16  ;;  %v730_v22 = vshll.u32 %v465_v56, 16 }
  0x42   : > { %516 = vst [vmem:[#allocation2 + $0xa8] sm:$0xf] %v7590_v1  ;;  %v744_v26 = vshrl.u32 %v7916_v4, 16  ;;  %v7938_v30 = vrot.slane %v727_v7, 7  ;;  %v753_v31 = vshrl.u32 %v7924_v6, 16  ;;  %v739_v39 = vshll.u32 %v7903_v60, 16 }
  0x43   : > { %517 = vst [vmem:[#allocation2 + $0xac] sm:$0xf] %v7590_v1  ;;  %v756_v43 = vshll.u32 %v7924_v6, 16  ;;  %v934_v45 = vld [vmem:[#allocation2 + $0x90] sm:$0xf]  ;;  %vm1628_vm10 = vcmask 1042432  }
  0x44   : > { %518 = vst [vmem:[#allocation2 + $0xb0] sm:$0x1] %v7590_v1  ;;  %v7949_v42 = vrot.slane %v744_v26, 7  ;;  %v7209_v26 = vld [vmem:[%s9429_s3 + $0x30] sm:$0xff]  ;;  %vm1629_vm11 = vcmask 1046532  }
  0x45   : > { %519 = vst [vmem:[#allocation2 + $0xb4] sm:$0xf] %v7590_v1  ;;  %vm8229_vm13 = vmor %vm1628_vm10, %vm1629_vm11 }
  0x46   : > { %520 = vst [vmem:[#allocation2 + $0xb8] sm:$0xf] %v7590_v1 }
  0x47   : > { %521 = vst [vmem:[#allocation2 + $0xbc] sm:$0x1] %v7590_v1 }
  0x48   : > { %522 = vst [vmem:[#allocation2 + $0xc0] sm:$0xf] %v7590_v1 }
  0x49   : > { %523 = vst [vmem:[#allocation2 + $0xc4] sm:$0xf] %v7590_v1 }
  0x4a   : > { %524 = vst [vmem:[#allocation2 + $0xc8] sm:$0x1] %v7590_v1 }
  0x4b   : > { %525 = vst [vmem:[#allocation2 + $0xcc] sm:$0xf] %v7590_v1 }
  0x4c   : > { %526 = vst [vmem:[#allocation2 + $0xd0] sm:$0xf] %v7590_v1 }
  0x4d   : > { %527 = vst [vmem:[#allocation2 + $0xd4] sm:$0x1] %v7590_v1  ;;  %v688_v1 = vshll.u32 %v7861_v17, 16  ;;  %v7932_v17 = vpack.c.bf16 %v437_v2, %v437_v2 }
  0x4e   : > { %880 = vst [vmem:[#allocation2 + $0x30] sm:$0xf] %v879_v24  ;;  %v719_v24 = vshrl.u32 %v7888_v49, 16  ;;  %v732_v49 = vor.u32 %v730_v22, %v7938_v30  ;;  %v7297_v22 = vld [vmem:[%s9429_s3 + $0x170] sm:$0xff] }
  0x4f   : > { %881 = vst [vmem:[#allocation2 + $0x34] sm:$0xf] %v7811_v29  ;;  %v673_v29 = vor.u32 %v671_v40, %v7878_v36  ;;  %v690_v9 = vor.u32 %v688_v1, %v687_v61  ;;  %v699_v36 = vsel %vm7707_vm4, %v691_v12, %v698_v14  ;;  %v747_v40 = vshll.u32 %v7916_v4, 16  ;;  %v7290_v14 = vld [vmem:[%s9429_s3 + $0x138] sm:$0xff] }
  0x50   : > { %887 = vst [vmem:[#allocation2 + $0x3c] sm:$0xf] %v886_v38  ;;  %v681_v38 = vor.u32 %v679_v59, %v7899_v58  ;;  %v721_v20 = vrot.slane %v719_v24, 7  ;;  %v761_v44 = vshrl.u32 %v7932_v17, 16  ;;  %v764_v51 = vshll.u32 %v7932_v17, 16  ;;  %3353 = vmatpush.bf16.msrb.mxu1 %v7290_v14  ;;  %v7524_v14 = vld [vmem:[%s7650_s30 + $0x50] sm:$0xff]  }
  0x51   : > { %888 = vst [vmem:[#allocation2 + $0x40] sm:$0xf] %v7842_v57  ;;  %v736_v57 = vshrl.u32 %v7903_v60, 16  ;;  %v914_v28 = vsel %vm7720_vm5, %v673_v29, %v913_v8  ;;  %v921_v37 = vsel %vm7720_vm5, %v690_v9, %v920_v11  ;;  %v941_v59 = vld [vmem:[#allocation2 + $0x9c] sm:$0xf]  ;;  %v7381_v1 = vunpack.c.l.bf16 %v7516_v54 }
  0x52   : > { %894 = vst [vmem:[#allocation2 + $0x48] sm:$0xf] %v893_v50  ;;  %v682_v34 = vsel %vm7707_vm4, %v674_v25, %v681_v38  ;;  %v725_v41 = vrot.slane %v721_v20, 4  ;;  %v724_v47 = vor.u32 %v722_v21, %v721_v20  ;;  %v7954_v50 = vrot.slane %v753_v31, 7  ;;  %v7298_v8 = vld [vmem:[%s9429_s3 + $0x178] sm:$0xff] }
  0x53   : > { %895 = vst [vmem:[#allocation2 + $0x4c] sm:$0xf] %v631_v3  ;;  %v738_v35 = vrot.slane %v736_v57, 7  ;;  %v7382_v60 = vunpack.c.h.bf16 %v7516_v54  ;;  %v7397_v61 = vunpack.c.l.bf16 %v7520_v55  ;;  %v7398_v4 = vunpack.c.h.bf16 %v7520_v55  ;;  %v7210_v57 = vld [vmem:[%s9429_s3 + $0x38] sm:$0xff]  ;;  %3442 = vmatpush.bf16.msrb.mxu2 %v7298_v8 }
  0x54   : > { %908 = vst [vmem:[#allocation2 + $0x60] sm:$0xf] %v907_v5  ;;  %v749_v5 = vor.u32 %v747_v40, %v7949_v42  ;;  %v346_v6 = vmul.f32 %v7662_v10, %v7381_v1  ;;  %v733_v25 = vsel %vm7707_vm4, %v725_v41, %v732_v49  ;;  %v935_v38 = vsel %vm7720_vm5, %v724_v47, %v934_v45 }
  0x55   : > { %v977_v27 = vld [vmem:[#allocation2 + $0x30] sm:$0xf]  ;;  %909 = vst [vmem:[#allocation2 + $0x64] sm:$0xf] %v665_v18  ;;  %v742_v56 = vrot.slane %v738_v35, 4  ;;  %v741_v3 = vor.u32 %v739_v39, %v738_v35  ;;  %v347_v7 = vmul.f32 %v7662_v10, %v7382_v60  ;;  %v7976_v12 = vrot.slane %v761_v44, 7  ;;  %3931 = vmatpush.bf16.msrb.mxu3 %v7210_v57 }
  0x56   : > { %v978_v33 = vld [vmem:[#allocation2 + $0x34] sm:$0xf]  ;;  %1009 = vst [vmem:[#allocation3 + $0x60] sm:$0xf] %v977_v27  ;;  %v382_v11 = vadd.f32 %v7673_v16, %v346_v6  ;;  %v354_v20 = vmul.f32 %v7662_v10, %v7397_v61  ;;  %v7218_v27 = vld [vmem:[%s9429_s3 + $0x78] sm:$0xff]  ;;  %v759_v39 = vrot.slane %v7954_v50, 4 }
  0x57   : > { %1010 = vst [vmem:[#allocation3 + $0x6c] sm:$0xf] %v978_v33  ;;  %v1927_v0 = vld [vmem:[#allocation2 + $0x3c] sm:$0xf]  ;;  %v383_v17 = vadd.f32 %v7673_v16, %v347_v7  ;;  %v942_v21 = vsel %vm7720_vm5, %v741_v3, %v941_v59  ;;  %v750_v31 = vsel %vm7707_vm4, %v742_v56, %v749_v5  ;;  %v948_v33 = vld [vmem:[#allocation2 + $0xa8] sm:$0xf]  ;;  %4020 = vmatpush.bf16.msrb.mxu0 %v7218_v27 }
  0x58   : > { %915 = vst [vmem:[#allocation2 + $0x6c] sm:$0xf] %v914_v28  ;;  %v1928_v24 = vld [vmem:[#allocation2 + $0x40] sm:$0xf]  ;;  %v355_v28 = vmul.f32 %v7662_v10, %v7398_v4  ;;  %v766_v44 = vor.u32 %v764_v51, %v7976_v12  ;;  %v390_v49 = vadd.f32 %v7673_v16, %v354_v20  ;;  %3443 = vmatpush.bf16.msrb.mxu2 %v7297_v22  ;;  %v7528_v22 = vld [vmem:[%s7650_s30 + $0x70] sm:$0xff]  }
  0x59   : > { %9441 = vst [vmem:[#allocation4_spill] sm:$0xff] %v7949_v42  ;;  %v415_v35 = vmax.f32 %v383_v17, 0.0  ;;  %v4207_v40 = vld [vmem:[#allocation2 + $0x48] sm:$0xf]  ;;  %3932 = vmatpush.bf16.msrb.mxu3 %v7209_v26 }
  0x5a   : > { %916 = vst [vmem:[#allocation2 + $0x70] sm:$0xf] %v682_v34  ;;  %v414_v34 = vmax.f32 %v382_v11, 0.0  ;;  %v4208_v54 = vld [vmem:[#allocation2 + $0x4c] sm:$0xf]  ;;  %v767_v3 = vsel %vm7707_vm4, %v759_v39, %v766_v44 }
  0x5b   : > { %922 = vst [vmem:[#allocation2 + $0x78] sm:$0xf] %v921_v37  ;;  %v985_v2 = vld [vmem:[#allocation2 + $0x60] sm:$0xf]  ;;  %v758_v37 = vor.u32 %v756_v43, %v7954_v50  ;;  %v447_v47 = vpack.c.bf16 %v415_v35, %v415_v35  ;;  %v391_v43 = vadd.f32 %v7673_v16, %v355_v28 }
  0x5c   : > { %923 = vst [vmem:[#allocation2 + $0x7c] sm:$0xf] %v699_v36  ;;  %v986_v29 = vld [vmem:[#allocation2 + $0x64] sm:$0xf]  ;;  %v446_v45 = vpack.c.bf16 %v414_v34, %v414_v34 }
  0x5d   : > { %1017 = vst [vmem:[#allocation3 + $0xc0] sm:$0xf] %v985_v2  ;;  %v7962_v18 = vld [vmem:[#allocation3 + $0x60] sm:$0xf]  ;;  %v949_v51 = vsel %vm7720_vm5, %v758_v37, %v948_v33  ;;  %v574_v60 = vshrl.u32 %v447_v47, 16  ;;  %v577_v61 = vshll.u32 %v447_v47, 16  ;;  %v7414_v33 = vunpack.c.h.bf16 %v7524_v14 }
  0x5e   : > { %1018 = vst [vmem:[#allocation3 + $0xcc] sm:$0xf] %v986_v29  ;;  %v7974_v9 = vld [vmem:[#allocation3 + $0x68] sm:$0xf0]  ;;  %v566_v56 = vshrl.u32 %v446_v45, 16  ;;  %v569_v59 = vshll.u32 %v446_v45, 16  ;;  %v7429_v47 = vunpack.c.l.bf16 %v7528_v22 }
  0x5f   : > { %1959 = vst [vmem:[#allocation3 + $0x60] sm:$0xf] %v1927_v0  ;;  %v1935_v36 = vld [vmem:[#allocation2 + $0x6c] sm:$0xf]  ;;  %v871_v0 = vld [vmem:[#allocation2 + $0x24] sm:$0xf]  ;;  %v363_v45 = vmul.f32 %v7662_v10, %v7414_v33 }
  0x60   : > { %9442 = vst [vmem:[#allocation5_spill] sm:$0xff] %v7976_v12  ;;  %v568_v4 = vrot.slane %v566_v56, 7  ;;  %v8011_v6 = vrot.slane %v574_v60, 7  ;;  %v423_v7 = vmax.f32 %v391_v43, 0.0  ;;  %v972_v43 = vld [vmem:[#allocation2 + $0x10] sm:$0xf] }
  0x61   : > { %1960 = vst [vmem:[#allocation3 + $0x6c] sm:$0xf] %v1928_v24  ;;  %v1936_v41 = vld [vmem:[#allocation2 + $0x70] sm:$0xf]  ;;  %v422_v24 = vmax.f32 %v390_v49, 0.0  ;;  %v7430_v49 = vunpack.c.h.bf16 %v7528_v22 }
  0x62   : > { %936 = vst [vmem:[#allocation2 + $0x90] sm:$0xf] %v935_v38  ;;  %v571_v38 = vor.u32 %v569_v59, %v568_v4  ;;  %v572_v8 = vrot.slane %v568_v4, 4  ;;  %v4215_v11 = vld [vmem:[#allocation2 + $0x78] sm:$0xf]  ;;  %v579_v17 = vor.u32 %v577_v61, %v8011_v6  ;;  %v455_v20 = vpack.c.bf16 %v423_v7, %v423_v7 }
  0x63   : > { %937 = vst [vmem:[#allocation2 + $0x94] sm:$0xf] %v733_v25  ;;  %v454_v57 = vpack.c.bf16 %v422_v24, %v422_v24  ;;  %v4216_v26 = vld [vmem:[#allocation2 + $0x7c] sm:$0xf]  ;;  %v899_v60 = vld [vmem:[#allocation2 + $0x54] sm:$0xf]  ;;  %v399_v61 = vadd.f32 %v7673_v16, %v363_v45  ;;  %v371_v24 = vmul.f32 %v7662_v10, %v7430_v49 }
  0x64   : > { %943 = vst [vmem:[#allocation2 + $0x9c] sm:$0xf] %v942_v21  ;;  %v8002_v55 = vld [vmem:[#allocation3 + $0xc0] sm:$0xf]  ;;  %v7413_v21 = vunpack.c.l.bf16 %v7524_v14  ;;  %v872_v27 = vsel %vm7720_vm5, %v571_v38, %v871_v0  ;;  %v580_v35 = vsel %vm7707_vm4, %v572_v8, %v579_v17  ;;  %v642_v37 = vshrl.u32 %v455_v20, 16 }
  0x65   : > { %944 = vst [vmem:[#allocation2 + $0xa0] sm:$0xf] %v750_v31  ;;  %v8005_v50 = vld [vmem:[#allocation3 + $0xc8] sm:$0xf0]  ;;  %v634_v28 = vshrl.u32 %v454_v57, 16  ;;  %v637_v31 = vshll.u32 %v454_v57, 16  ;;  %v370_v0 = vmul.f32 %v7662_v10, %v7429_v47  ;;  %v407_v57 = vadd.f32 %v7673_v16, %v371_v24 }
  0x66   : > { %1967 = vst [vmem:[#allocation3 + $0xc0] sm:$0xf] %v1935_v36  ;;  %v6273_v1 = vld [vmem:[#allocation3 + $0x60] sm:$0xf]  ;;  %v971_v36 = vld [vmem:[#allocation2 + $0xc] sm:$0xf] }
  0x67   : > { %1968 = vst [vmem:[#allocation3 + $0xcc] sm:$0xf] %v1936_v41  ;;  %v645_v39 = vshll.u32 %v455_v20, 16  ;;  %v636_v44 = vrot.slane %v634_v28, 7  ;;  %v8022_v56 = vrot.slane %v642_v37, 7 }
  0x68   : > { %v7240_v2 = vld [vmem:[#allocation3 + $0x68] sm:$0xf0]  ;;  %4239 = vst [vmem:[#allocation3 + $0x60] sm:$0xf] %v4207_v40  ;;  %v362_v40 = vmul.f32 %v7662_v10, %v7413_v21  ;;  %v979_v38 = vld [vmem:[#allocation2 + $0x3c] sm:$0xf] }
  0x69   : > { %v6274_v29 = vor.u32 %v7240_v2, %v6273_v1  ;;  %4240 = vst [vmem:[#allocation3 + $0x6c] sm:$0xf] %v4208_v54  ;;  %v993_v5 = vld [vmem:[#allocation2 + $0x90] sm:$0xf]  ;;  %v639_v1 = vor.u32 %v637_v31, %v636_v44  ;;  %v1921_v20 = vld [vmem:[#allocation2 + $0x18] sm:$0xf] }
  0x6a   : > { %950 = vst [vmem:[#allocation2 + $0xa8] sm:$0xf] %v949_v51  ;;  %v994_v25 = vld [vmem:[#allocation2 + $0x94] sm:$0xf]  ;;  %v398_v59 = vadd.f32 %v7673_v16, %v362_v40  ;;  %v640_v51 = vrot.slane %v636_v44, 4 }
  0x6b   : > { %3292 = vmatmul.bf16.vlgmr.msra.gmra.mxu1 %v6274_v29  ;;  %951 = vst [vmem:[#allocation2 + $0xac] sm:$0xf] %v767_v3  ;;  %v1943_v2 = vld [vmem:[#allocation2 + $0x9c] sm:$0xf]  ;;  %v647_v3 = vor.u32 %v645_v39, %v8022_v56  ;;  %v927_v39 = vld [vmem:[#allocation2 + $0x84] sm:$0xf] }
  0x6c   : > { %1025 = vst [vmem:[#allocation3 + $0x120] sm:$0xf] %v993_v5  ;;  %v430_v4 = vmax.f32 %v398_v59, 0.0  ;;  %v1944_v29 = vld [vmem:[#allocation2 + $0xa0] sm:$0xf]  ;;  %v406_v5 = vadd.f32 %v7673_v16, %v370_v0 }
  0x6d   : > { %v6321_v34 = vld [vmem:[#allocation3 + $0xc0] sm:$0xf]  ;;  %1026 = vst [vmem:[#allocation3 + $0x12c] sm:$0xf] %v994_v25  ;;  %v900_v25 = vsel %vm7720_vm5, %v639_v1, %v899_v60  ;;  %v648_v10 = vsel %vm7707_vm4, %v640_v51, %v647_v3  ;;  %v1929_v59 = vld [vmem:[#allocation2 + $0x48] sm:$0xf] }
  0x6e   : > { %v7252_v41 = vld [vmem:[#allocation3 + $0xc8] sm:$0xf0]  ;;  %4247 = vst [vmem:[#allocation3 + $0xc0] sm:$0xf] %v4215_v11  ;;  %v462_v8 = vpack.c.bf16 %v430_v4, %v430_v4  ;;  %v431_v11 = vmax.f32 %v399_v61, 0.0  ;;  %v438_v17 = vmax.f32 %v406_v5, 0.0 }
  0x6f   : > { %v6322_v54 = vor.u32 %v7252_v41, %v6321_v34  ;;  %4248 = vst [vmem:[#allocation3 + $0xcc] sm:$0xf] %v4216_v26  ;;  %v1922_v26 = vld [vmem:[#allocation2 + $0x1c] sm:$0xf]  ;;  %v439_v34 = vmax.f32 %v407_v57, 0.0 }
  0x70   : > { %873 = vst [vmem:[#allocation2 + $0x24] sm:$0xf] %v872_v27  ;;  %v702_v21 = vshrl.u32 %v462_v8, 16  ;;  %v705_v22 = vshll.u32 %v462_v8, 16  ;;  %v980_v27 = vld [vmem:[#allocation2 + $0x40] sm:$0xf]  ;;  %v463_v28 = vpack.c.bf16 %v431_v11, %v431_v11  ;;  %v470_v31 = vpack.c.bf16 %v438_v17, %v438_v17 }
  0x71   : > { %3312 = vmatmul.bf16.vlgmr.msra.gmra.mxu2 %v6322_v54  ;;  %874 = vst [vmem:[#allocation2 + $0x28] sm:$0xf] %v580_v35  ;;  %v4223_v33 = vld [vmem:[#allocation2 + $0xa8] sm:$0xf]  ;;  %v471_v54 = vpack.c.bf16 %v439_v34, %v439_v34  ;;  %v1930_v4 = vld [vmem:[#allocation2 + $0x4c] sm:$0xf] }
  0x72   : > { %1003 = vst [vmem:[#allocation3 + $0x18] sm:$0xf] %v971_v36  ;;  %v704_v16 = vrot.slane %v702_v21, 7  ;;  %v4224_v35 = vld [vmem:[#allocation2 + $0xac] sm:$0xf]  ;;  %v710_v36 = vshrl.u32 %v463_v28, 16 }
  0x73   : > { %v8030_v7 = vld [vmem:[#allocation3 + $0x120] sm:$0xf]  ;;  %1004 = vst [vmem:[#allocation3 + $0x24] sm:$0xf] %v972_v43  ;;  %v713_v37 = vshll.u32 %v463_v28, 16  ;;  %v770_v44 = vshrl.u32 %v470_v31, 16 }
  0x74   : > { %9443 = vst [vmem:[#allocation6_spill] sm:$0xff] %v8030_v7  ;;  %v8035_v14 = vld [vmem:[#allocation3 + $0x128] sm:$0xf0]  ;;  %v707_v41 = vor.u32 %v705_v22, %v704_v16  ;;  %v708_v47 = vrot.slane %v704_v16, 4  ;;  %v8043_v49 = vrot.slane %v710_v36, 7  ;;  %v773_v51 = vshll.u32 %v470_v31, 16 }
  0x75   : > { %9444 = vst [vmem:[#allocation7_spill] sm:$0xff] %v8035_v14  ;;  %v772_v0 = vrot.slane %v770_v44, 7  ;;  %v987_v8 = vld [vmem:[#allocation2 + $0x6c] sm:$0xf]  ;;  %v7289_v11 = vld [vmem:[%s9429_s3 + $0x130] sm:$0xff] }
  0x76   : > { %1975 = vst [vmem:[#allocation3 + $0x120] sm:$0xf] %v1943_v2  ;;  %v928_v1 = vsel %vm7720_vm5, %v707_v41, %v927_v39  ;;  %v715_v61 = vor.u32 %v713_v37, %v8043_v49  ;;  %v7296_v22 = vld [vmem:[%s9429_s3 + $0x168] sm:$0xff]  ;;  %3354 = vmatpush.bf16.msrb.mxu1 %v7289_v11  ;;  %v7217_v39 = vld [vmem:[%s9429_s3 + $0x70] sm:$0xff]  ;;  %v995_v44 = vld [vmem:[#allocation2 + $0x9c] sm:$0xf] }
  0x77   : > { %1976 = vst [vmem:[#allocation3 + $0x12c] sm:$0xf] %v1944_v29  ;;  %v4201_v3 = vld [vmem:[#allocation2 + $0x24] sm:$0xf]  ;;  %v776_v5 = vrot.slane %v772_v0, 4  ;;  %v775_v57 = vor.u32 %v773_v51, %v772_v0  ;;  %3444 = vmatpush.bf16.msrb.mxu2 %v7296_v22  ;;  %v7288_v41 = vld [vmem:[%s9429_s3 + $0x128] sm:$0xff]  ;;  %4021 = vmatpush.bf16.msrb.mxu0 %v7217_v39 }
  0x78   : > { %901 = vst [vmem:[#allocation2 + $0x54] sm:$0xf] %v900_v25  ;;  %v4202_v24 = vld [vmem:[#allocation2 + $0x28] sm:$0xf]  ;;  %v716_v29 = vsel %vm7707_vm4, %v708_v47, %v715_v61  ;;  %v778_v25 = vshrl.u32 %v471_v54, 16  ;;  %v7295_v47 = vld [vmem:[%s9429_s3 + $0x160] sm:$0xff] }
  0x79   : > { %902 = vst [vmem:[#allocation2 + $0x58] sm:$0xf] %v648_v10  ;;  %v8039_v40 = vld [vmem:[#allocation3 + $0x18] sm:$0xf]  ;;  %v781_v10 = vshll.u32 %v471_v54, 16  ;;  %v7207_v54 = vld [vmem:[%s9429_s3 + $0x20] sm:$0xff] }
  0x7a   : > { %1011 = vst [vmem:[#allocation3 + $0x78] sm:$0xf] %v979_v38  ;;  %v8041_v45 = vld [vmem:[#allocation3 + $0x20] sm:$0xf0]  ;;  %v8057_v21 = vrot.slane %v778_v25, 7  ;;  %3355 = vmatpush.bf16.msrb.mxu1 %v7288_v41 }
  0x7b   : > { %1012 = vst [vmem:[#allocation3 + $0x84] sm:$0xf] %v980_v27  ;;  %v955_v27 = vld [vmem:[#allocation2 + $0xb4] sm:$0xf]  ;;  %3445 = vmatpush.bf16.msrb.mxu2 %v7295_v47  ;;  %v1937_v0 = vld [vmem:[#allocation2 + $0x78] sm:$0xf] }
  0x7c   : > { %1953 = vst [vmem:[#allocation3 + $0x18] sm:$0xf] %v1921_v20  ;;  %v988_v20 = vld [vmem:[#allocation2 + $0x70] sm:$0xf]  ;;  %v783_v31 = vor.u32 %v781_v10, %v8057_v21  ;;  %v956_v34 = vsel %vm7720_vm5, %v775_v57, %v955_v27  ;;  %v974_v25 = vld [vmem:[#allocation2 + $0x1c] sm:$0xf] }
  0x7d   : > { %v6369_v43 = vld [vmem:[#allocation3 + $0x120] sm:$0xf]  ;;  %1954 = vst [vmem:[#allocation3 + $0x24] sm:$0xf] %v1922_v26  ;;  %v982_v57 = vld [vmem:[#allocation2 + $0x4c] sm:$0xf] }
  0x7e   : > { %v7264_v60 = vld [vmem:[#allocation3 + $0x128] sm:$0xf0]  ;;  %4255 = vst [vmem:[#allocation3 + $0x120] sm:$0xf] %v4223_v33  ;;  %v7208_v33 = vld [vmem:[%s9429_s3 + $0x28] sm:$0xff]  ;;  %v784_v36 = vsel %vm7707_vm4, %v776_v5, %v783_v31 }
  0x7f   : > { %v6370_v2 = vor.u32 %v7264_v60, %v6369_v43  ;;  %4256 = vst [vmem:[#allocation3 + $0x12c] sm:$0xf] %v4224_v35  ;;  %v4209_v35 = vld [vmem:[#allocation2 + $0x54] sm:$0xf]  ;;  %3933 = vmatpush.bf16.msrb.mxu3 %v7208_v33  ;;  %v996_v60 = vld [vmem:[#allocation2 + $0xa0] sm:$0xf] }
  0x80   : > { %929 = vst [vmem:[#allocation2 + $0x84] sm:$0xf] %v928_v1  ;;  %v4210_v37 = vld [vmem:[#allocation2 + $0x58] sm:$0xf]  ;;  %v7580_v10 = vld [vmem:[%s9427_s1] ss:$0 sm:$0xff] }
  0x81   : > { %3332 = vmatmul.bf16.vlgmr.msra.gmra.mxu3 %v6370_v2  ;;  %v8050_v38 = vld [vmem:[#allocation3 + $0x78] sm:$0xf]  ;;  %930 = vst [vmem:[#allocation2 + $0x88] sm:$0xf] %v716_v29  ;;  %v7529_v1 = vld [vmem:[%s7650_s30 + $0x78] sm:$0xff]  }
  0x82   : > { %v8055_v17 = vld [vmem:[#allocation3 + $0x80] sm:$0xf0]  ;;  %1961 = vst [vmem:[#allocation3 + $0x78] sm:$0xf] %v1929_v59  ;;  %v7216_v59 = vld [vmem:[%s9429_s3 + $0x68] sm:$0xff] }
  0x83   : > { %9445 = vst [vmem:[#allocation8_spill] sm:$0xff] %v8057_v21  ;;  %v6237_v26 = vld [vmem:[#allocation3 + $0x18] sm:$0xf]  ;;  %3934 = vmatpush.bf16.msrb.mxu3 %v7207_v54  ;;  %v1938_v2 = vld [vmem:[#allocation2 + $0x7c] sm:$0xf]  ;;  %4022 = vmatpush.bf16.msrb.mxu0 %v7216_v59 }
  0x84   : > { %1962 = vst [vmem:[#allocation3 + $0x84] sm:$0xf] %v1930_v4  ;;  %v7231_v28 = vld [vmem:[#allocation3 + $0x20] sm:$0xf0]  ;;  %v7434_v4 = vunpack.c.h.bf16 %v7529_v1  ;;  %v973_v29 = vld [vmem:[#allocation2 + $0x18] sm:$0xf] }
  0x85   : > { %4233 = vst [vmem:[#allocation3 + $0x18] sm:$0xf] %v4201_v3  ;;  %v6238_v16 = vor.u32 %v7231_v28, %v6237_v26  ;;  %v7433_v3 = vunpack.c.l.bf16 %v7529_v1  ;;  %v1945_v22 = vld [vmem:[#allocation2 + $0xa8] sm:$0xf]  ;;  %v1946_v27 = vld [vmem:[#allocation2 + $0xac] sm:$0xf] }
  0x86   : > { %4234 = vst [vmem:[#allocation3 + $0x24] sm:$0xf] %v4202_v24  ;;  %v1924_v39 = vld [vmem:[#allocation2 + $0x28] sm:$0xf]  ;;  %v1932_v59 = vld [vmem:[#allocation2 + $0x58] sm:$0xf] }
  0x87   : > { %1019 = vst [vmem:[#allocation3 + $0xd8] sm:$0xf] %v987_v8  ;;  %3277 = vmatmul.bf16.gmra.mxu0 %v6238_v16  ;;  %v981_v8 = vld [vmem:[#allocation2 + $0x48] sm:$0xf]  ;;  %v372_v11 = vmul.f32 %v7580_v10, %v7433_v3  ;;  %v4217_v26 = vld [vmem:[#allocation2 + $0x84] sm:$0xf] }
  0x88   : > { %1020 = vst [vmem:[#allocation3 + $0xe4] sm:$0xf] %v988_v20  ;;  %v373_v20 = vmul.f32 %v7580_v10, %v7434_v4  ;;  %v4218_v28 = vld [vmem:[#allocation2 + $0x88] sm:$0xf]  ;;  %v1923_v16 = vld [vmem:[#allocation2 + $0x24] sm:$0xf] }
  0x89   : > { %957 = vst [vmem:[#allocation2 + $0xb4] sm:$0xf] %v956_v34  ;;  %v6285_v43 = vld [vmem:[#allocation3 + $0x78] sm:$0xf]  ;;  %v7581_v34 = vld [vmem:[%s9428_s2] ss:$0 sm:$0xff] }
  0x8a   : > { %958 = vst [vmem:[#allocation2 + $0xb8] sm:$0xf] %v784_v36  ;;  %v409_v36 = vadd.f32 %v7581_v34, %v373_v20  ;;  %v989_v3 = vld [vmem:[#allocation2 + $0x78] sm:$0xf]  ;;  %v4264_v14 = vld [vmem:[#allocation2 + $0x1c] sm:$0xf] }
  0x8b   : > { %v7243_v51 = vld [vmem:[#allocation3 + $0x80] sm:$0xf0]  ;;  %4241 = vst [vmem:[#allocation3 + $0x78] sm:$0xf] %v4209_v35  ;;  %v408_v35 = vadd.f32 %v7581_v34, %v372_v11  ;;  %v4204_v11 = vld [vmem:[#allocation2 + $0x34] sm:$0xf] }
  0x8c   : > { %v6286_v61 = vor.u32 %v7243_v51, %v6285_v43  ;;  %4242 = vst [vmem:[#allocation3 + $0x84] sm:$0xf] %v4210_v37  ;;  %v4212_v34 = vld [vmem:[#allocation2 + $0x64] sm:$0xf]  ;;  %v4263_v21 = vld [vmem:[#allocation2 + $0x18] sm:$0xf] }
  0x8d   : > { %1027 = vst [vmem:[#allocation3 + $0x138] sm:$0xf] %v995_v44  ;;  %v1931_v44 = vld [vmem:[#allocation2 + $0x54] sm:$0xf]  ;;  %v440_v51 = vmax.f32 %v408_v35, 0.0 }
  0x8e   : > { %3297 = vmatmul.bf16.gmra.mxu1 %v6286_v61  ;;  %v8086_v24 = vld [vmem:[#allocation3 + $0xd8] sm:$0xf]  ;;  %1028 = vst [vmem:[#allocation3 + $0x144] sm:$0xf] %v996_v60  ;;  %v441_v60 = vmax.f32 %v409_v36, 0.0 }
  0x8f   : > { %v8088_v5 = vld [vmem:[#allocation3 + $0xe0] sm:$0xf0]  ;;  %1969 = vst [vmem:[#allocation3 + $0xd8] sm:$0xf] %v1937_v0  ;;  %v472_v4 = vpack.c.bf16 %v440_v51, %v440_v51  ;;  %v962_v36 = vld [vmem:[#allocation2 + $0xc0] sm:$0xf] }
  0x90   : > { %1970 = vst [vmem:[#allocation3 + $0xe4] sm:$0xf] %v1938_v2  ;;  %v4225_v54 = vld [vmem:[#allocation2 + $0xb4] sm:$0xf]  ;;  %v7206_v51 = vld [vmem:[%s9429_s3 + $0x18] sm:$0xff] }
  0x91   : > { %1005 = vst [vmem:[#allocation3 + $0x30] sm:$0xf] %v973_v29  ;;  %v4226_v61 = vld [vmem:[#allocation2 + $0xb8] sm:$0xf]  ;;  %v473_v29 = vpack.c.bf16 %v441_v60, %v441_v60  ;;  %v787_v20 = vshrl.u32 %v472_v4, 16  ;;  %3935 = vmatpush.bf16.msrb.mxu3 %v7206_v51 }
  0x92   : > { %1006 = vst [vmem:[#allocation3 + $0x3c] sm:$0xf] %v974_v25 }
  0x93   : > { %1013 = vst [vmem:[#allocation3 + $0x90] sm:$0xf] %v981_v8  ;;  %v4203_v8 = vld [vmem:[#allocation2 + $0x30] sm:$0xf]  ;;  %v789_v35 = vrot.slane %v787_v20, 7 }
  0x94   : > { %v8093_v31 = vld [vmem:[#allocation3 + $0x138] sm:$0xf]  ;;  %1014 = vst [vmem:[#allocation3 + $0x9c] sm:$0xf] %v982_v57  ;;  %v990_v57 = vld [vmem:[#allocation2 + $0x7c] sm:$0xf] }
  0x95   : > { %9446 = vst [vmem:[#allocation9_spill] sm:$0xff] %v8093_v31  ;;  %v8095_v33 = vld [vmem:[#allocation3 + $0x140] sm:$0xf0]  ;;  %3936 = vmatpush.bf16.msrb.mxu3 %v7205_v62  ;;  %v991_v62 = vld [vmem:[#allocation2 + $0x84] sm:$0xf] }
  0x96   : > { %9447 = vst [vmem:[#allocation10_spill] sm:$0xff] %v8095_v33  ;;  %v6333_v37 = vld [vmem:[#allocation3 + $0xd8] sm:$0xf] }
  0x97   : > { %1977 = vst [vmem:[#allocation3 + $0x138] sm:$0xf] %v1945_v22  ;;  %v7255_v41 = vld [vmem:[#allocation3 + $0xe0] sm:$0xf0]  ;;  %v790_v22 = vshll.u32 %v472_v4, 16  ;;  %v7215_v4 = vld [vmem:[%s9429_s3 + $0x60] sm:$0xff] }
  0x98   : > { %1978 = vst [vmem:[#allocation3 + $0x144] sm:$0xf] %v1946_v27  ;;  %v6334_v47 = vor.u32 %v7255_v41, %v6333_v37  ;;  %v8100_v43 = vld [vmem:[#allocation3 + $0x30] sm:$0xf]  ;;  %v4211_v27 = vld [vmem:[#allocation2 + $0x60] sm:$0xf]  ;;  %4023 = vmatpush.bf16.msrb.mxu0 %v7215_v4 }
  0x99   : > { %4249 = vst [vmem:[#allocation3 + $0xd8] sm:$0xf] %v4217_v26  ;;  %v8102_v1 = vld [vmem:[#allocation3 + $0x38] sm:$0xf0]  ;;  %v7287_v37 = vld [vmem:[%s9429_s3 + $0x120] sm:$0xff] }
  0x9a   : > { %4250 = vst [vmem:[#allocation3 + $0xe4] sm:$0xf] %v4218_v28  ;;  %3317 = vmatmul.bf16.gmra.mxu2 %v6334_v47  ;;  %v8104_v0 = vld [vmem:[#allocation3 + $0x90] sm:$0xf]  ;;  %v795_v28 = vshrl.u32 %v473_v29, 16  ;;  %3356 = vmatpush.bf16.msrb.mxu1 %v7287_v37 }
  0x9b   : > { %1955 = vst [vmem:[#allocation3 + $0x30] sm:$0xf] %v1923_v16  ;;  %v8106_v2 = vld [vmem:[#allocation3 + $0x98] sm:$0xf0]  ;;  %v798_v16 = vshll.u32 %v473_v29, 16 }
  0x9c   : > { %1956 = vst [vmem:[#allocation3 + $0x3c] sm:$0xf] %v1924_v39  ;;  %v8111_v41 = vrot.slane %v795_v28, 7  ;;  %v997_v28 = vld [vmem:[#allocation2 + $0xa8] sm:$0xf] }
  0x9d   : > { %1963 = vst [vmem:[#allocation3 + $0x90] sm:$0xf] %v1931_v44  ;;  %v7294_v44 = vld [vmem:[%s9429_s3 + $0x158] sm:$0xff]  ;;  %v1925_v4 = vld [vmem:[#allocation2 + $0x30] sm:$0xf] }
  0x9e   : > { %v6381_v25 = vld [vmem:[#allocation3 + $0x138] sm:$0xf]  ;;  %1964 = vst [vmem:[#allocation3 + $0x9c] sm:$0xf] %v1932_v59  ;;  %v793_v59 = vrot.slane %v789_v35, 4  ;;  %3446 = vmatpush.bf16.msrb.mxu2 %v7294_v44 }
  0x9f   : > { %v7267_v10 = vld [vmem:[#allocation3 + $0x140] sm:$0xf0]  ;;  %4257 = vst [vmem:[#allocation3 + $0x138] sm:$0xf] %v4225_v54  ;;  %v792_v54 = vor.u32 %v790_v22, %v789_v35  ;;  %v1940_v22 = vld [vmem:[#allocation2 + $0x88] sm:$0xf] }
  0xa0   : > { %v6382_v26 = vor.u32 %v7267_v10, %v6381_v25  ;;  %4258 = vst [vmem:[#allocation3 + $0x144] sm:$0xf] %v4226_v61  ;;  %v976_v35 = vld [vmem:[#allocation2 + $0x28] sm:$0xf]  ;;  %v984_v37 = vld [vmem:[#allocation2 + $0x58] sm:$0xf] }
  0xa1   : > { %1021 = vst [vmem:[#allocation3 + $0xf0] sm:$0xf] %v989_v3  ;;  %v800_v3 = vor.u32 %v798_v16, %v8111_v41  ;;  %v963_v25 = vsel %vm7720_vm5, %v792_v54, %v962_v36  ;;  %v998_v16 = vld [vmem:[#allocation2 + $0xac] sm:$0xf]  ;;  %v983_v36 = vld [vmem:[#allocation2 + $0x54] sm:$0xf] }
  0xa2   : > { %3337 = vmatmul.bf16.gmra.mxu3 %v6382_v26  ;;  %v6249_v39 = vld [vmem:[#allocation3 + $0x30] sm:$0xf]  ;;  %1022 = vst [vmem:[#allocation3 + $0xfc] sm:$0xf] %v990_v57  ;;  %v7293_v57 = vld [vmem:[%s9429_s3 + $0x150] sm:$0xff]  ;;  %v7214_v26 = vld [vmem:[%s9429_s3 + $0x58] sm:$0xff] }
  0xa3   : > { %9448 = vst [vmem:[#allocation11_spill] sm:$0xff] %v8111_v41  ;;  %v7234_v47 = vld [vmem:[#allocation3 + $0x38] sm:$0xf0]  ;;  %v801_v20 = vsel %vm7707_vm4, %v793_v59, %v800_v3  ;;  %3447 = vmatpush.bf16.msrb.mxu2 %v7293_v57  ;;  %4024 = vmatpush.bf16.msrb.mxu0 %v7214_v26  ;;  %v1933_v57 = vld [vmem:[#allocation2 + $0x60] sm:$0xf] }
  0xa4   : > { %4235 = vst [vmem:[#allocation3 + $0x30] sm:$0xf] %v4203_v8  ;;  %v6250_v60 = vor.u32 %v7234_v47, %v6249_v39  ;;  %v6297_v61 = vld [vmem:[#allocation3 + $0x90] sm:$0xf]  ;;  %v7286_v8 = vld [vmem:[%s9429_s3 + $0x118] sm:$0xff] }
  0xa5   : > { %4236 = vst [vmem:[#allocation3 + $0x3c] sm:$0xf] %v4204_v11  ;;  %v7246_v29 = vld [vmem:[#allocation3 + $0x98] sm:$0xf0]  ;;  %v1939_v11 = vld [vmem:[#allocation2 + $0x84] sm:$0xf]  ;;  %3357 = vmatpush.bf16.msrb.mxu1 %v7286_v8 }
  0xa6   : > { %4243 = vst [vmem:[#allocation3 + $0x90] sm:$0xf] %v4211_v27  ;;  %3282 = vmatmul.bf16.gmra.mxu0 %v6250_v60  ;;  %v6298_v10 = vor.u32 %v7246_v29, %v6297_v61  ;;  %v4219_v39 = vld [vmem:[#allocation2 + $0x90] sm:$0xf]  ;;  %v4220_v47 = vld [vmem:[#allocation2 + $0x94] sm:$0xf] }
  0xa7   : > { %4244 = vst [vmem:[#allocation3 + $0x9c] sm:$0xf] %v4212_v34  ;;  %v975_v34 = vld [vmem:[#allocation2 + $0x24] sm:$0xf]  ;;  %v1947_v59 = vld [vmem:[#allocation2 + $0xb4] sm:$0xf] }
  0xa8   : > { %964 = vst [vmem:[#allocation2 + $0xc0] sm:$0xf] %v963_v25  ;;  %3302 = vmatmul.bf16.gmra.mxu1 %v6298_v10  ;;  %v8139_v27 = vld [vmem:[#allocation3 + $0xf0] sm:$0xf]  ;;  %v1948_v60 = vld [vmem:[#allocation2 + $0xb8] sm:$0xf] }
  0xa9   : > { %965 = vst [vmem:[#allocation2 + $0xc4] sm:$0xf] %v801_v20  ;;  %v8141_v52 = vld [vmem:[#allocation3 + $0xf8] sm:$0xf0]  ;;  %v992_v26 = vld [vmem:[#allocation2 + $0x88] sm:$0xf] }
  0xaa   : > { %9449 = vst [vmem:[#allocation12_spill] sm:$0xff] %v8141_v52  ;;  %v1926_v25 = vld [vmem:[#allocation2 + $0x34] sm:$0xf]  ;;  %v4222_v41 = vld [vmem:[#allocation2 + $0xa0] sm:$0xf] }
  0xab   : > { %1971 = vst [vmem:[#allocation3 + $0xf0] sm:$0xf] %v1939_v11  ;;  %v1934_v11 = vld [vmem:[#allocation2 + $0x64] sm:$0xf] }
  0xac   : > { %1972 = vst [vmem:[#allocation3 + $0xfc] sm:$0xf] %v1940_v22 }
  0xad   : > { %1029 = vst [vmem:[#allocation3 + $0x150] sm:$0xf] %v997_v28 }
  0xae   : > { %1030 = vst [vmem:[#allocation3 + $0x15c] sm:$0xf] %v998_v16  ;;  %v4205_v16 = vld [vmem:[#allocation2 + $0x3c] sm:$0xf] }
  0xaf   : > { %1007 = vst [vmem:[#allocation3 + $0x48] sm:$0xf] %v975_v34  ;;  %v4227_v28 = vld [vmem:[#allocation2 + $0xc0] sm:$0xf]  ;;  %v7285_v34 = vld [vmem:[%s9429_s3 + $0x110] sm:$0xff] }
  0xb0   : > { %1008 = vst [vmem:[#allocation3 + $0x54] sm:$0xf] %v976_v35  ;;  %v7292_v35 = vld [vmem:[%s9429_s3 + $0x148] sm:$0xff]  ;;  %3358 = vmatpush.bf16.msrb.mxu1 %v7285_v34  ;;  %v1942_v34 = vld [vmem:[#allocation2 + $0x94] sm:$0xf] }
  0xb1   : > { %1015 = vst [vmem:[#allocation3 + $0xa8] sm:$0xf] %v983_v36  ;;  %v4228_v36 = vld [vmem:[#allocation2 + $0xc4] sm:$0xf]  ;;  %3448 = vmatpush.bf16.msrb.mxu2 %v7292_v35  ;;  %v1949_v33 = vld [vmem:[#allocation2 + $0xc0] sm:$0xf] }
  0xb2   : > { %v6345_v54 = vld [vmem:[#allocation3 + $0xf0] sm:$0xf]  ;;  %1016 = vst [vmem:[#allocation3 + $0xb4] sm:$0xf] %v984_v37  ;;  %v4206_v37 = vld [vmem:[#allocation2 + $0x40] sm:$0xf] }
  0xb3   : > { %v7258_v51 = vld [vmem:[#allocation3 + $0xf8] sm:$0xf0]  ;;  %4251 = vst [vmem:[#allocation3 + $0xf0] sm:$0xf] %v4219_v39  ;;  %v7204_v39 = vld [vmem:[%s9429_s3 + $0x8] sm:$0xff]  ;;  %v7283_v35 = vld [vmem:[%s9429_s3 + $0x100] sm:$0xff] }
  0xb4   : > { %v6346_v61 = vor.u32 %v7258_v51, %v6345_v54  ;;  %4252 = vst [vmem:[#allocation3 + $0xfc] sm:$0xf] %v4220_v47  ;;  %v8144_v3 = vld [vmem:[#allocation3 + $0x150] sm:$0xf]  ;;  %v7213_v47 = vld [vmem:[%s9429_s3 + $0x50] sm:$0xff]  ;;  %v564_v54 = vrot.slane %v7701_v48, 4  ;;  %3937 = vmatpush.bf16.msrb.mxu3 %v7204_v39 }
  0xb5   : > { %9450 = vst [vmem:[#allocation13_spill] sm:$0xff] %v8144_v3  ;;  %v8146_v29 = vld [vmem:[#allocation3 + $0x158] sm:$0xf0]  ;;  %v4213_v51 = vld [vmem:[#allocation2 + $0x6c] sm:$0xf]  ;;  %4025 = vmatpush.bf16.msrb.mxu0 %v7213_v47  ;;  %v7203_v48 = vld [vmem:[%s9429_s3] sm:$0xff] }
  0xb6   : > { %9451 = vst [vmem:[#allocation14_spill] sm:$0xff] %v8146_v29  ;;  %3322 = vmatmul.bf16.gmra.mxu2 %v6346_v61  ;;  %v8148_v8 = vld [vmem:[#allocation3 + $0x48] sm:$0xf]  ;;  %v861_v39 = vld [vmem:[#allocation2 + $0x14] sm:$0x1] }
  0xb7   : > { %1979 = vst [vmem:[#allocation3 + $0x150] sm:$0xf] %v1947_v59  ;;  %v8150_v10 = vld [vmem:[#allocation3 + $0x50] sm:$0xf0]  ;;  %v1000_v29 = vld [vmem:[#allocation2 + $0xb8] sm:$0xf] }
  0xb8   : > { %1980 = vst [vmem:[#allocation3 + $0x15c] sm:$0xf] %v1948_v60  ;;  %v8152_v20 = vld [vmem:[#allocation3 + $0xa8] sm:$0xf]  ;;  %v7284_v60 = vld [vmem:[%s9429_s3 + $0x108] sm:$0xff]  ;;  %3938 = vmatpush.bf16.msrb.mxu3 %v7203_v48  ;;  %v9456_v48 = vrot.slane %v7698_v46, 4 }
  0xb9   : > { %1957 = vst [vmem:[#allocation3 + $0x48] sm:$0xf] %v1925_v4  ;;  %v8154_v22 = vld [vmem:[#allocation3 + $0xb0] sm:$0xf0]  ;;  %v4214_v4 = vld [vmem:[#allocation2 + $0x70] sm:$0xf]  ;;  %3359 = vmatpush.bf16.msrb.mxu1 %v7284_v60 }
  0xba   : > { %1958 = vst [vmem:[#allocation3 + $0x54] sm:$0xf] %v1926_v25  ;;  %v7291_v25 = vld [vmem:[%s9429_s3 + $0x140] sm:$0xff]  ;;  %v1983_v46 = vld [vmem:[#allocation2 + $0xc] sm:$0xf] }
  0xbb   : > { %1965 = vst [vmem:[#allocation3 + $0xa8] sm:$0xf] %v1933_v57  ;;  %3449 = vmatpush.bf16.msrb.mxu2 %v7291_v25  ;;  %v1035_v25 = vld [vmem:[#allocation2 + $0x8] sm:$0x1] }
  0xbc   : > { %1966 = vst [vmem:[#allocation3 + $0xb4] sm:$0xf] %v1934_v11 }
  0xbd   : > { %1023 = vst [vmem:[#allocation3 + $0x108] sm:$0xf] %v991_v62  ;;  %v1941_v62 = vld [vmem:[#allocation2 + $0x90] sm:$0xf]  ;;  %3360 = vmatpush.bf16.msrb.mxu1 %v7283_v35 }
  0xbe   : > { %v6393_v59 = vld [vmem:[#allocation3 + $0x150] sm:$0xf]  ;;  %1024 = vst [vmem:[#allocation3 + $0x114] sm:$0xf] %v992_v26 }
  0xbf   : > { %v7270_v61 = vld [vmem:[#allocation3 + $0x158] sm:$0xf0]  ;;  %4259 = vst [vmem:[#allocation3 + $0x150] sm:$0xf] %v4227_v28  ;;  %v7212_v26 = vld [vmem:[%s9429_s3 + $0x48] sm:$0xff] }
  0xc0   : > { %v6394_v57 = vor.u32 %v7270_v61, %v6393_v59  ;;  %4260 = vst [vmem:[#allocation3 + $0x15c] sm:$0xf] %v4228_v36  ;;  %v6261_v11 = vld [vmem:[#allocation3 + $0x48] sm:$0xf]  ;;  %v999_v36 = vld [vmem:[#allocation2 + $0xb4] sm:$0xf]  ;;  %4026 = vmatpush.bf16.msrb.mxu0 %v7212_v26 }
  0xc1   : > { %v7237_v28 = vld [vmem:[#allocation3 + $0x50] sm:$0xf0]  ;;  %4237 = vst [vmem:[#allocation3 + $0x48] sm:$0xf] %v4205_v16  ;;  %v868_v61 = vld [vmem:[#allocation2 + $0x20] sm:$0x1] }
  0xc2   : > { %3342 = vmatmul.bf16.gmra.mxu3 %v6394_v57  ;;  %v6262_v47 = vor.u32 %v7237_v28, %v6261_v11  ;;  %4238 = vst [vmem:[#allocation3 + $0x54] sm:$0xf] %v4206_v37  ;;  %v6309_v59 = vld [vmem:[#allocation3 + $0xa8] sm:$0xf]  ;;  %v862_v28 = vsel %vm8189_vm7, %v9456_v48, %v861_v39 }
  0xc3   : > { %v7249_v44 = vld [vmem:[#allocation3 + $0xb0] sm:$0xf0]  ;;  %4245 = vst [vmem:[#allocation3 + $0xa8] sm:$0xf] %v4213_v51  ;;  %v7211_v16 = vld [vmem:[%s9429_s3 + $0x40] sm:$0xff] }
  0xc4   : > { %v1033_v37 = vld [vmem:[#allocation2] sm:$0xf]  ;;  %3287 = vmatmul.bf16.gmra.mxu0 %v6262_v47  ;;  %v6310_v57 = vor.u32 %v7249_v44, %v6309_v59  ;;  %4246 = vst [vmem:[#allocation3 + $0xb4] sm:$0xf] %v4214_v4  ;;  %v1034_v51 = vld [vmem:[#allocation2 + $0x4] sm:$0xf]  ;;  %v869_v47 = vsel %vm8189_vm7, %v564_v54, %v868_v61 }
  0xc5   : > { %v8193_v60 = vld [vmem:[#allocation3 + $0x108] sm:$0xf]  ;;  %v8195_v11 = vld [vmem:[#allocation3 + $0x110] sm:$0xf0]  ;;  %1031 = vst [vmem:[#allocation3 + $0x168] sm:$0xf] %v999_v36  ;;  %4027 = vmatpush.bf16.msrb.mxu0 %v7211_v16 }
  0xc6   : > { %9454 = vst [vmem:[#allocation15_spill] sm:$0xff] %v8193_v60  ;;  %3307 = vmatmul.bf16.gmra.mxu1 %v6310_v57  ;;  %v1085_v44 = vshrl.u32 %v1033_v37, 16  ;;  %v1088_v4 = vshll.u32 %v1033_v37, 16  ;;  %v1094_v59 = vshll.u32 %v1034_v51, 16  ;;  %v4221_v57 = vld [vmem:[#allocation2 + $0x9c] sm:$0xf] }
  0xc7   : > { %9455 = vst [vmem:[#allocation16_spill] sm:$0xff] %v8195_v11  ;;  %v1984_v36 = vld [vmem:[#allocation2 + $0x10] sm:$0xf]  ;;  %v2032_v37 = vshrl.u32 %v1983_v46, 16 }
  0xc8   : > { %1973 = vst [vmem:[#allocation3 + $0x108] sm:$0xf] %v1941_v62  ;;  %v1098_v62 = vshrl.u32 %v1034_v51, 16  ;;  %v1087_v39 = vrot.slane %v1085_v44, 4  ;;  %v1090_v48 = vrot.slane %v1088_v4, 5  ;;  %v1096_v54 = vrot.slane %v1094_v59, 5 }
  0xc9   : > { %1974 = vst [vmem:[#allocation3 + $0x114] sm:$0xf] %v1942_v34  ;;  %v1104_v34 = vshll.u32 %v1035_v25, 16  ;;  %v1950_v51 = vld [vmem:[#allocation2 + $0xc4] sm:$0xf]  ;;  %v2041_v25 = vshll.u32 %v1984_v36, 16 }
  0xca   : > { %1032 = vst [vmem:[#allocation3 + $0x174] sm:$0xf] %v1000_v29  ;;  %v1100_v61 = vrot.slane %v1098_v62, 4  ;;  %v1091_v26 = vor.u32 %v1090_v48, %v1087_v39  ;;  %v2035_v29 = vshll.u32 %v1983_v46, 16  ;;  %v2045_v44 = vshrl.u32 %v1984_v36, 16 }
  0xcb   : > { %863 = vst [vmem:[#allocation2 + $0x14] sm:$0x1] %v862_v28  ;;  %v1106_v35 = vrot.slane %v1104_v34, 5  ;;  %v4312_v4 = vshrl.u32 %v4263_v21, 16  ;;  %v4315_v59 = vshll.u32 %v4263_v21, 16  ;;  %v2043_v7 = vrot.slane %v2041_v25, 5 }
  0xcc   : > { %870 = vst [vmem:[#allocation2 + $0x20] sm:$0x1] %v869_v47  ;;  %v1101_v31 = vor.u32 %v1100_v61, %v1096_v54  ;;  %v2034_v47 = vrot.slane %v2032_v37, 4  ;;  %v1092_v34 = vrot.slane %v1091_v26, 4  ;;  %v8210_v46 = vld [vmem:[#allocation3 + $0x168] sm:$0xf] }
  0xcd   : > { %9459 = vst [vmem:[#allocation17_spill] sm:$0xff] %v8210_v46  ;;  %v2037_v61 = vrot.slane %v2035_v29, 5  ;;  %v2047_v21 = vrot.slane %v2045_v44, 4  ;;  %v4314_v37 = vrot.slane %v4312_v4, 4 }
  0xce   : > { %v1102_v39 = vrot.slane %v1101_v31, 4  ;;  %1981 = vst [vmem:[#allocation3 + $0x168] sm:$0xf] %v1949_v33  ;;  %v1097_v11 = vsel %vm8206_vm12, %v1092_v34, %v1096_v54  ;;  %v4229_v33 = vld [vmem:[#allocation2 + $0xcc] sm:$0xf] }
  0xcf   : > { %v6357_v16 = vld [vmem:[#allocation3 + $0x108] sm:$0xf]  ;;  %v2038_v26 = vor.u32 %v2037_v61, %v2034_v47  ;;  %1500 = vst [vmem:[#allocation3 + $0x4] sm:$0xf] %v1097_v11  ;;  %v2048_v29 = vor.u32 %v2047_v21, %v2043_v7  ;;  %v7362_v11 = vld [vmem:[%s9429_s3 + $0x1f8] sm:$0xff] }
  0xd0   : > { %v7261_v62 = vld [vmem:[#allocation3 + $0x110] sm:$0xf0]  ;;  %4253 = vst [vmem:[#allocation3 + $0x108] sm:$0xf] %v4221_v57  ;;  %v1107_v36 = vsel %vm8206_vm12, %v1102_v39, %v1106_v35  ;;  %v4321_v57 = vshll.u32 %v4264_v14, 16  ;;  %5633 = vmatpush.bf16.msra.mxu3 %v7362_v11 }
  0xd1   : > { %v6358_v48 = vor.u32 %v7261_v62, %v6357_v16  ;;  %4254 = vst [vmem:[#allocation3 + $0x114] sm:$0xf] %v4222_v41  ;;  %v8212_v12 = vld [vmem:[#allocation3 + $0x170] sm:$0xf0]  ;;  %v4317_v41 = vrot.slane %v4315_v59, 5  ;;  %v4325_v62 = vshrl.u32 %v4264_v14, 16 }
  0xd2   : > { %9460 = vst [vmem:[#allocation18_spill] sm:$0xff] %v8212_v12  ;;  %v1985_v31 = vld [vmem:[#allocation2 + $0x14] sm:$0x1]  ;;  %v2039_v12 = vrot.slane %v2038_v26, 4  ;;  %v8218_v34 = vrot.slane %v4321_v57, 5  ;;  %v2049_v44 = vrot.slane %v2048_v29, 4 }
  0xd3   : > { %3327 = vmatmul.bf16.gmra.mxu2 %v6358_v48  ;;  %1982 = vst [vmem:[#allocation3 + $0x174] sm:$0xf] %v1950_v51  ;;  %v2051_v25 = vshll.u32 %v1985_v31, 16  ;;  %v4265_v16 = vld [vmem:[#allocation2 + $0x20] sm:$0x1]  ;;  %v4318_v54 = vor.u32 %v4317_v41, %v4314_v37  ;;  %v7354_v51 = vld [vmem:[%s9429_s3 + $0x1b8] sm:$0xff] }
  0xd4   : > { %1501 = vst [vmem:[#allocation3 + $0x10] sm:$0xf] %v1107_v36  ;;  %v4331_v35 = vshll.u32 %v4265_v16, 16  ;;  %v4327_v4 = vrot.slane %v4325_v62, 4  ;;  %v1532_v59 = vld [vmem:[#allocation2] sm:$0xe]  ;;  %5544 = vmatpush.bf16.msra.mxu2 %v7354_v51  ;;  %v2044_v57 = vsel %vm8206_vm12, %v2039_v12, %v2043_v7 }
  0xd5   : > { %v2053_v47 = vrot.slane %v2051_v25, 5  ;;  %v4230_v14 = vld [vmem:[#allocation2 + $0xd0] sm:$0xf]  ;;  %v1533_v39 = vld [vmem:[#allocation2 + $0x4] sm:$0xf]  ;;  %v6143_v21 = vrot.slane %v1532_v59, 9 }
  0xd6   : > { %v1534_v48 = vld [vmem:[#allocation2 + $0x8] sm:$0x1]  ;;  %v4328_v61 = vor.u32 %v4327_v4, %v8218_v34  ;;  %v1633_v37 = vrot.slane %v1533_v39, 5  ;;  %v2479_v31 = vld [vmem:[#allocation2 + $0xc] sm:$0xe]  ;;  %v4319_v29 = vrot.slane %v4318_v54, 4 }
  0xd7   : > { %v2480_v26 = vld [vmem:[#allocation2 + $0x10] sm:$0xf]  ;;  %v6405_v41 = vld [vmem:[#allocation3 + $0x168] sm:$0xf]  ;;  %v1636_v25 = vrot.slane %v1534_v48, 5  ;;  %v2054_v51 = vsel %vm8206_vm12, %v2049_v44, %v2053_v47  ;;  %v4333_v4 = vrot.slane %v4331_v35, 5 }
  0xd8   : > { %v2481_v16 = vld [vmem:[#allocation2 + $0x14] sm:$0x1]  ;;  %4261 = vst [vmem:[#allocation3 + $0x168] sm:$0xf] %v4229_v33  ;;  %v1635_v46 = vrot.slane %v1633_v37, 4  ;;  %v1634_v11 = vsel %vm8229_vm13, %v6143_v21, %v1633_v37  ;;  %v6159_v39 = vrot.slane %v2479_v31, 9 }
  0xd9   : > { %v7155_v59 = vld [vmem:[#allocation3 + $0x4] sm:$0xf]  ;;  %v2577_v42 = vrot.slane %v2480_v26, 5  ;;  %v4329_v12 = vrot.slane %v4328_v61, 4  ;;  %v2580_v33 = vrot.slane %v2481_v16, 5  ;;  %v9463_v37 = vrot.slane %v8011_v6, 4 }
  0xda   : > { %v7273_v62 = vld [vmem:[#allocation3 + $0x170] sm:$0xf0]  ;;  %2447 = vst [vmem:[#allocation3 + $0x4] sm:$0xf] %v2044_v57  ;;  %v1637_v7 = vsel %vm8229_vm13, %v1635_v46, %v1636_v25  ;;  %v8241_v54 = vld [vmem:[#allocation2 + $0x18] sm:$0xe]  ;;  %v4324_v57 = vsel %vm8206_vm12, %v4319_v29, %v8218_v34 }
  0xdb   : > { %v6406_v60 = vor.u32 %v7273_v62, %v6405_v41  ;;  %4262 = vst [vmem:[#allocation3 + $0x174] sm:$0xf] %v4230_v14  ;;  %v6515_v52 = vld [vmem:[#allocation3 + $0xc] sm:$0xf0]  ;;  %v8243_v35 = vld [vmem:[#allocation2 + $0x1c] sm:$0xf]  ;;  %v4334_v25 = vsel %vm8206_vm12, %v4329_v12, %v4333_v4 }
  0xdc   : > { %2448 = vst [vmem:[#allocation3 + $0x10] sm:$0xf] %v2054_v51  ;;  %v6518_v44 = vor.u32 %v7155_v59, %v6515_v52  ;;  %v8245_v47 = vld [vmem:[#allocation2 + $0x20] sm:$0x1]  ;;  %v4857_v14 = vrot.slane %v8243_v35, 5  ;;  %v7226_v48 = vld [vmem:[%s9429_s3 + $0xb8] sm:$0xff] }
  0xdd   : > { %3347 = vmatmul.bf16.gmra.mxu3 %v6406_v60  ;;  %1775 = vst [vmem:[#allocation3 + $0x8] sm:$0xf] %v1634_v11  ;;  %v2579_v61 = vrot.slane %v2577_v42, 4  ;;  %v7370_v60 = vld [vmem:[%s9429_s3 + $0x238] sm:$0xff]  ;;  %v875_v46 = vld [vmem:[#allocation2 + $0x2c] sm:$0x1]  ;;  %4109 = vmatpush.bf16.msra.mxu1 %v7226_v48 }
  0xde   : > { %1776 = vst [vmem:[#allocation3 + $0x14] sm:$0xf] %v1637_v7  ;;  %4028 = vmatmul.bf16.vlgmr.msrb.gmra.mxu0 %v6518_v44  ;;  %v6799_v21 = vrot.slane %v8241_v54, 9  ;;  %v876_v31 = vsel %vm8189_vm7, %v9463_v37, %v875_v46  ;;  %v1036_v26 = vld [vmem:[#allocation2 + $0xc] sm:$0xf]  ;;  %v4859_v59 = vrot.slane %v4857_v14, 4  ;;  %v2578_v44 = vsel %vm8229_vm13, %v6159_v39, %v2577_v42 }
  0xdf   : > { %v1037_v41 = vld [vmem:[#allocation2 + $0x10] sm:$0xf]  ;;  %5722 = vmatpush.bf16.msra.mxu0 %v7370_v60  ;;  %877 = vst [vmem:[#allocation2 + $0x2c] sm:$0x1] %v876_v31  ;;  %v1038_v16 = vld [vmem:[#allocation2 + $0x14] sm:$0x1]  ;;  %v2581_v4 = vsel %vm8229_vm13, %v2579_v61, %v2580_v33  ;;  %v6514_v42 = vor.u32 %v7747_v15, %v7744_v13 }
  0xe0   : > { %v1109_v62 = vshrl.u32 %v1036_v26, 16  ;;  %v1112_v51 = vshll.u32 %v1036_v26, 16  ;;  %v1118_v11 = vshll.u32 %v1037_v41, 16  ;;  %v1122_v6 = vshrl.u32 %v1037_v41, 16  ;;  %v1986_v54 = vld [vmem:[#allocation2 + $0x18] sm:$0xf] }
  0xe1   : > { %v1128_v7 = vshll.u32 %v1038_v16, 16  ;;  %v7227_v35 = vld [vmem:[#allocation3 + $0x4] sm:$0xf]  ;;  %v2056_v16 = vshrl.u32 %v1986_v54, 16 }
  0xe2   : > { %v1111_v48 = vrot.slane %v1109_v62, 4  ;;  %v1114_v46 = vrot.slane %v1112_v51, 5  ;;  %v1987_v34 = vld [vmem:[#allocation2 + $0x1c] sm:$0xf]  ;;  %4727 = vst [vmem:[#allocation3 + $0x4] sm:$0xf] %v4324_v57 }
  0xe3   : > { %v6227_v29 = vld [vmem:[#allocation3 + $0xc] sm:$0xf0]  ;;  %v1120_v12 = vrot.slane %v1118_v11, 5  ;;  %v1124_v60 = vrot.slane %v1122_v6, 4  ;;  %v1130_v41 = vrot.slane %v1128_v7, 5  ;;  %v2058_v61 = vrot.slane %v2056_v16, 4 }
  0xe4   : > { %v6230_v37 = vor.u32 %v7227_v35, %v6227_v29  ;;  %4728 = vst [vmem:[#allocation3 + $0x10] sm:$0xf] %v4334_v25  ;;  %v8269_v31 = vld [vmem:[#allocation3 + $0x8] sm:$0xf]  ;;  %v1115_v26 = vor.u32 %v1114_v46, %v1111_v48  ;;  %v2059_v62 = vshll.u32 %v1986_v54, 16  ;;  %v2065_v51 = vshll.u32 %v1987_v34, 16 }
  0xe5   : > { %v8271_v52 = vld [vmem:[#allocation3 + $0x10] sm:$0xf0]  ;;  %2719 = vst [vmem:[#allocation3 + $0x8] sm:$0xf] %v2578_v44  ;;  %v1125_v39 = vor.u32 %v1124_v60, %v1120_v12  ;;  %v1988_v57 = vld [vmem:[#allocation2 + $0x20] sm:$0x1]  ;;  %v4858_v44 = vsel %vm8229_vm13, %v6799_v21, %v4857_v14 }
  0xe6   : > { %3361 = vmatmul.bf16.vlgmr.msrb.gmra.mxu1 %v6230_v37  ;;  %2720 = vst [vmem:[#allocation3 + $0x14] sm:$0xf] %v2581_v4  ;;  %v1116_v33 = vrot.slane %v1115_v26, 4  ;;  %v2069_v11 = vshrl.u32 %v1987_v34, 16  ;;  %v2075_v6 = vshll.u32 %v1988_v57, 16  ;;  %v598_v7 = vrot.slane %v7769_v53, 4 }
  0xe7   : > { %v1126_v25 = vrot.slane %v1125_v39, 4  ;;  %v4266_v35 = vld [vmem:[#allocation2 + $0x24] sm:$0xf]  ;;  %v2061_v15 = vrot.slane %v2059_v62, 5  ;;  %v2067_v48 = vrot.slane %v2065_v51, 5  ;;  %v9464_v14 = vrot.slane %v8245_v47, 5 }
  0xe8   : > { %v1121_v13 = vsel %vm8206_vm12, %v1116_v33, %v1120_v12  ;;  %v4267_v46 = vld [vmem:[#allocation2 + $0x28] sm:$0xf]  ;;  %v4268_v29 = vld [vmem:[#allocation2 + $0x2c] sm:$0x1]  ;;  %v2071_v4 = vrot.slane %v2069_v11, 4  ;;  %v2077_v34 = vrot.slane %v2075_v6, 5  ;;  %v6522_v36 = vor.u32 %v8271_v52, %v8269_v31 }
  0xe9   : > { %v1131_v54 = vsel %vm8206_vm12, %v1126_v25, %v1130_v41  ;;  %1502 = vst [vmem:[#allocation3 + $0x1c] sm:$0xf] %v1121_v13  ;;  %v4336_v60 = vshrl.u32 %v4266_v35, 16  ;;  %v2062_v37 = vor.u32 %v2061_v15, %v2058_v61  ;;  %v4339_v26 = vshll.u32 %v4266_v35, 16  ;;  %v1535_v62 = vld [vmem:[#allocation2 + $0xc] sm:$0xe] }
  0xea   : > { %1503 = vst [vmem:[#allocation3 + $0x28] sm:$0xf] %v1131_v54  ;;  %v4345_v16 = vshll.u32 %v4267_v46, 16  ;;  %v4349_v39 = vshrl.u32 %v4267_v46, 16  ;;  %v4861_v21 = vsel %vm8229_vm13, %v4859_v59, %v9464_v14  ;;  %v2072_v12 = vor.u32 %v2071_v4, %v2067_v48  ;;  %v1536_v51 = vld [vmem:[#allocation2 + $0x10] sm:$0xf] }
  0xeb   : > { %v4338_v57 = vrot.slane %v4336_v60, 4  ;;  %v4355_v33 = vshll.u32 %v4268_v29, 16  ;;  %v2063_v25 = vrot.slane %v2062_v37, 4  ;;  %v4341_v11 = vrot.slane %v4339_v26, 5  ;;  %v1537_v29 = vld [vmem:[#allocation2 + $0x14] sm:$0x1] }
  0xec   : > { %v6233_v41 = vld [vmem:[#allocation3 + $0x8] sm:$0xf]  ;;  %v4347_v6 = vrot.slane %v4345_v16, 5  ;;  %v4351_v13 = vrot.slane %v4349_v39, 4  ;;  %v2073_v35 = vrot.slane %v2072_v12, 4  ;;  %v1640_v60 = vrot.slane %v1536_v51, 5 }
  0xed   : > { %3939 = vmatmul.bf16.vlgmr.msrb.gmra.mxu3 %v6514_v42  ;;  %v7229_v61 = vld [vmem:[#allocation3 + $0x10] sm:$0xf0]  ;;  %4999 = vst [vmem:[#allocation3 + $0x8] sm:$0xf] %v4858_v44  ;;  %v4357_v15 = vrot.slane %v4355_v33, 5  ;;  %v2068_v47 = vsel %vm8206_vm12, %v2063_v25, %v2067_v48  ;;  %v4342_v59 = vor.u32 %v4341_v11, %v4338_v57  ;;  %v6144_v42 = vrot.slane %v1535_v62, 9 }
  0xee   : > { %v6234_v46 = vor.u32 %v7229_v61, %v6233_v41  ;;  %5000 = vst [vmem:[#allocation3 + $0x14] sm:$0xf] %v4861_v21  ;;  %v4352_v54 = vor.u32 %v4351_v13, %v4347_v6  ;;  %v2078_v4 = vsel %vm8206_vm12, %v2073_v35, %v2077_v34  ;;  %v1643_v37 = vrot.slane %v1537_v29, 5  ;;  %v2483_v26 = vld [vmem:[#allocation2 + $0x1c] sm:$0xf] }
  0xef   : > { %v2482_v44 = vld [vmem:[#allocation2 + $0x18] sm:$0xe]  ;;  %v2484_v39 = vld [vmem:[#allocation2 + $0x20] sm:$0x1]  ;;  %v4343_v21 = vrot.slane %v4342_v59, 4  ;;  %v1641_v48 = vsel %vm8229_vm13, %v6144_v42, %v1640_v60  ;;  %v1642_v12 = vrot.slane %v1640_v60, 4 }
  0xf0   : > { %3450 = vmatmul.bf16.vlgmr.msrb.gmra.mxu2 %v6234_v46  ;;  %v7158_v16 = vld [vmem:[#allocation3 + $0x1c] sm:$0xf]  ;;  %v4353_v57 = vrot.slane %v4352_v54, 4  ;;  %v2584_v33 = vrot.slane %v2483_v26, 5  ;;  %v4762_v41 = vld [vmem:[#allocation2 + $0x24] sm:$0xe] }
  0xf1   : > { %v6527_v14 = vld [vmem:[#allocation3 + $0x24] sm:$0xf0]  ;;  %2449 = vst [vmem:[#allocation3 + $0x1c] sm:$0xf] %v2068_v47  ;;  %v1644_v34 = vsel %vm8229_vm13, %v1642_v12, %v1643_v37  ;;  %v4763_v62 = vld [vmem:[#allocation2 + $0x28] sm:$0xf]  ;;  %v4348_v61 = vsel %vm8206_vm12, %v4343_v21, %v4347_v6 }
  0xf2   : > { %2450 = vst [vmem:[#allocation3 + $0x28] sm:$0xf] %v2078_v4  ;;  %v4764_v51 = vld [vmem:[#allocation2 + $0x2c] sm:$0x1]  ;;  %v6530_v25 = vor.u32 %v7158_v16, %v6527_v14  ;;  %v6160_v11 = vrot.slane %v2482_v44, 9  ;;  %v4864_v13 = vrot.slane %v4763_v62, 5  ;;  %v4358_v54 = vsel %vm8206_vm12, %v4353_v57, %v4357_v15 }
  0xf3   : > { %1777 = vst [vmem:[#allocation3 + $0x20] sm:$0xf] %v1641_v48  ;;  %v2586_v35 = vrot.slane %v2584_v33, 4  ;;  %v2587_v46 = vrot.slane %v2484_v39, 5  ;;  %v882_v47 = vld [vmem:[#allocation2 + $0x38] sm:$0x1]  ;;  %v6526_v15 = vor.u32 %v8041_v45, %v8039_v40 }
  0xf4   : > { %1778 = vst [vmem:[#allocation3 + $0x2c] sm:$0xf] %v1644_v34  ;;  %4033 = vmatmul.bf16.gmra.mxu0 %v6530_v25  ;;  %v1039_v59 = vld [vmem:[#allocation2 + $0x18] sm:$0xf]  ;;  %v6800_v29 = vrot.slane %v4762_v41, 9  ;;  %v4867_v4 = vrot.slane %v4764_v51, 5  ;;  %v883_v42 = vsel %vm8189_vm7, %v598_v7, %v882_v47  ;;  %v2585_v14 = vsel %vm8229_vm13, %v6160_v11, %v2584_v33 }
  0xf5   : > { %v1040_v60 = vld [vmem:[#allocation2 + $0x1c] sm:$0xf]  ;;  %v1041_v37 = vld [vmem:[#allocation2 + $0x20] sm:$0x1]  ;;  %884 = vst [vmem:[#allocation2 + $0x38] sm:$0x1] %v883_v42  ;;  %v2588_v7 = vsel %vm8229_vm13, %v2586_v35, %v2587_v46 }
  0xf6   : > { %v1133_v26 = vshrl.u32 %v1039_v59, 16  ;;  %v1136_v6 = vshll.u32 %v1039_v59, 16  ;;  %v1142_v16 = vshll.u32 %v1040_v60, 16  ;;  %v1146_v44 = vshrl.u32 %v1040_v60, 16  ;;  %v1989_v53 = vld [vmem:[#allocation2 + $0x24] sm:$0xf] }
  0xf7   : > { %v4866_v21 = vrot.slane %v4864_v13, 4  ;;  %v1152_v48 = vshll.u32 %v1041_v37, 16  ;;  %v2080_v45 = vshrl.u32 %v1989_v53, 16  ;;  %v1990_v47 = vld [vmem:[#allocation2 + $0x28] sm:$0xf]  ;;  %v2083_v60 = vshll.u32 %v1989_v53, 16 }
  0xf8   : > { %v7230_v39 = vld [vmem:[#allocation3 + $0x1c] sm:$0xf]  ;;  %v1135_v57 = vrot.slane %v1133_v26, 4  ;;  %v1138_v41 = vrot.slane %v1136_v6, 5  ;;  %v1144_v51 = vrot.slane %v1142_v16, 5  ;;  %v1148_v25 = vrot.slane %v1146_v44, 4 }
  0xf9   : > { %v6239_v12 = vld [vmem:[#allocation3 + $0x24] sm:$0xf0]  ;;  %4729 = vst [vmem:[#allocation3 + $0x1c] sm:$0xf] %v4348_v61  ;;  %v1154_v40 = vrot.slane %v1152_v48, 5  ;;  %v4865_v61 = vsel %vm8229_vm13, %v6800_v29, %v4864_v13  ;;  %v4868_v35 = vsel %vm8229_vm13, %v4866_v21, %v4867_v4  ;;  %v2082_v42 = vrot.slane %v2080_v45, 4 }
  0xfa   : > { %v6242_v34 = vor.u32 %v7230_v39, %v6239_v12  ;;  %4730 = vst [vmem:[#allocation3 + $0x28] sm:$0xf] %v4358_v54  ;;  %v8308_v62 = vld [vmem:[#allocation3 + $0x20] sm:$0xf]  ;;  %v1139_v11 = vor.u32 %v1138_v41, %v1135_v57  ;;  %v1149_v46 = vor.u32 %v1148_v25, %v1144_v51  ;;  %v1991_v59 = vld [vmem:[#allocation2 + $0x2c] sm:$0x1] }
  0xfb   : > { %v8310_v33 = vld [vmem:[#allocation3 + $0x28] sm:$0xf0]  ;;  %2721 = vst [vmem:[#allocation3 + $0x20] sm:$0xf] %v2585_v14  ;;  %v2089_v37 = vshll.u32 %v1990_v47, 16  ;;  %v2093_v16 = vshrl.u32 %v1990_v47, 16 }
  0xfc   : > { %3366 = vmatmul.bf16.gmra.mxu1 %v6242_v34  ;;  %2722 = vst [vmem:[#allocation3 + $0x2c] sm:$0xf] %v2588_v7  ;;  %v1140_v54 = vrot.slane %v1139_v11, 4  ;;  %v4269_v26 = vld [vmem:[#allocation2 + $0x30] sm:$0xf]  ;;  %v1150_v6 = vrot.slane %v1149_v46, 4 }
  0xfd   : > { %3944 = vmatmul.bf16.gmra.mxu3 %v6526_v15  ;;  %v2099_v44 = vshll.u32 %v1991_v59, 16  ;;  %v4270_v39 = vld [vmem:[#allocation2 + $0x34] sm:$0xf]  ;;  %v4360_v14 = vshrl.u32 %v4269_v26, 16  ;;  %v2085_v29 = vrot.slane %v2083_v60, 5  ;;  %v2091_v48 = vrot.slane %v2089_v37, 5 }
  0xfe   : > { %v1145_v13 = vsel %vm8206_vm12, %v1140_v54, %v1144_v51  ;;  %v4271_v4 = vld [vmem:[#allocation2 + $0x38] sm:$0x1]  ;;  %v4363_v21 = vshll.u32 %v4269_v26, 16  ;;  %v7353_v15 = vld [vmem:[%s9429_s3 + $0x1b0] sm:$0xff]  ;;  %v1155_v53 = vsel %vm8206_vm12, %v1150_v6, %v1154_v40  ;;  %v2095_v12 = vrot.slane %v2093_v16, 4 }
  0xff   : > { %1504 = vst [vmem:[#allocation3 + $0x34] sm:$0xf] %v1145_v13  ;;  %v2101_v7 = vrot.slane %v2099_v44, 5  ;;  %v4362_v57 = vrot.slane %v4360_v14, 4  ;;  %v7361_v41 = vld [vmem:[%s9429_s3 + $0x1f0] sm:$0xff]  ;;  %v2086_v34 = vor.u32 %v2085_v29, %v2082_v42  ;;  %v4369_v25 = vshll.u32 %v4270_v39, 16  ;;  %5545 = vmatpush.bf16.msra.mxu2 %v7353_v15 }
 0x100   : > { %1505 = vst [vmem:[#allocation3 + $0x40] sm:$0xf] %v1155_v53  ;;  %v4365_v51 = vrot.slane %v4363_v21, 5  ;;  %v4373_v11 = vshrl.u32 %v4270_v39, 16  ;;  %v7225_v45 = vld [vmem:[%s9429_s3 + $0xb0] sm:$0xff]  ;;  %v2096_v40 = vor.u32 %v2095_v12, %v2091_v48  ;;  %v4379_v47 = vshll.u32 %v4271_v4, 16  ;;  %5634 = vmatpush.bf16.msra.mxu3 %v7361_v41 }
 0x101   : > { %v1538_v59 = vld [vmem:[#allocation2 + $0x18] sm:$0xe]  ;;  %v7369_v54 = vld [vmem:[%s9429_s3 + $0x230] sm:$0xff]  ;;  %v2087_v42 = vrot.slane %v2086_v34, 4  ;;  %v8332_v26 = vrot.slane %v4369_v25, 5  ;;  %4110 = vmatpush.bf16.msra.mxu1 %v7225_v45  ;;  %v615_v6 = vrot.slane %v7796_v19, 4 }
 0x102   : > { %v6245_v46 = vld [vmem:[#allocation3 + $0x20] sm:$0xf]  ;;  %v4366_v37 = vor.u32 %v4365_v51, %v4362_v57  ;;  %v2097_v44 = vrot.slane %v2096_v40, 4  ;;  %v4375_v39 = vrot.slane %v4373_v11, 4  ;;  %5723 = vmatpush.bf16.msra.mxu0 %v7369_v54  ;;  %v8337_v13 = vrot.slane %v4379_v47, 5 }
 0x103   : > { %v7232_v60 = vld [vmem:[#allocation3 + $0x28] sm:$0xf0]  ;;  %5001 = vst [vmem:[#allocation3 + $0x20] sm:$0xf] %v4865_v61  ;;  %v2092_v14 = vsel %vm8206_vm12, %v2087_v42, %v2091_v48  ;;  %v1539_v29 = vld [vmem:[#allocation2 + $0x1c] sm:$0xf] }
 0x104   : > { %v6246_v16 = vor.u32 %v7232_v60, %v6245_v46  ;;  %5002 = vst [vmem:[#allocation3 + $0x2c] sm:$0xf] %v4868_v35  ;;  %v1540_v4 = vld [vmem:[#allocation2 + $0x20] sm:$0x1]  ;;  %v6145_v61 = vrot.slane %v1538_v59, 9  ;;  %v2102_v21 = vsel %vm8206_vm12, %v2097_v44, %v2101_v7  ;;  %v4376_v15 = vor.u32 %v4375_v39, %v8332_v26 }
 0x105   : > { %v1647_v19 = vrot.slane %v1539_v29, 5  ;;  %v1650_v53 = vrot.slane %v1540_v4, 5  ;;  %v2485_v35 = vld [vmem:[#allocation2 + $0x24] sm:$0xe]  ;;  %v2486_v12 = vld [vmem:[#allocation2 + $0x28] sm:$0xf]  ;;  %v6538_v7 = vor.u32 %v8102_v1, %v8100_v43 }
 0x106   : > { %3455 = vmatmul.bf16.gmra.mxu2 %v6246_v16  ;;  %v7161_v57 = vld [vmem:[#allocation3 + $0x34] sm:$0xf]  ;;  %v4367_v41 = vrot.slane %v4366_v37, 4  ;;  %v2591_v51 = vrot.slane %v2486_v12, 5  ;;  %v6161_v45 = vrot.slane %v2485_v35, 9  ;;  %v4377_v46 = vrot.slane %v4376_v15, 4 }
 0x107   : > { %v2487_v34 = vld [vmem:[#allocation2 + $0x2c] sm:$0x1]  ;;  %v6539_v48 = vld [vmem:[#allocation3 + $0x3c] sm:$0xf0]  ;;  %2451 = vst [vmem:[#allocation3 + $0x34] sm:$0xf] %v2092_v14  ;;  %v1648_v25 = vsel %vm8229_vm13, %v6145_v61, %v1647_v19 }
 0x108   : > { %v1649_v11 = vrot.slane %v1647_v19, 4  ;;  %2452 = vst [vmem:[#allocation3 + $0x40] sm:$0xf] %v2102_v21  ;;  %v2593_v40 = vrot.slane %v2591_v51, 4  ;;  %v4765_v47 = vld [vmem:[#allocation2 + $0x30] sm:$0xe]  ;;  %v6542_v59 = vor.u32 %v7161_v57, %v6539_v48  ;;  %v4372_v43 = vsel %vm8206_vm12, %v4367_v41, %v8332_v26 }
 0x109   : > { %1779 = vst [vmem:[#allocation3 + $0x38] sm:$0xf] %v1648_v25  ;;  %v4766_v60 = vld [vmem:[#allocation2 + $0x34] sm:$0xf]  ;;  %v4767_v42 = vld [vmem:[#allocation2 + $0x38] sm:$0x1]  ;;  %v4382_v4 = vsel %vm8206_vm12, %v4377_v46, %v8337_v13 }
 0x10a   : > { %v1651_v54 = vsel %vm8229_vm13, %v1649_v11, %v1650_v53  ;;  %v2594_v37 = vrot.slane %v2487_v34, 5  ;;  %v6801_v16 = vrot.slane %v4765_v47, 9  ;;  %v4871_v44 = vrot.slane %v4766_v60, 5  ;;  %4038 = vmatmul.bf16.gmra.mxu0 %v6542_v59  ;;  %v889_v1 = vld [vmem:[#allocation2 + $0x44] sm:$0x1] }
 0x10b   : > { %1780 = vst [vmem:[#allocation3 + $0x44] sm:$0xf] %v1651_v54  ;;  %v4874_v39 = vrot.slane %v4767_v42, 5  ;;  %v1042_v14 = vld [vmem:[#allocation2 + $0x24] sm:$0xf]  ;;  %v890_v21 = vsel %vm8189_vm7, %v615_v6, %v889_v1  ;;  %v2592_v34 = vsel %vm8229_vm13, %v6161_v45, %v2591_v51 }
 0x10c   : > { %v1043_v29 = vld [vmem:[#allocation2 + $0x28] sm:$0xf]  ;;  %v4873_v61 = vrot.slane %v4871_v44, 4  ;;  %v1044_v15 = vld [vmem:[#allocation2 + $0x2c] sm:$0x1]  ;;  %v1157_v19 = vshrl.u32 %v1042_v14, 16  ;;  %v2595_v6 = vsel %vm8229_vm13, %v2593_v40, %v2594_v37  ;;  %v4872_v51 = vsel %vm8229_vm13, %v6801_v16, %v4871_v44 }
 0x10d   : > { %3949 = vmatmul.bf16.gmra.mxu3 %v6538_v7  ;;  %v1992_v53 = vld [vmem:[#allocation2 + $0x30] sm:$0xf]  ;;  %891 = vst [vmem:[#allocation2 + $0x44] sm:$0x1] %v890_v21  ;;  %v1160_v35 = vshll.u32 %v1042_v14, 16  ;;  %v1166_v12 = vshll.u32 %v1043_v29, 16 }
 0x10e   : > { %v1170_v57 = vshrl.u32 %v1043_v29, 16  ;;  %v1176_v26 = vshll.u32 %v1044_v15, 16  ;;  %v7233_v41 = vld [vmem:[#allocation3 + $0x34] sm:$0xf]  ;;  %v1159_v48 = vrot.slane %v1157_v19, 4  ;;  %v2104_v11 = vshrl.u32 %v1992_v53, 16 }
 0x10f   : > { %v1993_v25 = vld [vmem:[#allocation2 + $0x34] sm:$0xf]  ;;  %v6251_v13 = vld [vmem:[#allocation3 + $0x3c] sm:$0xf0]  ;;  %4731 = vst [vmem:[#allocation3 + $0x34] sm:$0xf] %v4372_v43  ;;  %v4875_v45 = vsel %vm8229_vm13, %v4873_v61, %v4874_v39 }
 0x110   : > { %v1162_v7 = vrot.slane %v1160_v35, 5  ;;  %v1168_v46 = vrot.slane %v1166_v12, 5  ;;  %v6254_v47 = vor.u32 %v7233_v41, %v6251_v13  ;;  %4732 = vst [vmem:[#allocation3 + $0x40] sm:$0xf] %v4382_v4  ;;  %v8360_v59 = vld [vmem:[#allocation3 + $0x38] sm:$0xf]  ;;  %v6550_v35 = vor.u32 %v8150_v10, %v8148_v8 }
 0x111   : > { %v1172_v54 = vrot.slane %v1170_v57, 4  ;;  %v1178_v60 = vrot.slane %v1176_v26, 5  ;;  %2723 = vst [vmem:[#allocation3 + $0x38] sm:$0xf] %v2592_v34  ;;  %v1994_v1 = vld [vmem:[#allocation2 + $0x38] sm:$0x1] }
 0x112   : > { %v8362_v42 = vld [vmem:[#allocation3 + $0x40] sm:$0xf0]  ;;  %v1163_v43 = vor.u32 %v1162_v7, %v1159_v48  ;;  %3371 = vmatmul.bf16.gmra.mxu1 %v6254_v47  ;;  %v2106_v37 = vrot.slane %v2104_v11, 4  ;;  %v2107_v14 = vshll.u32 %v1992_v53, 16  ;;  %v2113_v29 = vshll.u32 %v1993_v25, 16 }
 0x113   : > { %2724 = vst [vmem:[#allocation3 + $0x44] sm:$0xf] %v2595_v6  ;;  %v1173_v40 = vor.u32 %v1172_v54, %v1168_v46  ;;  %v2117_v21 = vshrl.u32 %v1993_v25, 16  ;;  %v2123_v15 = vshll.u32 %v1994_v1, 16  ;;  %v4272_v19 = vld [vmem:[#allocation2 + $0x3c] sm:$0xf] }
 0x114   : > { %v1164_v4 = vrot.slane %v1163_v43, 4  ;;  %v2109_v16 = vrot.slane %v2107_v14, 5  ;;  %v2115_v44 = vrot.slane %v2113_v29, 5  ;;  %v4273_v57 = vld [vmem:[#allocation2 + $0x40] sm:$0xf]  ;;  %v4384_v39 = vshrl.u32 %v4272_v19, 16 }
 0x115   : > { %v1174_v12 = vrot.slane %v1173_v40, 4  ;;  %v2119_v26 = vrot.slane %v2117_v21, 4  ;;  %v2125_v41 = vrot.slane %v2123_v15, 5  ;;  %v4274_v34 = vld [vmem:[#allocation2 + $0x44] sm:$0x1]  ;;  %v4387_v53 = vshll.u32 %v4272_v19, 16 }
 0x116   : > { %v1169_v61 = vsel %vm8206_vm12, %v1164_v4, %v1168_v46  ;;  %v2110_v25 = vor.u32 %v2109_v16, %v2106_v37  ;;  %v4386_v11 = vrot.slane %v4384_v39, 4  ;;  %v4393_v13 = vshll.u32 %v4273_v57, 16  ;;  %v1541_v8 = vld [vmem:[#allocation2 + $0x24] sm:$0xe]  ;;  %v1542_v1 = vld [vmem:[#allocation2 + $0x28] sm:$0xf] }
 0x117   : > { %v1179_v48 = vsel %vm8206_vm12, %v1174_v12, %v1178_v60  ;;  %1506 = vst [vmem:[#allocation3 + $0x4c] sm:$0xf] %v1169_v61  ;;  %v2120_v10 = vor.u32 %v2119_v26, %v2115_v44  ;;  %v4389_v6 = vrot.slane %v4387_v53, 5  ;;  %v4397_v7 = vshrl.u32 %v4273_v57, 16  ;;  %v1543_v37 = vld [vmem:[#allocation2 + $0x2c] sm:$0x1] }
 0x118   : > { %1507 = vst [vmem:[#allocation3 + $0x58] sm:$0xf] %v1179_v48  ;;  %v4403_v47 = vshll.u32 %v4274_v34, 16  ;;  %v6257_v54 = vld [vmem:[#allocation3 + $0x38] sm:$0xf]  ;;  %v2111_v43 = vrot.slane %v2110_v25, 4 }
 0x119   : > { %v8374_v46 = vrot.slane %v4393_v13, 5  ;;  %5003 = vst [vmem:[#allocation3 + $0x38] sm:$0xf] %v4872_v51  ;;  %v2121_v14 = vrot.slane %v2120_v10, 4  ;;  %v4390_v29 = vor.u32 %v4389_v6, %v4386_v11  ;;  %v4399_v60 = vrot.slane %v4397_v7, 4 }
 0x11a   : > { %v7235_v40 = vld [vmem:[#allocation3 + $0x40] sm:$0xf0]  ;;  %v6146_v21 = vrot.slane %v1541_v8, 9  ;;  %v632_v15 = vrot.slane %v7868_v23, 4  ;;  %v2116_v19 = vsel %vm8206_vm12, %v2111_v43, %v2115_v44  ;;  %v1654_v16 = vrot.slane %v1542_v1, 5 }
 0x11b   : > { %v6258_v4 = vor.u32 %v7235_v40, %v6257_v54  ;;  %5004 = vst [vmem:[#allocation3 + $0x44] sm:$0xf] %v4875_v45  ;;  %v4400_v12 = vor.u32 %v4399_v60, %v8374_v46  ;;  %v2488_v57 = vld [vmem:[#allocation2 + $0x30] sm:$0xe]  ;;  %v2489_v39 = vld [vmem:[#allocation2 + $0x34] sm:$0xf]  ;;  %v2126_v51 = vsel %vm8206_vm12, %v2121_v14, %v2125_v41 }
 0x11c   : > { %v4405_v61 = vrot.slane %v4403_v47, 5  ;;  %v1657_v26 = vrot.slane %v1543_v37, 5  ;;  %v2490_v45 = vld [vmem:[#allocation2 + $0x38] sm:$0x1]  ;;  %v2598_v34 = vrot.slane %v2489_v39, 5  ;;  %v4391_v48 = vrot.slane %v4390_v29, 4 }
 0x11d   : > { %3954 = vmatmul.bf16.gmra.mxu3 %v6550_v35  ;;  %3460 = vmatmul.bf16.gmra.mxu2 %v6258_v4  ;;  %v1655_v23 = vsel %vm8229_vm13, %v6146_v21, %v1654_v16  ;;  %v1656_v44 = vrot.slane %v1654_v16, 4  ;;  %v8384_v25 = vld [vmem:[#allocation2 + $0x3c] sm:$0xe]  ;;  %v4401_v13 = vrot.slane %v4400_v12, 4  ;;  %v6162_v35 = vrot.slane %v2488_v57, 9 }
 0x11e   : > { %v7164_v53 = vld [vmem:[#allocation3 + $0x4c] sm:$0xf]  ;;  %v8388_v8 = vld [vmem:[#allocation2 + $0x40] sm:$0xf]  ;;  %1781 = vst [vmem:[#allocation3 + $0x50] sm:$0xf] %v1655_v23  ;;  %v4396_v14 = vsel %vm8206_vm12, %v4391_v48, %v8374_v46 }
 0x11f   : > { %v6551_v11 = vld [vmem:[#allocation3 + $0x54] sm:$0xf0]  ;;  %2453 = vst [vmem:[#allocation3 + $0x4c] sm:$0xf] %v2116_v19  ;;  %v1658_v41 = vsel %vm8229_vm13, %v1656_v44, %v1657_v26  ;;  %v8390_v10 = vld [vmem:[#allocation2 + $0x44] sm:$0x1]  ;;  %v4406_v39 = vsel %vm8206_vm12, %v4401_v13, %v4405_v61 }
 0x120   : > { %2454 = vst [vmem:[#allocation3 + $0x58] sm:$0xf] %v2126_v51  ;;  %v6554_v6 = vor.u32 %v7164_v53, %v6551_v11  ;;  %v2600_v7 = vrot.slane %v2598_v34, 4  ;;  %v2601_v47 = vrot.slane %v2490_v45, 5  ;;  %v6802_v54 = vrot.slane %v8384_v25, 9 }
 0x121   : > { %v4878_v43 = vrot.slane %v8388_v8, 5  ;;  %1782 = vst [vmem:[#allocation3 + $0x5c] sm:$0xf] %v1658_v41  ;;  %v896_v1 = vld [vmem:[#allocation2 + $0x50] sm:$0x1]  ;;  %v4881_v29 = vrot.slane %v8390_v10, 5  ;;  %v2599_v51 = vsel %vm8229_vm13, %v6162_v35, %v2598_v34 }
 0x122   : > { %4043 = vmatmul.bf16.gmra.mxu0 %v6554_v6  ;;  %v1045_v40 = vld [vmem:[#allocation2 + $0x30] sm:$0xf]  ;;  %v897_v60 = vsel %vm8189_vm7, %v632_v15, %v896_v1  ;;  %v1046_v4 = vld [vmem:[#allocation2 + $0x34] sm:$0xf]  ;;  %v1047_v37 = vld [vmem:[#allocation2 + $0x38] sm:$0x1]  ;;  %v2602_v41 = vsel %vm8229_vm13, %v2600_v7, %v2601_v47 }
 0x123   : > { %v1181_v21 = vshrl.u32 %v1045_v40, 16  ;;  %898 = vst [vmem:[#allocation2 + $0x50] sm:$0x1] %v897_v60  ;;  %v1184_v19 = vshll.u32 %v1045_v40, 16  ;;  %v1190_v12 = vshll.u32 %v1046_v4, 16  ;;  %v1194_v16 = vshrl.u32 %v1046_v4, 16 }
 0x124   : > { %v1200_v57 = vshll.u32 %v1047_v37, 16  ;;  %v4880_v46 = vrot.slane %v4878_v43, 4  ;;  %v1995_v45 = vld [vmem:[#allocation2 + $0x3c] sm:$0xf]  ;;  %v1996_v53 = vld [vmem:[#allocation2 + $0x40] sm:$0xf]  ;;  %v6562_v4 = vor.u32 %v7974_v9, %v7962_v18 }
 0x125   : > { %v1183_v26 = vrot.slane %v1181_v21, 4  ;;  %v1186_v15 = vrot.slane %v1184_v19, 5  ;;  %v1192_v23 = vrot.slane %v1190_v12, 5  ;;  %v1196_v44 = vrot.slane %v1194_v16, 4  ;;  %v1997_v8 = vld [vmem:[#allocation2 + $0x44] sm:$0x1] }
 0x126   : > { %v7236_v48 = vld [vmem:[#allocation3 + $0x4c] sm:$0xf]  ;;  %v1202_v25 = vrot.slane %v1200_v57, 5  ;;  %v8406_v61 = vld [vmem:[#allocation3 + $0x50] sm:$0xf]  ;;  %v2128_v35 = vshrl.u32 %v1995_v45, 16 }
 0x127   : > { %v6263_v11 = vld [vmem:[#allocation3 + $0x54] sm:$0xf0]  ;;  %4733 = vst [vmem:[#allocation3 + $0x4c] sm:$0xf] %v4396_v14  ;;  %v1187_v34 = vor.u32 %v1186_v15, %v1183_v26  ;;  %v1197_v13 = vor.u32 %v1196_v44, %v1192_v23  ;;  %v2131_v40 = vshll.u32 %v1995_v45, 16  ;;  %v2137_v60 = vshll.u32 %v1996_v53, 16 }
 0x128   : > { %v6266_v6 = vor.u32 %v7236_v48, %v6263_v11  ;;  %4734 = vst [vmem:[#allocation3 + $0x58] sm:$0xf] %v4406_v39  ;;  %v8408_v1 = vld [vmem:[#allocation3 + $0x58] sm:$0xf0]  ;;  %v2130_v47 = vrot.slane %v2128_v35, 4  ;;  %v2141_v37 = vshrl.u32 %v1996_v53, 16  ;;  %v4879_v53 = vsel %vm8229_vm13, %v6802_v54, %v4878_v43  ;;  %v8431_v43 = vpop.f32.mrf.mxu1 }
 0x129   : > { %2725 = vst [vmem:[#allocation3 + $0x50] sm:$0xf] %v2599_v51  ;;  %v1188_v14 = vrot.slane %v1187_v34, 4  ;;  %v1198_v7 = vrot.slane %v1197_v13, 4  ;;  %v2133_v21 = vrot.slane %v2131_v40, 5  ;;  %v2139_v19 = vrot.slane %v2137_v60, 5 }
 0x12a   : > { %3376 = vmatmul.bf16.gmra.mxu1 %v6266_v6  ;;  %2726 = vst [vmem:[#allocation3 + $0x5c] sm:$0xf] %v2602_v41  ;;  %v2147_v12 = vshll.u32 %v1997_v8, 16  ;;  %v4275_v16 = vld [vmem:[#allocation2 + $0x48] sm:$0xf]  ;;  %v2143_v9 = vrot.slane %v2141_v37, 4  ;;  %v4882_v54 = vsel %vm8229_vm13, %v4880_v46, %v4881_v29 }
 0x12b   : > { %v7352_v57 = vld [vmem:[%s9429_s3 + $0x1a8] sm:$0xff]  ;;  %v1193_v39 = vsel %vm8206_vm12, %v1188_v14, %v1192_v23  ;;  %v1203_v18 = vsel %vm8206_vm12, %v1198_v7, %v1202_v25  ;;  %v4277_v26 = vld [vmem:[#allocation2 + $0x50] sm:$0x1]  ;;  %v4408_v45 = vshrl.u32 %v4275_v16, 16  ;;  %v2134_v48 = vor.u32 %v2133_v21, %v2130_v47  ;;  %v1544_v40 = vld [vmem:[#allocation2 + $0x30] sm:$0xe] }
 0x12c   : > { %v4276_v51 = vld [vmem:[#allocation2 + $0x4c] sm:$0xf]  ;;  %1508 = vst [vmem:[#allocation3 + $0x64] sm:$0xf] %v1193_v39  ;;  %v4411_v15 = vshll.u32 %v4275_v16, 16  ;;  %5546 = vmatpush.bf16.msra.mxu2 %v7352_v57  ;;  %v2144_v11 = vor.u32 %v2143_v9, %v2139_v19  ;;  %v2149_v25 = vrot.slane %v2147_v12, 5 }
 0x12d   : > { %3959 = vmatmul.bf16.gmra.mxu3 %v6562_v4  ;;  %v4417_v44 = vshll.u32 %v4276_v51, 16  ;;  %v7360_v23 = vld [vmem:[%s9429_s3 + $0x1e8] sm:$0xff]  ;;  %1509 = vst [vmem:[#allocation3 + $0x70] sm:$0xf] %v1203_v18  ;;  %v4410_v41 = vrot.slane %v4408_v45, 4  ;;  %v4421_v8 = vshrl.u32 %v4276_v51, 16 }
 0x12e   : > { %v7224_v6 = vld [vmem:[%s9429_s3 + $0xa8] sm:$0xff]  ;;  %v2135_v34 = vrot.slane %v2134_v48, 4  ;;  %v4413_v13 = vrot.slane %v4411_v15, 5  ;;  %5635 = vmatpush.bf16.msra.mxu3 %v7360_v23  ;;  %v2145_v14 = vrot.slane %v2144_v11, 4  ;;  %v4427_v47 = vshll.u32 %v4277_v26, 16 }
 0x12f   : > { %v8433_v35 = vrot.slane %v4417_v44, 5  ;;  %v7368_v60 = vld [vmem:[%s9429_s3 + $0x228] sm:$0xff]  ;;  %v4423_v7 = vrot.slane %v4421_v8, 4  ;;  %v6147_v10 = vrot.slane %v1544_v40, 9  ;;  %4111 = vmatpush.bf16.msra.mxu1 %v7224_v6  ;;  %v1545_v46 = vld [vmem:[#allocation2 + $0x34] sm:$0xf] }
 0x130   : > { %v6269_v4 = vld [vmem:[#allocation3 + $0x50] sm:$0xf]  ;;  %v4414_v29 = vor.u32 %v4413_v13, %v4410_v41  ;;  %5724 = vmatpush.bf16.msra.mxu0 %v7368_v60  ;;  %v2140_v12 = vsel %vm8206_vm12, %v2135_v34, %v2139_v19  ;;  %v1546_v57 = vld [vmem:[#allocation2 + $0x38] sm:$0x1]  ;;  %v1661_v39 = vrot.slane %v1545_v46, 5  ;;  %v2150_v18 = vsel %vm8206_vm12, %v2145_v14, %v2149_v25  ;;  %v8446_v41 = vpop.f32.mrf.mxu2 }
 0x131   : > { %v7238_v37 = vld [vmem:[#allocation3 + $0x58] sm:$0xf0]  ;;  %5005 = vst [vmem:[#allocation3 + $0x50] sm:$0xf] %v4879_v53  ;;  %v4424_v16 = vor.u32 %v4423_v7, %v8433_v35  ;;  %v1664_v9 = vrot.slane %v1546_v57, 5  ;;  %v649_v45 = vrot.slane %v8022_v56, 4 }
 0x132   : > { %v6270_v21 = vor.u32 %v7238_v37, %v6269_v4  ;;  %5006 = vst [vmem:[#allocation3 + $0x5c] sm:$0xf] %v4882_v54  ;;  %v2491_v51 = vld [vmem:[#allocation2 + $0x3c] sm:$0xe]  ;;  %v2492_v26 = vld [vmem:[#allocation2 + $0x40] sm:$0xf]  ;;  %v1662_v48 = vsel %vm8229_vm13, %v6147_v10, %v1661_v39  ;;  %v8455_v37 = vpop.f32.mrf.mxu1 }
 0x133   : > { %v7167_v53 = vld [vmem:[#allocation3 + $0x64] sm:$0xf]  ;;  %v1663_v15 = vrot.slane %v1661_v39, 4  ;;  %v2493_v44 = vld [vmem:[#allocation2 + $0x44] sm:$0x1]  ;;  %v4415_v23 = vrot.slane %v4414_v29, 4 }
 0x134   : > { %3465 = vmatmul.bf16.gmra.mxu2 %v6270_v21  ;;  %v6563_v19 = vld [vmem:[#allocation3 + $0x6c] sm:$0xf0]  ;;  %2455 = vst [vmem:[#allocation3 + $0x64] sm:$0xf] %v2140_v12  ;;  %v2605_v11 = vrot.slane %v2492_v26, 5  ;;  %v4425_v25 = vrot.slane %v4424_v16, 4 }
 0x135   : > { %2456 = vst [vmem:[#allocation3 + $0x70] sm:$0xf] %v2150_v18  ;;  %v4429_v8 = vrot.slane %v4427_v47, 5  ;;  %v1665_v6 = vsel %vm8229_vm13, %v1663_v15, %v1664_v9  ;;  %v4771_v56 = vld [vmem:[#allocation2 + $0x48] sm:$0xe]  ;;  %v6566_v54 = vor.u32 %v7167_v53, %v6563_v19  ;;  %v6163_v34 = vrot.slane %v2491_v51, 9  ;;  %v8453_v47 = vpop.f32.mrf.mxu3 }
 0x136   : > { %1783 = vst [vmem:[#allocation3 + $0x68] sm:$0xf] %v1662_v48  ;;  %v4772_v13 = vld [vmem:[#allocation2 + $0x4c] sm:$0xf]  ;;  %v2608_v40 = vrot.slane %v2493_v44, 5  ;;  %v4420_v14 = vsel %vm8206_vm12, %v4415_v23, %v8433_v35  ;;  %v2607_v7 = vrot.slane %v2605_v11, 4 }
 0x137   : > { %1784 = vst [vmem:[#allocation3 + $0x74] sm:$0xf] %v1665_v6  ;;  %v4773_v60 = vld [vmem:[#allocation2 + $0x50] sm:$0x1]  ;;  %v4885_v4 = vrot.slane %v4772_v13, 5  ;;  %4048 = vmatmul.bf16.gmra.mxu0 %v6566_v54  ;;  %v6803_v10 = vrot.slane %v4771_v56, 9  ;;  %v4430_v21 = vsel %vm8206_vm12, %v4425_v25, %v4429_v8  ;;  %v2606_v48 = vsel %vm8229_vm13, %v6163_v34, %v2605_v11  ;;  %v8465_v6 = vpop.f32.mrf.mxu0 }
 0x138   : > { %9465 = vst [vmem:[#allocation19_spill] sm:$0xff] %v8455_v37  ;;  %v903_v29 = vld [vmem:[#allocation2 + $0x5c] sm:$0x1]  ;;  %v4888_v12 = vrot.slane %v4773_v60, 5  ;;  %v1049_v57 = vld [vmem:[#allocation2 + $0x40] sm:$0xf]  ;;  %v8473_v34 = vpop.f32.mrf.mxu2 }
 0x139   : > { %v1048_v46 = vld [vmem:[#allocation2 + $0x3c] sm:$0xf]  ;;  %v904_v16 = vsel %vm8189_vm7, %v649_v45, %v903_v29  ;;  %v1050_v39 = vld [vmem:[#allocation2 + $0x44] sm:$0x1]  ;;  %v1214_v9 = vshll.u32 %v1049_v57, 16  ;;  %v1218_v51 = vshrl.u32 %v1049_v57, 16  ;;  %v2609_v45 = vsel %vm8229_vm13, %v2607_v7, %v2608_v40 }
 0x13a   : > { %v1205_v18 = vshrl.u32 %v1048_v46, 16  ;;  %905 = vst [vmem:[#allocation2 + $0x5c] sm:$0x1] %v904_v16  ;;  %v1208_v35 = vshll.u32 %v1048_v46, 16  ;;  %v1224_v26 = vshll.u32 %v1050_v39, 16  ;;  %v4887_v15 = vrot.slane %v4885_v4, 4 }
 0x13b   : > { %v7239_v53 = vld [vmem:[#allocation3 + $0x64] sm:$0xf]  ;;  %v1998_v19 = vld [vmem:[#allocation2 + $0x48] sm:$0xf]  ;;  %v1216_v8 = vrot.slane %v1214_v9, 5  ;;  %v1220_v13 = vrot.slane %v1218_v51, 4  ;;  %v4886_v11 = vsel %vm8229_vm13, %v6803_v10, %v4885_v4  ;;  %v6574_v7 = vor.u32 %v8055_v17, %v8050_v38 }
 0x13c   : > { %v1207_v44 = vrot.slane %v1205_v18, 4  ;;  %v6275_v23 = vld [vmem:[#allocation3 + $0x6c] sm:$0xf0]  ;;  %4735 = vst [vmem:[#allocation3 + $0x64] sm:$0xf] %v4420_v14  ;;  %v1210_v25 = vrot.slane %v1208_v35, 5  ;;  %v4889_v46 = vsel %vm8229_vm13, %v4887_v15, %v4888_v12 }
 0x13d   : > { %v6278_v56 = vor.u32 %v7239_v53, %v6275_v23  ;;  %4736 = vst [vmem:[#allocation3 + $0x70] sm:$0xf] %v4430_v21  ;;  %v8467_v54 = vld [vmem:[#allocation3 + $0x68] sm:$0xf]  ;;  %v1226_v60 = vrot.slane %v1224_v26, 5  ;;  %v1221_v21 = vor.u32 %v1220_v13, %v1216_v8  ;;  %v2152_v57 = vshrl.u32 %v1998_v19, 16  ;;  %3964 = vmatmul.bf16.gmra.mxu3 %v6574_v7  ;;  %v8479_v17 = vpop.f32.mrf.mxu3 }
 0x13e   : > { %v8469_v29 = vld [vmem:[#allocation3 + $0x70] sm:$0xf0]  ;;  %2727 = vst [vmem:[#allocation3 + $0x68] sm:$0xf] %v2606_v48  ;;  %v1211_v14 = vor.u32 %v1210_v25, %v1207_v44  ;;  %v2000_v16 = vld [vmem:[#allocation2 + $0x50] sm:$0x1]  ;;  %v8481_v44 = vpop.f32.mrf.mxu1 }
 0x13f   : > { %9466 = vst [vmem:[#allocation20_spill] sm:$0xff] %v8469_v29  ;;  %v1999_v40 = vld [vmem:[#allocation2 + $0x4c] sm:$0xf]  ;;  %3381 = vmatmul.bf16.gmra.mxu1 %v6278_v56  ;;  %v2155_v39 = vshll.u32 %v1998_v19, 16  ;;  %v2171_v4 = vshll.u32 %v2000_v16, 16  ;;  %v1222_v51 = vrot.slane %v1221_v21, 4 }
 0x140   : > { %9467 = vst [vmem:[#allocation21_spill] sm:$0xff] %v8473_v34  ;;  %v1212_v18 = vrot.slane %v1211_v14, 4  ;;  %v2161_v35 = vshll.u32 %v1999_v40, 16  ;;  %v2165_v9 = vshrl.u32 %v1999_v40, 16  ;;  %v4278_v10 = vld [vmem:[#allocation2 + $0x54] sm:$0xf] }
 0x141   : > { %2728 = vst [vmem:[#allocation3 + $0x74] sm:$0xf] %v2609_v45  ;;  %v2154_v26 = vrot.slane %v2152_v57, 4  ;;  %v2157_v53 = vrot.slane %v2155_v39, 5  ;;  %v4279_v48 = vld [vmem:[#allocation2 + $0x58] sm:$0xf]  ;;  %v1227_v25 = vsel %vm8206_vm12, %v1222_v51, %v1226_v60  ;;  %v8489_v51 = vpop.f32.mrf.mxu0 }
 0x142   : > { %v4432_v38 = vshrl.u32 %v4278_v10, 16  ;;  %9468 = vst [vmem:[#allocation22_spill] sm:$0xff] %v8479_v17  ;;  %v1217_v12 = vsel %vm8206_vm12, %v1212_v18, %v1216_v8  ;;  %v2163_v15 = vrot.slane %v2161_v35, 5  ;;  %v2167_v19 = vrot.slane %v2165_v9, 4  ;;  %v4280_v45 = vld [vmem:[#allocation2 + $0x5c] sm:$0x1] }
 0x143   : > { %v2173_v23 = vrot.slane %v2171_v4, 5  ;;  %1510 = vst [vmem:[#allocation3 + $0x7c] sm:$0xf] %v1217_v12  ;;  %v2158_v56 = vor.u32 %v2157_v53, %v2154_v26  ;;  %v4435_v14 = vshll.u32 %v4278_v10, 16  ;;  %v1547_v40 = vld [vmem:[#allocation2 + $0x3c] sm:$0xe] }
 0x144   : > { %v4434_v13 = vrot.slane %v4432_v38, 4  ;;  %1511 = vst [vmem:[#allocation3 + $0x88] sm:$0xf] %v1227_v25  ;;  %v2168_v7 = vor.u32 %v2167_v19, %v2163_v15  ;;  %v4441_v21 = vshll.u32 %v4279_v48, 16  ;;  %v4445_v16 = vshrl.u32 %v4279_v48, 16  ;;  %v8493_v19 = vpop.f32.mrf.mxu2 }
 0x145   : > { %v4451_v57 = vshll.u32 %v4280_v45, 16  ;;  %v6281_v39 = vld [vmem:[#allocation3 + $0x68] sm:$0xf]  ;;  %v2159_v34 = vrot.slane %v2158_v56, 4  ;;  %v4437_v8 = vrot.slane %v4435_v14, 5  ;;  %9469 = vst [vmem:[#allocation23_spill] sm:$0xff] %v8489_v51 }
 0x146   : > { %v1548_v18 = vld [vmem:[#allocation2 + $0x40] sm:$0xf]  ;;  %5007 = vst [vmem:[#allocation3 + $0x68] sm:$0xf] %v4886_v11  ;;  %v2169_v9 = vrot.slane %v2168_v7, 4  ;;  %v8487_v4 = vrot.slane %v4441_v21, 5 }
 0x147   : > { %v4438_v10 = vor.u32 %v4437_v8, %v4434_v13  ;;  %v4447_v26 = vrot.slane %v4445_v16, 4  ;;  %v1549_v53 = vld [vmem:[#allocation2 + $0x44] sm:$0x1]  ;;  %v2164_v48 = vsel %vm8206_vm12, %v2159_v34, %v2163_v15  ;;  %v6148_v38 = vrot.slane %v1547_v40, 9  ;;  %v2494_v56 = vld [vmem:[#allocation2 + $0x48] sm:$0xe] }
 0x148   : > { %v7241_v35 = vld [vmem:[#allocation3 + $0x70] sm:$0xf0]  ;;  %v1668_v12 = vrot.slane %v1548_v18, 5  ;;  %v2174_v11 = vsel %vm8206_vm12, %v2169_v9, %v2173_v23  ;;  %v4453_v25 = vrot.slane %v4451_v57, 5  ;;  %v2496_v16 = vld [vmem:[#allocation2 + $0x50] sm:$0x1]  ;;  %v8504_v9 = vpop.f32.mrf.mxu1 }
 0x149   : > { %v6282_v60 = vor.u32 %v7241_v35, %v6281_v39  ;;  %5008 = vst [vmem:[#allocation3 + $0x74] sm:$0xf] %v4889_v46  ;;  %v4448_v45 = vor.u32 %v4447_v26, %v8487_v4  ;;  %v1671_v46 = vrot.slane %v1549_v53, 5  ;;  %v2495_v14 = vld [vmem:[#allocation2 + $0x4c] sm:$0xf]  ;;  %v4439_v7 = vrot.slane %v4438_v10, 4  ;;  %v8502_v35 = vpop.f32.mrf.mxu3 }
 0x14a   : > { %v7170_v13 = vld [vmem:[#allocation3 + $0x7c] sm:$0xf]  ;;  %v1669_v21 = vsel %vm8229_vm13, %v6148_v38, %v1668_v12  ;;  %v1670_v34 = vrot.slane %v1668_v12, 4  ;;  %v2612_v15 = vrot.slane %v2495_v14, 5  ;;  %v6164_v8 = vrot.slane %v2494_v56, 9  ;;  %9470 = vst [vmem:[#allocation24_spill] sm:$0xff] %v8502_v35 }
 0x14b   : > { %3470 = vmatmul.bf16.gmra.mxu2 %v6282_v60  ;;  %v6575_v40 = vld [vmem:[#allocation3 + $0x84] sm:$0xf0]  ;;  %2457 = vst [vmem:[#allocation3 + $0x7c] sm:$0xf] %v2164_v48  ;;  %v4449_v39 = vrot.slane %v4448_v45, 4  ;;  %v2615_v53 = vrot.slane %v2496_v16, 5  ;;  %v4444_v56 = vsel %vm8206_vm12, %v4439_v7, %v8487_v4  ;;  %v8512_v16 = vpop.f32.mrf.mxu0 }
 0x14c   : > { %2458 = vst [vmem:[#allocation3 + $0x88] sm:$0xf] %v2174_v11  ;;  %v1672_v23 = vsel %vm8229_vm13, %v1670_v34, %v1671_v46  ;;  %v4774_v57 = vld [vmem:[#allocation2 + $0x54] sm:$0xe]  ;;  %v6578_v18 = vor.u32 %v7170_v13, %v6575_v40  ;;  %v4775_v60 = vld [vmem:[#allocation2 + $0x58] sm:$0xf]  ;;  %v2613_v4 = vsel %vm8229_vm13, %v6164_v8, %v2612_v15  ;;  %v8518_v7 = vpop.f32.mrf.mxu2 }
 0x14d   : > { %9471 = vst [vmem:[#allocation25_spill] sm:$0xff] %v8504_v9  ;;  %v4776_v10 = vld [vmem:[#allocation2 + $0x5c] sm:$0x1]  ;;  %v2614_v26 = vrot.slane %v2612_v15, 4  ;;  %v6804_v48 = vrot.slane %v4774_v57, 9  ;;  %v4892_v38 = vrot.slane %v4775_v60, 5  ;;  %v4454_v14 = vsel %vm8206_vm12, %v4449_v39, %v4453_v25 }
 0x14e   : > { %1785 = vst [vmem:[#allocation3 + $0x80] sm:$0xf] %v1669_v21  ;;  %4053 = vmatmul.bf16.gmra.mxu0 %v6578_v18  ;;  %v4895_v12 = vrot.slane %v4776_v10, 5  ;;  %v666_v11 = vrot.slane %v7873_v32, 4  ;;  %v910_v45 = vld [vmem:[#allocation2 + $0x68] sm:$0x1] }
 0x14f   : > { %1786 = vst [vmem:[#allocation3 + $0x8c] sm:$0xf] %v1672_v23  ;;  %v1051_v46 = vld [vmem:[#allocation2 + $0x48] sm:$0xf]  ;;  %v4894_v13 = vrot.slane %v4892_v38, 4  ;;  %v2616_v37 = vsel %vm8229_vm13, %v2614_v26, %v2615_v53  ;;  %v4893_v15 = vsel %vm8229_vm13, %v6804_v48, %v4892_v38 }
 0x150   : > { %v1052_v21 = vld [vmem:[#allocation2 + $0x4c] sm:$0xf]  ;;  %v1053_v34 = vld [vmem:[#allocation2 + $0x50] sm:$0x1]  ;;  %v1229_v40 = vshrl.u32 %v1051_v46, 16  ;;  %v911_v23 = vsel %vm8189_vm7, %v666_v11, %v910_v45  ;;  %v1232_v57 = vshll.u32 %v1051_v46, 16  ;;  %v8534_v53 = vpop.f32.mrf.mxu1 }
 0x151   : > { %v1238_v32 = vshll.u32 %v1052_v21, 16  ;;  %v1242_v18 = vshrl.u32 %v1052_v21, 16  ;;  %v2001_v60 = vld [vmem:[#allocation2 + $0x54] sm:$0xf]  ;;  %9472 = vst [vmem:[#allocation26_spill] sm:$0xff] %v8518_v7  ;;  %v1248_v39 = vshll.u32 %v1053_v34, 16  ;;  %v8532_v26 = vpop.f32.mrf.mxu3 }
 0x152   : > { %v7242_v10 = vld [vmem:[#allocation3 + $0x7c] sm:$0xf]  ;;  %912 = vst [vmem:[#allocation2 + $0x68] sm:$0x1] %v911_v23  ;;  %v1231_v25 = vrot.slane %v1229_v40, 4  ;;  %v1234_v51 = vrot.slane %v1232_v57, 5 }
 0x153   : > { %v6287_v9 = vld [vmem:[#allocation3 + $0x84] sm:$0xf0]  ;;  %4737 = vst [vmem:[#allocation3 + $0x7c] sm:$0xf] %v4444_v56  ;;  %v1240_v11 = vrot.slane %v1238_v32, 5  ;;  %v1244_v21 = vrot.slane %v1242_v18, 4  ;;  %v6586_v56 = vor.u32 %v8106_v2, %v8104_v0 }
 0x154   : > { %v6290_v45 = vor.u32 %v7242_v10, %v6287_v9  ;;  %4738 = vst [vmem:[#allocation3 + $0x88] sm:$0xf] %v4454_v14  ;;  %v1250_v35 = vrot.slane %v1248_v39, 5  ;;  %v1235_v8 = vor.u32 %v1234_v51, %v1231_v25  ;;  %v2002_v34 = vld [vmem:[#allocation2 + $0x58] sm:$0xf]  ;;  %v4896_v9 = vsel %vm8229_vm13, %v4894_v13, %v4895_v12 }
 0x155   : > { %v8522_v46 = vld [vmem:[#allocation3 + $0x80] sm:$0xf]  ;;  %9475 = vst [vmem:[#allocation29_spill] sm:$0xff] %v8532_v26  ;;  %v1245_v14 = vor.u32 %v1244_v21, %v1240_v11  ;;  %v2003_v40 = vld [vmem:[#allocation2 + $0x5c] sm:$0x1]  ;;  %v2176_v23 = vshrl.u32 %v2001_v60, 16  ;;  %3969 = vmatmul.bf16.gmra.mxu3 %v6586_v56 }
 0x156   : > { %9473 = vst [vmem:[#allocation27_spill] sm:$0xff] %v8522_v46  ;;  %v8524_v17 = vld [vmem:[#allocation3 + $0x88] sm:$0xf0]  ;;  %3386 = vmatmul.bf16.gmra.mxu1 %v6290_v45  ;;  %v2179_v57 = vshll.u32 %v2001_v60, 16  ;;  %v1236_v32 = vrot.slane %v1235_v8, 4  ;;  %v2185_v48 = vshll.u32 %v2002_v34, 16 }
 0x157   : > { %9474 = vst [vmem:[#allocation28_spill] sm:$0xff] %v8524_v17  ;;  %v2189_v51 = vshrl.u32 %v2002_v34, 16  ;;  %v2195_v38 = vshll.u32 %v2003_v40, 16  ;;  %v4281_v18 = vld [vmem:[#allocation2 + $0x60] sm:$0xf]  ;;  %v1246_v0 = vrot.slane %v1245_v14, 4  ;;  %v8543_v40 = vpop.f32.mrf.mxu0 }
 0x158   : > { %2729 = vst [vmem:[#allocation3 + $0x80] sm:$0xf] %v2613_v4  ;;  %v2178_v2 = vrot.slane %v2176_v23, 4  ;;  %v4282_v10 = vld [vmem:[#allocation2 + $0x64] sm:$0xf]  ;;  %v4456_v4 = vshrl.u32 %v4281_v18, 16  ;;  %v1241_v12 = vsel %vm8206_vm12, %v1236_v32, %v1240_v11 }
 0x159   : > { %2730 = vst [vmem:[#allocation3 + $0x8c] sm:$0xf] %v2616_v37  ;;  %v2181_v37 = vrot.slane %v2179_v57, 5  ;;  %v2187_v13 = vrot.slane %v2185_v48, 5  ;;  %v2191_v25 = vrot.slane %v2189_v51, 4  ;;  %v2197_v39 = vrot.slane %v2195_v38, 5 }
 0x15a   : > { %v4283_v45 = vld [vmem:[#allocation2 + $0x68] sm:$0x1]  ;;  %v7351_v60 = vld [vmem:[%s9429_s3 + $0x1a0] sm:$0xff]  ;;  %v1251_v21 = vsel %vm8206_vm12, %v1246_v0, %v1250_v35  ;;  %1512 = vst [vmem:[#allocation3 + $0x94] sm:$0xf] %v1241_v12  ;;  %v4458_v34 = vrot.slane %v4456_v4, 4 }
 0x15b   : > { %v2182_v8 = vor.u32 %v2181_v37, %v2178_v2  ;;  %v4459_v56 = vshll.u32 %v4281_v18, 16  ;;  %v1550_v14 = vld [vmem:[#allocation2 + $0x48] sm:$0xe]  ;;  %9476 = vst [vmem:[#allocation30_spill] sm:$0xff] %v8543_v40  ;;  %v2192_v11 = vor.u32 %v2191_v25, %v2187_v13  ;;  %v4465_v23 = vshll.u32 %v4282_v10, 16  ;;  %5547 = vmatpush.bf16.msra.mxu2 %v7351_v60  ;;  %v7359_v48 = vld [vmem:[%s9429_s3 + $0x1e0] sm:$0xff]  ;;  %v8548_v2 = vpop.f32.mrf.mxu2 }
 0x15c   : > { %1513 = vst [vmem:[#allocation3 + $0xa0] sm:$0xf] %v1251_v21  ;;  %v4469_v57 = vshrl.u32 %v4282_v10, 16  ;;  %v4475_v32 = vshll.u32 %v4283_v45, 16  ;;  %v1551_v0 = vld [vmem:[#allocation2 + $0x4c] sm:$0xf]  ;;  %5636 = vmatpush.bf16.msra.mxu3 %v7359_v48 }
 0x15d   : > { %v2183_v38 = vrot.slane %v2182_v8, 4  ;;  %v4461_v35 = vrot.slane %v4459_v56, 5  ;;  %v2193_v37 = vrot.slane %v2192_v11, 4  ;;  %v8550_v4 = vrot.slane %v4465_v23, 5  ;;  %v1552_v45 = vld [vmem:[#allocation2 + $0x50] sm:$0x1] }
 0x15e   : > { %v4471_v25 = vrot.slane %v4469_v57, 4  ;;  %v7223_v60 = vld [vmem:[%s9429_s3 + $0xa0] sm:$0xff]  ;;  %v6149_v8 = vrot.slane %v1550_v14, 9  ;;  %v1675_v56 = vrot.slane %v1551_v0, 5  ;;  %v2497_v7 = vld [vmem:[#allocation2 + $0x54] sm:$0xe] }
 0x15f   : > { %v6293_v51 = vld [vmem:[#allocation3 + $0x80] sm:$0xf]  ;;  %v4462_v10 = vor.u32 %v4461_v35, %v4458_v34  ;;  %v2188_v21 = vsel %vm8206_vm12, %v2183_v38, %v2187_v13  ;;  %v683_v11 = vrot.slane %v7899_v58, 4  ;;  %v1678_v23 = vrot.slane %v1552_v45, 5  ;;  %v2499_v48 = vld [vmem:[#allocation2 + $0x5c] sm:$0x1]  ;;  %v8566_v13 = vpop.f32.mrf.mxu1  ;;  %4112 = vmatpush.bf16.msra.mxu1 %v7223_v60 }
 0x160   : > { %v7244_v18 = vld [vmem:[#allocation3 + $0x88] sm:$0xf0]  ;;  %5009 = vst [vmem:[#allocation3 + $0x80] sm:$0xf] %v4893_v15  ;;  %v4472_v34 = vor.u32 %v4471_v25, %v8550_v4  ;;  %v2498_v57 = vld [vmem:[#allocation2 + $0x58] sm:$0xf]  ;;  %v1676_v35 = vsel %vm8229_vm13, %v6149_v8, %v1675_v56 }
 0x161   : > { %v6294_v12 = vor.u32 %v7244_v18, %v6293_v51  ;;  %5010 = vst [vmem:[#allocation3 + $0x8c] sm:$0xf] %v4896_v9  ;;  %v7367_v15 = vld [vmem:[%s9429_s3 + $0x220] sm:$0xff]  ;;  %v2198_v9 = vsel %vm8206_vm12, %v2193_v37, %v2197_v39  ;;  %v8564_v51 = vpop.f32.mrf.mxu3  ;;  %v7173_v14 = vld [vmem:[#allocation3 + $0x94] sm:$0xf]  ;;  %v4477_v38 = vrot.slane %v4475_v32, 5 }
 0x162   : > { %9477 = vst [vmem:[#allocation31_spill] sm:$0xff] %v8564_v51  ;;  %v1677_v58 = vrot.slane %v1675_v56, 4  ;;  %v2619_v0 = vrot.slane %v2498_v57, 5  ;;  %5725 = vmatpush.bf16.msra.mxu0 %v7367_v15  ;;  %v4463_v39 = vrot.slane %v4462_v10, 4  ;;  %v6165_v37 = vrot.slane %v2497_v7, 9  ;;  %v8572_v51 = vpop.f32.mrf.mxu0 }
 0x163   : > { %3475 = vmatmul.bf16.gmra.mxu2 %v6294_v12  ;;  %9478 = vst [vmem:[#allocation32_spill] sm:$0xff] %v8566_v13  ;;  %v6587_v18 = vld [vmem:[#allocation3 + $0x9c] sm:$0xf0]  ;;  %v4473_v12 = vrot.slane %v4472_v34, 4  ;;  %v2622_v45 = vrot.slane %v2499_v48, 5  ;;  %v8577_v10 = vpop.f32.mrf.mxu2 }
 0x164   : > { %2459 = vst [vmem:[#allocation3 + $0x94] sm:$0xf] %v2188_v21  ;;  %v1679_v25 = vsel %vm8229_vm13, %v1677_v58, %v1678_v23  ;;  %v4777_v13 = vld [vmem:[#allocation2 + $0x60] sm:$0xe]  ;;  %v6590_v60 = vor.u32 %v7173_v14, %v6587_v18  ;;  %v4778_v32 = vld [vmem:[#allocation2 + $0x64] sm:$0xf]  ;;  %v4468_v7 = vsel %vm8206_vm12, %v4463_v39, %v8550_v4 }
 0x165   : > { %2460 = vst [vmem:[#allocation3 + $0xa0] sm:$0xf] %v2198_v9  ;;  %v4779_v40 = vld [vmem:[#allocation2 + $0x68] sm:$0x1]  ;;  %v2621_v8 = vrot.slane %v2619_v0, 4  ;;  %v6805_v56 = vrot.slane %v4777_v13, 9  ;;  %v4478_v57 = vsel %vm8206_vm12, %v4473_v12, %v4477_v38 }
 0x166   : > { %1787 = vst [vmem:[#allocation3 + $0x98] sm:$0xf] %v1676_v35  ;;  %v4899_v15 = vrot.slane %v4778_v32, 5  ;;  %v4902_v21 = vrot.slane %v4779_v40, 5  ;;  %4058 = vmatmul.bf16.gmra.mxu0 %v6590_v60  ;;  %v917_v9 = vld [vmem:[#allocation2 + $0x74] sm:$0x1]  ;;  %v2620_v60 = vsel %vm8229_vm13, %v6165_v37, %v2619_v0 }
 0x167   : > { %1788 = vst [vmem:[#allocation3 + $0xa4] sm:$0xf] %v1679_v25  ;;  %v1054_v34 = vld [vmem:[#allocation2 + $0x54] sm:$0xf]  ;;  %v1055_v23 = vld [vmem:[#allocation2 + $0x58] sm:$0xf]  ;;  %v918_v14 = vsel %vm8189_vm7, %v683_v11, %v917_v9  ;;  %v2623_v11 = vsel %vm8229_vm13, %v2621_v8, %v2622_v45  ;;  %v8589_v9 = vpop.f32.mrf.mxu1  ;;  %v6598_v8 = vor.u32 %v8154_v22, %v8152_v20 }
 0x168   : > { %9479 = vst [vmem:[#allocation33_spill] sm:$0xff] %v8577_v10  ;;  %v4901_v48 = vrot.slane %v4899_v15, 4  ;;  %v1056_v13 = vld [vmem:[#allocation2 + $0x5c] sm:$0x1]  ;;  %v1253_v35 = vshrl.u32 %v1054_v34, 16  ;;  %v1256_v58 = vshll.u32 %v1054_v34, 16 }
 0x169   : > { %v2004_v40 = vld [vmem:[#allocation2 + $0x60] sm:$0xf]  ;;  %919 = vst [vmem:[#allocation2 + $0x74] sm:$0x1] %v918_v14  ;;  %v1262_v18 = vshll.u32 %v1055_v23, 16  ;;  %v1266_v25 = vshrl.u32 %v1055_v23, 16  ;;  %v8587_v12 = vpop.f32.mrf.mxu3  ;;  %3974 = vmatmul.bf16.gmra.mxu3 %v6598_v8 }
 0x16a   : > { %v1272_v4 = vshll.u32 %v1056_v13, 16  ;;  %v1255_v32 = vrot.slane %v1253_v35, 4  ;;  %v2005_v10 = vld [vmem:[#allocation2 + $0x64] sm:$0xf]  ;;  %v2200_v26 = vshrl.u32 %v2004_v40, 16  ;;  %9480 = vst [vmem:[#allocation34_spill] sm:$0xff] %v8587_v12 }
 0x16b   : > { %v7245_v39 = vld [vmem:[#allocation3 + $0x94] sm:$0xf]  ;;  %v1258_v34 = vrot.slane %v1256_v58, 5  ;;  %v1264_v14 = vrot.slane %v1262_v18, 5  ;;  %v1268_v17 = vrot.slane %v1266_v25, 4  ;;  %v4903_v25 = vsel %vm8229_vm13, %v4901_v48, %v4902_v21  ;;  %v8605_v21 = vpop.f32.mrf.mxu2 }
 0x16c   : > { %v6299_v38 = vld [vmem:[#allocation3 + $0x9c] sm:$0xf0]  ;;  %4739 = vst [vmem:[#allocation3 + $0x94] sm:$0xf] %v4468_v7  ;;  %v1274_v0 = vrot.slane %v1272_v4, 5  ;;  %v4900_v7 = vsel %vm8229_vm13, %v6805_v56, %v4899_v15  ;;  %v2202_v18 = vrot.slane %v2200_v26, 4  ;;  %v8601_v56 = vpop.f32.mrf.mxu0 }
 0x16d   : > { %v6302_v23 = vor.u32 %v7245_v39, %v6299_v38  ;;  %4740 = vst [vmem:[#allocation3 + $0xa0] sm:$0xf] %v4478_v57  ;;  %v8591_v13 = vld [vmem:[#allocation3 + $0x98] sm:$0xf]  ;;  %v1259_v35 = vor.u32 %v1258_v34, %v1255_v32  ;;  %v2006_v45 = vld [vmem:[#allocation2 + $0x68] sm:$0x1]  ;;  %v1269_v58 = vor.u32 %v1268_v17, %v1264_v14 }
 0x16e   : > { %9481 = vst [vmem:[#allocation35_spill] sm:$0xff] %v8591_v13  ;;  %v8593_v37 = vld [vmem:[#allocation3 + $0xa0] sm:$0xf0]  ;;  %v2203_v57 = vshll.u32 %v2004_v40, 16  ;;  %v2209_v39 = vshll.u32 %v2005_v10, 16  ;;  %v2213_v38 = vshrl.u32 %v2005_v10, 16 }
 0x16f   : > { %9482 = vst [vmem:[#allocation36_spill] sm:$0xff] %v8593_v37  ;;  %3391 = vmatmul.bf16.gmra.mxu1 %v6302_v23  ;;  %v1260_v4 = vrot.slane %v1259_v35, 4  ;;  %v4284_v12 = vld [vmem:[#allocation2 + $0x6c] sm:$0xf]  ;;  %v1270_v15 = vrot.slane %v1269_v58, 4 }
 0x170   : > { %2731 = vst [vmem:[#allocation3 + $0x98] sm:$0xf] %v2620_v60  ;;  %v2219_v60 = vshll.u32 %v2006_v45, 16  ;;  %v2205_v32 = vrot.slane %v2203_v57, 5  ;;  %v2211_v34 = vrot.slane %v2209_v39, 5  ;;  %v4480_v22 = vshrl.u32 %v4284_v12, 16 }
 0x171   : > { %2732 = vst [vmem:[#allocation3 + $0xa4] sm:$0xf] %v2623_v11  ;;  %v4285_v20 = vld [vmem:[#allocation2 + $0x70] sm:$0xf]  ;;  %v1265_v17 = vsel %vm8206_vm12, %v1260_v4, %v1264_v14  ;;  %v2215_v26 = vrot.slane %v2213_v38, 4  ;;  %v4483_v23 = vshll.u32 %v4284_v12, 16  ;;  %v1275_v10 = vsel %vm8206_vm12, %v1270_v15, %v1274_v0  ;;  %v8611_v15 = vpop.f32.mrf.mxu3 }
 0x172   : > { %9483 = vst [vmem:[#allocation37_spill] sm:$0xff] %v8601_v56  ;;  %v2221_v40 = vrot.slane %v2219_v60, 5  ;;  %v4286_v11 = vld [vmem:[#allocation2 + $0x74] sm:$0x1]  ;;  %v2206_v48 = vor.u32 %v2205_v32, %v2202_v18  ;;  %v4482_v35 = vrot.slane %v4480_v22, 4  ;;  %v4489_v45 = vshll.u32 %v4285_v20, 16  ;;  %v8613_v18 = vpop.f32.mrf.mxu1 }
 0x173   : > { %1514 = vst [vmem:[#allocation3 + $0xac] sm:$0xf] %v1265_v17  ;;  %v1553_v8 = vld [vmem:[#allocation2 + $0x54] sm:$0xe]  ;;  %v2216_v58 = vor.u32 %v2215_v26, %v2211_v34  ;;  %v4485_v57 = vrot.slane %v4483_v23, 5  ;;  %v4493_v39 = vshrl.u32 %v4285_v20, 16 }
 0x174   : > { %1515 = vst [vmem:[#allocation3 + $0xb8] sm:$0xf] %v1275_v10  ;;  %v4499_v56 = vshll.u32 %v4286_v11, 16  ;;  %v2207_v4 = vrot.slane %v2206_v48, 4  ;;  %v8609_v38 = vrot.slane %v4489_v45, 5  ;;  %v6150_v17 = vrot.slane %v1553_v8, 9 }
 0x175   : > { %v1554_v12 = vld [vmem:[#allocation2 + $0x58] sm:$0xf]  ;;  %v2217_v37 = vrot.slane %v2216_v58, 4  ;;  %v4486_v13 = vor.u32 %v4485_v57, %v4482_v35  ;;  %v4495_v0 = vrot.slane %v4493_v39, 4  ;;  %9484 = vst [vmem:[#allocation38_spill] sm:$0xff] %v8611_v15  ;;  %v700_v20 = vrot.slane %v7906_v63, 4 }
 0x176   : > { %9485 = vst [vmem:[#allocation39_spill] sm:$0xff] %v8613_v18  ;;  %v1555_v22 = vld [vmem:[#allocation2 + $0x5c] sm:$0x1]  ;;  %v2212_v26 = vsel %vm8206_vm12, %v2207_v4, %v2211_v34  ;;  %v1682_v23 = vrot.slane %v1554_v12, 5  ;;  %v2501_v10 = vld [vmem:[#allocation2 + $0x64] sm:$0xf] }
 0x177   : > { %v6305_v14 = vld [vmem:[#allocation3 + $0x98] sm:$0xf]  ;;  %v4496_v11 = vor.u32 %v4495_v0, %v8609_v38  ;;  %v2222_v48 = vsel %vm8206_vm12, %v2217_v37, %v2221_v40  ;;  %v4501_v35 = vrot.slane %v4499_v56, 5  ;;  %v1685_v45 = vrot.slane %v1555_v22, 5  ;;  %v2502_v58 = vld [vmem:[#allocation2 + $0x68] sm:$0x1] }
 0x178   : > { %v7247_v60 = vld [vmem:[#allocation3 + $0xa0] sm:$0xf0]  ;;  %5011 = vst [vmem:[#allocation3 + $0x98] sm:$0xf] %v4900_v7  ;;  %v2500_v7 = vld [vmem:[#allocation2 + $0x60] sm:$0xe]  ;;  %v1683_v63 = vsel %vm8229_vm13, %v6150_v17, %v1682_v23 }
 0x179   : > { %v6306_v32 = vor.u32 %v7247_v60, %v6305_v14  ;;  %5012 = vst [vmem:[#allocation3 + $0xa4] sm:$0xf] %v4903_v25  ;;  %v2626_v25 = vrot.slane %v2501_v10, 5  ;;  %v4487_v8 = vrot.slane %v4486_v13, 4  ;;  %v1684_v39 = vrot.slane %v1682_v23, 4  ;;  %v8623_v14 = vpop.f32.mrf.mxu0  ;;  %v8629_v13 = vpop.f32.mrf.mxu2 }
 0x17a   : > { %v7176_v57 = vld [vmem:[#allocation3 + $0xac] sm:$0xf]  ;;  %v4780_v34 = vld [vmem:[#allocation2 + $0x6c] sm:$0xe]  ;;  %v4497_v12 = vrot.slane %v4496_v11, 4  ;;  %v6166_v60 = vrot.slane %v2500_v7, 9 }
 0x17b   : > { %3480 = vmatmul.bf16.gmra.mxu2 %v6306_v32  ;;  %v6599_v4 = vld [vmem:[#allocation3 + $0xb4] sm:$0xf0]  ;;  %2461 = vst [vmem:[#allocation3 + $0xac] sm:$0xf] %v2212_v26  ;;  %v1686_v37 = vsel %vm8229_vm13, %v1684_v39, %v1685_v45  ;;  %v8627_v40 = vld [vmem:[#allocation2 + $0x74] sm:$0x1]  ;;  %v4492_v7 = vsel %vm8206_vm12, %v4487_v8, %v8609_v38  ;;  %v8637_v39 = vpop.f32.mrf.mxu3 }
 0x17c   : > { %2462 = vst [vmem:[#allocation3 + $0xb8] sm:$0xf] %v2222_v48  ;;  %v4781_v56 = vld [vmem:[#allocation2 + $0x70] sm:$0xf]  ;;  %v6602_v0 = vor.u32 %v7176_v57, %v6599_v4  ;;  %v2628_v32 = vrot.slane %v2626_v25, 4  ;;  %v2629_v22 = vrot.slane %v2502_v58, 5  ;;  %v3362_v58 = vpop.f32.mrf.mxu1  ;;  %v2627_v38 = vsel %vm8229_vm13, %v6166_v60, %v2626_v25 }
 0x17d   : > { %9486 = vst [vmem:[#allocation40_spill] sm:$0xff] %v8629_v13  ;;  %v6806_v17 = vrot.slane %v4780_v34, 9  ;;  %v4906_v23 = vrot.slane %v4781_v56, 5  ;;  %v924_v26 = vld [vmem:[#allocation2 + $0x80] sm:$0x1]  ;;  %v4909_v10 = vrot.slane %v8627_v40, 5 }
 0x17e   : > { %1789 = vst [vmem:[#allocation3 + $0xb0] sm:$0xf] %v1683_v63  ;;  %4063 = vmatmul.bf16.gmra.mxu0 %v6602_v0  ;;  %v1057_v11 = vld [vmem:[#allocation2 + $0x60] sm:$0xf]  ;;  %v925_v48 = vsel %vm8189_vm7, %v700_v20, %v924_v26  ;;  %v1058_v45 = vld [vmem:[#allocation2 + $0x64] sm:$0xf]  ;;  %v4502_v0 = vsel %vm8206_vm12, %v4497_v12, %v4501_v35 }
 0x17f   : > { %1790 = vst [vmem:[#allocation3 + $0xbc] sm:$0xf] %v1686_v37  ;;  %v1059_v57 = vld [vmem:[#allocation2 + $0x68] sm:$0x1]  ;;  %v1277_v63 = vshrl.u32 %v1057_v11, 16  ;;  %v1280_v34 = vshll.u32 %v1057_v11, 16  ;;  %v2630_v11 = vsel %vm8229_vm13, %v2628_v32, %v2629_v22 }
 0x180   : > { %9487 = vst [vmem:[#allocation41_spill] sm:$0xff] %v8637_v39  ;;  %v1286_v4 = vshll.u32 %v1058_v45, 16  ;;  %v1290_v37 = vshrl.u32 %v1058_v45, 16  ;;  %v1296_v56 = vshll.u32 %v1059_v57, 16  ;;  %v4908_v8 = vrot.slane %v4906_v23, 4 }
 0x181   : > { %926 = vst [vmem:[#allocation2 + $0x80] sm:$0x1] %v925_v48  ;;  %v1279_v40 = vrot.slane %v1277_v63, 4  ;;  %v2007_v20 = vld [vmem:[#allocation2 + $0x6c] sm:$0xf]  ;;  %v1282_v18 = vrot.slane %v1280_v34, 5  ;;  %v3363_v45 = vadd.f32 %v3362_v58, %v8465_v6  ;;  %v4907_v34 = vsel %vm8229_vm13, %v6806_v17, %v4906_v23  ;;  %v3451_v58 = vpop.f32.mrf.mxu2 }
 0x182   : > { %v2008_v26 = vld [vmem:[#allocation2 + $0x70] sm:$0xf]  ;;  %v7248_v13 = vld [vmem:[#allocation3 + $0xac] sm:$0xf]  ;;  %v1288_v15 = vrot.slane %v1286_v4, 5  ;;  %v1292_v39 = vrot.slane %v1290_v37, 4  ;;  %v6610_v6 = vor.u32 %v8005_v50, %v8002_v55 }
 0x183   : > { %v1298_v46 = vrot.slane %v1296_v56, 5  ;;  %v6311_v48 = vld [vmem:[#allocation3 + $0xb4] sm:$0xf0]  ;;  %4741 = vst [vmem:[#allocation3 + $0xac] sm:$0xf] %v4492_v7  ;;  %v1283_v60 = vor.u32 %v1282_v18, %v1279_v40  ;;  %v2224_v63 = vshrl.u32 %v2007_v20, 16  ;;  %v8652_v7 = vpop.f32.mrf.mxu0  ;;  %v3452_v23 = vadd.f32 %v3451_v58, %v3363_v45 }
 0x184   : > { %v2009_v35 = vld [vmem:[#allocation2 + $0x74] sm:$0x1]  ;;  %v6314_v12 = vor.u32 %v7248_v13, %v6311_v48  ;;  %4742 = vst [vmem:[#allocation3 + $0xb8] sm:$0xf] %v4502_v0  ;;  %v1293_v57 = vor.u32 %v1292_v39, %v1288_v15  ;;  %v2227_v4 = vshll.u32 %v2007_v20, 16  ;;  %v2233_v32 = vshll.u32 %v2008_v26, 16  ;;  %3979 = vmatmul.bf16.gmra.mxu3 %v6610_v6 }
 0x185   : > { %v8646_v25 = vld [vmem:[#allocation3 + $0xb0] sm:$0xf]  ;;  %9488 = vst [vmem:[#allocation42_spill] sm:$0xff] %v8652_v7  ;;  %v1284_v13 = vrot.slane %v1283_v60, 4  ;;  %v2226_v18 = vrot.slane %v2224_v63, 4  ;;  %v2237_v39 = vshrl.u32 %v2008_v26, 16 }
 0x186   : > { %v8648_v29 = vld [vmem:[#allocation3 + $0xb8] sm:$0xf0]  ;;  %2733 = vst [vmem:[#allocation3 + $0xb0] sm:$0xf] %v2627_v38  ;;  %3396 = vmatmul.bf16.gmra.mxu1 %v6314_v12  ;;  %v1294_v22 = vrot.slane %v1293_v57, 4  ;;  %v2229_v37 = vrot.slane %v2227_v4, 5  ;;  %v3940_v4 = vpop.f32.mrf.mxu3 }
 0x187   : > { %2734 = vst [vmem:[#allocation3 + $0xbc] sm:$0xf] %v2630_v11  ;;  %v8656_v56 = vrot.slane %v2233_v32, 5  ;;  %v2243_v0 = vshll.u32 %v2009_v35, 16  ;;  %v4287_v38 = vld [vmem:[#allocation2 + $0x78] sm:$0xf]  ;;  %v1289_v55 = vsel %vm8206_vm12, %v1284_v13, %v1288_v15  ;;  %v4910_v11 = vsel %vm8229_vm13, %v4908_v8, %v4909_v10 }
 0x188   : > { %v7350_v17 = vld [vmem:[%s9429_s3 + $0x198] sm:$0xff]  ;;  %v1299_v50 = vsel %vm8206_vm12, %v1294_v22, %v1298_v46  ;;  %v2239_v40 = vrot.slane %v2237_v39, 4  ;;  %v4289_v26 = vld [vmem:[#allocation2 + $0x80] sm:$0x1]  ;;  %v4504_v48 = vshrl.u32 %v4287_v38, 16  ;;  %v2230_v35 = vor.u32 %v2229_v37, %v2226_v18 }
 0x189   : > { %v4288_v20 = vld [vmem:[#allocation2 + $0x7c] sm:$0xf]  ;;  %1516 = vst [vmem:[#allocation3 + $0xc4] sm:$0xf] %v1289_v55  ;;  %v4507_v12 = vshll.u32 %v4287_v38, 16  ;;  %5548 = vmatpush.bf16.msra.mxu2 %v7350_v17  ;;  %v2245_v46 = vrot.slane %v2243_v0, 5  ;;  %v8676_v22 = vadd.f32 %v3940_v4, %v3452_v23 }
 0x18a   : > { %v4513_v60 = vshll.u32 %v4288_v20, 16  ;;  %v7358_v45 = vld [vmem:[%s9429_s3 + $0x1d8] sm:$0xff]  ;;  %1517 = vst [vmem:[#allocation3 + $0xd0] sm:$0xf] %v1299_v50  ;;  %v2240_v15 = vor.u32 %v2239_v40, %v8656_v56  ;;  %v4506_v57 = vrot.slane %v4504_v48, 4  ;;  %v4517_v63 = vshrl.u32 %v4288_v20, 16 }
 0x18b   : > { %v7222_v10 = vld [vmem:[%s9429_s3 + $0x98] sm:$0xff]  ;;  %v2231_v8 = vrot.slane %v2230_v35, 4  ;;  %v4509_v32 = vrot.slane %v4507_v12, 5  ;;  %v1556_v13 = vld [vmem:[#allocation2 + $0x60] sm:$0xe]  ;;  %5637 = vmatpush.bf16.msra.mxu3 %v7358_v45  ;;  %v4523_v0 = vshll.u32 %v4289_v26, 16  ;;  %v8685_v12 = vpop.f32.mrf.mxu1  ;;  %v8687_v26 = vpop.f32.mrf.mxu0 }
 0x18c   : > { %v8674_v6 = vrot.slane %v4513_v60, 5  ;;  %v7366_v18 = vld [vmem:[%s9429_s3 + $0x218] sm:$0xff]  ;;  %v2241_v58 = vrot.slane %v2240_v15, 4  ;;  %v4519_v37 = vrot.slane %v4517_v63, 4  ;;  %v6151_v38 = vrot.slane %v1556_v13, 9  ;;  %4113 = vmatpush.bf16.msra.mxu1 %v7222_v10 }
 0x18d   : > { %v6317_v39 = vld [vmem:[#allocation3 + $0xb0] sm:$0xf]  ;;  %v4510_v55 = vor.u32 %v4509_v32, %v4506_v57  ;;  %v1557_v50 = vld [vmem:[#allocation2 + $0x64] sm:$0xf]  ;;  %5726 = vmatpush.bf16.msra.mxu0 %v7366_v18  ;;  %v2236_v23 = vsel %vm8206_vm12, %v2231_v8, %v8656_v56  ;;  %v2503_v45 = vld [vmem:[#allocation2 + $0x6c] sm:$0xe] }
 0x18e   : > { %v7250_v17 = vld [vmem:[#allocation3 + $0xb8] sm:$0xf0]  ;;  %5013 = vst [vmem:[#allocation3 + $0xb0] sm:$0xf] %v4907_v34  ;;  %v4520_v20 = vor.u32 %v4519_v37, %v8674_v6  ;;  %v1558_v48 = vld [vmem:[#allocation2 + $0x68] sm:$0x1]  ;;  %v2246_v34 = vsel %vm8206_vm12, %v2241_v58, %v2245_v46 }
 0x18f   : > { %v6318_v40 = vor.u32 %v7250_v17, %v6317_v39  ;;  %5014 = vst [vmem:[#allocation3 + $0xbc] sm:$0xf] %v4910_v11  ;;  %v1689_v35 = vrot.slane %v1557_v50, 5  ;;  %v1692_v60 = vrot.slane %v1558_v48, 5  ;;  %v2504_v15 = vld [vmem:[#allocation2 + $0x70] sm:$0xf] }
 0x190   : > { %v717_v11 = vrot.slane %v8043_v49, 4  ;;  %v7179_v57 = vld [vmem:[#allocation3 + $0xc4] sm:$0xf]  ;;  %v2505_v4 = vld [vmem:[#allocation2 + $0x74] sm:$0x1]  ;;  %v4511_v8 = vrot.slane %v4510_v55, 4 }
 0x191   : > { %3485 = vmatmul.bf16.gmra.mxu2 %v6318_v40  ;;  %v1690_v56 = vsel %vm8229_vm13, %v6151_v38, %v1689_v35  ;;  %v1691_v63 = vrot.slane %v1689_v35, 4  ;;  %v6611_v10 = vld [vmem:[#allocation3 + $0xcc] sm:$0xf0]  ;;  %2463 = vst [vmem:[#allocation3 + $0xc4] sm:$0xf] %v2236_v23  ;;  %v2633_v32 = vrot.slane %v2504_v15, 5 }
 0x192   : > { %2464 = vst [vmem:[#allocation3 + $0xd0] sm:$0xf] %v2246_v34  ;;  %v4521_v13 = vrot.slane %v4520_v20, 4  ;;  %v4525_v18 = vrot.slane %v4523_v0, 5  ;;  %v4783_v39 = vld [vmem:[#allocation2 + $0x78] sm:$0xe]  ;;  %v6614_v58 = vor.u32 %v7179_v57, %v6611_v10  ;;  %v4516_v55 = vsel %vm8206_vm12, %v4511_v8, %v8674_v6  ;;  %v8699_v0 = vpop.f32.mrf.mxu2 }
 0x193   : > { %v1693_v46 = vsel %vm8229_vm13, %v1691_v63, %v1692_v60  ;;  %1791 = vst [vmem:[#allocation3 + $0xc8] sm:$0xf] %v1690_v56  ;;  %v6167_v49 = vrot.slane %v2503_v45, 9  ;;  %v4784_v37 = vld [vmem:[#allocation2 + $0x7c] sm:$0xf]  ;;  %v2636_v17 = vrot.slane %v2505_v4, 5 }
 0x194   : > { %1792 = vst [vmem:[#allocation3 + $0xd4] sm:$0xf] %v1693_v46  ;;  %v4785_v38 = vld [vmem:[#allocation2 + $0x80] sm:$0x1]  ;;  %v4913_v50 = vrot.slane %v4784_v37, 5  ;;  %4068 = vmatmul.bf16.gmra.mxu0 %v6614_v58  ;;  %v2635_v40 = vrot.slane %v2633_v32, 4  ;;  %v4526_v35 = vsel %vm8206_vm12, %v4521_v13, %v4525_v18  ;;  %v8709_v37 = vpop.f32.mrf.mxu0 }
 0x195   : > { %v6807_v23 = vrot.slane %v4783_v39, 9  ;;  %9489 = vst [vmem:[#allocation43_spill] sm:$0xff] %v8699_v0  ;;  %v931_v20 = vld [vmem:[#allocation2 + $0x8c] sm:$0x1]  ;;  %v4916_v34 = vrot.slane %v4785_v38, 5  ;;  %v2634_v8 = vsel %vm8229_vm13, %v6167_v49, %v2633_v32  ;;  %v3367_v39 = vpop.f32.mrf.mxu1 }
 0x196   : > { %v1060_v48 = vld [vmem:[#allocation2 + $0x6c] sm:$0xf]  ;;  %v932_v60 = vsel %vm8189_vm7, %v717_v11, %v931_v20  ;;  %v1061_v45 = vld [vmem:[#allocation2 + $0x70] sm:$0xf]  ;;  %v1062_v15 = vld [vmem:[#allocation2 + $0x74] sm:$0x1]  ;;  %v2637_v11 = vsel %vm8229_vm13, %v2635_v40, %v2636_v17  ;;  %v3368_v17 = vadd.f32 %v3367_v39, %v8512_v16 }
 0x197   : > { %v1301_v57 = vshrl.u32 %v1060_v48, 16  ;;  %933 = vst [vmem:[#allocation2 + $0x8c] sm:$0x1] %v932_v60  ;;  %v1304_v56 = vshll.u32 %v1060_v48, 16  ;;  %v1310_v63 = vshll.u32 %v1061_v45, 16  ;;  %v1314_v6 = vshrl.u32 %v1061_v45, 16 }
 0x198   : > { %v1320_v4 = vshll.u32 %v1062_v15, 16  ;;  %v7251_v10 = vld [vmem:[#allocation3 + $0xc4] sm:$0xf]  ;;  %v4915_v46 = vrot.slane %v4913_v50, 4  ;;  %v2010_v13 = vld [vmem:[#allocation2 + $0x78] sm:$0xf]  ;;  %v4914_v49 = vsel %vm8229_vm13, %v6807_v23, %v4913_v50 }
 0x199   : > { %v1303_v58 = vrot.slane %v1301_v57, 4  ;;  %v6323_v18 = vld [vmem:[#allocation3 + $0xcc] sm:$0xf0]  ;;  %4743 = vst [vmem:[#allocation3 + $0xc4] sm:$0xf] %v4516_v55  ;;  %v1306_v38 = vrot.slane %v1304_v56, 5  ;;  %v8717_v55 = vpop.f32.mrf.mxu3  ;;  %v6622_v56 = vor.u32 %v8088_v5, %v8086_v24 }
 0x19a   : > { %9490 = vst [vmem:[#allocation44_spill] sm:$0xff] %v8709_v37  ;;  %v1312_v20 = vrot.slane %v1310_v63, 5  ;;  %v6326_v48 = vor.u32 %v7251_v10, %v6323_v18  ;;  %v8711_v60 = vld [vmem:[#allocation3 + $0xc8] sm:$0xf]  ;;  %v1316_v45 = vrot.slane %v1314_v6, 4  ;;  %v1322_v15 = vrot.slane %v1320_v4, 5 }
 0x19b   : > { %4744 = vst [vmem:[#allocation3 + $0xd0] sm:$0xf] %v4526_v35  ;;  %v8713_v32 = vld [vmem:[#allocation3 + $0xd0] sm:$0xf0]  ;;  %v1307_v40 = vor.u32 %v1306_v38, %v1303_v58  ;;  %v2011_v57 = vld [vmem:[#allocation2 + $0x7c] sm:$0xf]  ;;  %v4917_v35 = vsel %vm8229_vm13, %v4915_v46, %v4916_v34  ;;  %3984 = vmatmul.bf16.gmra.mxu3 %v6622_v56 }
 0x19c   : > { %2735 = vst [vmem:[#allocation3 + $0xc8] sm:$0xf] %v2634_v8  ;;  %3401 = vmatmul.bf16.gmra.mxu1 %v6326_v48  ;;  %v1317_v63 = vor.u32 %v1316_v45, %v1312_v20  ;;  %v2012_v6 = vld [vmem:[#allocation2 + $0x80] sm:$0x1]  ;;  %v2248_v4 = vshrl.u32 %v2010_v13, 16  ;;  %v2251_v10 = vshll.u32 %v2010_v13, 16  ;;  %v3456_v45 = vpop.f32.mrf.mxu2  ;;  %v8728_v0 = vpop.f32.mrf.mxu0 }
 0x19d   : > { %9491 = vst [vmem:[#allocation45_spill] sm:$0xff] %v8717_v55  ;;  %v1308_v8 = vrot.slane %v1307_v40, 4  ;;  %v2257_v50 = vshll.u32 %v2011_v57, 16  ;;  %v2261_v23 = vshrl.u32 %v2011_v57, 16  ;;  %v2267_v18 = vshll.u32 %v2012_v6, 16 }
 0x19e   : > { %2736 = vst [vmem:[#allocation3 + $0xd4] sm:$0xf] %v2637_v11  ;;  %v4290_v7 = vld [vmem:[#allocation2 + $0x84] sm:$0xf]  ;;  %v1318_v16 = vrot.slane %v1317_v63, 4  ;;  %v2250_v39 = vrot.slane %v2248_v4, 4 }
 0x19f   : > { %v2253_v58 = vrot.slane %v2251_v10, 5  ;;  %v4291_v38 = vld [vmem:[#allocation2 + $0x88] sm:$0xf]  ;;  %v4528_v24 = vshrl.u32 %v4290_v7, 16  ;;  %v1313_v5 = vsel %vm8206_vm12, %v1308_v8, %v1312_v20  ;;  %v2259_v11 = vrot.slane %v2257_v50, 5 }
 0x1a0   : > { %v2263_v34 = vrot.slane %v2261_v23, 4  ;;  %v2269_v46 = vrot.slane %v2267_v18, 5  ;;  %v4292_v48 = vld [vmem:[#allocation2 + $0x8c] sm:$0x1]  ;;  %v1323_v13 = vsel %vm8206_vm12, %v1318_v16, %v1322_v15  ;;  %1518 = vst [vmem:[#allocation3 + $0xdc] sm:$0xf] %v1313_v5  ;;  %v3457_v23 = vadd.f32 %v3456_v45, %v3368_v17 }
 0x1a1   : > { %v2254_v40 = vor.u32 %v2253_v58, %v2250_v39  ;;  %v4530_v57 = vrot.slane %v4528_v24, 4  ;;  %v4531_v56 = vshll.u32 %v4290_v7, 16  ;;  %v1559_v63 = vld [vmem:[#allocation2 + $0x6c] sm:$0xe]  ;;  %1519 = vst [vmem:[#allocation3 + $0xe8] sm:$0xf] %v1323_v13  ;;  %v3945_v45 = vpop.f32.mrf.mxu3 }
 0x1a2   : > { %v2264_v6 = vor.u32 %v2263_v34, %v2259_v11  ;;  %v4537_v4 = vshll.u32 %v4291_v38, 16  ;;  %v4541_v10 = vshrl.u32 %v4291_v38, 16  ;;  %v4547_v37 = vshll.u32 %v4292_v48, 16  ;;  %v1560_v50 = vld [vmem:[#allocation2 + $0x70] sm:$0xf] }
 0x1a3   : > { %v6329_v55 = vld [vmem:[#allocation3 + $0xc8] sm:$0xf]  ;;  %v2255_v20 = vrot.slane %v2254_v40, 4  ;;  %v4533_v8 = vrot.slane %v4531_v56, 5  ;;  %v1561_v24 = vld [vmem:[#allocation2 + $0x74] sm:$0x1]  ;;  %v8740_v56 = vadd.f32 %v3945_v45, %v3457_v23 }
 0x1a4   : > { %5015 = vst [vmem:[#allocation3 + $0xc8] sm:$0xf] %v4914_v49  ;;  %v2265_v15 = vrot.slane %v2264_v6, 4  ;;  %v8730_v16 = vrot.slane %v4537_v4, 5  ;;  %v4543_v58 = vrot.slane %v4541_v10, 4  ;;  %v734_v38 = vrot.slane %v7938_v30, 4  ;;  %v8735_v49 = vpop.f32.mrf.mxu1 }
 0x1a5   : > { %v7253_v18 = vld [vmem:[#allocation3 + $0xd0] sm:$0xf0]  ;;  %v4534_v7 = vor.u32 %v4533_v8, %v4530_v57  ;;  %v2260_v5 = vsel %vm8206_vm12, %v2255_v20, %v2259_v11  ;;  %v6152_v34 = vrot.slane %v1559_v63, 9  ;;  %v1696_v48 = vrot.slane %v1560_v50, 5  ;;  %v2506_v17 = vld [vmem:[#allocation2 + $0x78] sm:$0xe] }
 0x1a6   : > { %v6330_v39 = vor.u32 %v7253_v18, %v6329_v55  ;;  %5016 = vst [vmem:[#allocation3 + $0xd4] sm:$0xf] %v4917_v35  ;;  %v2270_v13 = vsel %vm8206_vm12, %v2265_v15, %v2269_v46  ;;  %v4544_v55 = vor.u32 %v4543_v58, %v8730_v16  ;;  %v1699_v35 = vrot.slane %v1561_v24, 5  ;;  %v2507_v40 = vld [vmem:[#allocation2 + $0x7c] sm:$0xf] }
 0x1a7   : > { %9492 = vst [vmem:[#allocation46_spill] sm:$0xff] %v8735_v49  ;;  %v2508_v57 = vld [vmem:[#allocation2 + $0x80] sm:$0x1]  ;;  %v7182_v30 = vld [vmem:[#allocation3 + $0xdc] sm:$0xf]  ;;  %v4549_v6 = vrot.slane %v4547_v37, 5  ;;  %v1697_v11 = vsel %vm8229_vm13, %v6152_v34, %v1696_v48 }
 0x1a8   : > { %3490 = vmatmul.bf16.gmra.mxu2 %v6330_v39  ;;  %v1698_v63 = vrot.slane %v1696_v48, 4  ;;  %v2640_v4 = vrot.slane %v2507_v40, 5  ;;  %v6623_v10 = vld [vmem:[#allocation3 + $0xe4] sm:$0xf0]  ;;  %2465 = vst [vmem:[#allocation3 + $0xdc] sm:$0xf] %v2260_v5  ;;  %v8749_v5 = vpop.f32.mrf.mxu2  ;;  %v8753_v40 = vpop.f32.mrf.mxu0 }
 0x1a9   : > { %v4535_v20 = vrot.slane %v4534_v7, 4  ;;  %v6168_v8 = vrot.slane %v2506_v17, 9  ;;  %2466 = vst [vmem:[#allocation3 + $0xe8] sm:$0xf] %v2270_v13  ;;  %v4545_v46 = vrot.slane %v4544_v55, 4  ;;  %v2643_v18 = vrot.slane %v2508_v57, 5 }
 0x1aa   : > { %v1700_v50 = vsel %vm8229_vm13, %v1698_v63, %v1699_v35  ;;  %v4786_v15 = vld [vmem:[#allocation2 + $0x84] sm:$0xe]  ;;  %v6626_v23 = vor.u32 %v7182_v30, %v6623_v10  ;;  %1793 = vst [vmem:[#allocation3 + $0xe0] sm:$0xf] %v1697_v11  ;;  %v4787_v39 = vld [vmem:[#allocation2 + $0x88] sm:$0xf] }
 0x1ab   : > { %v4788_v37 = vld [vmem:[#allocation2 + $0x8c] sm:$0x1]  ;;  %1794 = vst [vmem:[#allocation3 + $0xec] sm:$0xf] %v1700_v50  ;;  %v2642_v58 = vrot.slane %v2640_v4, 4  ;;  %v6808_v24 = vrot.slane %v4786_v15, 9  ;;  %v4540_v7 = vsel %vm8206_vm12, %v4535_v20, %v8730_v16  ;;  %v4550_v55 = vsel %vm8206_vm12, %v4545_v46, %v4549_v6 }
 0x1ac   : > { %v4920_v34 = vrot.slane %v4787_v39, 5  ;;  %v4923_v48 = vrot.slane %v4788_v37, 5  ;;  %4073 = vmatmul.bf16.gmra.mxu0 %v6626_v23  ;;  %9493 = vst [vmem:[#allocation47_spill] sm:$0xff] %v8749_v5  ;;  %v938_v17 = vld [vmem:[#allocation2 + $0x98] sm:$0x1]  ;;  %v2641_v23 = vsel %vm8229_vm13, %v6168_v8, %v2640_v4  ;;  %v3372_v39 = vpop.f32.mrf.mxu1 }
 0x1ad   : > { %v1063_v45 = vld [vmem:[#allocation2 + $0x78] sm:$0xf]  ;;  %v1064_v13 = vld [vmem:[#allocation2 + $0x7c] sm:$0xf]  ;;  %9494 = vst [vmem:[#allocation48_spill] sm:$0xff] %v8753_v40  ;;  %v939_v57 = vsel %vm8189_vm7, %v734_v38, %v938_v17  ;;  %v2644_v38 = vsel %vm8229_vm13, %v2642_v58, %v2643_v18  ;;  %v8761_v17 = vpop.f32.mrf.mxu3 }
 0x1ae   : > { %v4922_v35 = vrot.slane %v4920_v34, 4  ;;  %v1065_v30 = vld [vmem:[#allocation2 + $0x80] sm:$0x1]  ;;  %v1325_v11 = vshrl.u32 %v1063_v45, 16  ;;  %v2013_v63 = vld [vmem:[#allocation2 + $0x84] sm:$0xf]  ;;  %v4921_v8 = vsel %vm8229_vm13, %v6808_v24, %v4920_v34 }
 0x1af   : > { %940 = vst [vmem:[#allocation2 + $0x98] sm:$0x1] %v939_v57  ;;  %v1328_v10 = vshll.u32 %v1063_v45, 16  ;;  %v1334_v16 = vshll.u32 %v1064_v13, 16  ;;  %v1338_v20 = vshrl.u32 %v1064_v13, 16  ;;  %v1344_v50 = vshll.u32 %v1065_v30, 16 }
 0x1b0   : > { %v7254_v15 = vld [vmem:[#allocation3 + $0xdc] sm:$0xf]  ;;  %v1327_v6 = vrot.slane %v1325_v11, 4  ;;  %v2014_v46 = vld [vmem:[#allocation2 + $0x88] sm:$0xf]  ;;  %v2272_v37 = vshrl.u32 %v2013_v63, 16 }
 0x1b1   : > { %v6335_v40 = vld [vmem:[#allocation3 + $0xe4] sm:$0xf0]  ;;  %4745 = vst [vmem:[#allocation3 + $0xdc] sm:$0xf] %v4540_v7  ;;  %v1330_v57 = vrot.slane %v1328_v10, 5  ;;  %v1336_v45 = vrot.slane %v1334_v16, 5  ;;  %v3373_v7 = vadd.f32 %v3372_v39, %v8572_v51 }
 0x1b2   : > { %9495 = vst [vmem:[#allocation49_spill] sm:$0xff] %v8761_v17  ;;  %v6338_v5 = vor.u32 %v7254_v15, %v6335_v40  ;;  %v8763_v13 = vld [vmem:[#allocation3 + $0xe0] sm:$0xf]  ;;  %v1340_v30 = vrot.slane %v1338_v20, 4  ;;  %v1346_v49 = vrot.slane %v1344_v50, 5  ;;  %v2274_v40 = vrot.slane %v2272_v37, 4 }
 0x1b3   : > { %4746 = vst [vmem:[#allocation3 + $0xe8] sm:$0xf] %v4550_v55  ;;  %v8765_v4 = vld [vmem:[#allocation3 + $0xe8] sm:$0xf0]  ;;  %v1331_v11 = vor.u32 %v1330_v57, %v1327_v6  ;;  %v2015_v18 = vld [vmem:[#allocation2 + $0x8c] sm:$0x1]  ;;  %v4924_v50 = vsel %vm8229_vm13, %v4922_v35, %v4923_v48  ;;  %v3461_v57 = vpop.f32.mrf.mxu2 }
 0x1b4   : > { %9496 = vst [vmem:[#allocation50_spill] sm:$0xff] %v8765_v4  ;;  %v9497_v58 = vld [vmem:[#allocation12_spill] sm:$0xff]  ;;  %3406 = vmatmul.bf16.gmra.mxu1 %v6338_v5  ;;  %v1341_v55 = vor.u32 %v1340_v30, %v1336_v45  ;;  %v2275_v16 = vshll.u32 %v2013_v63, 16  ;;  %v2281_v20 = vshll.u32 %v2014_v46, 16  ;;  %v2291_v17 = vshll.u32 %v2015_v18, 16  ;;  %v7349_v51 = vld [vmem:[%s9429_s3 + $0x190] sm:$0xff]  ;;  %v8782_v30 = vpop.f32.mrf.mxu0 }
 0x1b5   : > { %2737 = vst [vmem:[#allocation3 + $0xe0] sm:$0xf] %v2641_v23  ;;  %v6634_v10 = vor.u32 %v9497_v58, %v8139_v27  ;;  %v1332_v15 = vrot.slane %v1331_v11, 4  ;;  %v2285_v23 = vshrl.u32 %v2014_v46, 16  ;;  %v4293_v24 = vld [vmem:[#allocation2 + $0x90] sm:$0xf]  ;;  %5549 = vmatpush.bf16.msra.mxu2 %v7349_v51 }
 0x1b6   : > { %2738 = vst [vmem:[#allocation3 + $0xec] sm:$0xf] %v2644_v38  ;;  %v1342_v34 = vrot.slane %v1341_v55, 4  ;;  %v2277_v27 = vrot.slane %v2275_v16, 5  ;;  %v2283_v5 = vrot.slane %v2281_v20, 5  ;;  %v4552_v6 = vshrl.u32 %v4293_v24, 16 }
 0x1b7   : > { %3989 = vmatmul.bf16.gmra.mxu3 %v6634_v10  ;;  %v4294_v39 = vld [vmem:[#allocation2 + $0x94] sm:$0xf]  ;;  %v1337_v63 = vsel %vm8206_vm12, %v1332_v15, %v1336_v45  ;;  %v2287_v37 = vrot.slane %v2285_v23, 4  ;;  %v2293_v38 = vrot.slane %v2291_v17, 5  ;;  %v4295_v48 = vld [vmem:[#allocation2 + $0x98] sm:$0x1] }
 0x1b8   : > { %v4555_v35 = vshll.u32 %v4293_v24, 16  ;;  %v7357_v46 = vld [vmem:[%s9429_s3 + $0x1d0] sm:$0xff]  ;;  %v1347_v11 = vsel %vm8206_vm12, %v1342_v34, %v1346_v49  ;;  %1520 = vst [vmem:[#allocation3 + $0xf4] sm:$0xf] %v1337_v63  ;;  %v2278_v18 = vor.u32 %v2277_v27, %v2274_v40  ;;  %v4554_v58 = vrot.slane %v4552_v6, 4 }
 0x1b9   : > { %v4561_v10 = vshll.u32 %v4294_v39, 16  ;;  %v1562_v45 = vld [vmem:[#allocation2 + $0x78] sm:$0xe]  ;;  %1521 = vst [vmem:[#allocation3 + $0x100] sm:$0xf] %v1347_v11  ;;  %v2288_v17 = vor.u32 %v2287_v37, %v2283_v5  ;;  %v4565_v16 = vshrl.u32 %v4294_v39, 16  ;;  %5638 = vmatpush.bf16.msra.mxu3 %v7357_v46  ;;  %v3462_v34 = vadd.f32 %v3461_v57, %v3373_v7  ;;  %v3950_v37 = vpop.f32.mrf.mxu3 }
 0x1ba   : > { %v4557_v55 = vrot.slane %v4555_v35, 5  ;;  %v4571_v20 = vshll.u32 %v4295_v48, 16  ;;  %v7221_v15 = vld [vmem:[%s9429_s3 + $0x90] sm:$0xff]  ;;  %v2279_v24 = vrot.slane %v2278_v18, 4  ;;  %v1563_v49 = vld [vmem:[#allocation2 + $0x7c] sm:$0xf]  ;;  %v8791_v35 = vpop.f32.mrf.mxu1 }
 0x1bb   : > { %v8789_v51 = vrot.slane %v4561_v10, 5  ;;  %v2289_v27 = vrot.slane %v2288_v17, 4  ;;  %v4567_v63 = vrot.slane %v4565_v16, 4  ;;  %9498 = vst [vmem:[#allocation12_spill] sm:$0xff] %v8791_v35  ;;  %4114 = vmatpush.bf16.msra.mxu1 %v7221_v15  ;;  %v9499_v39 = vld [vmem:[#allocation4_spill] sm:$0xff]  ;;  %v6153_v4 = vrot.slane %v1562_v45, 9 }
 0x1bc   : > { %v6341_v23 = vld [vmem:[#allocation3 + $0xe0] sm:$0xf]  ;;  %v4558_v6 = vor.u32 %v4557_v55, %v4554_v58  ;;  %v751_v48 = vrot.slane %v9499_v39, 4  ;;  %v1564_v11 = vld [vmem:[#allocation2 + $0x80] sm:$0x1]  ;;  %v2284_v18 = vsel %vm8206_vm12, %v2279_v24, %v2283_v5  ;;  %v8797_v57 = vrot.slane %v4571_v20, 5 }
 0x1bd   : > { %v7256_v40 = vld [vmem:[#allocation3 + $0xe8] sm:$0xf0]  ;;  %5017 = vst [vmem:[#allocation3 + $0xe0] sm:$0xf] %v4921_v8  ;;  %v4568_v7 = vor.u32 %v4567_v63, %v8789_v51  ;;  %v1703_v8 = vrot.slane %v1563_v49, 5  ;;  %v2294_v17 = vsel %vm8206_vm12, %v2289_v27, %v2293_v38  ;;  %v1706_v55 = vrot.slane %v1564_v11, 5 }
 0x1be   : > { %v6342_v46 = vor.u32 %v7256_v40, %v6341_v23  ;;  %5018 = vst [vmem:[#allocation3 + $0xec] sm:$0xf] %v4924_v50  ;;  %v2509_v58 = vld [vmem:[#allocation2 + $0x84] sm:$0xe]  ;;  %v2510_v10 = vld [vmem:[#allocation2 + $0x88] sm:$0xf]  ;;  %v8801_v50 = vadd.f32 %v3950_v37, %v3462_v34 }
 0x1bf   : > { %v2511_v16 = vld [vmem:[#allocation2 + $0x8c] sm:$0x1]  ;;  %v2647_v15 = vrot.slane %v2510_v10, 5  ;;  %v7365_v5 = vld [vmem:[%s9429_s3 + $0x210] sm:$0xff]  ;;  %v4559_v23 = vrot.slane %v4558_v6, 4  ;;  %v1704_v20 = vsel %vm8229_vm13, %v6153_v4, %v1703_v8  ;;  %v1705_v24 = vrot.slane %v1703_v8, 4  ;;  %v8814_v10 = vpop.f32.mrf.mxu0 }
 0x1c0   : > { %3495 = vmatmul.bf16.gmra.mxu2 %v6342_v46  ;;  %v7185_v45 = vld [vmem:[#allocation3 + $0xf4] sm:$0xf]  ;;  %v4789_v49 = vld [vmem:[#allocation2 + $0x90] sm:$0xe]  ;;  %v6635_v40 = vld [vmem:[#allocation3 + $0xfc] sm:$0xf0]  ;;  %5727 = vmatpush.bf16.msra.mxu0 %v7365_v5  ;;  %v8812_v46 = vpop.f32.mrf.mxu2 }
 0x1c1   : > { %2467 = vst [vmem:[#allocation3 + $0xf4] sm:$0xf] %v2284_v18  ;;  %v4569_v63 = vrot.slane %v4568_v7, 4  ;;  %v6169_v38 = vrot.slane %v2509_v58, 9  ;;  %v1707_v34 = vsel %vm8229_vm13, %v1705_v24, %v1706_v55  ;;  %v4790_v27 = vld [vmem:[#allocation2 + $0x94] sm:$0xf]  ;;  %v6638_v39 = vor.u32 %v7185_v45, %v6635_v40  ;;  %v8826_v24 = vpop.f32.mrf.mxu3 }
 0x1c2   : > { %2468 = vst [vmem:[#allocation3 + $0x100] sm:$0xf] %v2294_v17  ;;  %v8810_v37 = vld [vmem:[#allocation2 + $0x98] sm:$0x1]  ;;  %v2649_v6 = vrot.slane %v2647_v15, 4  ;;  %v2650_v4 = vrot.slane %v2511_v16, 5  ;;  %v8818_v58 = vadd.f32 %v8687_v26, %v8676_v22  ;;  %v4564_v17 = vsel %vm8206_vm12, %v4559_v23, %v8789_v51 }
 0x1c3   : > { %9500 = vst [vmem:[#allocation4_spill] sm:$0xff] %v8812_v46  ;;  %v6809_v11 = vrot.slane %v4789_v49, 9  ;;  %v4927_v8 = vrot.slane %v4790_v27, 5  ;;  %4078 = vmatmul.bf16.gmra.mxu0 %v6638_v39  ;;  %v945_v18 = vld [vmem:[#allocation2 + $0xa4] sm:$0x1]  ;;  %v4930_v55 = vrot.slane %v8810_v37, 5  ;;  %v3377_v49 = vpop.f32.mrf.mxu1  ;;  %v4574_v51 = vsel %vm8206_vm12, %v4569_v63, %v8797_v57 }
 0x1c4   : > { %1795 = vst [vmem:[#allocation3 + $0xf8] sm:$0xf] %v1704_v20  ;;  %v1066_v7 = vld [vmem:[#allocation2 + $0x84] sm:$0xf]  ;;  %v946_v16 = vsel %vm8189_vm7, %v751_v48, %v945_v18  ;;  %v1067_v5 = vld [vmem:[#allocation2 + $0x88] sm:$0xf]  ;;  %v2648_v23 = vsel %vm8229_vm13, %v6169_v38, %v2647_v15 }
 0x1c5   : > { %9501 = vst [vmem:[#allocation51_spill] sm:$0xff] %v8814_v10  ;;  %v1068_v45 = vld [vmem:[#allocation2 + $0x8c] sm:$0x1]  ;;  %v1349_v20 = vshrl.u32 %v1066_v7, 16  ;;  %v1352_v40 = vshll.u32 %v1066_v7, 16  ;;  %v1362_v22 = vshrl.u32 %v1067_v5, 16 }
 0x1c6   : > { %1796 = vst [vmem:[#allocation3 + $0x104] sm:$0xf] %v1707_v34  ;;  %v1358_v34 = vshll.u32 %v1067_v5, 16  ;;  %v1368_v26 = vshll.u32 %v1068_v45, 16  ;;  %v4929_v27 = vrot.slane %v4927_v8, 4  ;;  %v2651_v5 = vsel %vm8229_vm13, %v2649_v6, %v2650_v4  ;;  %v9505_v6 = vld [vmem:[#allocation16_spill] sm:$0xff] }
 0x1c7   : > { %9502 = vst [vmem:[#allocation52_spill] sm:$0xff] %v8818_v58  ;;  %v1351_v48 = vrot.slane %v1349_v20, 4  ;;  %v2016_v37 = vld [vmem:[#allocation2 + $0x90] sm:$0xf]  ;;  %v2017_v39 = vld [vmem:[#allocation2 + $0x94] sm:$0xf]  ;;  %v3378_v45 = vadd.f32 %v3377_v49, %v8623_v14 }
 0x1c8   : > { %9503 = vst [vmem:[#allocation53_spill] sm:$0xff] %v8826_v24  ;;  %v7257_v18 = vld [vmem:[#allocation3 + $0xf4] sm:$0xf]  ;;  %v1354_v10 = vrot.slane %v1352_v40, 5  ;;  %v1360_v24 = vrot.slane %v1358_v34, 5  ;;  %v1364_v46 = vrot.slane %v1362_v22, 4  ;;  %v4928_v40 = vsel %vm8229_vm13, %v6809_v11, %v4927_v8 }
 0x1c9   : > { %947 = vst [vmem:[#allocation2 + $0xa4] sm:$0x1] %v946_v16  ;;  %v1370_v16 = vrot.slane %v1368_v26, 5  ;;  %v6347_v7 = vld [vmem:[#allocation3 + $0xfc] sm:$0xf0]  ;;  %v2296_v35 = vshrl.u32 %v2016_v37, 16 }
 0x1ca   : > { %4747 = vst [vmem:[#allocation3 + $0xf4] sm:$0xf] %v4564_v17  ;;  %v2018_v57 = vld [vmem:[#allocation2 + $0x98] sm:$0x1]  ;;  %v6350_v63 = vor.u32 %v7257_v18, %v6347_v7  ;;  %v1355_v38 = vor.u32 %v1354_v10, %v1351_v48  ;;  %v1365_v20 = vor.u32 %v1364_v46, %v1360_v24  ;;  %v2299_v17 = vshll.u32 %v2016_v37, 16  ;;  %v9504_v22 = vld [vmem:[#allocation15_spill] sm:$0xff]  ;;  %v3466_v10 = vpop.f32.mrf.mxu2  ;;  %v8844_v46 = vpop.f32.mrf.mxu0 }
 0x1cb   : > { %4748 = vst [vmem:[#allocation3 + $0x100] sm:$0xf] %v4574_v51  ;;  %v8836_v15 = vld [vmem:[#allocation3 + $0xf8] sm:$0xf]  ;;  %v2305_v34 = vshll.u32 %v2017_v39, 16  ;;  %v6646_v4 = vor.u32 %v9505_v6, %v9504_v22  ;;  %v2298_v26 = vrot.slane %v2296_v35, 4  ;;  %v3467_v11 = vadd.f32 %v3466_v10, %v3378_v45 }
 0x1cc   : > { %2739 = vst [vmem:[#allocation3 + $0xf8] sm:$0xf] %v2648_v23  ;;  %3411 = vmatmul.bf16.gmra.mxu1 %v6350_v63  ;;  %v1356_v14 = vrot.slane %v1355_v38, 4  ;;  %v1366_v49 = vrot.slane %v1365_v20, 4  ;;  %v2309_v51 = vshrl.u32 %v2017_v39, 16  ;;  %v2301_v48 = vrot.slane %v2299_v17, 5 }
 0x1cd   : > { %v8838_v58 = vld [vmem:[#allocation3 + $0x100] sm:$0xf0]  ;;  %v2307_v18 = vrot.slane %v2305_v34, 5  ;;  %v2315_v23 = vshll.u32 %v2018_v57, 16  ;;  %3994 = vmatmul.bf16.gmra.mxu3 %v6646_v4  ;;  %v4297_v63 = vld [vmem:[#allocation2 + $0xa0] sm:$0xf]  ;;  %v4931_v35 = vsel %vm8229_vm13, %v4929_v27, %v4930_v55 }
 0x1ce   : > { %2740 = vst [vmem:[#allocation3 + $0x104] sm:$0xf] %v2651_v5  ;;  %v4296_v7 = vld [vmem:[#allocation2 + $0x9c] sm:$0xf]  ;;  %v1361_v8 = vsel %vm8206_vm12, %v1356_v14, %v1360_v24  ;;  %v1371_v37 = vsel %vm8206_vm12, %v1366_v49, %v1370_v16  ;;  %v2311_v5 = vrot.slane %v2309_v51, 4  ;;  %v2302_v39 = vor.u32 %v2301_v48, %v2298_v26  ;;  %v3955_v24 = vpop.f32.mrf.mxu3 }
 0x1cf   : > { %v4576_v38 = vshrl.u32 %v4296_v7, 16  ;;  %1522 = vst [vmem:[#allocation3 + $0x10c] sm:$0xf] %v1361_v8  ;;  %v4579_v17 = vshll.u32 %v4296_v7, 16  ;;  %v4585_v57 = vshll.u32 %v4297_v63, 16  ;;  %v2317_v45 = vrot.slane %v2315_v23, 5 }
 0x1d0   : > { %v4298_v20 = vld [vmem:[#allocation2 + $0xa4] sm:$0x1]  ;;  %1523 = vst [vmem:[#allocation3 + $0x118] sm:$0xf] %v1371_v37  ;;  %v2312_v34 = vor.u32 %v2311_v5, %v2307_v18  ;;  %v4589_v6 = vshrl.u32 %v4297_v63, 16  ;;  %v2303_v4 = vrot.slane %v2302_v39, 4  ;;  %v8854_v51 = vadd.f32 %v3955_v24, %v3467_v11 }
 0x1d1   : > { %v4578_v22 = vrot.slane %v4576_v38, 4  ;;  %v4581_v14 = vrot.slane %v4579_v17, 5  ;;  %v8852_v16 = vrot.slane %v4585_v57, 5  ;;  %v1565_v49 = vld [vmem:[#allocation2 + $0x84] sm:$0xe]  ;;  %v4595_v26 = vshll.u32 %v4298_v20, 16  ;;  %v8863_v17 = vpop.f32.mrf.mxu1 }
 0x1d2   : > { %v2313_v55 = vrot.slane %v2312_v34, 4  ;;  %v4591_v27 = vrot.slane %v4589_v6, 4  ;;  %v6154_v48 = vrot.slane %v1565_v49, 9  ;;  %v1566_v37 = vld [vmem:[#allocation2 + $0x88] sm:$0xf]  ;;  %v8858_v23 = vadd.f32 %v8728_v0, %v8740_v56  ;;  %9506 = vst [vmem:[#allocation15_spill] sm:$0xff] %v8863_v17  ;;  %v8870_v49 = vpop.f32.mrf.mxu0 }
 0x1d3   : > { %v6353_v10 = vld [vmem:[#allocation3 + $0xf8] sm:$0xf]  ;;  %v4582_v8 = vor.u32 %v4581_v14, %v4578_v22  ;;  %v2308_v63 = vsel %vm8206_vm12, %v2303_v4, %v2307_v18  ;;  %v1567_v38 = vld [vmem:[#allocation2 + $0x8c] sm:$0x1]  ;;  %v1710_v39 = vrot.slane %v1566_v37, 5  ;;  %v9507_v22 = vld [vmem:[#allocation5_spill] sm:$0xff] }
 0x1d4   : > { %5019 = vst [vmem:[#allocation3 + $0xf8] sm:$0xf] %v4928_v40  ;;  %v4592_v11 = vor.u32 %v4591_v27, %v8852_v16  ;;  %v2318_v40 = vsel %vm8206_vm12, %v2313_v55, %v2317_v45  ;;  %v1713_v20 = vrot.slane %v1567_v38, 5  ;;  %v2512_v57 = vld [vmem:[#allocation2 + $0x90] sm:$0xe]  ;;  %v768_v0 = vrot.slane %v9507_v22, 4 }
 0x1d5   : > { %v7259_v7 = vld [vmem:[#allocation3 + $0x100] sm:$0xf0]  ;;  %v2513_v34 = vld [vmem:[#allocation2 + $0x94] sm:$0xf]  ;;  %v1712_v18 = vrot.slane %v1710_v39, 4  ;;  %v4583_v4 = vrot.slane %v4582_v8, 4 }
 0x1d6   : > { %v6354_v5 = vor.u32 %v7259_v7, %v6353_v10  ;;  %5020 = vst [vmem:[#allocation3 + $0x104] sm:$0xf] %v4931_v35  ;;  %v7188_v56 = vld [vmem:[#allocation3 + $0x10c] sm:$0xf]  ;;  %v1711_v35 = vsel %vm8229_vm13, %v6154_v48, %v1710_v39  ;;  %v2514_v6 = vld [vmem:[#allocation2 + $0x98] sm:$0x1] }
 0x1d7   : > { %v6647_v24 = vld [vmem:[#allocation3 + $0x114] sm:$0xf0]  ;;  %2469 = vst [vmem:[#allocation3 + $0x10c] sm:$0xf] %v2308_v63  ;;  %v2654_v14 = vrot.slane %v2513_v34, 5  ;;  %v4593_v45 = vrot.slane %v4592_v11, 4  ;;  %v1714_v55 = vsel %vm8229_vm13, %v1712_v18, %v1713_v20  ;;  %v4588_v8 = vsel %vm8206_vm12, %v4583_v4, %v8852_v16 }
 0x1d8   : > { %3500 = vmatmul.bf16.gmra.mxu2 %v6354_v5  ;;  %9508 = vst [vmem:[#allocation16_spill] sm:$0xff] %v8870_v49  ;;  %v4597_v10 = vrot.slane %v4595_v26, 5  ;;  %v4792_v27 = vld [vmem:[#allocation2 + $0x9c] sm:$0xe]  ;;  %v6650_v7 = vor.u32 %v7188_v56, %v6647_v24  ;;  %v6170_v37 = vrot.slane %v2512_v57, 9  ;;  %v2657_v48 = vrot.slane %v2514_v6, 5  ;;  %v8877_v26 = vpop.f32.mrf.mxu2 }
 0x1d9   : > { %2470 = vst [vmem:[#allocation3 + $0x118] sm:$0xf] %v2318_v40  ;;  %v4793_v5 = vld [vmem:[#allocation2 + $0xa0] sm:$0xf]  ;;  %v4794_v38 = vld [vmem:[#allocation2 + $0xa4] sm:$0x1] }
 0x1da   : > { %1797 = vst [vmem:[#allocation3 + $0x110] sm:$0xf] %v1711_v35  ;;  %v4934_v39 = vrot.slane %v4793_v5, 5  ;;  %4083 = vmatmul.bf16.gmra.mxu0 %v6650_v7  ;;  %v2656_v63 = vrot.slane %v2654_v14, 4  ;;  %v6810_v11 = vrot.slane %v4792_v27, 9  ;;  %v4598_v34 = vsel %vm8206_vm12, %v4593_v45, %v4597_v10  ;;  %v3382_v5 = vpop.f32.mrf.mxu1 }
 0x1db   : > { %1798 = vst [vmem:[#allocation3 + $0x11c] sm:$0xf] %v1714_v55  ;;  %v952_v40 = vld [vmem:[#allocation2 + $0xb0] sm:$0x1]  ;;  %v4937_v57 = vrot.slane %v4794_v38, 5  ;;  %v2655_v27 = vsel %vm8229_vm13, %v6170_v37, %v2654_v14  ;;  %v8887_v10 = vadd.f32 %v8782_v30, %v8801_v50  ;;  %v8893_v14 = vpop.f32.mrf.mxu3  ;;  %v3383_v50 = vadd.f32 %v3382_v5, %v8431_v43 }
 0x1dc   : > { %9509 = vst [vmem:[#allocation5_spill] sm:$0xff] %v8877_v26  ;;  %v1069_v20 = vld [vmem:[#allocation2 + $0x90] sm:$0xf]  ;;  %v953_v22 = vsel %vm8189_vm7, %v768_v0, %v952_v40  ;;  %v1070_v56 = vld [vmem:[#allocation2 + $0x94] sm:$0xf]  ;;  %v4936_v7 = vrot.slane %v4934_v39, 4  ;;  %v2658_v38 = vsel %vm8229_vm13, %v2656_v63, %v2657_v48  ;;  %v4935_v30 = vsel %vm8229_vm13, %v6810_v11, %v4934_v39 }
 0x1dd   : > { %v1071_v35 = vld [vmem:[#allocation2 + $0x98] sm:$0x1]  ;;  %v1373_v18 = vshrl.u32 %v1069_v20, 16  ;;  %954 = vst [vmem:[#allocation2 + $0xb0] sm:$0x1] %v953_v22  ;;  %v1376_v6 = vshll.u32 %v1069_v20, 16 }
 0x1de   : > { %v1382_v24 = vshll.u32 %v1070_v56, 16  ;;  %v1386_v16 = vshrl.u32 %v1070_v56, 16  ;;  %v1392_v4 = vshll.u32 %v1071_v35, 16  ;;  %v7260_v55 = vld [vmem:[#allocation3 + $0x10c] sm:$0xf]  ;;  %9510 = vst [vmem:[#allocation54_spill] sm:$0xff] %v8887_v10 }
 0x1df   : > { %v1375_v49 = vrot.slane %v1373_v18, 4  ;;  %v2019_v45 = vld [vmem:[#allocation2 + $0x9c] sm:$0xf]  ;;  %4749 = vst [vmem:[#allocation3 + $0x10c] sm:$0xf] %v4588_v8  ;;  %v1378_v40 = vrot.slane %v1376_v6, 5  ;;  %v8900_v8 = vpop.f32.mrf.mxu0 }
 0x1e0   : > { %v6359_v0 = vld [vmem:[#allocation3 + $0x114] sm:$0xf0]  ;;  %v1384_v20 = vrot.slane %v1382_v24, 5  ;;  %9512 = vst [vmem:[#allocation56_spill] sm:$0xff] %v8893_v14  ;;  %v1388_v37 = vrot.slane %v1386_v16, 4  ;;  %v1394_v35 = vrot.slane %v1392_v4, 5  ;;  %v4938_v16 = vsel %vm8229_vm13, %v4936_v7, %v4937_v57 }
 0x1e1   : > { %v6362_v22 = vor.u32 %v7260_v55, %v6359_v0  ;;  %4750 = vst [vmem:[#allocation3 + $0x118] sm:$0xf] %v4598_v34  ;;  %v8891_v56 = vld [vmem:[#allocation3 + $0x110] sm:$0xf]  ;;  %v1379_v48 = vor.u32 %v1378_v40, %v1375_v49  ;;  %v2020_v63 = vld [vmem:[#allocation2 + $0xa0] sm:$0xf] }
 0x1e2   : > { %9511 = vst [vmem:[#allocation55_spill] sm:$0xff] %v8891_v56  ;;  %v8895_v18 = vld [vmem:[#allocation3 + $0x118] sm:$0xf0]  ;;  %v9514_v6 = vld [vmem:[#allocation6_spill] sm:$0xff]  ;;  %v1389_v4 = vor.u32 %v1388_v37, %v1384_v20  ;;  %v2021_v55 = vld [vmem:[#allocation2 + $0xa4] sm:$0x1] }
 0x1e3   : > { %9513 = vst [vmem:[#allocation57_spill] sm:$0xff] %v8895_v18  ;;  %v9515_v34 = vld [vmem:[#allocation7_spill] sm:$0xff]  ;;  %3416 = vmatmul.bf16.gmra.mxu1 %v6362_v22  ;;  %v2323_v0 = vshll.u32 %v2019_v45, 16  ;;  %v1380_v14 = vrot.slane %v1379_v48, 4  ;;  %v2329_v39 = vshll.u32 %v2020_v63, 16  ;;  %v2333_v11 = vshrl.u32 %v2020_v63, 16  ;;  %v3471_v48 = vpop.f32.mrf.mxu2 }
 0x1e4   : > { %2741 = vst [vmem:[#allocation3 + $0x110] sm:$0xf] %v2655_v27  ;;  %v6658_v24 = vor.u32 %v9515_v34, %v9514_v6  ;;  %v2320_v27 = vshrl.u32 %v2019_v45, 16  ;;  %v2339_v43 = vshll.u32 %v2021_v55, 16  ;;  %v4299_v5 = vld [vmem:[#allocation2 + $0xa8] sm:$0xf] }
 0x1e5   : > { %2742 = vst [vmem:[#allocation3 + $0x11c] sm:$0xf] %v2658_v38  ;;  %v1390_v49 = vrot.slane %v1389_v4, 4  ;;  %v2325_v26 = vrot.slane %v2323_v0, 5  ;;  %v4300_v17 = vld [vmem:[#allocation2 + $0xac] sm:$0xf]  ;;  %v1385_v38 = vsel %vm8206_vm12, %v1380_v14, %v1384_v20 }
 0x1e6   : > { %3999 = vmatmul.bf16.gmra.mxu3 %v6658_v24  ;;  %v2322_v40 = vrot.slane %v2320_v27, 4  ;;  %v4600_v6 = vshrl.u32 %v4299_v5, 16  ;;  %v2331_v22 = vrot.slane %v2329_v39, 5  ;;  %v2335_v57 = vrot.slane %v2333_v11, 4  ;;  %v4301_v37 = vld [vmem:[#allocation2 + $0xb0] sm:$0x1] }
 0x1e7   : > { %v2341_v7 = vrot.slane %v2339_v43, 5  ;;  %v7348_v45 = vld [vmem:[%s9429_s3 + $0x188] sm:$0xff]  ;;  %v1395_v63 = vsel %vm8206_vm12, %v1390_v49, %v1394_v35  ;;  %1524 = vst [vmem:[#allocation3 + $0x124] sm:$0xf] %v1385_v38  ;;  %v4603_v4 = vshll.u32 %v4299_v5, 16  ;;  %v4609_v20 = vshll.u32 %v4300_v17, 16 }
 0x1e8   : > { %v2326_v34 = vor.u32 %v2325_v26, %v2322_v40  ;;  %v4602_v24 = vrot.slane %v4600_v6, 4  ;;  %v1568_v55 = vld [vmem:[#allocation2 + $0x90] sm:$0xe]  ;;  %1525 = vst [vmem:[#allocation3 + $0x130] sm:$0xf] %v1395_v63  ;;  %v2336_v27 = vor.u32 %v2335_v57, %v2331_v22  ;;  %v4613_v14 = vshrl.u32 %v4300_v17, 16  ;;  %5550 = vmatpush.bf16.msra.mxu2 %v7348_v45  ;;  %v3960_v57 = vpop.f32.mrf.mxu3 }
 0x1e9   : > { %v4619_v0 = vshll.u32 %v4301_v37, 16  ;;  %v7356_v39 = vld [vmem:[%s9429_s3 + $0x1c8] sm:$0xff]  ;;  %v4605_v10 = vrot.slane %v4603_v4, 5  ;;  %v1569_v18 = vld [vmem:[#allocation2 + $0x94] sm:$0xf]  ;;  %v3472_v35 = vadd.f32 %v3471_v48, %v3383_v50  ;;  %v8916_v5 = vrot.slane %v4609_v20, 5  ;;  %v8924_v4 = vpop.f32.mrf.mxu1 }
 0x1ea   : > { %v2327_v43 = vrot.slane %v2326_v34, 4  ;;  %v2337_v26 = vrot.slane %v2336_v27, 4  ;;  %5639 = vmatpush.bf16.msra.mxu3 %v7356_v39  ;;  %v4615_v6 = vrot.slane %v4613_v14, 4  ;;  %v1570_v38 = vld [vmem:[#allocation2 + $0x98] sm:$0x1]  ;;  %v7220_v37 = vld [vmem:[%s9429_s3 + $0x88] sm:$0xff]  ;;  %v8926_v27 = vpop.f32.mrf.mxu0 }
 0x1eb   : > { %v6365_v11 = vld [vmem:[#allocation3 + $0x110] sm:$0xf]  ;;  %v4606_v17 = vor.u32 %v4605_v10, %v4602_v24  ;;  %v9516_v45 = vld [vmem:[#allocation8_spill] sm:$0xff]  ;;  %v1717_v48 = vrot.slane %v1569_v18, 5  ;;  %9517 = vst [vmem:[#allocation6_spill] sm:$0xff] %v8924_v4  ;;  %v1720_v20 = vrot.slane %v1570_v38, 5  ;;  %4115 = vmatpush.bf16.msra.mxu1 %v7220_v37 }
 0x1ec   : > { %v7262_v49 = vld [vmem:[#allocation3 + $0x118] sm:$0xf0]  ;;  %5021 = vst [vmem:[#allocation3 + $0x110] sm:$0xf] %v4935_v30  ;;  %v785_v63 = vrot.slane %v9516_v45, 4  ;;  %v2332_v50 = vsel %vm8206_vm12, %v2327_v43, %v2331_v22  ;;  %v6155_v30 = vrot.slane %v1568_v55, 9  ;;  %v4616_v24 = vor.u32 %v4615_v6, %v8916_v5 }
 0x1ed   : > { %v6366_v40 = vor.u32 %v7262_v49, %v6365_v11  ;;  %5022 = vst [vmem:[#allocation3 + $0x11c] sm:$0xf] %v4938_v16  ;;  %v2515_v34 = vld [vmem:[#allocation2 + $0x9c] sm:$0xe]  ;;  %v7364_v10 = vld [vmem:[%s9429_s3 + $0x208] sm:$0xff]  ;;  %v2342_v16 = vsel %vm8206_vm12, %v2337_v26, %v2341_v7  ;;  %v8934_v55 = vadd.f32 %v3960_v57, %v3472_v35  ;;  %v4621_v39 = vrot.slane %v4619_v0, 5 }
 0x1ee   : > { %9518 = vst [vmem:[#allocation7_spill] sm:$0xff] %v8926_v27  ;;  %v2516_v14 = vld [vmem:[#allocation2 + $0xa0] sm:$0xf]  ;;  %v2517_v22 = vld [vmem:[#allocation2 + $0xa4] sm:$0x1]  ;;  %v1718_v11 = vsel %vm8229_vm13, %v6155_v30, %v1717_v48  ;;  %v1719_v43 = vrot.slane %v1717_v48, 4  ;;  %5728 = vmatpush.bf16.msra.mxu0 %v7364_v10  ;;  %v8942_v30 = vadd.f32 %v8844_v46, %v8854_v51 }
 0x1ef   : > { %3505 = vmatmul.bf16.gmra.mxu2 %v6366_v40  ;;  %v7191_v18 = vld [vmem:[#allocation3 + $0x124] sm:$0xf]  ;;  %v2661_v49 = vrot.slane %v2516_v14, 5  ;;  %v6659_v40 = vld [vmem:[#allocation3 + $0x12c] sm:$0xf0]  ;;  %v4607_v45 = vrot.slane %v4606_v17, 4 }
 0x1f0   : > { %2471 = vst [vmem:[#allocation3 + $0x124] sm:$0xf] %v2332_v50  ;;  %v6171_v7 = vrot.slane %v2515_v34, 9  ;;  %v4617_v26 = vrot.slane %v4616_v24, 4  ;;  %v1721_v6 = vsel %vm8229_vm13, %v1719_v43, %v1720_v20  ;;  %v2664_v35 = vrot.slane %v2517_v22, 5  ;;  %v9523_v56 = vld [vmem:[#allocation9_spill] sm:$0xff] }
 0x1f1   : > { %2472 = vst [vmem:[#allocation3 + $0x130] sm:$0xf] %v2342_v16  ;;  %v4795_v38 = vld [vmem:[#allocation2 + $0xa8] sm:$0xe]  ;;  %v6662_v57 = vor.u32 %v7191_v18, %v6659_v40  ;;  %v4796_v0 = vld [vmem:[#allocation2 + $0xac] sm:$0xf]  ;;  %v4612_v10 = vsel %vm8206_vm12, %v4607_v45, %v8916_v5  ;;  %v8947_v16 = vpop.f32.mrf.mxu2  ;;  %v8953_v40 = vpop.f32.mrf.mxu3 }
 0x1f2   : > { %1799 = vst [vmem:[#allocation3 + $0x128] sm:$0xf] %v1718_v11  ;;  %v4797_v37 = vld [vmem:[#allocation2 + $0xb0] sm:$0x1]  ;;  %v2663_v48 = vrot.slane %v2661_v49, 4  ;;  %v6811_v50 = vrot.slane %v4795_v38, 9  ;;  %v4622_v22 = vsel %vm8206_vm12, %v4617_v26, %v4621_v39  ;;  %v8957_v39 = vpop.f32.mrf.mxu0 }
 0x1f3   : > { %9519 = vst [vmem:[#allocation8_spill] sm:$0xff] %v8942_v30  ;;  %v4941_v17 = vrot.slane %v4796_v0, 5  ;;  %v4944_v34 = vrot.slane %v4797_v37, 5  ;;  %4088 = vmatmul.bf16.gmra.mxu0 %v6662_v57  ;;  %v959_v24 = vld [vmem:[#allocation2 + $0xbc] sm:$0x1]  ;;  %v2662_v0 = vsel %vm8229_vm13, %v6171_v7, %v2661_v49  ;;  %v3387_v37 = vpop.f32.mrf.mxu1 }
 0x1f4   : > { %1800 = vst [vmem:[#allocation3 + $0x134] sm:$0xf] %v1721_v6  ;;  %v1072_v20 = vld [vmem:[#allocation2 + $0x9c] sm:$0xf]  ;;  %v1073_v14 = vld [vmem:[#allocation2 + $0xa0] sm:$0xf]  ;;  %v960_v51 = vsel %vm8189_vm7, %v785_v63, %v959_v24 }
 0x1f5   : > { %9520 = vst [vmem:[#allocation58_spill] sm:$0xff] %v8947_v16  ;;  %v4943_v46 = vrot.slane %v4941_v17, 4  ;;  %v1074_v18 = vld [vmem:[#allocation2 + $0xa4] sm:$0x1]  ;;  %v1397_v11 = vshrl.u32 %v1072_v20, 16  ;;  %v1400_v6 = vshll.u32 %v1072_v20, 16  ;;  %v4942_v7 = vsel %vm8229_vm13, %v6811_v50, %v4941_v17 }
 0x1f6   : > { %v2022_v43 = vld [vmem:[#allocation2 + $0xa8] sm:$0xf]  ;;  %9521 = vst [vmem:[#allocation59_spill] sm:$0xff] %v8953_v40  ;;  %v1406_v5 = vshll.u32 %v1073_v14, 16  ;;  %v1410_v45 = vshrl.u32 %v1073_v14, 16  ;;  %v1416_v38 = vshll.u32 %v1074_v18, 16  ;;  %v2665_v40 = vsel %vm8229_vm13, %v2663_v48, %v2664_v35 }
 0x1f7   : > { %961 = vst [vmem:[#allocation2 + $0xbc] sm:$0x1] %v960_v51  ;;  %v7263_v57 = vld [vmem:[#allocation3 + $0x124] sm:$0xf]  ;;  %v1399_v26 = vrot.slane %v1397_v11, 4  ;;  %v2344_v63 = vshrl.u32 %v2022_v43, 16  ;;  %v3388_v11 = vadd.f32 %v3387_v37, %v8481_v44 }
 0x1f8   : > { %v2023_v27 = vld [vmem:[#allocation2 + $0xac] sm:$0xf]  ;;  %v6371_v24 = vld [vmem:[#allocation3 + $0x12c] sm:$0xf0]  ;;  %4751 = vst [vmem:[#allocation3 + $0x124] sm:$0xf] %v4612_v10 }
 0x1f9   : > { %v1402_v51 = vrot.slane %v1400_v6, 5  ;;  %v1408_v20 = vrot.slane %v1406_v5, 5  ;;  %v6374_v16 = vor.u32 %v7263_v57, %v6371_v24  ;;  %4752 = vst [vmem:[#allocation3 + $0x130] sm:$0xf] %v4622_v22  ;;  %v8961_v14 = vld [vmem:[#allocation3 + $0x128] sm:$0xf] }
 0x1fa   : > { %v1412_v18 = vrot.slane %v1410_v45, 4  ;;  %v1418_v4 = vrot.slane %v1416_v38, 5  ;;  %2743 = vst [vmem:[#allocation3 + $0x128] sm:$0xf] %v2662_v0  ;;  %v2024_v30 = vld [vmem:[#allocation2 + $0xb0] sm:$0x1]  ;;  %v4945_v38 = vsel %vm8229_vm13, %v4943_v46, %v4944_v34 }
 0x1fb   : > { %v8963_v49 = vld [vmem:[#allocation3 + $0x130] sm:$0xf0]  ;;  %v1403_v10 = vor.u32 %v1402_v51, %v1399_v26  ;;  %3421 = vmatmul.bf16.gmra.mxu1 %v6374_v16  ;;  %v2346_v6 = vrot.slane %v2344_v63, 4  ;;  %v2347_v5 = vshll.u32 %v2022_v43, 16  ;;  %v2353_v45 = vshll.u32 %v2023_v27, 16 }
 0x1fc   : > { %9522 = vst [vmem:[#allocation60_spill] sm:$0xff] %v8963_v49  ;;  %v9524_v35 = vld [vmem:[#allocation10_spill] sm:$0xff]  ;;  %v1413_v22 = vor.u32 %v1412_v18, %v1408_v20  ;;  %v2357_v0 = vshrl.u32 %v2023_v27, 16  ;;  %v2363_v24 = vshll.u32 %v2024_v30, 16  ;;  %v4302_v50 = vld [vmem:[#allocation2 + $0xb4] sm:$0xf]  ;;  %v3476_v18 = vpop.f32.mrf.mxu2  ;;  %v8978_v49 = vpop.f32.mrf.mxu1 }
 0x1fd   : > { %v6670_v48 = vor.u32 %v9524_v35, %v9523_v56  ;;  %2744 = vst [vmem:[#allocation3 + $0x134] sm:$0xf] %v2665_v40  ;;  %v1404_v57 = vrot.slane %v1403_v10, 4  ;;  %v2349_v17 = vrot.slane %v2347_v5, 5  ;;  %v2355_v37 = vrot.slane %v2353_v45, 5  ;;  %v3965_v45 = vpop.f32.mrf.mxu3 }
 0x1fe   : > { %v1414_v44 = vrot.slane %v1413_v22, 4  ;;  %v4303_v26 = vld [vmem:[#allocation2 + $0xb8] sm:$0xf]  ;;  %v4624_v51 = vshrl.u32 %v4302_v50, 16  ;;  %v2359_v16 = vrot.slane %v2357_v0, 4  ;;  %v2365_v40 = vrot.slane %v2363_v24, 5 }
 0x1ff   : > { %4004 = vmatmul.bf16.gmra.mxu3 %v6670_v48  ;;  %v1409_v56 = vsel %vm8206_vm12, %v1404_v57, %v1408_v20  ;;  %v4304_v43 = vld [vmem:[#allocation2 + $0xbc] sm:$0x1]  ;;  %v4627_v63 = vshll.u32 %v4302_v50, 16  ;;  %v2350_v27 = vor.u32 %v2349_v17, %v2346_v6  ;;  %v4633_v46 = vshll.u32 %v4303_v26, 16  ;;  %v1571_v10 = vld [vmem:[#allocation2 + $0x9c] sm:$0xe] }
 0x200   : > { %v1419_v34 = vsel %vm8206_vm12, %v1414_v44, %v1418_v4  ;;  %1526 = vst [vmem:[#allocation3 + $0x13c] sm:$0xf] %v1409_v56  ;;  %v4626_v30 = vrot.slane %v4624_v51, 4  ;;  %v2360_v35 = vor.u32 %v2359_v16, %v2355_v37  ;;  %v4637_v22 = vshrl.u32 %v4303_v26, 16  ;;  %v1572_v24 = vld [vmem:[#allocation2 + $0xa0] sm:$0xf]  ;;  %v8980_v4 = vpop.f32.mrf.mxu0 }
 0x201   : > { %1527 = vst [vmem:[#allocation3 + $0x148] sm:$0xf] %v1419_v34  ;;  %v4629_v48 = vrot.slane %v4627_v63, 5  ;;  %v4643_v5 = vshll.u32 %v4304_v43, 16  ;;  %v6377_v20 = vld [vmem:[#allocation3 + $0x128] sm:$0xf]  ;;  %v3477_v50 = vadd.f32 %v3476_v18, %v3388_v11  ;;  %v8984_v26 = vadd.f32 %v8900_v8, %v8934_v55 }
 0x202   : > { %v2351_v57 = vrot.slane %v2350_v27, 4  ;;  %v8976_v0 = vrot.slane %v4633_v46, 5  ;;  %9525 = vst [vmem:[#allocation9_spill] sm:$0xff] %v8978_v49  ;;  %v2361_v44 = vrot.slane %v2360_v35, 4  ;;  %v4639_v51 = vrot.slane %v4637_v22, 4  ;;  %v9527_v56 = vld [vmem:[#allocation11_spill] sm:$0xff] }
 0x203   : > { %9526 = vst [vmem:[#allocation10_spill] sm:$0xff] %v8980_v4  ;;  %v4630_v17 = vor.u32 %v4629_v48, %v4626_v30  ;;  %v802_v16 = vrot.slane %v9527_v56, 4  ;;  %v1573_v63 = vld [vmem:[#allocation2 + $0xa4] sm:$0x1]  ;;  %v6156_v18 = vrot.slane %v1571_v10, 9  ;;  %v8992_v27 = vrot.slane %v4643_v5, 5 }
 0x204   : > { %v7265_v6 = vld [vmem:[#allocation3 + $0x130] sm:$0xf0]  ;;  %5023 = vst [vmem:[#allocation3 + $0x128] sm:$0xf] %v4942_v7  ;;  %v2356_v11 = vsel %vm8206_vm12, %v2351_v57, %v2355_v37  ;;  %v2366_v34 = vsel %vm8206_vm12, %v2361_v44, %v2365_v40  ;;  %v4640_v7 = vor.u32 %v4639_v51, %v8976_v0  ;;  %v1724_v30 = vrot.slane %v1572_v24, 5 }
 0x205   : > { %v6378_v43 = vor.u32 %v7265_v6, %v6377_v20  ;;  %5024 = vst [vmem:[#allocation3 + $0x134] sm:$0xf] %v4945_v38  ;;  %v2518_v46 = vld [vmem:[#allocation2 + $0xa8] sm:$0xe]  ;;  %v2519_v8 = vld [vmem:[#allocation2 + $0xac] sm:$0xf]  ;;  %v8994_v22 = vadd.f32 %v3965_v45, %v3477_v50  ;;  %v9000_v45 = vpop.f32.mrf.mxu2 }
 0x206   : > { %v4631_v55 = vrot.slane %v4630_v17, 4  ;;  %v1727_v35 = vrot.slane %v1573_v63, 5  ;;  %v2520_v48 = vld [vmem:[#allocation2 + $0xb0] sm:$0x1]  ;;  %v2668_v38 = vrot.slane %v2519_v8, 5  ;;  %v1725_v10 = vsel %vm8229_vm13, %v6156_v18, %v1724_v30  ;;  %9528 = vst [vmem:[#allocation11_spill] sm:$0xff] %v9000_v45  ;;  %v3392_v8 = vpop.f32.mrf.mxu1 }
 0x207   : > { %3510 = vmatmul.bf16.gmra.mxu2 %v6378_v43  ;;  %v7194_v37 = vld [vmem:[#allocation3 + $0x13c] sm:$0xf]  ;;  %v1726_v20 = vrot.slane %v1724_v30, 4  ;;  %v6172_v40 = vrot.slane %v2518_v46, 9  ;;  %v4641_v5 = vrot.slane %v4640_v7, 4  ;;  %v2671_v50 = vrot.slane %v2520_v48, 5  ;;  %v9002_v30 = vpop.f32.mrf.mxu3 }
 0x208   : > { %v4798_v57 = vld [vmem:[#allocation2 + $0xb4] sm:$0xe]  ;;  %v6671_v6 = vld [vmem:[#allocation3 + $0x144] sm:$0xf0]  ;;  %2473 = vst [vmem:[#allocation3 + $0x13c] sm:$0xf] %v2356_v11 }
 0x209   : > { %v2670_v24 = vrot.slane %v2668_v38, 4  ;;  %2474 = vst [vmem:[#allocation3 + $0x148] sm:$0xf] %v2366_v34  ;;  %v1728_v44 = vsel %vm8229_vm13, %v1726_v20, %v1727_v35  ;;  %v4799_v17 = vld [vmem:[#allocation2 + $0xb8] sm:$0xf]  ;;  %v6674_v56 = vor.u32 %v7194_v37, %v6671_v6  ;;  %v6812_v43 = vrot.slane %v4798_v57, 9  ;;  %v9007_v35 = vpop.f32.mrf.mxu0 }
 0x20a   : > { %v4800_v51 = vld [vmem:[#allocation2 + $0xbc] sm:$0x1]  ;;  %1801 = vst [vmem:[#allocation3 + $0x140] sm:$0xf] %v1725_v10  ;;  %v4948_v63 = vrot.slane %v4799_v17, 5  ;;  %v4636_v34 = vsel %vm8206_vm12, %v4631_v55, %v8976_v0  ;;  %v2669_v0 = vsel %vm8229_vm13, %v6172_v40, %v2668_v38  ;;  %v3393_v38 = vadd.f32 %v3392_v8, %v8534_v53 }
 0x20b   : > { %v4951_v18 = vrot.slane %v4800_v51, 5  ;;  %1802 = vst [vmem:[#allocation3 + $0x14c] sm:$0xf] %v1728_v44  ;;  %4093 = vmatmul.bf16.gmra.mxu0 %v6674_v56  ;;  %v966_v11 = vld [vmem:[#allocation2 + $0xc8] sm:$0x1]  ;;  %v4646_v51 = vsel %vm8206_vm12, %v4641_v5, %v8992_v27 }
 0x20c   : > { %9529 = vst [vmem:[#allocation61_spill] sm:$0xff] %v9002_v30  ;;  %v1075_v7 = vld [vmem:[#allocation2 + $0xa8] sm:$0xf]  ;;  %v4950_v46 = vrot.slane %v4948_v63, 4  ;;  %v967_v48 = vsel %vm8189_vm7, %v802_v16, %v966_v11  ;;  %v1076_v37 = vld [vmem:[#allocation2 + $0xac] sm:$0xf] }
 0x20d   : > { %v1077_v10 = vld [vmem:[#allocation2 + $0xb0] sm:$0x1]  ;;  %v1421_v20 = vshrl.u32 %v1075_v7, 16  ;;  %968 = vst [vmem:[#allocation2 + $0xc8] sm:$0x1] %v967_v48  ;;  %v1424_v57 = vshll.u32 %v1075_v7, 16  ;;  %v2672_v7 = vsel %vm8229_vm13, %v2670_v24, %v2671_v50 }
 0x20e   : > { %v1430_v6 = vshll.u32 %v1076_v37, 16  ;;  %v1434_v44 = vshrl.u32 %v1076_v37, 16  ;;  %v1440_v17 = vshll.u32 %v1077_v10, 16  ;;  %v2025_v56 = vld [vmem:[#allocation2 + $0xb4] sm:$0xf]  ;;  %v9020_v37 = vsel %vm8229_vm13, %v6812_v43, %v4948_v63  ;;  %v9530_v43 = vld [vmem:[#allocation13_spill] sm:$0xff] }
 0x20f   : > { %v1423_v55 = vrot.slane %v1421_v20, 4  ;;  %v2026_v4 = vld [vmem:[#allocation2 + $0xb8] sm:$0xf]  ;;  %v7266_v3 = vld [vmem:[#allocation3 + $0x13c] sm:$0xf]  ;;  %v1426_v16 = vrot.slane %v1424_v57, 5  ;;  %v9024_v27 = vsel %vm8229_vm13, %v4950_v46, %v4951_v18  ;;  %v9035_v18 = vadd.f32 %v8957_v39, %v8994_v22 }
 0x210   : > { %v1432_v11 = vrot.slane %v1430_v6, 5  ;;  %v1436_v30 = vrot.slane %v1434_v44, 4  ;;  %v1442_v45 = vrot.slane %v1440_v17, 5  ;;  %v6383_v48 = vld [vmem:[#allocation3 + $0x144] sm:$0xf0]  ;;  %v2368_v57 = vshrl.u32 %v2025_v56, 16 }
 0x211   : > { %4753 = vst [vmem:[#allocation3 + $0x13c] sm:$0xf] %v4636_v34  ;;  %v2027_v40 = vld [vmem:[#allocation2 + $0xbc] sm:$0x1]  ;;  %v6386_v5 = vor.u32 %v7266_v3, %v6383_v48  ;;  %v9027_v10 = vld [vmem:[#allocation3 + $0x140] sm:$0xf]  ;;  %v1427_v20 = vor.u32 %v1426_v16, %v1423_v55 }
 0x212   : > { %4754 = vst [vmem:[#allocation3 + $0x148] sm:$0xf] %v4646_v51  ;;  %v1437_v34 = vor.u32 %v1436_v30, %v1432_v11  ;;  %v9029_v6 = vld [vmem:[#allocation3 + $0x148] sm:$0xf0]  ;;  %v2371_v24 = vshll.u32 %v2025_v56, 16  ;;  %v2377_v50 = vshll.u32 %v2026_v4, 16  ;;  %v3481_v30 = vpop.f32.mrf.mxu2 }
 0x213   : > { %2745 = vst [vmem:[#allocation3 + $0x140] sm:$0xf] %v2669_v0  ;;  %v9531_v63 = vld [vmem:[#allocation14_spill] sm:$0xff]  ;;  %3426 = vmatmul.bf16.gmra.mxu1 %v6386_v5  ;;  %v1428_v53 = vrot.slane %v1427_v20, 4  ;;  %v2370_v8 = vrot.slane %v2368_v57, 4  ;;  %v2381_v17 = vshrl.u32 %v2026_v4, 16  ;;  %v3482_v16 = vadd.f32 %v3481_v30, %v3393_v38  ;;  %v3970_v20 = vpop.f32.mrf.mxu3 }
 0x214   : > { %v6682_v44 = vor.u32 %v9531_v63, %v9530_v43  ;;  %9532 = vst [vmem:[#allocation13_spill] sm:$0xff] %v9035_v18  ;;  %v1438_v46 = vrot.slane %v1437_v34, 4  ;;  %v2373_v51 = vrot.slane %v2371_v24, 5  ;;  %v2379_v55 = vrot.slane %v2377_v50, 5  ;;  %v4305_v0 = vld [vmem:[#allocation2 + $0xc0] sm:$0xf]  ;;  %v9047_v50 = vpop.f32.mrf.mxu1 }
 0x215   : > { %2746 = vst [vmem:[#allocation3 + $0x14c] sm:$0xf] %v2672_v7  ;;  %v2387_v3 = vshll.u32 %v2027_v40, 16  ;;  %v7347_v56 = vld [vmem:[%s9429_s3 + $0x180] sm:$0xff]  ;;  %v1433_v39 = vsel %vm8206_vm12, %v1428_v53, %v1432_v11  ;;  %v2383_v48 = vrot.slane %v2381_v17, 4  ;;  %v4648_v5 = vshrl.u32 %v4305_v0, 16  ;;  %v9049_v11 = vpop.f32.mrf.mxu0 }
 0x216   : > { %4009 = vmatmul.bf16.gmra.mxu3 %v6682_v44  ;;  %v1443_v22 = vsel %vm8206_vm12, %v1438_v46, %v1442_v45  ;;  %v4306_v7 = vld [vmem:[#allocation2 + $0xc4] sm:$0xf]  ;;  %v4307_v4 = vld [vmem:[#allocation2 + $0xc8] sm:$0x1]  ;;  %1528 = vst [vmem:[#allocation3 + $0x154] sm:$0xf] %v1433_v39  ;;  %v2374_v40 = vor.u32 %v2373_v51, %v2370_v8  ;;  %5551 = vmatpush.bf16.msra.mxu2 %v7347_v56 }
 0x217   : > { %v2389_v34 = vrot.slane %v2387_v3, 5  ;;  %v4651_v57 = vshll.u32 %v4305_v0, 16  ;;  %v4657_v24 = vshll.u32 %v4306_v7, 16  ;;  %v7355_v38 = vld [vmem:[%s9429_s3 + $0x1c0] sm:$0xff]  ;;  %9533 = vst [vmem:[#allocation14_spill] sm:$0xff] %v9047_v50  ;;  %v2384_v45 = vor.u32 %v2383_v48, %v2379_v55 }
 0x218   : > { %9534 = vst [vmem:[#allocation62_spill] sm:$0xff] %v9049_v11  ;;  %v4650_v43 = vrot.slane %v4648_v5, 4  ;;  %v4661_v63 = vshrl.u32 %v4306_v7, 16  ;;  %v4667_v44 = vshll.u32 %v4307_v4, 16  ;;  %v7219_v53 = vld [vmem:[%s9429_s3 + $0x80] sm:$0xff]  ;;  %v2375_v46 = vrot.slane %v2374_v40, 4  ;;  %5640 = vmatpush.bf16.msra.mxu3 %v7355_v38 }
 0x219   : > { %1529 = vst [vmem:[#allocation3 + $0x160] sm:$0xf] %v1443_v22  ;;  %v4653_v8 = vrot.slane %v4651_v57, 5  ;;  %v9054_v17 = vrot.slane %v4657_v24, 5  ;;  %v1574_v30 = vld [vmem:[#allocation2 + $0xa8] sm:$0xe]  ;;  %v3971_v51 = vadd.f32 %v3970_v20, %v3482_v16  ;;  %4116 = vmatpush.bf16.msra.mxu1 %v7219_v53 }
 0x21a   : > { %v7363_v3 = vld [vmem:[%s9429_s3 + $0x200] sm:$0xff]  ;;  %v6389_v0 = vld [vmem:[#allocation3 + $0x140] sm:$0xf]  ;;  %v2385_v56 = vrot.slane %v2384_v45, 4  ;;  %v4663_v39 = vrot.slane %v4661_v63, 4  ;;  %v6157_v22 = vrot.slane %v1574_v30, 9  ;;  %v2380_v16 = vsel %vm8206_vm12, %v2375_v46, %v2379_v55 }
 0x21b   : > { %5025 = vst [vmem:[#allocation3 + $0x140] sm:$0xf] %v9020_v37  ;;  %v4654_v7 = vor.u32 %v4653_v8, %v4650_v43  ;;  %v1575_v4 = vld [vmem:[#allocation2 + $0xac] sm:$0xf]  ;;  %5729 = vmatpush.bf16.msra.mxu0 %v7363_v3  ;;  %v1576_v40 = vld [vmem:[#allocation2 + $0xb0] sm:$0x1] }
 0x21c   : > { %v7268_v48 = vld [vmem:[#allocation3 + $0x148] sm:$0xf0]  ;;  %v4664_v20 = vor.u32 %v4663_v39, %v9054_v17  ;;  %v1731_v57 = vrot.slane %v1575_v4, 5  ;;  %v2390_v24 = vsel %vm8206_vm12, %v2385_v56, %v2389_v34  ;;  %v4669_v38 = vrot.slane %v4667_v44, 5  ;;  %v2522_v63 = vld [vmem:[#allocation2 + $0xb8] sm:$0xf]  ;;  %v9072_v56 = vpop.f32.mrf.mxu3 }
 0x21d   : > { %v6390_v5 = vor.u32 %v7268_v48, %v6389_v0  ;;  %5026 = vst [vmem:[#allocation3 + $0x14c] sm:$0xf] %v9024_v27  ;;  %v1734_v45 = vrot.slane %v1576_v40, 5  ;;  %v7197_v37 = vld [vmem:[#allocation3 + $0x154] sm:$0xf]  ;;  %v4655_v43 = vrot.slane %v4654_v7, 4  ;;  %v9070_v0 = vpop.f32.mrf.mxu2  ;;  %v3397_v48 = vpop.f32.mrf.mxu1 }
 0x21e   : > { %v1732_v53 = vsel %vm8229_vm13, %v6157_v22, %v1731_v57  ;;  %v1733_v27 = vrot.slane %v1731_v57, 4  ;;  %v2521_v8 = vld [vmem:[#allocation2 + $0xb4] sm:$0xe]  ;;  %2475 = vst [vmem:[#allocation3 + $0x154] sm:$0xf] %v2380_v16  ;;  %v4665_v55 = vrot.slane %v4664_v20, 4  ;;  %v9078_v7 = vpop.f32.mrf.mxu0  ;;  %v9084_v20 = vadd.f32 %v9007_v35, %v3971_v51 }
 0x21f   : > { %3515 = vmatmul.bf16.gmra.mxu2 %v6390_v5  ;;  %v2675_v46 = vrot.slane %v2522_v63, 5  ;;  %v2523_v34 = vld [vmem:[#allocation2 + $0xbc] sm:$0x1]  ;;  %9535 = vst [vmem:[#allocation63_spill] sm:$0xff] %v9070_v0  ;;  %v9074_v39 = vld [vmem:[#allocation2 + $0xc0] sm:$0xe]  ;;  %v4660_v40 = vsel %vm8206_vm12, %v4655_v43, %v9054_v17 }
 0x220   : > { %v6683_v30 = vld [vmem:[#allocation3 + $0x15c] sm:$0xf0]  ;;  %v1735_v3 = vsel %vm8229_vm13, %v1733_v27, %v1734_v45  ;;  %9536 = vst [vmem:[#allocation64_spill] sm:$0xff] %v9072_v56  ;;  %v9076_v22 = vld [vmem:[#allocation2 + $0xc4] sm:$0xf]  ;;  %v6173_v4 = vrot.slane %v2521_v8, 9  ;;  %v4670_v57 = vsel %vm8206_vm12, %v4665_v55, %v4669_v38 }
 0x221   : > { %2476 = vst [vmem:[#allocation3 + $0x160] sm:$0xf] %v2390_v24  ;;  %v6686_v44 = vor.u32 %v7197_v37, %v6683_v30  ;;  %v9080_v5 = vld [vmem:[#allocation2 + $0xc8] sm:$0x1]  ;;  %v4955_v16 = vrot.slane %v9076_v22, 5  ;;  %v2677_v24 = vrot.slane %v2675_v46, 4 }
 0x222   : > { %1803 = vst [vmem:[#allocation3 + $0x158] sm:$0xf] %v1732_v53  ;;  %v2678_v45 = vrot.slane %v2523_v34, 5  ;;  %v1078_v63 = vld [vmem:[#allocation2 + $0xb4] sm:$0xf]  ;;  %v6813_v53 = vrot.slane %v9074_v39, 9  ;;  %v2676_v38 = vsel %vm8229_vm13, %v6173_v4, %v2675_v46  ;;  %v3398_v46 = vadd.f32 %v3397_v48, %v8589_v9 }
 0x223   : > { %1804 = vst [vmem:[#allocation3 + $0x164] sm:$0xf] %v1735_v3  ;;  %4098 = vmatmul.bf16.gmra.mxu0 %v6686_v44  ;;  %v1079_v37 = vld [vmem:[#allocation2 + $0xb8] sm:$0xf]  ;;  %v4958_v27 = vrot.slane %v9080_v5, 5  ;;  %v1445_v30 = vshrl.u32 %v1078_v63, 16 }
 0x224   : > { %9537 = vst [vmem:[#allocation65_spill] sm:$0xff] %v9084_v20  ;;  %v1080_v8 = vld [vmem:[#allocation2 + $0xbc] sm:$0x1]  ;;  %v1448_v3 = vshll.u32 %v1078_v63, 16  ;;  %v4957_v35 = vrot.slane %v4955_v16, 4  ;;  %v1454_v51 = vshll.u32 %v1079_v37, 16  ;;  %v2679_v39 = vsel %vm8229_vm13, %v2677_v24, %v2678_v45 }
 0x225   : > { %v1458_v44 = vshrl.u32 %v1079_v37, 16  ;;  %v1464_v22 = vshll.u32 %v1080_v8, 16  ;;  %v2028_v11 = vld [vmem:[#allocation2 + $0xc0] sm:$0xf]  ;;  %v7269_v17 = vld [vmem:[#allocation3 + $0x154] sm:$0xf]  ;;  %v9104_v9 = vpop.f32.mrf.mxu1 }
 0x226   : > { %v1447_v43 = vrot.slane %v1445_v30, 4  ;;  %v1450_v55 = vrot.slane %v1448_v3, 5  ;;  %v2029_v34 = vld [vmem:[#allocation2 + $0xc4] sm:$0xf]  ;;  %4755 = vst [vmem:[#allocation3 + $0x154] sm:$0xf] %v4660_v40  ;;  %v9106_v48 = vpop.f32.mrf.mxu0 }
 0x227   : > { %v1456_v5 = vrot.slane %v1454_v51, 5  ;;  %v1460_v20 = vrot.slane %v1458_v44, 4  ;;  %v1466_v8 = vrot.slane %v1464_v22, 5  ;;  %v2392_v50 = vshrl.u32 %v2028_v11, 16  ;;  %v2030_v30 = vld [vmem:[#allocation2 + $0xc8] sm:$0x1]  ;;  %v3486_v51 = vpop.f32.mrf.mxu2  ;;  %v3975_v44 = vpop.f32.mrf.mxu3 }
 0x228   : > { %v6395_v56 = vld [vmem:[#allocation3 + $0x15c] sm:$0xf0]  ;;  %v1451_v37 = vor.u32 %v1450_v55, %v1447_v43  ;;  %v9538_v40 = vld [vmem:[#allocation17_spill] sm:$0xff]  ;;  %v9539_v3 = vld [vmem:[#allocation18_spill] sm:$0xff]  ;;  %v2401_v45 = vshll.u32 %v2029_v34, 16  ;;  %v2411_v43 = vshll.u32 %v2030_v30, 16 }
 0x229   : > { %v6398_v63 = vor.u32 %v7269_v17, %v6395_v56  ;;  %4756 = vst [vmem:[#allocation3 + $0x160] sm:$0xf] %v4670_v57  ;;  %v9097_v0 = vld [vmem:[#allocation3 + $0x158] sm:$0xf]  ;;  %v1461_v4 = vor.u32 %v1460_v20, %v1456_v5  ;;  %v6694_v49 = vor.u32 %v9539_v3, %v9538_v40  ;;  %v2394_v56 = vrot.slane %v2392_v50, 4 }
 0x22a   : > { %v9099_v18 = vld [vmem:[#allocation3 + $0x160] sm:$0xf0]  ;;  %2747 = vst [vmem:[#allocation3 + $0x158] sm:$0xf] %v2676_v38  ;;  %v1452_v24 = vrot.slane %v1451_v37, 4  ;;  %v2395_v57 = vshll.u32 %v2028_v11, 16  ;;  %v3487_v38 = vadd.f32 %v3486_v51, %v3398_v46  ;;  %v4956_v20 = vsel %vm8229_vm13, %v6813_v53, %v4955_v16 }
 0x22b   : > { %3431 = vmatmul.bf16.gmra.mxu1 %v6398_v63  ;;  %2748 = vst [vmem:[#allocation3 + $0x164] sm:$0xf] %v2679_v39  ;;  %v1462_v22 = vrot.slane %v1461_v4, 4  ;;  %v2405_v17 = vshrl.u32 %v2029_v34, 16  ;;  %v4308_v55 = vld [vmem:[#allocation2 + $0xcc] sm:$0xf]  ;;  %4014 = vmatmul.bf16.gmra.mxu3 %v6694_v49  ;;  %v4959_v34 = vsel %vm8229_vm13, %v4957_v35, %v4958_v27 }
 0x22c   : > { %9540 = vst [vmem:[#allocation17_spill] sm:$0xff] %v9104_v9  ;;  %v1457_v50 = vsel %vm8206_vm12, %v1452_v24, %v1456_v5  ;;  %v2397_v11 = vrot.slane %v2395_v57, 5  ;;  %v2403_v39 = vrot.slane %v2401_v45, 5  ;;  %v4309_v63 = vld [vmem:[#allocation2 + $0xd0] sm:$0xf]  ;;  %v4672_v4 = vshrl.u32 %v4308_v55, 16 }
 0x22d   : > { %9541 = vst [vmem:[#allocation18_spill] sm:$0xff] %v9106_v48  ;;  %v1467_v49 = vsel %vm8206_vm12, %v1462_v22, %v1466_v8  ;;  %v2407_v37 = vrot.slane %v2405_v17, 4  ;;  %v4310_v46 = vld [vmem:[#allocation2 + $0xd4] sm:$0x1]  ;;  %v4675_v40 = vshll.u32 %v4308_v55, 16  ;;  %v4681_v16 = vshll.u32 %v4309_v63, 16 }
 0x22e   : > { %1530 = vst [vmem:[#allocation3 + $0x16c] sm:$0xf] %v1457_v50  ;;  %v2398_v30 = vor.u32 %v2397_v11, %v2394_v56  ;;  %v4685_v53 = vshrl.u32 %v4309_v63, 16  ;;  %v2413_v5 = vrot.slane %v2411_v43, 5  ;;  %v4674_v24 = vrot.slane %v4672_v4, 4 }
 0x22f   : > { %1531 = vst [vmem:[#allocation3 + $0x178] sm:$0xf] %v1467_v49  ;;  %v2408_v3 = vor.u32 %v2407_v37, %v2403_v39  ;;  %v1577_v57 = vld [vmem:[#allocation2 + $0xb4] sm:$0xe]  ;;  %v1578_v45 = vld [vmem:[#allocation2 + $0xb8] sm:$0xf]  ;;  %v3976_v51 = vadd.f32 %v3975_v44, %v3487_v38  ;;  %v9118_v63 = vpop.f32.mrf.mxu2  ;;  %v9120_v44 = vpop.f32.mrf.mxu3 }
 0x230   : > { %v2399_v27 = vrot.slane %v2398_v30, 4  ;;  %v4677_v35 = vrot.slane %v4675_v40, 5  ;;  %v4683_v9 = vrot.slane %v4681_v16, 5  ;;  %v4687_v8 = vrot.slane %v4685_v53, 4  ;;  %v1579_v11 = vld [vmem:[#allocation2 + $0xbc] sm:$0x1] }
 0x231   : > { %v6401_v48 = vld [vmem:[#allocation3 + $0x158] sm:$0xf]  ;;  %v2409_v17 = vrot.slane %v2408_v3, 4  ;;  %v4691_v50 = vshll.u32 %v4310_v46, 16  ;;  %v6158_v37 = vrot.slane %v1577_v57, 9  ;;  %v1738_v4 = vrot.slane %v1578_v45, 5  ;;  %v3402_v46 = vpop.f32.mrf.mxu1 }
 0x232   : > { %v7271_v22 = vld [vmem:[#allocation3 + $0x160] sm:$0xf0]  ;;  %5027 = vst [vmem:[#allocation3 + $0x158] sm:$0xf] %v4956_v20  ;;  %v2404_v56 = vsel %vm8206_vm12, %v2399_v27, %v2403_v39  ;;  %v4678_v55 = vor.u32 %v4677_v35, %v4674_v24  ;;  %v4688_v43 = vor.u32 %v4687_v8, %v4683_v9  ;;  %v1741_v20 = vrot.slane %v1579_v11, 5 }
 0x233   : > { %v6402_v49 = vor.u32 %v7271_v22, %v6401_v48  ;;  %5028 = vst [vmem:[#allocation3 + $0x164] sm:$0xf] %v4959_v34  ;;  %v2414_v38 = vsel %vm8206_vm12, %v2409_v17, %v2413_v5  ;;  %v2525_v30 = vld [vmem:[#allocation2 + $0xc4] sm:$0xf]  ;;  %v4069_v48 = vpop.f32.mrf.mxu0  ;;  %v2524_v40 = vld [vmem:[#allocation2 + $0xc0] sm:$0xe]  ;;  %v1739_v16 = vsel %vm8229_vm13, %v6158_v37, %v1738_v4  ;;  %v9127_v3 = vadd.f32 %v9078_v7, %v3976_v51 }
 0x234   : > { %v1740_v53 = vrot.slane %v1738_v4, 4  ;;  %v4679_v5 = vrot.slane %v4678_v55, 4  ;;  %v2526_v24 = vld [vmem:[#allocation2 + $0xc8] sm:$0x1]  ;;  %v2682_v57 = vrot.slane %v2525_v30, 5  ;;  %v4689_v45 = vrot.slane %v4688_v43, 4 }
 0x235   : > { %3520 = vmatmul.bf16.gmra.mxu2 %v6402_v49  ;;  %v7200_v34 = vld [vmem:[#allocation3 + $0x16c] sm:$0xf]  ;;  %v4693_v27 = vrot.slane %v4691_v50, 5  ;;  %1805 = vst [vmem:[#allocation3 + $0x170] sm:$0xf] %v1739_v16  ;;  %v6174_v22 = vrot.slane %v2524_v40, 9 }
 0x236   : > { %v6695_v39 = vld [vmem:[#allocation3 + $0x174] sm:$0xf0]  ;;  %2477 = vst [vmem:[#allocation3 + $0x16c] sm:$0xf] %v2404_v56  ;;  %v1742_v35 = vsel %vm8229_vm13, %v1740_v53, %v1741_v20  ;;  %v2684_v17 = vrot.slane %v2682_v57, 4  ;;  %v2685_v49 = vrot.slane %v2526_v24, 5  ;;  %v3403_v56 = vadd.f32 %v3402_v46, %v8446_v41 }
 0x237   : > { %2478 = vst [vmem:[#allocation3 + $0x178] sm:$0xf] %v2414_v38  ;;  %v6698_v8 = vor.u32 %v7200_v34, %v6695_v39  ;;  %v4684_v7 = vsel %vm8206_vm12, %v4679_v5, %v4683_v9  ;;  %v4805_v51 = vld [vmem:[#allocation2 + $0xd0] sm:$0xf]  ;;  %v7299_v55 = vld [vmem:[#allocation3 + $0x4] sm:$0xf]  ;;  %v3491_v43 = vpop.f32.mrf.mxu2  ;;  %v3980_v50 = vpop.f32.mrf.mxu3  ;;  %v4694_v38 = vsel %vm8206_vm12, %v4689_v45, %v4693_v27  ;;  %v2683_v41 = vsel %vm8229_vm13, %v6174_v22, %v2682_v57 }
 0x238   : > { %1806 = vst [vmem:[#allocation3 + $0x17c] sm:$0xf] %v1742_v35  ;;  %v6867_v11 = vld [vmem:[#allocation3 + $0xc] sm:$0xf0]  ;;  %v3492_v4 = vadd.f32 %v3491_v43, %v3403_v56  ;;  %v4804_v46 = vld [vmem:[#allocation2 + $0xcc] sm:$0xe]  ;;  %v2686_v40 = vsel %vm8229_vm13, %v2684_v17, %v2685_v49 }
 0x239   : > { %4103 = vmatmul.bf16.gmra.mxu0 %v6698_v8  ;;  %v6870_v37 = vor.u32 %v7299_v55, %v6867_v11  ;;  %v9136_v20 = vpop.f32.mrf.mxu1  ;;  %v4962_v39 = vrot.slane %v4805_v51, 5  ;;  %v4806_v5 = vld [vmem:[#allocation2 + $0xd4] sm:$0x1]  ;;  %v6814_v57 = vrot.slane %v4804_v46, 9  ;;  %v6873_v35 = vld [vmem:[#allocation3 + $0x8] sm:$0xf] }
 0x23a   : > { %v3981_v28 = vadd.f32 %v3980_v50, %v3492_v4  ;;  %v4965_v27 = vrot.slane %v4806_v5, 5  ;;  %v7301_v8 = vld [vmem:[#allocation3 + $0x10] sm:$0xf0]  ;;  %v6879_v4 = vld [vmem:[#allocation3 + $0x24] sm:$0xf0] }
 0x23b   : > { %v9138_v30 = vpop.f32.mrf.mxu0  ;;  %5641 = vmatmul.bf16.vlgmr.msra.gmra.mxu3 %v6870_v37  ;;  %v4964_v45 = vrot.slane %v4962_v39, 4  ;;  %v6874_v55 = vor.u32 %v7301_v8, %v6873_v35  ;;  %v7304_v5 = vld [vmem:[#allocation3 + $0x28] sm:$0xf0]  ;;  %v6891_v52 = vld [vmem:[#allocation3 + $0x3c] sm:$0xf0] }
 0x23c   : > { %v9144_v53 = vld [vmem:[#allocation3 + $0x170] sm:$0xf]  ;;  %v9152_v49 = vadd.f32 %v4069_v48, %v3981_v28 }
 0x23d   : > { %v7272_v34 = vld [vmem:[#allocation3 + $0x16c] sm:$0xf]  ;;  %2749 = vst [vmem:[#allocation3 + $0x170] sm:$0xf] %v2683_v41  ;;  %v4966_v51 = vsel %vm8229_vm13, %v4964_v45, %v4965_v27  ;;  %v6865_v45 = vld [vmem:[#allocation3] sm:$0xf] }
 0x23e   : > { %v6407_v9 = vld [vmem:[#allocation3 + $0x174] sm:$0xf0]  ;;  %4757 = vst [vmem:[#allocation3 + $0x16c] sm:$0xf] %v4684_v7  ;;  %v4963_v7 = vsel %vm8229_vm13, %v6814_v57, %v4962_v39  ;;  %v7300_v27 = vld [vmem:[#allocation3 + $0x8] sm:$0xf0] }
 0x23f   : > { %v6410_v16 = vor.u32 %v7272_v34, %v6407_v9  ;;  %4758 = vst [vmem:[#allocation3 + $0x178] sm:$0xf] %v4694_v38  ;;  %v9146_v24 = vld [vmem:[#allocation3 + $0x178] sm:$0xf0]  ;;  %v9148_v22 = vpop.f32.mrf.mxu2  ;;  %v9150_v17 = vpop.f32.mrf.mxu3 }
 0x240   : > { %2750 = vst [vmem:[#allocation3 + $0x17c] sm:$0xf] %v2686_v40  ;;  %v7302_v38 = vld [vmem:[#allocation3 + $0x1c] sm:$0xf] }
 0x241   : > { %3436 = vmatmul.bf16.gmra.mxu1 %v6410_v16  ;;  %v3407_v11 = vpop.f32.mrf.mxu1  ;;  %v6882_v34 = vor.u32 %v7302_v38, %v6879_v4  ;;  %v6885_v16 = vld [vmem:[#allocation3 + $0x20] sm:$0xf] }
 0x242   : > { %v3408_v48 = vadd.f32 %v3407_v11, %v8493_v19 }
 0x243   : > { %v4074_v56 = vpop.f32.mrf.mxu0 }
 0x244   : > { %v6413_v43 = vld [vmem:[#allocation3 + $0x170] sm:$0xf] }
 0x245   : > { %5029 = vst [vmem:[#allocation3 + $0x170] sm:$0xf] %v4963_v7  ;;  %v6886_v7 = vor.u32 %v7304_v5, %v6885_v16  ;;  %v7308_v5 = vld [vmem:[#allocation3 + $0x4c] sm:$0xf] }
 0x247   : > { %v7274_v50 = vld [vmem:[#allocation3 + $0x178] sm:$0xf0]  ;;  %v3496_v41 = vpop.f32.mrf.mxu2  ;;  %v3985_v46 = vpop.f32.mrf.mxu3 }
 0x248   : > { %v6414_v37 = vor.u32 %v7274_v50, %v6413_v43  ;;  %5030 = vst [vmem:[#allocation3 + $0x17c] sm:$0xf] %v4966_v51  ;;  %v3497_v9 = vadd.f32 %v3496_v41, %v3408_v48  ;;  %v6866_v51 = vor.u32 %v7300_v27, %v6865_v45  ;;  %v6534_v50 = vor.u32 %v8310_v33, %v8308_v62  ;;  %v7307_v41 = vld [vmem:[#allocation3 + $0x40] sm:$0xf0]  ;;  %v6903_v45 = vld [vmem:[#allocation3 + $0x54] sm:$0xf0] }
 0x249   : > { %5730 = vmatmul.bf16.vlgmr.msra.gmra.mxu0 %v6874_v55  ;;  %v9163_v28 = vpop.f32.mrf.mxu1  ;;  %v7305_v55 = vld [vmem:[#allocation3 + $0x34] sm:$0xf] }
 0x24a   : > { %3525 = vmatmul.bf16.gmra.mxu2 %v6414_v37  ;;  %v3986_v39 = vadd.f32 %v3985_v46, %v3497_v9  ;;  %v6894_v11 = vor.u32 %v7305_v55, %v6891_v52  ;;  %v6546_v55 = vor.u32 %v8362_v42, %v8360_v59  ;;  %v7311_v59 = vld [vmem:[#allocation3 + $0x64] sm:$0xf]  ;;  %v6915_v42 = vld [vmem:[#allocation3 + $0x6c] sm:$0xf0] }
 0x24b   : > { %v9159_v40 = vpop.f32.mrf.mxu0  ;;  %5646 = vmatmul.bf16.gmra.mxu3 %v6882_v34  ;;  %v6897_v34 = vld [vmem:[#allocation3 + $0x38] sm:$0xf] }
 0x24c   : > { %v9167_v19 = vadd.f32 %v4074_v56, %v3986_v39  ;;  %v7303_v39 = vld [vmem:[#allocation3 + $0x20] sm:$0xf0]  ;;  %v6898_v62 = vor.u32 %v7307_v41, %v6897_v34 }
 0x24f   : > { %v9165_v57 = vpop.f32.mrf.mxu3  ;;  %v9169_v35 = vpop.f32.mrf.mxu2 }
 0x251   : > { %4117 = vmatmul.bf16.vlgmr.msra.gmra.mxu1 %v6522_v36  ;;  %v3412_v31 = vpop.f32.mrf.mxu1  ;;  %v6877_v36 = vld [vmem:[#allocation3 + $0x18] sm:$0xf] }
 0x252   : > { %v3413_v56 = vadd.f32 %v3412_v31, %v8548_v2  ;;  %v6878_v33 = vor.u32 %v7303_v39, %v6877_v36 }
 0x253   : > { %v4079_v8 = vpop.f32.mrf.mxu0 }
 0x257   : > { %v3990_v43 = vpop.f32.mrf.mxu3 }
 0x259   : > { %5735 = vmatmul.bf16.gmra.mxu0 %v6886_v7  ;;  %v9180_v16 = vpop.f32.mrf.mxu1  ;;  %v6906_v7 = vor.u32 %v7308_v5, %v6903_v45  ;;  %v6558_v45 = vor.u32 %v8408_v1, %v8406_v61 }
 0x25a   : > { %5552 = vmatmul.bf16.vlgmr.msra.gmra.mxu2 %v6866_v51 }
 0x25b   : > { %v9174_v38 = vpop.f32.mrf.mxu0  ;;  %5651 = vmatmul.bf16.gmra.mxu3 %v6894_v11  ;;  %v3501_v37 = vpop.f32.mrf.mxu2  ;;  %v6909_v11 = vld [vmem:[#allocation3 + $0x50] sm:$0xf] }
 0x25c   : > { %v3502_v4 = vadd.f32 %v3501_v37, %v3413_v56  ;;  %v6889_v56 = vld [vmem:[#allocation3 + $0x30] sm:$0xf]  ;;  %v7306_v37 = vld [vmem:[#allocation3 + $0x38] sm:$0xf0] }
 0x25d   : > { %v6890_v41 = vor.u32 %v7306_v37, %v6889_v56 }
 0x25e   : > { %v3991_v48 = vadd.f32 %v3990_v43, %v3502_v4  ;;  %v7310_v43 = vld [vmem:[#allocation3 + $0x58] sm:$0xf0] }
 0x25f   : > { %v9176_v46 = vpop.f32.mrf.mxu3  ;;  %v6910_v34 = vor.u32 %v7310_v43, %v6909_v11  ;;  %v6901_v11 = vld [vmem:[#allocation3 + $0x48] sm:$0xf]  ;;  %v7309_v43 = vld [vmem:[#allocation3 + $0x50] sm:$0xf0] }
 0x260   : > { %v9178_v9 = vadd.f32 %v4079_v8, %v3991_v48  ;;  %v6902_v37 = vor.u32 %v7309_v43, %v6901_v11 }
 0x261   : > { %4122 = vmatmul.bf16.gmra.mxu1 %v6534_v50  ;;  %v3417_v8 = vpop.f32.mrf.mxu1 }
 0x262   : > { %v3418_v31 = vadd.f32 %v3417_v8, %v8605_v21  ;;  %v7313_v8 = vld [vmem:[#allocation3 + $0x70] sm:$0xf0] }
 0x263   : > { %v4084_v2 = vpop.f32.mrf.mxu0  ;;  %v9182_v27 = vpop.f32.mrf.mxu2 }
 0x267   : > { %v3995_v51 = vpop.f32.mrf.mxu3 }
 0x269   : > { %5740 = vmatmul.bf16.gmra.mxu0 %v6898_v62  ;;  %v9191_v39 = vpop.f32.mrf.mxu1 }
 0x26a   : > { %5557 = vmatmul.bf16.gmra.mxu2 %v6878_v33  ;;  %9544 = vst [vmem:[#allocation68_spill] sm:$0xff] %v9191_v39  ;;  %v6918_v33 = vor.u32 %v7311_v59, %v6915_v42  ;;  %v9547_v42 = vld [vmem:[#allocation20_spill] sm:$0xff] }
 0x26b   : > { %5656 = vmatmul.bf16.gmra.mxu3 %v6906_v7  ;;  %v9186_v52 = vpop.f32.mrf.mxu0 }
 0x26c   : > { %9542 = vst [vmem:[#allocation66_spill] sm:$0xff] %v9186_v52 }
 0x26f   : > { %v9189_v50 = vpop.f32.mrf.mxu3 }
 0x270   : > { %9543 = vst [vmem:[#allocation67_spill] sm:$0xff] %v9189_v50 }
 0x271   : > { %4127 = vmatmul.bf16.gmra.mxu1 %v6546_v55 }
 0x272   : > { %v3506_v4 = vpop.f32.mrf.mxu2 }
 0x273   : > { %v3507_v48 = vadd.f32 %v3506_v4, %v3418_v31  ;;  %v4089_v21 = vpop.f32.mrf.mxu0  ;;  %v7314_v4 = vld [vmem:[#allocation3 + $0x7c] sm:$0xf] }
 0x275   : > { %v3996_v36 = vadd.f32 %v3995_v51, %v3507_v48  ;;  %v6921_v51 = vld [vmem:[#allocation3 + $0x68] sm:$0xf] }
 0x276   : > { %v6922_v56 = vor.u32 %v7313_v8, %v6921_v51  ;;  %v6927_v48 = vld [vmem:[#allocation3 + $0x84] sm:$0xf0]  ;;  %v9549_v51 = vld [vmem:[#allocation22_spill] sm:$0xff] }
 0x277   : > { %v9193_v62 = vadd.f32 %v4084_v2, %v3996_v36  ;;  %v4000_v5 = vpop.f32.mrf.mxu3 }
 0x278   : > { %v3422_v55 = vpop.f32.mrf.mxu1 }
 0x279   : > { %9545 = vst [vmem:[#allocation69_spill] sm:$0xff] %v9193_v62  ;;  %5745 = vmatmul.bf16.gmra.mxu0 %v6910_v34  ;;  %v3423_v34 = vadd.f32 %v3422_v55, %v8453_v47  ;;  %v6933_v47 = vld [vmem:[#allocation3 + $0x80] sm:$0xf]  ;;  %v7316_v55 = vld [vmem:[#allocation3 + $0x88] sm:$0xf0] }
 0x27a   : > { %5562 = vmatmul.bf16.gmra.mxu2 %v6890_v41  ;;  %v9197_v7 = vpop.f32.mrf.mxu2  ;;  %v6930_v41 = vor.u32 %v7314_v4, %v6927_v48 }
 0x27b   : > { %5661 = vmatmul.bf16.gmra.mxu3 %v6918_v33  ;;  %9546 = vst [vmem:[#allocation70_spill] sm:$0xff] %v9197_v7  ;;  %v4091_v2 = vpop.f32.mrf.mxu0  ;;  %v6570_v33 = vor.u32 %v9547_v42, %v8467_v54  ;;  %v7317_v54 = vld [vmem:[#allocation3 + $0x94] sm:$0xf]  ;;  %v9551_v42 = vld [vmem:[#allocation27_spill] sm:$0xff]  ;;  %v9556_v7 = vld [vmem:[#allocation36_spill] sm:$0xff] }
 0x27f   : > { %v4002_v31 = vpop.f32.mrf.mxu3 }
 0x280   : > { %v3424_v59 = vpop.f32.mrf.mxu1 }
 0x281   : > { %4132 = vmatmul.bf16.gmra.mxu1 %v6558_v45  ;;  %v3425_v8 = vadd.f32 %v3424_v59, %v9549_v51 }
 0x287   : > { %v4005_v1 = vpop.f32.mrf.mxu3 }
 0x288   : > { %v4094_v52 = vpop.f32.mrf.mxu0 }
 0x289   : > { %5750 = vmatmul.bf16.gmra.mxu0 %v6922_v56  ;;  %v6913_v56 = vld [vmem:[#allocation3 + $0x60] sm:$0xf] }
 0x28a   : > { %5567 = vmatmul.bf16.gmra.mxu2 %v6902_v37  ;;  %v3511_v61 = vpop.f32.mrf.mxu2  ;;  %v7312_v37 = vld [vmem:[#allocation3 + $0x68] sm:$0xf0] }
 0x28b   : > { %v3512_v36 = vadd.f32 %v3511_v61, %v3423_v34  ;;  %5666 = vmatmul.bf16.gmra.mxu3 %v6930_v41  ;;  %v6934_v61 = vor.u32 %v7316_v55, %v6933_v47  ;;  %v6914_v62 = vor.u32 %v7312_v37, %v6913_v56  ;;  %v6945_v55 = vld [vmem:[#allocation3 + $0x98] sm:$0xf]  ;;  %v7319_v56 = vld [vmem:[#allocation3 + $0xa0] sm:$0xf0] }
 0x28c   : > { %v7315_v37 = vld [vmem:[#allocation3 + $0x80] sm:$0xf0] }
 0x28d   : > { %v4001_v45 = vadd.f32 %v4000_v5, %v3512_v36  ;;  %v6939_v5 = vld [vmem:[#allocation3 + $0x9c] sm:$0xf0] }
 0x28e   : > { %v6942_v36 = vor.u32 %v7317_v54, %v6939_v5  ;;  %v7320_v5 = vld [vmem:[#allocation3 + $0xac] sm:$0xf] }
 0x28f   : > { %v9202_v50 = vadd.f32 %v4089_v21, %v4001_v45  ;;  %v4007_v43 = vpop.f32.mrf.mxu3 }
 0x290   : > { %v3427_v34 = vpop.f32.mrf.mxu1  ;;  %v4096_v21 = vpop.f32.mrf.mxu0 }
 0x291   : > { %9548 = vst [vmem:[#allocation20_spill] sm:$0xff] %v9202_v50  ;;  %4137 = vmatmul.bf16.gmra.mxu1 %v6570_v33  ;;  %v9552_v33 = vld [vmem:[#allocation28_spill] sm:$0xff] }
 0x292   : > { %v3513_v11 = vpop.f32.mrf.mxu2  ;;  %v6582_v45 = vor.u32 %v9552_v33, %v9551_v42  ;;  %v9553_v50 = vld [vmem:[#allocation24_spill] sm:$0xff]  ;;  %v6951_v42 = vld [vmem:[#allocation3 + $0xb4] sm:$0xf0] }
 0x293   : > { %v3514_v4 = vadd.f32 %v3513_v11, %v3425_v8  ;;  %v3428_v8 = vadd.f32 %v3427_v34, %v9553_v50  ;;  %v6954_v34 = vor.u32 %v7320_v5, %v6951_v42 }
 0x295   : > { %v4003_v48 = vadd.f32 %v4002_v31, %v3514_v4 }
 0x297   : > { %v9205_v41 = vadd.f32 %v4091_v2, %v4003_v48  ;;  %v6925_v2 = vld [vmem:[#allocation3 + $0x78] sm:$0xf] }
 0x298   : > { %v3429_v51 = vpop.f32.mrf.mxu1 }
 0x299   : > { %9550 = vst [vmem:[#allocation22_spill] sm:$0xff] %v9205_v41  ;;  %5755 = vmatmul.bf16.gmra.mxu0 %v6934_v61  ;;  %v4010_v59 = vpop.f32.mrf.mxu3  ;;  %v6946_v61 = vor.u32 %v7319_v56, %v6945_v55  ;;  %v7322_v56 = vld [vmem:[#allocation3 + $0xb8] sm:$0xf0] }
 0x29a   : > { %5572 = vmatmul.bf16.gmra.mxu2 %v6914_v62  ;;  %v6926_v62 = vor.u32 %v7315_v37, %v6925_v2  ;;  %v6937_v2 = vld [vmem:[#allocation3 + $0x90] sm:$0xf] }
 0x29b   : > { %5671 = vmatmul.bf16.gmra.mxu3 %v6942_v36  ;;  %v9554_v36 = vld [vmem:[#allocation29_spill] sm:$0xff] }
 0x29c   : > { %v3430_v33 = vadd.f32 %v3429_v51, %v9554_v36  ;;  %v7318_v51 = vld [vmem:[#allocation3 + $0x98] sm:$0xf0]  ;;  %v7323_v36 = vld [vmem:[#allocation3 + $0xc4] sm:$0xf] }
 0x2a0   : > { %v4099_v47 = vpop.f32.mrf.mxu0 }
 0x2a1   : > { %4142 = vmatmul.bf16.gmra.mxu1 %v6582_v45  ;;  %v4012_v48 = vpop.f32.mrf.mxu3 }
 0x2a2   : > { %v3516_v31 = vpop.f32.mrf.mxu2 }
 0x2a3   : > { %v3517_v11 = vadd.f32 %v3516_v31, %v3428_v8  ;;  %v9555_v31 = vld [vmem:[#allocation35_spill] sm:$0xff] }
 0x2a4   : > { %v6594_v39 = vor.u32 %v9556_v7, %v9555_v31  ;;  %v9560_v31 = vld [vmem:[#allocation34_spill] sm:$0xff] }
 0x2a5   : > { %v4006_v4 = vadd.f32 %v4005_v1, %v3517_v11 }
 0x2a7   : > { %v9210_v54 = vadd.f32 %v4094_v52, %v4006_v4  ;;  %v6957_v52 = vld [vmem:[#allocation3 + $0xb0] sm:$0xf] }
 0x2a8   : > { %v3432_v50 = vpop.f32.mrf.mxu1  ;;  %v4101_v1 = vpop.f32.mrf.mxu0  ;;  %v6958_v4 = vor.u32 %v7322_v56, %v6957_v52 }
 0x2a9   : > { %5760 = vmatmul.bf16.gmra.mxu0 %v6946_v61  ;;  %v9558_v61 = vld [vmem:[#allocation31_spill] sm:$0xff] }
 0x2aa   : > { %v3518_v41 = vpop.f32.mrf.mxu2  ;;  %5577 = vmatmul.bf16.gmra.mxu2 %v6926_v62  ;;  %v3433_v5 = vadd.f32 %v3432_v50, %v9558_v61  ;;  %v6938_v62 = vor.u32 %v7318_v51, %v6937_v2 }
 0x2ab   : > { %v3519_v45 = vadd.f32 %v3518_v41, %v3430_v33  ;;  %5676 = vmatmul.bf16.gmra.mxu3 %v6954_v34  ;;  %v6963_v33 = vld [vmem:[#allocation3 + $0xcc] sm:$0xf0] }
 0x2ac   : > { %v6966_v34 = vor.u32 %v7323_v36, %v6963_v33 }
 0x2ad   : > { %v4008_v8 = vadd.f32 %v4007_v43, %v3519_v45 }
 0x2ae   : > { %v4015_v11 = vpop.f32.mrf.mxu3 }
 0x2af   : > { %v9215_v55 = vadd.f32 %v4096_v21, %v4008_v8 }
 0x2b0   : > { %v3434_v37 = vpop.f32.mrf.mxu1 }
 0x2b1   : > { %9557 = vst [vmem:[#allocation27_spill] sm:$0xff] %v9215_v55  ;;  %4147 = vmatmul.bf16.gmra.mxu1 %v6594_v39  ;;  %v6606_v39 = vor.u32 %v8648_v29, %v8646_v25  ;;  %v3435_v50 = vadd.f32 %v3434_v37, %v9560_v31  ;;  %v6999_v55 = vld [vmem:[#allocation3 + $0x114] sm:$0xf0] }
 0x2b6   : > { %v4104_v41 = vpop.f32.mrf.mxu0  ;;  %v4017_v43 = vpop.f32.mrf.mxu3 }
 0x2b8   : > { %v3521_v42 = vpop.f32.mrf.mxu2 }
 0x2b9   : > { %v3522_v7 = vadd.f32 %v3521_v42, %v3433_v5  ;;  %5765 = vmatmul.bf16.gmra.mxu0 %v6958_v4  ;;  %v6969_v5 = vld [vmem:[#allocation3 + $0xc8] sm:$0xf]  ;;  %v7325_v4 = vld [vmem:[#allocation3 + $0xd0] sm:$0xf0] }
 0x2ba   : > { %5582 = vmatmul.bf16.gmra.mxu2 %v6938_v62  ;;  %v6949_v42 = vld [vmem:[#allocation3 + $0xa8] sm:$0xf]  ;;  %v7321_v62 = vld [vmem:[#allocation3 + $0xb0] sm:$0xf0]  ;;  %v6970_v29 = vor.u32 %v7325_v4, %v6969_v5  ;;  %v6981_v5 = vld [vmem:[#allocation3 + $0xe0] sm:$0xf] }
 0x2bb   : > { %v4011_v21 = vadd.f32 %v4010_v59, %v3522_v7  ;;  %5681 = vmatmul.bf16.gmra.mxu3 %v6966_v34  ;;  %v6950_v25 = vor.u32 %v7321_v62, %v6949_v42  ;;  %v7326_v7 = vld [vmem:[#allocation3 + $0xdc] sm:$0xf]  ;;  %v6975_v34 = vld [vmem:[#allocation3 + $0xe4] sm:$0xf0]  ;;  %v7328_v4 = vld [vmem:[#allocation3 + $0xe8] sm:$0xf0] }
 0x2bc   : > { %v6978_v37 = vor.u32 %v7326_v7, %v6975_v34  ;;  %v6961_v62 = vld [vmem:[#allocation3 + $0xc0] sm:$0xf] }
 0x2bd   : > { %v9220_v45 = vadd.f32 %v4099_v47, %v4011_v21  ;;  %v9562_v21 = vld [vmem:[#allocation38_spill] sm:$0xff] }
 0x2be   : > { %v3437_v8 = vpop.f32.mrf.mxu1  ;;  %v4106_v52 = vpop.f32.mrf.mxu0 }
 0x2bf   : > { %9559 = vst [vmem:[#allocation28_spill] sm:$0xff] %v9220_v45  ;;  %v5642_v51 = vpop.f32.mrf.mxu3 }
 0x2c0   : > { %v3523_v56 = vpop.f32.mrf.mxu2 }
 0x2c1   : > { %v3524_v2 = vadd.f32 %v3523_v56, %v3435_v50  ;;  %4152 = vmatmul.bf16.gmra.mxu1 %v6606_v39  ;;  %v3438_v39 = vadd.f32 %v3437_v8, %v9562_v21 }
 0x2c3   : > { %v4013_v61 = vadd.f32 %v4012_v48, %v3524_v2  ;;  %v6618_v48 = vor.u32 %v8713_v32, %v8711_v60  ;;  %v6982_v60 = vor.u32 %v7328_v4, %v6981_v5 }
 0x2c5   : > { %v9223_v59 = vadd.f32 %v4101_v1, %v4013_v61 }
 0x2c6   : > { %v3439_v36 = vpop.f32.mrf.mxu1  ;;  %v5731_v47 = vpop.f32.mrf.mxu0 }
 0x2c7   : > { %9561 = vst [vmem:[#allocation24_spill] sm:$0xff] %v9223_v59  ;;  %v5644_v33 = vpop.f32.mrf.mxu3 }
 0x2c9   : > { %5770 = vmatmul.bf16.gmra.mxu0 %v6970_v29  ;;  %v7324_v29 = vld [vmem:[#allocation3 + $0xc8] sm:$0xf0] }
 0x2ca   : > { %5587 = vmatmul.bf16.gmra.mxu2 %v6950_v25  ;;  %v9564_v25 = vld [vmem:[#allocation41_spill] sm:$0xff]  ;;  %v6962_v21 = vor.u32 %v7324_v29, %v6961_v62  ;;  %v9568_v62 = vld [vmem:[#allocation43_spill] sm:$0xff] }
 0x2cb   : > { %5686 = vmatmul.bf16.gmra.mxu3 %v6978_v37  ;;  %v3440_v8 = vadd.f32 %v3439_v36, %v9564_v25  ;;  %v9567_v36 = vld [vmem:[#allocation50_spill] sm:$0xff] }
 0x2cc   : > { %v6630_v25 = vor.u32 %v9567_v36, %v8763_v13  ;;  %v9570_v36 = vld [vmem:[#allocation52_spill] sm:$0xff] }
 0x2cd   : > { %v3526_v31 = vpop.f32.mrf.mxu2 }
 0x2ce   : > { %v4118_v50 = vpop.f32.mrf.mxu1  ;;  %v3527_v1 = vadd.f32 %v3526_v31, %v3438_v39  ;;  %v5733_v56 = vpop.f32.mrf.mxu0  ;;  %v7329_v39 = vld [vmem:[#allocation3 + $0xf4] sm:$0xf] }
 0x2cf   : > { %v9228_v61 = vpop.f32.mrf.mxu3 }
 0x2d0   : > { %v4016_v2 = vadd.f32 %v4015_v11, %v3527_v1 }
 0x2d1   : > { %4157 = vmatmul.bf16.gmra.mxu1 %v6618_v48  ;;  %v6987_v48 = vld [vmem:[#allocation3 + $0xfc] sm:$0xf0] }
 0x2d2   : > { %v9230_v42 = vadd.f32 %v4104_v41, %v4016_v2  ;;  %v6990_v1 = vor.u32 %v7329_v39, %v6987_v48  ;;  %v9566_v2 = vld [vmem:[#allocation23_spill] sm:$0xff] }
 0x2d3   : > { %v6973_v39 = vld [vmem:[#allocation3 + $0xd8] sm:$0xf] }
 0x2d4   : > { %9563 = vst [vmem:[#allocation29_spill] sm:$0xff] %v9230_v42  ;;  %v3365_v42 = vadd.f32 %v8685_v12, %v9566_v2  ;;  %v7327_v12 = vld [vmem:[#allocation3 + $0xe0] sm:$0xf0] }
 0x2d5   : > { %v3528_v7 = vpop.f32.mrf.mxu2 }
 0x2d6   : > { %v4120_v34 = vpop.f32.mrf.mxu1  ;;  %v3529_v32 = vadd.f32 %v3528_v7, %v3440_v8  ;;  %v5736_v37 = vpop.f32.mrf.mxu0  ;;  %v3454_v29 = vadd.f32 %v9568_v62, %v3365_v42 }
 0x2d7   : > { %v9233_v11 = vpop.f32.mrf.mxu3 }
 0x2d8   : > { %v4018_v31 = vadd.f32 %v4017_v43, %v3529_v32  ;;  %v6993_v32 = vld [vmem:[#allocation3 + $0xf8] sm:$0xf] }
 0x2d9   : > { %5775 = vmatmul.bf16.gmra.mxu0 %v6982_v60  ;;  %v9569_v60 = vld [vmem:[#allocation45_spill] sm:$0xff] }
 0x2da   : > { %5592 = vmatmul.bf16.gmra.mxu2 %v6962_v21  ;;  %v9235_v41 = vadd.f32 %v4106_v52, %v4018_v31  ;;  %v3943_v52 = vadd.f32 %v9569_v60, %v3454_v29  ;;  %v7331_v21 = vld [vmem:[#allocation3 + $0x100] sm:$0xf0] }
 0x2db   : > { %5691 = vmatmul.bf16.gmra.mxu3 %v6990_v1  ;;  %v6994_v2 = vor.u32 %v7331_v21, %v6993_v32  ;;  %v4119_v1 = vadd.f32 %v4118_v50, %v9570_v36  ;;  %v9572_v32 = vld [vmem:[#allocation30_spill] sm:$0xff] }
 0x2dc   : > { %9565 = vst [vmem:[#allocation35_spill] sm:$0xff] %v9235_v41  ;;  %v9571_v41 = vld [vmem:[#allocation44_spill] sm:$0xff]  ;;  %v9573_v50 = vld [vmem:[#allocation46_spill] sm:$0xff] }
 0x2dd   : > { %v5553_v5 = vpop.f32.mrf.mxu2  ;;  %v4032_v42 = vadd.f32 %v9571_v41, %v3943_v52  ;;  %v3370_v21 = vadd.f32 %v9573_v50, %v9572_v32 }
 0x2de   : > { %v4123_v4 = vpop.f32.mrf.mxu1  ;;  %v9242_v43 = vpop.f32.mrf.mxu0  ;;  %v5643_v8 = vadd.f32 %v5642_v51, %v5553_v5  ;;  %v6974_v51 = vor.u32 %v7327_v12, %v6973_v39  ;;  %v7332_v5 = vld [vmem:[#allocation3 + $0x10c] sm:$0xf]  ;;  %v9574_v12 = vld [vmem:[#allocation47_spill] sm:$0xff] }
 0x2df   : > { %v9244_v7 = vpop.f32.mrf.mxu3  ;;  %v4121_v29 = vadd.f32 %v4120_v34, %v4032_v42 }
 0x2e0   : > { %v5732_v31 = vadd.f32 %v5731_v47, %v5643_v8  ;;  %v7002_v47 = vor.u32 %v7332_v5, %v6999_v55  ;;  %v7334_v5 = vld [vmem:[#allocation3 + $0x118] sm:$0xf0] }
 0x2e1   : > { %4162 = vmatmul.bf16.gmra.mxu1 %v6630_v25 }
 0x2e2   : > { %v5811_v59 = vadd.f32 %v5732_v31, %v4119_v1  ;;  %v3459_v31 = vadd.f32 %v9574_v12, %v3370_v21  ;;  %v4124_v1 = vadd.f32 %v4123_v4, %v8858_v23 }
 0x2e5   : > { %v5555_v48 = vpop.f32.mrf.mxu2 }
 0x2e6   : > { %v4125_v13 = vpop.f32.mrf.mxu1  ;;  %v5645_v62 = vadd.f32 %v5644_v33, %v5555_v48  ;;  %v9249_v25 = vpop.f32.mrf.mxu0  ;;  %v6642_v33 = vor.u32 %v8838_v58, %v8836_v15  ;;  %v9575_v15 = vld [vmem:[#allocation49_spill] sm:$0xff] }
 0x2e7   : > { %v9251_v45 = vpop.f32.mrf.mxu3 }
 0x2e8   : > { %v5734_v60 = vadd.f32 %v5733_v56, %v5645_v62  ;;  %v5944_v56 = vmul.f32 %v5811_v59, %v5811_v59 }
 0x2e9   : > { %5780 = vmatmul.bf16.gmra.mxu0 %v6994_v2 }
 0x2ea   : > { %v5812_v8 = vadd.f32 %v5734_v60, %v4121_v29  ;;  %5597 = vmatmul.bf16.gmra.mxu2 %v6974_v51  ;;  %v7005_v51 = vld [vmem:[#allocation3 + $0x110] sm:$0xf]  ;;  %v7330_v60 = vld [vmem:[#allocation3 + $0xf8] sm:$0xf0] }
 0x2eb   : > { %5696 = vmatmul.bf16.gmra.mxu3 %v7002_v47  ;;  %v6985_v29 = vld [vmem:[#allocation3 + $0xf0] sm:$0xf] }
 0x2ec   : > { %v7438_v34 = vpack.c.bf16 %v5812_v8, %v5811_v59  ;;  %v5907_v41 = vadd.f32 %v5812_v8, %v5811_v59  ;;  %v5945_v52 = vmul.f32 %v5812_v8, %v5812_v8  ;;  %v3948_v59 = vadd.f32 %v9575_v15, %v3459_v31 }
 0x2ed   : > { %v5558_v55 = vpop.f32.mrf.mxu2 }
 0x2ee   : > { %v4128_v39 = vpop.f32.mrf.mxu1  ;;  %7439 = vst [vmem:[%s9260_s11] sm:$0xff] %v7438_v34   ;;  %v5976_v48 = vadd.f32 %v5945_v52, %v5944_v56  ;;  %v5648_v2 = vadd.f32 %v9228_v61, %v5558_v55  ;;  %v9267_v36 = vpop.f32.mrf.mxu0  ;;  %v7006_v61 = vor.u32 %v7334_v5, %v7005_v51  ;;  %v9576_v56 = vld [vmem:[#allocation48_spill] sm:$0xff]  ;;  %v9579_v51 = vld [vmem:[#allocation55_spill] sm:$0xff]  ;;  %v9580_v5 = vld [vmem:[#allocation57_spill] sm:$0xff] }
 0x2ef   : > { %v9270_v58 = vpop.f32.mrf.mxu3  ;;  %v4037_v34 = vadd.f32 %v9576_v56, %v3948_v59 }
 0x2f0   : > { %v5737_v42 = vadd.f32 %v5736_v37, %v5648_v2  ;;  %v6986_v37 = vor.u32 %v7330_v60, %v6985_v29  ;;  %v6654_v29 = vor.u32 %v9580_v5, %v9579_v51 }
 0x2f1   : > { %4167 = vmatmul.bf16.gmra.mxu1 %v6642_v33  ;;  %v7335_v33 = vld [vmem:[#allocation3 + $0x124] sm:$0xf]  ;;  %v4126_v52 = vadd.f32 %v4125_v13, %v4037_v34  ;;  %v9582_v34 = vld [vmem:[#allocation54_spill] sm:$0xff] }
 0x2f2   : > { %v5813_v62 = vadd.f32 %v5737_v42, %v4124_v1  ;;  %v9578_v1 = vld [vmem:[#allocation12_spill] sm:$0xff] }
 0x2f4   : > { %v5908_v47 = vadd.f32 %v5907_v41, %v5813_v62  ;;  %v5946_v8 = vmul.f32 %v5813_v62, %v5813_v62  ;;  %v7011_v41 = vld [vmem:[#allocation3 + $0x12c] sm:$0xf0] }
 0x2f5   : > { %v5560_v32 = vpop.f32.mrf.mxu2  ;;  %v7014_v31 = vor.u32 %v7335_v33, %v7011_v41  ;;  %v7337_v41 = vld [vmem:[#allocation3 + $0x130] sm:$0xf0] }
 0x2f6   : > { %v4130_v50 = vpop.f32.mrf.mxu1  ;;  %v5977_v21 = vadd.f32 %v5976_v48, %v5946_v8  ;;  %v5650_v23 = vadd.f32 %v9233_v11, %v5560_v32  ;;  %v9275_v4 = vpop.f32.mrf.mxu0  ;;  %v9577_v48 = vld [vmem:[#allocation37_spill] sm:$0xff] }
 0x2f7   : > { %v9278_v12 = vpop.f32.mrf.mxu3  ;;  %v3375_v42 = vadd.f32 %v9578_v1, %v9577_v48 }
 0x2f8   : > { %v5739_v55 = vadd.f32 %v9242_v43, %v5650_v23  ;;  %v9581_v43 = vld [vmem:[#allocation4_spill] sm:$0xff]  ;;  %v4129_v23 = vadd.f32 %v4128_v39, %v9582_v34 }
 0x2f9   : > { %5785 = vmatmul.bf16.gmra.mxu0 %v7006_v61  ;;  %v3464_v8 = vadd.f32 %v9581_v43, %v3375_v42 }
 0x2fa   : > { %v5814_v2 = vadd.f32 %v5739_v55, %v4126_v52  ;;  %5602 = vmatmul.bf16.gmra.mxu2 %v6986_v37  ;;  %v9583_v37 = vld [vmem:[#allocation53_spill] sm:$0xff] }
 0x2fb   : > { %5701 = vmatmul.bf16.gmra.mxu3 %v7014_v31  ;;  %v3953_v33 = vadd.f32 %v9583_v37, %v3464_v8  ;;  %v7017_v55 = vld [vmem:[#allocation3 + $0x128] sm:$0xf] }
 0x2fc   : > { %v7443_v15 = vpack.c.bf16 %v5814_v2, %v5813_v62  ;;  %v5909_v11 = vadd.f32 %v5908_v47, %v5814_v2  ;;  %v5947_v59 = vmul.f32 %v5814_v2, %v5814_v2  ;;  %v6997_v31 = vld [vmem:[#allocation3 + $0x108] sm:$0xf]  ;;  %v7333_v2 = vld [vmem:[#allocation3 + $0x110] sm:$0xf0]  ;;  %v7018_v42 = vor.u32 %v7337_v41, %v7017_v55  ;;  %v9587_v55 = vld [vmem:[#allocation60_spill] sm:$0xff] }
 0x2fd   : > { %v5563_v13 = vpop.f32.mrf.mxu2  ;;  %v6998_v51 = vor.u32 %v7333_v2, %v6997_v31  ;;  %v6666_v41 = vor.u32 %v9587_v55, %v8961_v14  ;;  %v7341_v55 = vld [vmem:[#allocation3 + $0x154] sm:$0xf] }
 0x2fe   : > { %v4133_v60 = vpop.f32.mrf.mxu1  ;;  %7530 = vst [vmem:[%s9260_s11 + $0x8] sm:$0xff] %v7443_v15   ;;  %v5978_v32 = vadd.f32 %v5977_v21, %v5947_v59  ;;  %v5653_v61 = vadd.f32 %v9244_v7, %v5563_v13  ;;  %v9287_v56 = vpop.f32.mrf.mxu0  ;;  %v9584_v59 = vld [vmem:[#allocation51_spill] sm:$0xff] }
 0x2ff   : > { %v9291_v47 = vpop.f32.mrf.mxu3  ;;  %v4042_v39 = vadd.f32 %v9584_v59, %v3953_v33  ;;  %v9589_v59 = vld [vmem:[#allocation8_spill] sm:$0xff] }
 0x300   : > { %v5742_v62 = vadd.f32 %v9249_v25, %v5653_v61 }
 0x301   : > { %4172 = vmatmul.bf16.gmra.mxu1 %v6654_v29  ;;  %v7338_v29 = vld [vmem:[#allocation3 + $0x13c] sm:$0xf]  ;;  %v4131_v13 = vadd.f32 %v4130_v50, %v4042_v39  ;;  %v4134_v39 = vadd.f32 %v4133_v60, %v9589_v59  ;;  %v9593_v59 = vld [vmem:[#allocation6_spill] sm:$0xff] }
 0x302   : > { %v5815_v52 = vadd.f32 %v5742_v62, %v4129_v23  ;;  %v9586_v23 = vld [vmem:[#allocation15_spill] sm:$0xff] }
 0x304   : > { %v5910_v48 = vadd.f32 %v5909_v11, %v5815_v52  ;;  %v5948_v21 = vmul.f32 %v5815_v52, %v5815_v52  ;;  %v7023_v11 = vld [vmem:[#allocation3 + $0x144] sm:$0xf0] }
 0x305   : > { %v5565_v1 = vpop.f32.mrf.mxu2  ;;  %v7026_v61 = vor.u32 %v7338_v29, %v7023_v11  ;;  %v7029_v29 = vld [vmem:[#allocation3 + $0x140] sm:$0xf]  ;;  %v7336_v11 = vld [vmem:[#allocation3 + $0x128] sm:$0xf0] }
 0x306   : > { %v4135_v7 = vpop.f32.mrf.mxu1  ;;  %v5979_v15 = vadd.f32 %v5978_v32, %v5948_v21  ;;  %v5655_v25 = vadd.f32 %v9251_v45, %v5565_v1  ;;  %v9296_v5 = vpop.f32.mrf.mxu0  ;;  %v9585_v32 = vld [vmem:[#allocation42_spill] sm:$0xff] }
 0x307   : > { %v9299_v8 = vpop.f32.mrf.mxu3  ;;  %v3380_v62 = vadd.f32 %v9586_v23, %v9585_v32 }
 0x308   : > { %v5744_v43 = vadd.f32 %v9267_v36, %v5655_v25  ;;  %v9588_v36 = vld [vmem:[#allocation5_spill] sm:$0xff]  ;;  %v9590_v25 = vld [vmem:[#allocation56_spill] sm:$0xff] }
 0x309   : > { %5790 = vmatmul.bf16.gmra.mxu0 %v7018_v42  ;;  %v3469_v2 = vadd.f32 %v9588_v36, %v3380_v62  ;;  %v9591_v62 = vld [vmem:[#allocation16_spill] sm:$0xff] }
 0x30a   : > { %v5816_v34 = vadd.f32 %v5744_v43, %v4131_v13  ;;  %5607 = vmatmul.bf16.gmra.mxu2 %v6998_v51  ;;  %v7340_v13 = vld [vmem:[#allocation3 + $0x148] sm:$0xf0]  ;;  %v7009_v43 = vld [vmem:[#allocation3 + $0x120] sm:$0xf] }
 0x30b   : > { %5706 = vmatmul.bf16.gmra.mxu3 %v7026_v61  ;;  %v3958_v14 = vadd.f32 %v9590_v25, %v3469_v2  ;;  %v7030_v32 = vor.u32 %v7340_v13, %v7029_v29 }
 0x30c   : > { %v7448_v37 = vpack.c.bf16 %v5816_v34, %v5815_v52  ;;  %v5911_v45 = vadd.f32 %v5910_v48, %v5816_v34  ;;  %v5949_v33 = vmul.f32 %v5816_v34, %v5816_v34 }
 0x30d   : > { %v5568_v50 = vpop.f32.mrf.mxu2  ;;  %v4047_v60 = vadd.f32 %v9591_v62, %v3958_v14  ;;  %v6678_v14 = vor.u32 %v9029_v6, %v9027_v10  ;;  %v7041_v62 = vld [vmem:[#allocation3 + $0x158] sm:$0xf] }
 0x30e   : > { %v4138_v31 = vpop.f32.mrf.mxu1  ;;  %7531 = vst [vmem:[%s9260_s11 + $0x10] sm:$0xff] %v7448_v37   ;;  %v5980_v21 = vadd.f32 %v5979_v15, %v5949_v33  ;;  %v5658_v1 = vadd.f32 %v9270_v58, %v5568_v50  ;;  %v9308_v42 = vpop.f32.mrf.mxu0  ;;  %v7010_v37 = vor.u32 %v7336_v11, %v7009_v43 }
 0x30f   : > { %v9312_v48 = vpop.f32.mrf.mxu3 }
 0x310   : > { %v5747_v52 = vadd.f32 %v9275_v4, %v5658_v1 }
 0x311   : > { %4177 = vmatmul.bf16.gmra.mxu1 %v6666_v41  ;;  %v4136_v41 = vadd.f32 %v4135_v7, %v4047_v60  ;;  %v7343_v60 = vld [vmem:[#allocation3 + $0x160] sm:$0xf0] }
 0x312   : > { %v5817_v51 = vadd.f32 %v5747_v52, %v4134_v39 }
 0x314   : > { %v5912_v61 = vadd.f32 %v5911_v45, %v5817_v51  ;;  %v5950_v15 = vmul.f32 %v5817_v51, %v5817_v51  ;;  %v7035_v45 = vld [vmem:[#allocation3 + $0x15c] sm:$0xf0] }
 0x315   : > { %v5570_v34 = vpop.f32.mrf.mxu2  ;;  %v7038_v2 = vor.u32 %v7341_v55, %v7035_v45 }
 0x316   : > { %v4140_v58 = vpop.f32.mrf.mxu1  ;;  %v5981_v23 = vadd.f32 %v5980_v21, %v5950_v15  ;;  %v5660_v4 = vadd.f32 %v9278_v12, %v5570_v34  ;;  %v9317_v33 = vpop.f32.mrf.mxu0  ;;  %v9592_v21 = vld [vmem:[#allocation19_spill] sm:$0xff]  ;;  %v4139_v34 = vadd.f32 %v4138_v31, %v8984_v26 }
 0x317   : > { %v9320_v36 = vpop.f32.mrf.mxu3  ;;  %v3385_v39 = vadd.f32 %v9593_v59, %v9592_v21  ;;  %v7344_v21 = vld [vmem:[#allocation3 + $0x16c] sm:$0xf] }
 0x318   : > { %v5749_v50 = vadd.f32 %v9287_v56, %v5660_v4  ;;  %v9594_v56 = vld [vmem:[#allocation58_spill] sm:$0xff]  ;;  %v7021_v4 = vld [vmem:[#allocation3 + $0x138] sm:$0xf] }
 0x319   : > { %5795 = vmatmul.bf16.gmra.mxu0 %v7030_v32  ;;  %v3474_v13 = vadd.f32 %v9594_v56, %v3385_v39  ;;  %v9595_v32 = vld [vmem:[#allocation59_spill] sm:$0xff]  ;;  %v9598_v56 = vld [vmem:[#allocation9_spill] sm:$0xff] }
 0x31a   : > { %v5818_v1 = vadd.f32 %v5749_v50, %v4136_v41  ;;  %5612 = vmatmul.bf16.gmra.mxu2 %v7010_v37  ;;  %v7339_v37 = vld [vmem:[#allocation3 + $0x140] sm:$0xf0]  ;;  %v7042_v50 = vor.u32 %v7343_v60, %v7041_v62 }
 0x31b   : > { %5711 = vmatmul.bf16.gmra.mxu3 %v7038_v2  ;;  %v3963_v10 = vadd.f32 %v9595_v32, %v3474_v13  ;;  %v9596_v2 = vld [vmem:[#allocation7_spill] sm:$0xff]  ;;  %v7022_v31 = vor.u32 %v7339_v37, %v7021_v4  ;;  %v9600_v4 = vld [vmem:[#allocation13_spill] sm:$0xff] }
 0x31c   : > { %v7453_v52 = vpack.c.bf16 %v5818_v1, %v5817_v51  ;;  %v5913_v12 = vadd.f32 %v5912_v61, %v5818_v1  ;;  %v5951_v25 = vmul.f32 %v5818_v1, %v5818_v1 }
 0x31d   : > { %v5573_v7 = vpop.f32.mrf.mxu2  ;;  %v4052_v26 = vadd.f32 %v9596_v2, %v3963_v10  ;;  %v7033_v2 = vld [vmem:[#allocation3 + $0x150] sm:$0xf] }
 0x31e   : > { %v4143_v29 = vpop.f32.mrf.mxu1  ;;  %7532 = vst [vmem:[%s9260_s11 + $0x18] sm:$0xff] %v7453_v52   ;;  %v5982_v43 = vadd.f32 %v5981_v23, %v5951_v25  ;;  %v5663_v11 = vadd.f32 %v9291_v47, %v5573_v7  ;;  %v9329_v15 = vpop.f32.mrf.mxu0  ;;  %v7047_v25 = vld [vmem:[#allocation3 + $0x174] sm:$0xf0]  ;;  %v9597_v7 = vld [vmem:[#allocation25_spill] sm:$0xff] }
 0x31f   : > { %v9333_v61 = vpop.f32.mrf.mxu3  ;;  %v4141_v59 = vadd.f32 %v4140_v58, %v4052_v26  ;;  %v3390_v13 = vadd.f32 %v9598_v56, %v9597_v7  ;;  %v4144_v37 = vadd.f32 %v4143_v29, %v9600_v4  ;;  %v7342_v26 = vld [vmem:[#allocation3 + $0x158] sm:$0xf0] }
 0x320   : > { %v5752_v51 = vadd.f32 %v9296_v5, %v5663_v11 }
 0x321   : > { %4182 = vmatmul.bf16.gmra.mxu1 %v6678_v14 }
 0x322   : > { %v5819_v6 = vadd.f32 %v5752_v51, %v4139_v34  ;;  %v6690_v34 = vor.u32 %v9099_v18, %v9097_v0  ;;  %v7053_v0 = vld [vmem:[#allocation3 + $0x170] sm:$0xf] }
 0x324   : > { %v5914_v55 = vadd.f32 %v5913_v12, %v5819_v6  ;;  %v5952_v23 = vmul.f32 %v5819_v6, %v5819_v6  ;;  %v7050_v12 = vor.u32 %v7344_v21, %v7047_v25  ;;  %v7034_v25 = vor.u32 %v7342_v26, %v7033_v2  ;;  %v7045_v26 = vld [vmem:[#allocation3 + $0x168] sm:$0xf] }
 0x325   : > { %v5575_v41 = vpop.f32.mrf.mxu2 }
 0x326   : > { %v4145_v47 = vpop.f32.mrf.mxu1  ;;  %v5983_v45 = vadd.f32 %v5982_v43, %v5952_v23  ;;  %v5665_v5 = vadd.f32 %v9299_v8, %v5575_v41  ;;  %v5761_v1 = vpop.f32.mrf.mxu0 }
 0x327   : > { %v9339_v52 = vpop.f32.mrf.mxu3 }
 0x328   : > { %v5754_v39 = vadd.f32 %v9308_v42, %v5665_v5  ;;  %v9599_v42 = vld [vmem:[#allocation11_spill] sm:$0xff] }
 0x329   : > { %5800 = vmatmul.bf16.gmra.mxu0 %v7042_v50  ;;  %v3479_v32 = vadd.f32 %v9599_v42, %v3390_v13  ;;  %v7346_v50 = vld [vmem:[#allocation3 + $0x178] sm:$0xf0] }
 0x32a   : > { %v5820_v14 = vadd.f32 %v5754_v39, %v4141_v59  ;;  %5617 = vmatmul.bf16.gmra.mxu2 %v7022_v31  ;;  %v9602_v39 = vld [vmem:[#allocation10_spill] sm:$0xff] }
 0x32b   : > { %5716 = vmatmul.bf16.gmra.mxu3 %v7050_v12 }
 0x32c   : > { %v7458_v43 = vpack.c.bf16 %v5820_v14, %v5819_v6  ;;  %v5915_v11 = vadd.f32 %v5914_v55, %v5820_v14  ;;  %v5953_v8 = vmul.f32 %v5820_v14, %v5820_v14  ;;  %v9601_v55 = vld [vmem:[#allocation61_spill] sm:$0xff] }
 0x32d   : > { %v5578_v58 = vpop.f32.mrf.mxu2  ;;  %v3968_v41 = vadd.f32 %v9601_v55, %v3479_v32  ;;  %v6702_v32 = vor.u32 %v9146_v24, %v9144_v53 }
 0x32e   : > { %v4148_v51 = vpop.f32.mrf.mxu1  ;;  %7533 = vst [vmem:[%s9260_s11 + $0x20] sm:$0xff] %v7458_v43   ;;  %v5984_v10 = vadd.f32 %v5983_v45, %v5953_v8  ;;  %v5668_v62 = vadd.f32 %v9312_v48, %v5578_v58  ;;  %v5763_v60 = vpop.f32.mrf.mxu0  ;;  %v7054_v48 = vor.u32 %v7346_v50, %v7053_v0  ;;  %v9603_v43 = vld [vmem:[#allocation32_spill] sm:$0xff] }
 0x32f   : > { %v9350_v6 = vpop.f32.mrf.mxu3  ;;  %v4057_v29 = vadd.f32 %v9602_v39, %v3968_v41  ;;  %v9608_v39 = vld [vmem:[#allocation62_spill] sm:$0xff] }
 0x330   : > { %v5757_v23 = vadd.f32 %v9317_v33, %v5668_v62  ;;  %v9605_v62 = vld [vmem:[#allocation63_spill] sm:$0xff] }
 0x331   : > { %4187 = vmatmul.bf16.gmra.mxu1 %v6690_v34  ;;  %v4146_v14 = vadd.f32 %v4145_v47, %v4057_v29 }
 0x332   : > { %v5821_v18 = vadd.f32 %v5757_v23, %v4144_v37  ;;  %v9606_v23 = vld [vmem:[#allocation65_spill] sm:$0xff] }
 0x333   : > { %v4149_v55 = vadd.f32 %v4148_v51, %v9606_v23 }
 0x334   : > { %v5916_v5 = vadd.f32 %v5915_v11, %v5821_v18  ;;  %v5954_v31 = vmul.f32 %v5821_v18, %v5821_v18  ;;  %v9604_v11 = vld [vmem:[#allocation14_spill] sm:$0xff] }
 0x335   : > { %v5580_v45 = vpop.f32.mrf.mxu2  ;;  %v3395_v8 = vadd.f32 %v9604_v11, %v9603_v43 }
 0x336   : > { %v4150_v21 = vpop.f32.mrf.mxu1  ;;  %v5985_v59 = vadd.f32 %v5984_v10, %v5954_v31  ;;  %v5670_v33 = vadd.f32 %v9320_v36, %v5580_v45  ;;  %v5766_v12 = vpop.f32.mrf.mxu0 }
 0x337   : > { %v5679_v56 = vpop.f32.mrf.mxu3  ;;  %v3484_v4 = vadd.f32 %v9605_v62, %v3395_v8 }
 0x338   : > { %v5759_v7 = vadd.f32 %v9329_v15, %v5670_v33 }
 0x339   : > { %5805 = vmatmul.bf16.gmra.mxu0 %v7054_v48 }
 0x33a   : > { %v5822_v13 = vadd.f32 %v5759_v7, %v4146_v14  ;;  %5622 = vmatmul.bf16.gmra.mxu2 %v7034_v25  ;;  %v9609_v7 = vld [vmem:[#allocation39_spill] sm:$0xff] }
 0x33c   : > { %v7463_v34 = vpack.c.bf16 %v5822_v13, %v5821_v18  ;;  %v5917_v58 = vadd.f32 %v5916_v5, %v5822_v13  ;;  %v5955_v42 = vmul.f32 %v5822_v13, %v5822_v13  ;;  %v9607_v18 = vld [vmem:[#allocation64_spill] sm:$0xff]  ;;  %v7345_v5 = vld [vmem:[#allocation3 + $0x170] sm:$0xf0]  ;;  %v9610_v13 = vld [vmem:[#allocation17_spill] sm:$0xff] }
 0x33d   : > { %v5583_v36 = vpop.f32.mrf.mxu2  ;;  %v3973_v50 = vadd.f32 %v9607_v18, %v3484_v4  ;;  %v7046_v29 = vor.u32 %v7345_v5, %v7045_v26  ;;  %v3400_v43 = vadd.f32 %v9610_v13, %v9609_v7 }
 0x33e   : > { %v4153_v10 = vpop.f32.mrf.mxu1  ;;  %7534 = vst [vmem:[%s9260_s11 + $0x28] sm:$0xff] %v7463_v34   ;;  %v5986_v47 = vadd.f32 %v5985_v59, %v5955_v42  ;;  %v5673_v15 = vadd.f32 %v9333_v61, %v5583_v36  ;;  %v5768_v37 = vpop.f32.mrf.mxu0 }
 0x33f   : > { %v5682_v0 = vpop.f32.mrf.mxu3  ;;  %v4062_v59 = vadd.f32 %v9608_v39, %v3973_v50 }
 0x340   : > { %v5762_v41 = vadd.f32 %v5761_v1, %v5673_v15 }
 0x341   : > { %4192 = vmatmul.bf16.gmra.mxu1 %v6702_v32  ;;  %v4151_v1 = vadd.f32 %v4150_v21, %v4062_v59  ;;  %v3489_v32 = vadd.f32 %v9118_v63, %v3400_v43 }
 0x342   : > { %v5823_v2 = vadd.f32 %v5762_v41, %v4149_v55 }
 0x344   : > { %v5918_v53 = vadd.f32 %v5917_v58, %v5823_v2  ;;  %v5956_v24 = vmul.f32 %v5823_v2, %v5823_v2 }
 0x345   : > { %v5585_v31 = vpop.f32.mrf.mxu2 }
 0x346   : > { %v4155_v45 = vpop.f32.mrf.mxu1  ;;  %v5987_v48 = vadd.f32 %v5986_v47, %v5956_v24  ;;  %v5675_v61 = vadd.f32 %v9339_v52, %v5585_v31  ;;  %v5771_v51 = vpop.f32.mrf.mxu0  ;;  %v3978_v47 = vadd.f32 %v9120_v44, %v3489_v32 }
 0x347   : > { %v5684_v25 = vpop.f32.mrf.mxu3 }
 0x348   : > { %v5764_v33 = vadd.f32 %v5763_v60, %v5675_v61  ;;  %v4154_v60 = vadd.f32 %v4153_v10, %v9127_v3  ;;  %v9612_v3 = vld [vmem:[#allocation21_spill] sm:$0xff] }
 0x34a   : > { %v5824_v14 = vadd.f32 %v5764_v33, %v4151_v1  ;;  %5627 = vmatmul.bf16.gmra.mxu2 %v7046_v29 }
 0x34c   : > { %v7468_v11 = vpack.c.bf16 %v5824_v14, %v5823_v2  ;;  %v5919_v8 = vadd.f32 %v5918_v53, %v5824_v14  ;;  %v5957_v34 = vmul.f32 %v5824_v14, %v5824_v14  ;;  %v9611_v2 = vld [vmem:[#allocation18_spill] sm:$0xff] }
 0x34d   : > { %v5588_v58 = vpop.f32.mrf.mxu2  ;;  %v4067_v63 = vadd.f32 %v9611_v2, %v3978_v47 }
 0x34e   : > { %v4158_v42 = vpop.f32.mrf.mxu1  ;;  %7535 = vst [vmem:[%s9260_s11 + $0x30] sm:$0xff] %v7468_v11   ;;  %v5988_v36 = vadd.f32 %v5987_v48, %v5957_v34  ;;  %v5678_v52 = vadd.f32 %v9350_v6, %v5588_v58  ;;  %v5773_v62 = vpop.f32.mrf.mxu0 }
 0x34f   : > { %v5687_v4 = vpop.f32.mrf.mxu3  ;;  %v4156_v53 = vadd.f32 %v4155_v45, %v4067_v63 }
 0x350   : > { %v5767_v21 = vadd.f32 %v5766_v12, %v5678_v52  ;;  %v3405_v12 = vadd.f32 %v9136_v20, %v9612_v3  ;;  %v9613_v52 = vld [vmem:[#allocation26_spill] sm:$0xff] }
 0x352   : > { %v5825_v15 = vadd.f32 %v5767_v21, %v4154_v60  ;;  %v3494_v61 = vadd.f32 %v9148_v22, %v3405_v12  ;;  %v9614_v12 = vld [vmem:[#allocation33_spill] sm:$0xff] }
 0x354   : > { %v5920_v23 = vadd.f32 %v5919_v8, %v5825_v15  ;;  %v5958_v55 = vmul.f32 %v5825_v15, %v5825_v15 }
 0x355   : > { %v5590_v41 = vpop.f32.mrf.mxu2 }
 0x356   : > { %v4160_v18 = vpop.f32.mrf.mxu1  ;;  %v5989_v50 = vadd.f32 %v5988_v36, %v5958_v55  ;;  %v5680_v26 = vadd.f32 %v5679_v56, %v5590_v41  ;;  %v5776_v5 = vpop.f32.mrf.mxu0  ;;  %v4159_v56 = vadd.f32 %v4158_v42, %v9152_v49  ;;  %v3410_v49 = vadd.f32 %v9163_v28, %v9613_v52  ;;  %v9617_v52 = vld [vmem:[#allocation70_spill] sm:$0xff] }
 0x357   : > { %v5689_v31 = vpop.f32.mrf.mxu3 }
 0x358   : > { %v5769_v6 = vadd.f32 %v5768_v37, %v5680_v26  ;;  %v3983_v37 = vadd.f32 %v9150_v17, %v3494_v61  ;;  %v3499_v47 = vadd.f32 %v9169_v35, %v3410_v49 }
 0x35a   : > { %v5826_v24 = vadd.f32 %v5769_v6, %v4156_v53  ;;  %v4072_v34 = vadd.f32 %v9138_v30, %v3983_v37 }
 0x35c   : > { %v7473_v10 = vpack.c.bf16 %v5826_v24, %v5825_v15  ;;  %v5921_v44 = vadd.f32 %v5920_v23, %v5826_v24  ;;  %v5959_v48 = vmul.f32 %v5826_v24, %v5826_v24  ;;  %v4161_v58 = vadd.f32 %v4160_v18, %v4072_v34  ;;  %v9615_v34 = vld [vmem:[#allocation40_spill] sm:$0xff] }
 0x35d   : > { %v5593_v39 = vpop.f32.mrf.mxu2 }
 0x35e   : > { %v4163_v59 = vpop.f32.mrf.mxu1  ;;  %7536 = vst [vmem:[%s9260_s11 + $0x38] sm:$0xff] %v7473_v10   ;;  %v5990_v29 = vadd.f32 %v5989_v50, %v5959_v48  ;;  %v5683_v1 = vadd.f32 %v5682_v0, %v5593_v39  ;;  %v5778_v33 = vpop.f32.mrf.mxu0 }
 0x35f   : > { %v5692_v20 = vpop.f32.mrf.mxu3  ;;  %v4164_v30 = vadd.f32 %v4163_v59, %v9167_v19  ;;  %v3415_v19 = vadd.f32 %v9180_v16, %v9614_v12 }
 0x360   : > { %v5772_v45 = vadd.f32 %v5771_v51, %v5683_v1 }
 0x361   : > { %v3504_v59 = vadd.f32 %v9182_v27, %v3415_v19 }
 0x362   : > { %v5827_v14 = vadd.f32 %v5772_v45, %v4159_v56 }
 0x363   : > { %v3993_v1 = vadd.f32 %v9176_v46, %v3504_v59 }
 0x364   : > { %v5922_v7 = vadd.f32 %v5921_v44, %v5827_v14  ;;  %v5960_v13 = vmul.f32 %v5827_v14, %v5827_v14 }
 0x365   : > { %v5595_v43 = vpop.f32.mrf.mxu2 }
 0x366   : > { %v4165_v11 = vpop.f32.mrf.mxu1  ;;  %v5991_v8 = vadd.f32 %v5990_v29, %v5960_v13  ;;  %v5685_v22 = vadd.f32 %v5684_v25, %v5595_v43  ;;  %v5781_v0 = vpop.f32.mrf.mxu0  ;;  %v4082_v13 = vadd.f32 %v9174_v38, %v3993_v1  ;;  %v9618_v38 = vld [vmem:[#allocation69_spill] sm:$0xff] }
 0x367   : > { %v5694_v55 = vpop.f32.mrf.mxu3 }
 0x368   : > { %v5774_v32 = vadd.f32 %v5773_v62, %v5685_v22  ;;  %v3988_v62 = vadd.f32 %v9165_v57, %v3499_v47 }
 0x36a   : > { %v5828_v36 = vadd.f32 %v5774_v32, %v4161_v58  ;;  %v4077_v53 = vadd.f32 %v9159_v40, %v3988_v62 }
 0x36c   : > { %v7478_v51 = vpack.c.bf16 %v5828_v36, %v5827_v14  ;;  %v5923_v17 = vadd.f32 %v5922_v7, %v5828_v36  ;;  %v5961_v42 = vmul.f32 %v5828_v36, %v5828_v36  ;;  %v4166_v6 = vadd.f32 %v4165_v11, %v4077_v53 }
 0x36d   : > { %v5598_v60 = vpop.f32.mrf.mxu2 }
 0x36e   : > { %v4168_v21 = vpop.f32.mrf.mxu1  ;;  %7537 = vst [vmem:[%s9260_s11 + $0x40] sm:$0xff] %v7478_v51   ;;  %v5992_v15 = vadd.f32 %v5991_v8, %v5961_v42  ;;  %v5688_v23 = vadd.f32 %v5687_v4, %v5598_v60  ;;  %v5783_v18 = vpop.f32.mrf.mxu0 }
 0x36f   : > { %v5697_v4 = vpop.f32.mrf.mxu3  ;;  %v4169_v40 = vadd.f32 %v4168_v21, %v9178_v9  ;;  %v9616_v9 = vld [vmem:[#allocation68_spill] sm:$0xff] }
 0x370   : > { %v5777_v25 = vadd.f32 %v5776_v5, %v5688_v23  ;;  %v3420_v22 = vadd.f32 %v9616_v9, %v9615_v34 }
 0x372   : > { %v5829_v41 = vadd.f32 %v5777_v25, %v4164_v30  ;;  %v3509_v49 = vadd.f32 %v9617_v52, %v3420_v22 }
 0x374   : > { %v5924_v50 = vadd.f32 %v5923_v17, %v5829_v41  ;;  %v5962_v28 = vmul.f32 %v5829_v41, %v5829_v41 }
 0x375   : > { %v5600_v2 = vpop.f32.mrf.mxu2 }
 0x376   : > { %v4170_v63 = vpop.f32.mrf.mxu1  ;;  %v5993_v26 = vadd.f32 %v5992_v15, %v5962_v28  ;;  %v5690_v35 = vadd.f32 %v5689_v31, %v5600_v2  ;;  %v5786_v44 = vpop.f32.mrf.mxu0  ;;  %v9619_v15 = vld [vmem:[#allocation67_spill] sm:$0xff] }
 0x377   : > { %v5699_v56 = vpop.f32.mrf.mxu3  ;;  %v4171_v11 = vadd.f32 %v4170_v63, %v4082_v13  ;;  %v3998_v23 = vadd.f32 %v9619_v15, %v3509_v49 }
 0x378   : > { %v5779_v24 = vadd.f32 %v5778_v33, %v5690_v35 }
 0x37a   : > { %v5830_v3 = vadd.f32 %v5779_v24, %v4166_v6 }
 0x37c   : > { %v7483_v5 = vpack.c.bf16 %v5830_v3, %v5829_v41  ;;  %v5925_v57 = vadd.f32 %v5924_v50, %v5830_v3  ;;  %v5963_v10 = vmul.f32 %v5830_v3, %v5830_v3 }
 0x37d   : > { %v5603_v48 = vpop.f32.mrf.mxu2 }
 0x37e   : > { %v4173_v39 = vpop.f32.mrf.mxu1  ;;  %7538 = vst [vmem:[%s9260_s11 + $0x48] sm:$0xff] %v7483_v5   ;;  %v5994_v61 = vadd.f32 %v5993_v26, %v5963_v10  ;;  %v5693_v29 = vadd.f32 %v5692_v20, %v5603_v48  ;;  %v5788_v27 = vpop.f32.mrf.mxu0 }
 0x37f   : > { %v5702_v36 = vpop.f32.mrf.mxu3  ;;  %v4174_v60 = vadd.f32 %v4173_v39, %v9618_v38 }
 0x380   : > { %v5782_v31 = vadd.f32 %v5781_v0, %v5693_v29 }
 0x382   : > { %v5831_v33 = vadd.f32 %v5782_v31, %v4169_v40 }
 0x384   : > { %v5926_v45 = vadd.f32 %v5925_v57, %v5831_v33  ;;  %v5964_v16 = vmul.f32 %v5831_v33, %v5831_v33  ;;  %v9621_v57 = vld [vmem:[#allocation20_spill] sm:$0xff] }
 0x385   : > { %v5605_v37 = vpop.f32.mrf.mxu2 }
 0x386   : > { %v4175_v14 = vpop.f32.mrf.mxu1  ;;  %v5995_v7 = vadd.f32 %v5994_v61, %v5964_v16  ;;  %v5695_v43 = vadd.f32 %v5694_v55, %v5605_v37  ;;  %v5791_v47 = vpop.f32.mrf.mxu0 }
 0x387   : > { %v5704_v2 = vpop.f32.mrf.mxu3 }
 0x388   : > { %v5784_v8 = vadd.f32 %v5783_v18, %v5695_v43  ;;  %v9620_v18 = vld [vmem:[#allocation66_spill] sm:$0xff] }
 0x389   : > { %v4087_v50 = vadd.f32 %v9620_v18, %v3998_v23 }
 0x38a   : > { %v5832_v20 = vadd.f32 %v5784_v8, %v4171_v11 }
 0x38b   : > { %v4176_v63 = vadd.f32 %v4175_v14, %v4087_v50 }
 0x38c   : > { %v7488_v58 = vpack.c.bf16 %v5832_v20, %v5831_v33  ;;  %v5927_v46 = vadd.f32 %v5926_v45, %v5832_v20  ;;  %v5965_v32 = vmul.f32 %v5832_v20, %v5832_v20 }
 0x38d   : > { %v5608_v0 = vpop.f32.mrf.mxu2 }
 0x38e   : > { %7539 = vst [vmem:[%s9260_s11 + $0x50] sm:$0xff] %v7488_v58   ;;  %v5996_v51 = vadd.f32 %v5995_v7, %v5965_v32  ;;  %v5698_v17 = vadd.f32 %v5697_v4, %v5608_v0  ;;  %v4178_v42 = vpop.f32.mrf.mxu1  ;;  %v5793_v6 = vpop.f32.mrf.mxu0 }
 0x38f   : > { %v4179_v10 = vadd.f32 %v4178_v42, %v9621_v57  ;;  %v5707_v48 = vpop.f32.mrf.mxu3 }
 0x390   : > { %v5787_v21 = vadd.f32 %v5786_v44, %v5698_v17  ;;  %v9623_v17 = vld [vmem:[#allocation27_spill] sm:$0xff] }
 0x392   : > { %v5833_v55 = vadd.f32 %v5787_v21, %v4174_v60 }
 0x394   : > { %v5928_v30 = vadd.f32 %v5927_v46, %v5833_v55  ;;  %v5966_v25 = vmul.f32 %v5833_v55, %v5833_v55 }
 0x395   : > { %v5610_v62 = vpop.f32.mrf.mxu2 }
 0x396   : > { %v5997_v41 = vadd.f32 %v5996_v51, %v5966_v25  ;;  %v5700_v28 = vadd.f32 %v5699_v56, %v5610_v62  ;;  %v4180_v53 = vpop.f32.mrf.mxu1  ;;  %v5796_v31 = vpop.f32.mrf.mxu0  ;;  %v9622_v56 = vld [vmem:[#allocation22_spill] sm:$0xff]  ;;  %v9624_v62 = vld [vmem:[#allocation28_spill] sm:$0xff] }
 0x397   : > { %v4181_v45 = vadd.f32 %v4180_v53, %v9622_v56  ;;  %v5709_v14 = vpop.f32.mrf.mxu3 }
 0x398   : > { %v5789_v26 = vadd.f32 %v5788_v27, %v5700_v28 }
 0x39a   : > { %v5834_v35 = vadd.f32 %v5789_v26, %v4176_v63 }
 0x39c   : > { %v7493_v24 = vpack.c.bf16 %v5834_v35, %v5833_v55  ;;  %v5929_v4 = vadd.f32 %v5928_v30, %v5834_v35  ;;  %v5967_v3 = vmul.f32 %v5834_v35, %v5834_v35 }
 0x39d   : > { %v5613_v12 = vpop.f32.mrf.mxu2 }
 0x39e   : > { %7540 = vst [vmem:[%s9260_s11 + $0x58] sm:$0xff] %v7493_v24   ;;  %v5998_v19 = vadd.f32 %v5997_v41, %v5967_v3  ;;  %v5703_v5 = vadd.f32 %v5702_v36, %v5613_v12  ;;  %v4183_v59 = vpop.f32.mrf.mxu1  ;;  %v5798_v34 = vpop.f32.mrf.mxu0  ;;  %v9625_v24 = vld [vmem:[#allocation24_spill] sm:$0xff] }
 0x39f   : > { %v4184_v9 = vadd.f32 %v4183_v59, %v9210_v54  ;;  %v5712_v36 = vpop.f32.mrf.mxu3 }
 0x3a0   : > { %v5792_v44 = vadd.f32 %v5791_v47, %v5703_v5 }
 0x3a2   : > { %v5835_v39 = vadd.f32 %v5792_v44, %v4179_v10 }
 0x3a4   : > { %v5930_v61 = vadd.f32 %v5929_v4, %v5835_v39  ;;  %v5968_v29 = vmul.f32 %v5835_v39, %v5835_v39 }
 0x3a5   : > { %v5615_v40 = vpop.f32.mrf.mxu2 }
 0x3a6   : > { %v5999_v1 = vadd.f32 %v5998_v19, %v5968_v29  ;;  %v5705_v33 = vadd.f32 %v5704_v2, %v5615_v40  ;;  %v4185_v11 = vpop.f32.mrf.mxu1  ;;  %v5801_v60 = vpop.f32.mrf.mxu0  ;;  %v9626_v29 = vld [vmem:[#allocation29_spill] sm:$0xff] }
 0x3a7   : > { %v4186_v42 = vadd.f32 %v4185_v11, %v9623_v17  ;;  %v5714_v25 = vpop.f32.mrf.mxu3 }
 0x3a8   : > { %v5794_v16 = vadd.f32 %v5793_v6, %v5705_v33 }
 0x3aa   : > { %v5836_v37 = vadd.f32 %v5794_v16, %v4181_v45 }
 0x3ac   : > { %v7498_v7 = vpack.c.bf16 %v5836_v37, %v5835_v39  ;;  %v5931_v13 = vadd.f32 %v5930_v61, %v5836_v37  ;;  %v5969_v43 = vmul.f32 %v5836_v37, %v5836_v37 }
 0x3ad   : > { %v5618_v27 = vpop.f32.mrf.mxu2 }
 0x3ae   : > { %7541 = vst [vmem:[%s9260_s11 + $0x60] sm:$0xff] %v7498_v7   ;;  %v6000_v8 = vadd.f32 %v5999_v1, %v5969_v43  ;;  %v5708_v20 = vadd.f32 %v5707_v48, %v5618_v27  ;;  %v4188_v51 = vpop.f32.mrf.mxu1  ;;  %v5803_v2 = vpop.f32.mrf.mxu0  ;;  %v9627_v43 = vld [vmem:[#allocation35_spill] sm:$0xff] }
 0x3af   : > { %v4189_v41 = vadd.f32 %v4188_v51, %v9624_v62  ;;  %v5717_v12 = vpop.f32.mrf.mxu3 }
 0x3b0   : > { %v5797_v22 = vadd.f32 %v5796_v31, %v5708_v20 }
 0x3b2   : > { %v5837_v58 = vadd.f32 %v5797_v22, %v4184_v9 }
 0x3b4   : > { %v5932_v46 = vadd.f32 %v5931_v13, %v5837_v58  ;;  %v5970_v32 = vmul.f32 %v5837_v58, %v5837_v58 }
 0x3b5   : > { %v5620_v0 = vpop.f32.mrf.mxu2 }
 0x3b6   : > { %v6001_v52 = vadd.f32 %v6000_v8, %v5970_v32  ;;  %v5710_v49 = vadd.f32 %v5709_v14, %v5620_v0  ;;  %v4190_v50 = vpop.f32.mrf.mxu1  ;;  %v5806_v48 = vpop.f32.mrf.mxu0 }
 0x3b7   : > { %v4191_v4 = vadd.f32 %v4190_v50, %v9625_v24  ;;  %v5719_v33 = vpop.f32.mrf.mxu3 }
 0x3b8   : > { %v5799_v38 = vadd.f32 %v5798_v34, %v5710_v49 }
 0x3ba   : > { %v5838_v21 = vadd.f32 %v5799_v38, %v4186_v42 }
 0x3bc   : > { %v7503_v47 = vpack.c.bf16 %v5838_v21, %v5837_v58  ;;  %v5933_v15 = vadd.f32 %v5932_v46, %v5838_v21  ;;  %v5971_v23 = vmul.f32 %v5838_v21, %v5838_v21 }
 0x3bd   : > { %v5623_v55 = vpop.f32.mrf.mxu2 }
 0x3be   : > { %7542 = vst [vmem:[%s9260_s11 + $0x68] sm:$0xff] %v7503_v47   ;;  %v6002_v54 = vadd.f32 %v6001_v52, %v5971_v23  ;;  %v5713_v30 = vadd.f32 %v5712_v36, %v5623_v55  ;;  %v4193_v5 = vpop.f32.mrf.mxu1  ;;  %v5808_v13 = vpop.f32.mrf.mxu0 }
 0x3bf   : > { %v4194_v40 = vadd.f32 %v4193_v5, %v9626_v29 }
 0x3c0   : > { %v5802_v18 = vadd.f32 %v5801_v60, %v5713_v30 }
 0x3c2   : > { %v5839_v28 = vadd.f32 %v5802_v18, %v4189_v41 }
 0x3c4   : > { %v5934_v63 = vadd.f32 %v5933_v15, %v5839_v28  ;;  %v5972_v26 = vmul.f32 %v5839_v28, %v5839_v28 }
 0x3c5   : > { %v5625_v53 = vpop.f32.mrf.mxu2 }
 0x3c6   : > { %v6003_v35 = vadd.f32 %v6002_v54, %v5972_v26  ;;  %v5715_v6 = vadd.f32 %v5714_v25, %v5625_v53  ;;  %v4195_v16 = vpop.f32.mrf.mxu1 }
 0x3c7   : > { %v4196_v27 = vadd.f32 %v4195_v16, %v9627_v43 }
 0x3c8   : > { %v5804_v3 = vadd.f32 %v5803_v2, %v5715_v6 }
 0x3ca   : > { %v5840_v19 = vadd.f32 %v5804_v3, %v4191_v4 }
 0x3cc   : > { %v7508_v57 = vpack.c.bf16 %v5840_v19, %v5839_v28  ;;  %v5935_v10 = vadd.f32 %v5934_v63, %v5840_v19  ;;  %v5973_v44 = vmul.f32 %v5840_v19, %v5840_v19 }
 0x3cd   : > { %v5628_v39 = vpop.f32.mrf.mxu2 }
 0x3ce   : > { %7543 = vst [vmem:[%s9260_s11 + $0x70] sm:$0xff] %v7508_v57   ;;  %v6004_v59 = vadd.f32 %v6003_v35, %v5973_v44  ;;  %v5718_v61 = vadd.f32 %v5717_v12, %v5628_v39 }
 0x3d0   : > { %v5807_v31 = vadd.f32 %v5806_v48, %v5718_v61 }
 0x3d2   : > { %v5841_v1 = vadd.f32 %v5807_v31, %v4194_v40 }
 0x3d4   : > { %v5936_v56 = vadd.f32 %v5935_v10, %v5841_v1  ;;  %v5974_v45 = vmul.f32 %v5841_v1, %v5841_v1 }
 0x3d5   : > { %v5630_v37 = vpop.f32.mrf.mxu2 }
 0x3d6   : > { %v6005_v14 = vadd.f32 %v6004_v59, %v5974_v45  ;;  %v5720_v7 = vadd.f32 %v5719_v33, %v5630_v37 }
 0x3d8   : > { %v5809_v11 = vadd.f32 %v5808_v13, %v5720_v7 }
 0x3da   : > { %v5842_v8 = vadd.f32 %v5809_v11, %v4196_v27 }
 0x3dc   : > { %v7513_v20 = vpack.c.bf16 %v5842_v8, %v5841_v1  ;;  %v5937_v34 = vadd.f32 %v5936_v56, %v5842_v8  ;;  %v5975_v9 = vmul.f32 %v5842_v8, %v5842_v8 }
 0x3de   : > { %7544 = vst [vmem:[%s9260_s11 + $0x78] sm:$0xff] %v7513_v20   ;;  %v5938_v22 = vrot.slane %v5937_v34, 4  ;;  %v6006_v58 = vadd.f32 %v6005_v14, %v5975_v9 }
 0x3e0   : > { %v5939_v46 = vadd.f32 %v5938_v22, %v5937_v34  ;;  %v6007_v32 = vrot.slane %v6006_v58, 4 }
 0x3e2   : > { %v5940_v0 = vrot.slane %v5939_v46, 2  ;;  %v6008_v36 = vadd.f32 %v6007_v32, %v6006_v58 }
 0x3e4   : > { %v5941_v52 = vadd.f32 %v5940_v0, %v5939_v46  ;;  %v6009_v49 = vrot.slane %v6008_v36, 2 }
 0x3e6   : > { %v5942_v51 = vrot.slane %v5941_v52, 1  ;;  %v6010_v17 = vadd.f32 %v6009_v49, %v6008_v36 }
 0x3e8   : > { %v5943_v42 = vadd.f32 %v5942_v51, %v5941_v52  ;;  %v6011_v38 = vrot.slane %v6010_v17, 1 }
 0x3ea   : > { %v6012_v60 = vadd.f32 %v6011_v38, %v6010_v17  ;;  %6013 = vst [vmem:[%s268_s14] sm:$0xff] %v5943_v42 }
 0x3ec   : > { %6014 = vst [vmem:[%s272_s17] sm:$0xff] %v6012_v60 }
 0x3ed PF: > { %s17_s21 = sadd.s32 1, %s7588_s21  }
 0x3ee   : > { %p14_p4 = scmp.ge.s32.totalorder %s17_s21, 4  }
 0x3f0   :  { %16 = sbr.rel (!%p14_p4) target bundleno = 1 (0x1), region = 94 }

</bundles_post_ra>
